<compile_context>
chip_gen: v7x
topology: tpu7x:2x2x1
jax: 0.10.0
libtpu: 0.0.40
codegen_flags: <defaults>
</compile_context>

<pallas_src>
import jax
import jax.numpy as jnp
from jax.experimental import pallas as pl
from jax.experimental.pallas import tpu as pltpu


# ----------------------------------------------------------------------------
# Host-side glue (all O(input)-sized, pure layout plumbing / preprocessing)
# ----------------------------------------------------------------------------
def _torchvision_zscore(x):
    mean = jnp.array([0.485, 0.456, 0.406], jnp.float32).reshape(1, 3, 1, 1)
    std = jnp.array([0.229, 0.224, 0.225], jnp.float32).reshape(1, 3, 1, 1)
    return (x.astype(jnp.float32) - mean) / std


def _flat_padded_slab(x_nchw, nrows):
    """NCHW -> zero-padded NHWC flattened to (B, nrows, C) rows = (H+2)*(W+2)."""
    B, C, H, W = x_nchw.shape
    x = jnp.transpose(x_nchw, (0, 2, 3, 1))                 # (B, H, W, C)
    x = jnp.pad(x, ((0, 0), (1, 1), (1, 1), (0, 0)))        # (B, H+2, W+2, C)
    x = x.reshape(B, (H + 2) * (W + 2), C)
    pad_rows = nrows - (H + 2) * (W + 2)
    x = jnp.pad(x, ((0, 0), (0, pad_rows), (0, 0)))
    return x.astype(jnp.float32)


# ----------------------------------------------------------------------------
# Fused forward: conv3x3+ReLU features for BOTH images + LPIPS distance epilogue
# ----------------------------------------------------------------------------
@jax.jit
def perceptual_similarity_forward(x, y, weight, bias):
    """Forward of TorchvisionModelPerceptualSimilarity: (B,C,H,W) x2 -> (B,1,1,1)."""
    B, C, H, W = x.shape
    F = weight.shape[0]

    # --- preprocessing (matches the reference) ---
    if x.shape[1] == 1 and y.shape[1] == 1:
        x = jnp.repeat(x, 3, axis=1)
        y = jnp.repeat(y, 3, axis=1)
    x = _torchvision_zscore(x)
    y = _torchvision_zscore(y)

    # --- layout constants for the overlapping-window conv ---
    WP = W + 2                     # padded width
    HWP = H * WP                   # rows of the conv accumulator (W and 2 wrap cols)
    NROWS = -(-((H + 2) * WP + 2) // 8) * 8   # padded slab rows (8-aligned, +2 slack)
    OUT_LANES = 128

    # TODO(synk): pretrained torchvision ResNet50 (layer4.2.relu_2) features cannot
    # be instantiated here; a deterministic synthetic conv3x3+ReLU extractor is used.
    xf = _flat_padded_slab(x, NROWS)                                   # (B,NROWS,3) f32
    yf = _flat_padded_slab(y, NROWS)
    # weight (F, C, 3, 3) -> (tap=kh*3+kw, C, F) bf16 for the MXU
    w9 = jnp.transpose(weight, (2, 3, 1, 0)).reshape(9, 3, F).astype(jnp.bfloat16)
    b2 = bias.reshape(1, F).astype(jnp.float32)

    def kernel(x_ref, y_ref, w_ref, b_ref, o_ref, accx_ref, accy_ref):
        # --- conv3x3 (pad=1) + bias + ReLU via 9 shifted bf16 matmuls.
        #     In-kernel tap gather: each tap is a static row-shifted view of the
        #     padded slab, so no im2col slab ever exists in HBM.
        for acc_ref, img_ref in ((accx_ref, x_ref), (accy_ref, y_ref)):
            for t in range(9):
                dy, dx = divmod(t, 3)
                taps = img_ref[0, pl.ds(dy * WP + dx, HWP), :].astype(jnp.bfloat16)
                part = jnp.dot(taps, w_ref[t],
                               preferred_element_type=jnp.float32)    # (HWP, F) f32
                if t == 0:
                    acc_ref[...] = part
                else:
                    acc_ref[...] += part
            acc_ref[...] = jnp.maximum(acc_ref[...] + b_ref[...], 0.0)

        # --- fused LPIPS-style epilogue (features stay in VMEM):
        #     normalize over channels, squared diff, sum over channels, spatial mean.
        eps = 1e-10
        fx = accx_ref[...]
        fy = accy_ref[...]
        nx = jnp.sqrt(jnp.sum(fx * fx, axis=-1, keepdims=True))       # (HWP, 1)
        ny = jnp.sqrt(jnp.sum(fy * fy, axis=-1, keepdims=True))
        fxn = fx * pl.reciprocal(nx + eps, approx=True)               # EUP slot
        fyn = fy * pl.reciprocal(ny + eps, approx=True)
        per_pix = jnp.sum((fxn - fyn) ** 2, axis=-1, keepdims=True)   # (HWP, 1)
        # rows with (r mod WP) >= W are wrap-around artefacts of the
        # overlapping-window conv -> mask them out of the spatial mean.
        row = jax.lax.broadcasted_iota(jnp.int32, (HWP, 1), 0)
        valid = (row % WP) < W
        mean_val = jnp.sum(jnp.where(valid, per_pix, 0.0)) * (1.0 / (H * W))
        # lane-dense output store (no masked 1-wide vst)
        o_ref[...] = jnp.zeros((1, 1, OUT_LANES), jnp.float32) + mean_val

    grid_spec = pltpu.PrefetchScalarGridSpec(
        num_scalar_prefetch=0,
        grid=(B,),
        in_specs=[
            pl.BlockSpec((1, NROWS, 3), lambda b: (b, 0, 0)),   # x slab (per batch)
            pl.BlockSpec((1, NROWS, 3), lambda b: (b, 0, 0)),   # y slab (per batch)
            pl.BlockSpec((9, 3, F), lambda b: (0, 0, 0)),       # conv weights (resident)
            pl.BlockSpec((1, F), lambda b: (0, 0)),             # bias (resident)
        ],
        out_specs=pl.BlockSpec((1, 1, OUT_LANES), lambda b: (b, 0, 0)),
        scratch_shapes=[
            pltpu.VMEM((HWP, F), jnp.float32),   # f32 accumulator, image x
            pltpu.VMEM((HWP, F), jnp.float32),   # f32 accumulator, image y
        ],
    )

    out = pl.pallas_call(
        kernel,
        out_shape=jax.ShapeDtypeStruct((B, 1, OUT_LANES), jnp.float32),
        grid_spec=grid_spec,
        compiler_params=pltpu.CompilerParams(
            dimension_semantics=("parallel",),
            vmem_limit_bytes=32 * 1024 * 1024,
        ),
    )(xf, yf, w9, b2)

    # module forward returns the spatially-averaged per-batch map: (B, 1, 1, 1)
    return out[:, 0, 0].reshape(B, 1, 1, 1)


if __name__ == "__main__":
    key = jax.random.PRNGKey(0)
    k1, k2, k3, k4 = jax.random.split(key, 4)

    B, C, H, W = 2, 1, 16, 16      # single-channel input -> repeated to 3 channels
    F_OUT = 256                     # synthetic feature channels (fills v6e/v7x MXU)

    x = jax.random.uniform(k1, (B, C, H, W), dtype=jnp.float32)   # in [0, 1]
    y = jax.random.uniform(k2, (B, C, H, W), dtype=jnp.float32)

    # deterministic synthetic "network" parameters
    weight = 0.1 * jax.random.normal(k3, (F_OUT, 3, 3, 3), dtype=jnp.float32)
    bias = 0.01 * jax.random.normal(k4, (F_OUT,), dtype=jnp.float32)

    out = perceptual_similarity_forward(x, y, weight, bias)
    jax.block_until_ready(out)
    assert out.shape == (B, 1, 1, 1)
    assert bool(jnp.all(jnp.isfinite(out)))
    print("KERNEL_OK")
</pallas_src>

<mosaic_0001>
module attributes {stable_mosaic.version = 11 : i64} {
  func.func @kernel(%arg0: i32, %arg1: memref<1x328x3xf32, #tpu.memory_space<vmem>>, %arg2: memref<1x328x3xf32, #tpu.memory_space<vmem>>, %arg3: memref<9x3x256xbf16, #tpu.memory_space<vmem>>, %arg4: memref<1x256xf32, #tpu.memory_space<vmem>>, %arg5: memref<1x1x128xf32, #tpu.memory_space<vmem>>, %arg6: memref<288x256xf32, #tpu.memory_space<vmem>>, %arg7: memref<288x256xf32, #tpu.memory_space<vmem>>) attributes {dimension_semantics = [#tpu.dimension_semantics<parallel>], iteration_bounds = array<i64: 2>, scalar_prefetch = 0 : i64, scratch_operands = 2 : i64, tpu.core_type = #tpu.core_type<tc>, window_params = [{transform_indices = @transform_0, window_bounds = array<i64: 1, 328, 3>}, {transform_indices = @transform_1, window_bounds = array<i64: 1, 328, 3>}, {pipeline_mode = #tpu.pipeline_mode<synchronous>, transform_indices = @transform_2, window_bounds = array<i64: 9, 3, 256>}, {pipeline_mode = #tpu.pipeline_mode<synchronous>, transform_indices = @transform_3, window_bounds = array<i64: 1, 256>}, {transform_indices = @transform_4, window_bounds = array<i64: 1, 1, 128>}]} {
    %c0 = arith.constant 0 : index
    %c0_0 = arith.constant 0 : index
    %c0_1 = arith.constant 0 : index
    %0 = vector.load %arg1[%c0, %c0_0, %c0_1] : memref<1x328x3xf32, #tpu.memory_space<vmem>>, vector<1x288x3xf32>
    %1 = vector.shape_cast %0 : vector<1x288x3xf32> to vector<288x3xf32>
    %2 = arith.truncf %1 : vector<288x3xf32> to vector<288x3xbf16>
    %c0_2 = arith.constant 0 : index
    %c0_3 = arith.constant 0 : index
    %c0_4 = arith.constant 0 : index
    %3 = vector.load %arg3[%c0_2, %c0_3, %c0_4] : memref<9x3x256xbf16, #tpu.memory_space<vmem>>, vector<1x3x256xbf16>
    %4 = vector.shape_cast %3 : vector<1x3x256xbf16> to vector<3x256xbf16>
    %cst = arith.constant dense<0.000000e+00> : vector<288x256xf32>
    %5 = tpu.matmul %2, %4, %cst {dimension_numbers = #tpu.dot_dimension_numbers<[1], [0], [0], [1], [0, 0, 1, 1], [], []>} : vector<288x3xbf16>, vector<3x256xbf16>, vector<288x256xf32> -> vector<288x256xf32>
    %c0_5 = arith.constant 0 : index
    %c0_6 = arith.constant 0 : index
    %6 = vector.load %arg6[%c0_5, %c0_6] : memref<288x256xf32, #tpu.memory_space<vmem>>, vector<288x256xf32>
    tpu.vector_store %arg6[%c0_5, %c0_6], %5 {strides = array<i32>} : memref<288x256xf32, #tpu.memory_space<vmem>>, vector<288x256xf32>,
    %c0_7 = arith.constant 0 : index
    %c1 = arith.constant 1 : index
    %c0_8 = arith.constant 0 : index
    %7 = vector.load %arg1[%c0_7, %c1, %c0_8] : memref<1x328x3xf32, #tpu.memory_space<vmem>>, vector<1x288x3xf32>
    %8 = vector.shape_cast %7 : vector<1x288x3xf32> to vector<288x3xf32>
    %9 = arith.truncf %8 : vector<288x3xf32> to vector<288x3xbf16>
    %c1_9 = arith.constant 1 : index
    %c0_10 = arith.constant 0 : index
    %c0_11 = arith.constant 0 : index
    %10 = vector.load %arg3[%c1_9, %c0_10, %c0_11] : memref<9x3x256xbf16, #tpu.memory_space<vmem>>, vector<1x3x256xbf16>
    %11 = vector.shape_cast %10 : vector<1x3x256xbf16> to vector<3x256xbf16>
    %cst_12 = arith.constant dense<0.000000e+00> : vector<288x256xf32>
    %12 = tpu.matmul %9, %11, %cst_12 {dimension_numbers = #tpu.dot_dimension_numbers<[1], [0], [0], [1], [0, 0, 1, 1], [], []>} : vector<288x3xbf16>, vector<3x256xbf16>, vector<288x256xf32> -> vector<288x256xf32>
    %c0_13 = arith.constant 0 : index
    %c0_14 = arith.constant 0 : index
    %13 = vector.load %arg6[%c0_13, %c0_14] : memref<288x256xf32, #tpu.memory_space<vmem>>, vector<288x256xf32>
    %14 = arith.addf %13, %12 : vector<288x256xf32>
    %c0_15 = arith.constant 0 : index
    %c0_16 = arith.constant 0 : index
    %15 = vector.load %arg6[%c0_15, %c0_16] : memref<288x256xf32, #tpu.memory_space<vmem>>, vector<288x256xf32>
    tpu.vector_store %arg6[%c0_15, %c0_16], %14 {strides = array<i32>} : memref<288x256xf32, #tpu.memory_space<vmem>>, vector<288x256xf32>,
    %c0_17 = arith.constant 0 : index
    %c2 = arith.constant 2 : index
    %c0_18 = arith.constant 0 : index
    %16 = vector.load %arg1[%c0_17, %c2, %c0_18] : memref<1x328x3xf32, #tpu.memory_space<vmem>>, vector<1x288x3xf32>
    %17 = vector.shape_cast %16 : vector<1x288x3xf32> to vector<288x3xf32>
    %18 = arith.truncf %17 : vector<288x3xf32> to vector<288x3xbf16>
    %c2_19 = arith.constant 2 : index
    %c0_20 = arith.constant 0 : index
    %c0_21 = arith.constant 0 : index
    %19 = vector.load %arg3[%c2_19, %c0_20, %c0_21] : memref<9x3x256xbf16, #tpu.memory_space<vmem>>, vector<1x3x256xbf16>
    %20 = vector.shape_cast %19 : vector<1x3x256xbf16> to vector<3x256xbf16>
    %cst_22 = arith.constant dense<0.000000e+00> : vector<288x256xf32>
    %21 = tpu.matmul %18, %20, %cst_22 {dimension_numbers = #tpu.dot_dimension_numbers<[1], [0], [0], [1], [0, 0, 1, 1], [], []>} : vector<288x3xbf16>, vector<3x256xbf16>, vector<288x256xf32> -> vector<288x256xf32>
    %c0_23 = arith.constant 0 : index
    %c0_24 = arith.constant 0 : index
    %22 = vector.load %arg6[%c0_23, %c0_24] : memref<288x256xf32, #tpu.memory_space<vmem>>, vector<288x256xf32>
    %23 = arith.addf %22, %21 : vector<288x256xf32>
    %c0_25 = arith.constant 0 : index
    %c0_26 = arith.constant 0 : index
    %24 = vector.load %arg6[%c0_25, %c0_26] : memref<288x256xf32, #tpu.memory_space<vmem>>, vector<288x256xf32>
    tpu.vector_store %arg6[%c0_25, %c0_26], %23 {strides = array<i32>} : memref<288x256xf32, #tpu.memory_space<vmem>>, vector<288x256xf32>,
    %c0_27 = arith.constant 0 : index
    %c18 = arith.constant 18 : index
    %c0_28 = arith.constant 0 : index
    %25 = vector.load %arg1[%c0_27, %c18, %c0_28] : memref<1x328x3xf32, #tpu.memory_space<vmem>>, vector<1x288x3xf32>
    %26 = vector.shape_cast %25 : vector<1x288x3xf32> to vector<288x3xf32>
    %27 = arith.truncf %26 : vector<288x3xf32> to vector<288x3xbf16>
    %c3 = arith.constant 3 : index
    %c0_29 = arith.constant 0 : index
    %c0_30 = arith.constant 0 : index
    %28 = vector.load %arg3[%c3, %c0_29, %c0_30] : memref<9x3x256xbf16, #tpu.memory_space<vmem>>, vector<1x3x256xbf16>
    %29 = vector.shape_cast %28 : vector<1x3x256xbf16> to vector<3x256xbf16>
    %cst_31 = arith.constant dense<0.000000e+00> : vector<288x256xf32>
    %30 = tpu.matmul %27, %29, %cst_31 {dimension_numbers = #tpu.dot_dimension_numbers<[1], [0], [0], [1], [0, 0, 1, 1], [], []>} : vector<288x3xbf16>, vector<3x256xbf16>, vector<288x256xf32> -> vector<288x256xf32>
    %c0_32 = arith.constant 0 : index
    %c0_33 = arith.constant 0 : index
    %31 = vector.load %arg6[%c0_32, %c0_33] : memref<288x256xf32, #tpu.memory_space<vmem>>, vector<288x256xf32>
    %32 = arith.addf %31, %30 : vector<288x256xf32>
    %c0_34 = arith.constant 0 : index
    %c0_35 = arith.constant 0 : index
    %33 = vector.load %arg6[%c0_34, %c0_35] : memref<288x256xf32, #tpu.memory_space<vmem>>, vector<288x256xf32>
    tpu.vector_store %arg6[%c0_34, %c0_35], %32 {strides = array<i32>} : memref<288x256xf32, #tpu.memory_space<vmem>>, vector<288x256xf32>,
    %c0_36 = arith.constant 0 : index
    %c19 = arith.constant 19 : index
    %c0_37 = arith.constant 0 : index
    %34 = vector.load %arg1[%c0_36, %c19, %c0_37] : memref<1x328x3xf32, #tpu.memory_space<vmem>>, vector<1x288x3xf32>
    %35 = vector.shape_cast %34 : vector<1x288x3xf32> to vector<288x3xf32>
    %36 = arith.truncf %35 : vector<288x3xf32> to vector<288x3xbf16>
    %c4 = arith.constant 4 : index
    %c0_38 = arith.constant 0 : index
    %c0_39 = arith.constant 0 : index
    %37 = vector.load %arg3[%c4, %c0_38, %c0_39] : memref<9x3x256xbf16, #tpu.memory_space<vmem>>, vector<1x3x256xbf16>
    %38 = vector.shape_cast %37 : vector<1x3x256xbf16> to vector<3x256xbf16>
    %cst_40 = arith.constant dense<0.000000e+00> : vector<288x256xf32>
    %39 = tpu.matmul %36, %38, %cst_40 {dimension_numbers = #tpu.dot_dimension_numbers<[1], [0], [0], [1], [0, 0, 1, 1], [], []>} : vector<288x3xbf16>, vector<3x256xbf16>, vector<288x256xf32> -> vector<288x256xf32>
    %c0_41 = arith.constant 0 : index
    %c0_42 = arith.constant 0 : index
    %40 = vector.load %arg6[%c0_41, %c0_42] : memref<288x256xf32, #tpu.memory_space<vmem>>, vector<288x256xf32>
    %41 = arith.addf %40, %39 : vector<288x256xf32>
    %c0_43 = arith.constant 0 : index
    %c0_44 = arith.constant 0 : index
    %42 = vector.load %arg6[%c0_43, %c0_44] : memref<288x256xf32, #tpu.memory_space<vmem>>, vector<288x256xf32>
    tpu.vector_store %arg6[%c0_43, %c0_44], %41 {strides = array<i32>} : memref<288x256xf32, #tpu.memory_space<vmem>>, vector<288x256xf32>,
    %c0_45 = arith.constant 0 : index
    %c20 = arith.constant 20 : index
    %c0_46 = arith.constant 0 : index
    %43 = vector.load %arg1[%c0_45, %c20, %c0_46] : memref<1x328x3xf32, #tpu.memory_space<vmem>>, vector<1x288x3xf32>
    %44 = vector.shape_cast %43 : vector<1x288x3xf32> to vector<288x3xf32>
    %45 = arith.truncf %44 : vector<288x3xf32> to vector<288x3xbf16>
    %c5 = arith.constant 5 : index
    %c0_47 = arith.constant 0 : index
    %c0_48 = arith.constant 0 : index
    %46 = vector.load %arg3[%c5, %c0_47, %c0_48] : memref<9x3x256xbf16, #tpu.memory_space<vmem>>, vector<1x3x256xbf16>
    %47 = vector.shape_cast %46 : vector<1x3x256xbf16> to vector<3x256xbf16>
    %cst_49 = arith.constant dense<0.000000e+00> : vector<288x256xf32>
    %48 = tpu.matmul %45, %47, %cst_49 {dimension_numbers = #tpu.dot_dimension_numbers<[1], [0], [0], [1], [0, 0, 1, 1], [], []>} : vector<288x3xbf16>, vector<3x256xbf16>, vector<288x256xf32> -> vector<288x256xf32>
    %c0_50 = arith.constant 0 : index
    %c0_51 = arith.constant 0 : index
    %49 = vector.load %arg6[%c0_50, %c0_51] : memref<288x256xf32, #tpu.memory_space<vmem>>, vector<288x256xf32>
    %50 = arith.addf %49, %48 : vector<288x256xf32>
    %c0_52 = arith.constant 0 : index
    %c0_53 = arith.constant 0 : index
    %51 = vector.load %arg6[%c0_52, %c0_53] : memref<288x256xf32, #tpu.memory_space<vmem>>, vector<288x256xf32>
    tpu.vector_store %arg6[%c0_52, %c0_53], %50 {strides = array<i32>} : memref<288x256xf32, #tpu.memory_space<vmem>>, vector<288x256xf32>,
    %c0_54 = arith.constant 0 : index
    %c36 = arith.constant 36 : index
    %c0_55 = arith.constant 0 : index
    %52 = vector.load %arg1[%c0_54, %c36, %c0_55] : memref<1x328x3xf32, #tpu.memory_space<vmem>>, vector<1x288x3xf32>
    %53 = vector.shape_cast %52 : vector<1x288x3xf32> to vector<288x3xf32>
    %54 = arith.truncf %53 : vector<288x3xf32> to vector<288x3xbf16>
    %c6 = arith.constant 6 : index
    %c0_56 = arith.constant 0 : index
    %c0_57 = arith.constant 0 : index
    %55 = vector.load %arg3[%c6, %c0_56, %c0_57] : memref<9x3x256xbf16, #tpu.memory_space<vmem>>, vector<1x3x256xbf16>
    %56 = vector.shape_cast %55 : vector<1x3x256xbf16> to vector<3x256xbf16>
    %cst_58 = arith.constant dense<0.000000e+00> : vector<288x256xf32>
    %57 = tpu.matmul %54, %56, %cst_58 {dimension_numbers = #tpu.dot_dimension_numbers<[1], [0], [0], [1], [0, 0, 1, 1], [], []>} : vector<288x3xbf16>, vector<3x256xbf16>, vector<288x256xf32> -> vector<288x256xf32>
    %c0_59 = arith.constant 0 : index
    %c0_60 = arith.constant 0 : index
    %58 = vector.load %arg6[%c0_59, %c0_60] : memref<288x256xf32, #tpu.memory_space<vmem>>, vector<288x256xf32>
    %59 = arith.addf %58, %57 : vector<288x256xf32>
    %c0_61 = arith.constant 0 : index
    %c0_62 = arith.constant 0 : index
    %60 = vector.load %arg6[%c0_61, %c0_62] : memref<288x256xf32, #tpu.memory_space<vmem>>, vector<288x256xf32>
    tpu.vector_store %arg6[%c0_61, %c0_62], %59 {strides = array<i32>} : memref<288x256xf32, #tpu.memory_space<vmem>>, vector<288x256xf32>,
    %c0_63 = arith.constant 0 : index
    %c37 = arith.constant 37 : index
    %c0_64 = arith.constant 0 : index
    %61 = vector.load %arg1[%c0_63, %c37, %c0_64] : memref<1x328x3xf32, #tpu.memory_space<vmem>>, vector<1x288x3xf32>
    %62 = vector.shape_cast %61 : vector<1x288x3xf32> to vector<288x3xf32>
    %63 = arith.truncf %62 : vector<288x3xf32> to vector<288x3xbf16>
    %c7 = arith.constant 7 : index
    %c0_65 = arith.constant 0 : index
    %c0_66 = arith.constant 0 : index
    %64 = vector.load %arg3[%c7, %c0_65, %c0_66] : memref<9x3x256xbf16, #tpu.memory_space<vmem>>, vector<1x3x256xbf16>
    %65 = vector.shape_cast %64 : vector<1x3x256xbf16> to vector<3x256xbf16>
    %cst_67 = arith.constant dense<0.000000e+00> : vector<288x256xf32>
    %66 = tpu.matmul %63, %65, %cst_67 {dimension_numbers = #tpu.dot_dimension_numbers<[1], [0], [0], [1], [0, 0, 1, 1], [], []>} : vector<288x3xbf16>, vector<3x256xbf16>, vector<288x256xf32> -> vector<288x256xf32>
    %c0_68 = arith.constant 0 : index
    %c0_69 = arith.constant 0 : index
    %67 = vector.load %arg6[%c0_68, %c0_69] : memref<288x256xf32, #tpu.memory_space<vmem>>, vector<288x256xf32>
    %68 = arith.addf %67, %66 : vector<288x256xf32>
    %c0_70 = arith.constant 0 : index
    %c0_71 = arith.constant 0 : index
    %69 = vector.load %arg6[%c0_70, %c0_71] : memref<288x256xf32, #tpu.memory_space<vmem>>, vector<288x256xf32>
    tpu.vector_store %arg6[%c0_70, %c0_71], %68 {strides = array<i32>} : memref<288x256xf32, #tpu.memory_space<vmem>>, vector<288x256xf32>,
    %c0_72 = arith.constant 0 : index
    %c38 = arith.constant 38 : index
    %c0_73 = arith.constant 0 : index
    %70 = vector.load %arg1[%c0_72, %c38, %c0_73] : memref<1x328x3xf32, #tpu.memory_space<vmem>>, vector<1x288x3xf32>
    %71 = vector.shape_cast %70 : vector<1x288x3xf32> to vector<288x3xf32>
    %72 = arith.truncf %71 : vector<288x3xf32> to vector<288x3xbf16>
    %c8 = arith.constant 8 : index
    %c0_74 = arith.constant 0 : index
    %c0_75 = arith.constant 0 : index
    %73 = vector.load %arg3[%c8, %c0_74, %c0_75] : memref<9x3x256xbf16, #tpu.memory_space<vmem>>, vector<1x3x256xbf16>
    %74 = vector.shape_cast %73 : vector<1x3x256xbf16> to vector<3x256xbf16>
    %cst_76 = arith.constant dense<0.000000e+00> : vector<288x256xf32>
    %75 = tpu.matmul %72, %74, %cst_76 {dimension_numbers = #tpu.dot_dimension_numbers<[1], [0], [0], [1], [0, 0, 1, 1], [], []>} : vector<288x3xbf16>, vector<3x256xbf16>, vector<288x256xf32> -> vector<288x256xf32>
    %c0_77 = arith.constant 0 : index
    %c0_78 = arith.constant 0 : index
    %76 = vector.load %arg6[%c0_77, %c0_78] : memref<288x256xf32, #tpu.memory_space<vmem>>, vector<288x256xf32>
    %77 = arith.addf %76, %75 : vector<288x256xf32>
    %c0_79 = arith.constant 0 : index
    %c0_80 = arith.constant 0 : index
    %78 = vector.load %arg6[%c0_79, %c0_80] : memref<288x256xf32, #tpu.memory_space<vmem>>, vector<288x256xf32>
    tpu.vector_store %arg6[%c0_79, %c0_80], %77 {strides = array<i32>} : memref<288x256xf32, #tpu.memory_space<vmem>>, vector<288x256xf32>,
    %c0_81 = arith.constant 0 : index
    %c0_82 = arith.constant 0 : index
    %79 = vector.load %arg6[%c0_81, %c0_82] : memref<288x256xf32, #tpu.memory_space<vmem>>, vector<288x256xf32>
    %c0_83 = arith.constant 0 : index
    %c0_84 = arith.constant 0 : index
    %80 = vector.load %arg4[%c0_83, %c0_84] : memref<1x256xf32, #tpu.memory_space<vmem>>, vector<1x256xf32>
    %81 = vector.broadcast %80 : vector<1x256xf32> to vector<288x256xf32>
    %82 = arith.addf %79, %81 : vector<288x256xf32>
    %cst_85 = arith.constant 0.000000e+00 : f32
    %83 = vector.broadcast %cst_85 : f32 to vector<288x256xf32>
    %84 = arith.maximumf %82, %83 : vector<288x256xf32>
    %c0_86 = arith.constant 0 : index
    %c0_87 = arith.constant 0 : index
    %85 = vector.load %arg6[%c0_86, %c0_87] : memref<288x256xf32, #tpu.memory_space<vmem>>, vector<288x256xf32>
    tpu.vector_store %arg6[%c0_86, %c0_87], %84 {strides = array<i32>} : memref<288x256xf32, #tpu.memory_space<vmem>>, vector<288x256xf32>,
    %c0_88 = arith.constant 0 : index
    %c0_89 = arith.constant 0 : index
    %c0_90 = arith.constant 0 : index
    %86 = vector.load %arg2[%c0_88, %c0_89, %c0_90] : memref<1x328x3xf32, #tpu.memory_space<vmem>>, vector<1x288x3xf32>
    %87 = vector.shape_cast %86 : vector<1x288x3xf32> to vector<288x3xf32>
    %88 = arith.truncf %87 : vector<288x3xf32> to vector<288x3xbf16>
    %c0_91 = arith.constant 0 : index
    %c0_92 = arith.constant 0 : index
    %c0_93 = arith.constant 0 : index
    %89 = vector.load %arg3[%c0_91, %c0_92, %c0_93] : memref<9x3x256xbf16, #tpu.memory_space<vmem>>, vector<1x3x256xbf16>
    %90 = vector.shape_cast %89 : vector<1x3x256xbf16> to vector<3x256xbf16>
    %cst_94 = arith.constant dense<0.000000e+00> : vector<288x256xf32>
    %91 = tpu.matmul %88, %90, %cst_94 {dimension_numbers = #tpu.dot_dimension_numbers<[1], [0], [0], [1], [0, 0, 1, 1], [], []>} : vector<288x3xbf16>, vector<3x256xbf16>, vector<288x256xf32> -> vector<288x256xf32>
    %c0_95 = arith.constant 0 : index
    %c0_96 = arith.constant 0 : index
    %92 = vector.load %arg7[%c0_95, %c0_96] : memref<288x256xf32, #tpu.memory_space<vmem>>, vector<288x256xf32>
    tpu.vector_store %arg7[%c0_95, %c0_96], %91 {strides = array<i32>} : memref<288x256xf32, #tpu.memory_space<vmem>>, vector<288x256xf32>,
    %c0_97 = arith.constant 0 : index
    %c1_98 = arith.constant 1 : index
    %c0_99 = arith.constant 0 : index
    %93 = vector.load %arg2[%c0_97, %c1_98, %c0_99] : memref<1x328x3xf32, #tpu.memory_space<vmem>>, vector<1x288x3xf32>
    %94 = vector.shape_cast %93 : vector<1x288x3xf32> to vector<288x3xf32>
    %95 = arith.truncf %94 : vector<288x3xf32> to vector<288x3xbf16>
    %c1_100 = arith.constant 1 : index
    %c0_101 = arith.constant 0 : index
    %c0_102 = arith.constant 0 : index
    %96 = vector.load %arg3[%c1_100, %c0_101, %c0_102] : memref<9x3x256xbf16, #tpu.memory_space<vmem>>, vector<1x3x256xbf16>
    %97 = vector.shape_cast %96 : vector<1x3x256xbf16> to vector<3x256xbf16>
    %cst_103 = arith.constant dense<0.000000e+00> : vector<288x256xf32>
    %98 = tpu.matmul %95, %97, %cst_103 {dimension_numbers = #tpu.dot_dimension_numbers<[1], [0], [0], [1], [0, 0, 1, 1], [], []>} : vector<288x3xbf16>, vector<3x256xbf16>, vector<288x256xf32> -> vector<288x256xf32>
    %c0_104 = arith.constant 0 : index
    %c0_105 = arith.constant 0 : index
    %99 = vector.load %arg7[%c0_104, %c0_105] : memref<288x256xf32, #tpu.memory_space<vmem>>, vector<288x256xf32>
    %100 = arith.addf %99, %98 : vector<288x256xf32>
    %c0_106 = arith.constant 0 : index
    %c0_107 = arith.constant 0 : index
    %101 = vector.load %arg7[%c0_106, %c0_107] : memref<288x256xf32, #tpu.memory_space<vmem>>, vector<288x256xf32>
    tpu.vector_store %arg7[%c0_106, %c0_107], %100 {strides = array<i32>} : memref<288x256xf32, #tpu.memory_space<vmem>>, vector<288x256xf32>,
    %c0_108 = arith.constant 0 : index
    %c2_109 = arith.constant 2 : index
    %c0_110 = arith.constant 0 : index
    %102 = vector.load %arg2[%c0_108, %c2_109, %c0_110] : memref<1x328x3xf32, #tpu.memory_space<vmem>>, vector<1x288x3xf32>
    %103 = vector.shape_cast %102 : vector<1x288x3xf32> to vector<288x3xf32>
    %104 = arith.truncf %103 : vector<288x3xf32> to vector<288x3xbf16>
    %c2_111 = arith.constant 2 : index
    %c0_112 = arith.constant 0 : index
    %c0_113 = arith.constant 0 : index
    %105 = vector.load %arg3[%c2_111, %c0_112, %c0_113] : memref<9x3x256xbf16, #tpu.memory_space<vmem>>, vector<1x3x256xbf16>
    %106 = vector.shape_cast %105 : vector<1x3x256xbf16> to vector<3x256xbf16>
    %cst_114 = arith.constant dense<0.000000e+00> : vector<288x256xf32>
    %107 = tpu.matmul %104, %106, %cst_114 {dimension_numbers = #tpu.dot_dimension_numbers<[1], [0], [0], [1], [0, 0, 1, 1], [], []>} : vector<288x3xbf16>, vector<3x256xbf16>, vector<288x256xf32> -> vector<288x256xf32>
    %c0_115 = arith.constant 0 : index
    %c0_116 = arith.constant 0 : index
    %108 = vector.load %arg7[%c0_115, %c0_116] : memref<288x256xf32, #tpu.memory_space<vmem>>, vector<288x256xf32>
    %109 = arith.addf %108, %107 : vector<288x256xf32>
    %c0_117 = arith.constant 0 : index
    %c0_118 = arith.constant 0 : index
    %110 = vector.load %arg7[%c0_117, %c0_118] : memref<288x256xf32, #tpu.memory_space<vmem>>, vector<288x256xf32>
    tpu.vector_store %arg7[%c0_117, %c0_118], %109 {strides = array<i32>} : memref<288x256xf32, #tpu.memory_space<vmem>>, vector<288x256xf32>,
    %c0_119 = arith.constant 0 : index
    %c18_120 = arith.constant 18 : index
    %c0_121 = arith.constant 0 : index
    %111 = vector.load %arg2[%c0_119, %c18_120, %c0_121] : memref<1x328x3xf32, #tpu.memory_space<vmem>>, vector<1x288x3xf32>
    %112 = vector.shape_cast %111 : vector<1x288x3xf32> to vector<288x3xf32>
    %113 = arith.truncf %112 : vector<288x3xf32> to vector<288x3xbf16>
    %c3_122 = arith.constant 3 : index
    %c0_123 = arith.constant 0 : index
    %c0_124 = arith.constant 0 : index
    %114 = vector.load %arg3[%c3_122, %c0_123, %c0_124] : memref<9x3x256xbf16, #tpu.memory_space<vmem>>, vector<1x3x256xbf16>
    %115 = vector.shape_cast %114 : vector<1x3x256xbf16> to vector<3x256xbf16>
    %cst_125 = arith.constant dense<0.000000e+00> : vector<288x256xf32>
    %116 = tpu.matmul %113, %115, %cst_125 {dimension_numbers = #tpu.dot_dimension_numbers<[1], [0], [0], [1], [0, 0, 1, 1], [], []>} : vector<288x3xbf16>, vector<3x256xbf16>, vector<288x256xf32> -> vector<288x256xf32>
    %c0_126 = arith.constant 0 : index
    %c0_127 = arith.constant 0 : index
    %117 = vector.load %arg7[%c0_126, %c0_127] : memref<288x256xf32, #tpu.memory_space<vmem>>, vector<288x256xf32>
    %118 = arith.addf %117, %116 : vector<288x256xf32>
    %c0_128 = arith.constant 0 : index
    %c0_129 = arith.constant 0 : index
    %119 = vector.load %arg7[%c0_128, %c0_129] : memref<288x256xf32, #tpu.memory_space<vmem>>, vector<288x256xf32>
    tpu.vector_store %arg7[%c0_128, %c0_129], %118 {strides = array<i32>} : memref<288x256xf32, #tpu.memory_space<vmem>>, vector<288x256xf32>,
    %c0_130 = arith.constant 0 : index
    %c19_131 = arith.constant 19 : index
    %c0_132 = arith.constant 0 : index
    %120 = vector.load %arg2[%c0_130, %c19_131, %c0_132] : memref<1x328x3xf32, #tpu.memory_space<vmem>>, vector<1x288x3xf32>
    %121 = vector.shape_cast %120 : vector<1x288x3xf32> to vector<288x3xf32>
    %122 = arith.truncf %121 : vector<288x3xf32> to vector<288x3xbf16>
    %c4_133 = arith.constant 4 : index
    %c0_134 = arith.constant 0 : index
    %c0_135 = arith.constant 0 : index
    %123 = vector.load %arg3[%c4_133, %c0_134, %c0_135] : memref<9x3x256xbf16, #tpu.memory_space<vmem>>, vector<1x3x256xbf16>
    %124 = vector.shape_cast %123 : vector<1x3x256xbf16> to vector<3x256xbf16>
    %cst_136 = arith.constant dense<0.000000e+00> : vector<288x256xf32>
    %125 = tpu.matmul %122, %124, %cst_136 {dimension_numbers = #tpu.dot_dimension_numbers<[1], [0], [0], [1], [0, 0, 1, 1], [], []>} : vector<288x3xbf16>, vector<3x256xbf16>, vector<288x256xf32> -> vector<288x256xf32>
    %c0_137 = arith.constant 0 : index
    %c0_138 = arith.constant 0 : index
    %126 = vector.load %arg7[%c0_137, %c0_138] : memref<288x256xf32, #tpu.memory_space<vmem>>, vector<288x256xf32>
    %127 = arith.addf %126, %125 : vector<288x256xf32>
    %c0_139 = arith.constant 0 : index
    %c0_140 = arith.constant 0 : index
    %128 = vector.load %arg7[%c0_139, %c0_140] : memref<288x256xf32, #tpu.memory_space<vmem>>, vector<288x256xf32>
    tpu.vector_store %arg7[%c0_139, %c0_140], %127 {strides = array<i32>} : memref<288x256xf32, #tpu.memory_space<vmem>>, vector<288x256xf32>,
    %c0_141 = arith.constant 0 : index
    %c20_142 = arith.constant 20 : index
    %c0_143 = arith.constant 0 : index
    %129 = vector.load %arg2[%c0_141, %c20_142, %c0_143] : memref<1x328x3xf32, #tpu.memory_space<vmem>>, vector<1x288x3xf32>
    %130 = vector.shape_cast %129 : vector<1x288x3xf32> to vector<288x3xf32>
    %131 = arith.truncf %130 : vector<288x3xf32> to vector<288x3xbf16>
    %c5_144 = arith.constant 5 : index
    %c0_145 = arith.constant 0 : index
    %c0_146 = arith.constant 0 : index
    %132 = vector.load %arg3[%c5_144, %c0_145, %c0_146] : memref<9x3x256xbf16, #tpu.memory_space<vmem>>, vector<1x3x256xbf16>
    %133 = vector.shape_cast %132 : vector<1x3x256xbf16> to vector<3x256xbf16>
    %cst_147 = arith.constant dense<0.000000e+00> : vector<288x256xf32>
    %134 = tpu.matmul %131, %133, %cst_147 {dimension_numbers = #tpu.dot_dimension_numbers<[1], [0], [0], [1], [0, 0, 1, 1], [], []>} : vector<288x3xbf16>, vector<3x256xbf16>, vector<288x256xf32> -> vector<288x256xf32>
    %c0_148 = arith.constant 0 : index
    %c0_149 = arith.constant 0 : index
    %135 = vector.load %arg7[%c0_148, %c0_149] : memref<288x256xf32, #tpu.memory_space<vmem>>, vector<288x256xf32>
    %136 = arith.addf %135, %134 : vector<288x256xf32>
    %c0_150 = arith.constant 0 : index
    %c0_151 = arith.constant 0 : index
    %137 = vector.load %arg7[%c0_150, %c0_151] : memref<288x256xf32, #tpu.memory_space<vmem>>, vector<288x256xf32>
    tpu.vector_store %arg7[%c0_150, %c0_151], %136 {strides = array<i32>} : memref<288x256xf32, #tpu.memory_space<vmem>>, vector<288x256xf32>,
    %c0_152 = arith.constant 0 : index
    %c36_153 = arith.constant 36 : index
    %c0_154 = arith.constant 0 : index
    %138 = vector.load %arg2[%c0_152, %c36_153, %c0_154] : memref<1x328x3xf32, #tpu.memory_space<vmem>>, vector<1x288x3xf32>
    %139 = vector.shape_cast %138 : vector<1x288x3xf32> to vector<288x3xf32>
    %140 = arith.truncf %139 : vector<288x3xf32> to vector<288x3xbf16>
    %c6_155 = arith.constant 6 : index
    %c0_156 = arith.constant 0 : index
    %c0_157 = arith.constant 0 : index
    %141 = vector.load %arg3[%c6_155, %c0_156, %c0_157] : memref<9x3x256xbf16, #tpu.memory_space<vmem>>, vector<1x3x256xbf16>
    %142 = vector.shape_cast %141 : vector<1x3x256xbf16> to vector<3x256xbf16>
    %cst_158 = arith.constant dense<0.000000e+00> : vector<288x256xf32>
    %143 = tpu.matmul %140, %142, %cst_158 {dimension_numbers = #tpu.dot_dimension_numbers<[1], [0], [0], [1], [0, 0, 1, 1], [], []>} : vector<288x3xbf16>, vector<3x256xbf16>, vector<288x256xf32> -> vector<288x256xf32>
    %c0_159 = arith.constant 0 : index
    %c0_160 = arith.constant 0 : index
    %144 = vector.load %arg7[%c0_159, %c0_160] : memref<288x256xf32, #tpu.memory_space<vmem>>, vector<288x256xf32>
    %145 = arith.addf %144, %143 : vector<288x256xf32>
    %c0_161 = arith.constant 0 : index
    %c0_162 = arith.constant 0 : index
    %146 = vector.load %arg7[%c0_161, %c0_162] : memref<288x256xf32, #tpu.memory_space<vmem>>, vector<288x256xf32>
    tpu.vector_store %arg7[%c0_161, %c0_162], %145 {strides = array<i32>} : memref<288x256xf32, #tpu.memory_space<vmem>>, vector<288x256xf32>,
    %c0_163 = arith.constant 0 : index
    %c37_164 = arith.constant 37 : index
    %c0_165 = arith.constant 0 : index
    %147 = vector.load %arg2[%c0_163, %c37_164, %c0_165] : memref<1x328x3xf32, #tpu.memory_space<vmem>>, vector<1x288x3xf32>
    %148 = vector.shape_cast %147 : vector<1x288x3xf32> to vector<288x3xf32>
    %149 = arith.truncf %148 : vector<288x3xf32> to vector<288x3xbf16>
    %c7_166 = arith.constant 7 : index
    %c0_167 = arith.constant 0 : index
    %c0_168 = arith.constant 0 : index
    %150 = vector.load %arg3[%c7_166, %c0_167, %c0_168] : memref<9x3x256xbf16, #tpu.memory_space<vmem>>, vector<1x3x256xbf16>
    %151 = vector.shape_cast %150 : vector<1x3x256xbf16> to vector<3x256xbf16>
    %cst_169 = arith.constant dense<0.000000e+00> : vector<288x256xf32>
    %152 = tpu.matmul %149, %151, %cst_169 {dimension_numbers = #tpu.dot_dimension_numbers<[1], [0], [0], [1], [0, 0, 1, 1], [], []>} : vector<288x3xbf16>, vector<3x256xbf16>, vector<288x256xf32> -> vector<288x256xf32>
    %c0_170 = arith.constant 0 : index
    %c0_171 = arith.constant 0 : index
    %153 = vector.load %arg7[%c0_170, %c0_171] : memref<288x256xf32, #tpu.memory_space<vmem>>, vector<288x256xf32>
    %154 = arith.addf %153, %152 : vector<288x256xf32>
    %c0_172 = arith.constant 0 : index
    %c0_173 = arith.constant 0 : index
    %155 = vector.load %arg7[%c0_172, %c0_173] : memref<288x256xf32, #tpu.memory_space<vmem>>, vector<288x256xf32>
    tpu.vector_store %arg7[%c0_172, %c0_173], %154 {strides = array<i32>} : memref<288x256xf32, #tpu.memory_space<vmem>>, vector<288x256xf32>,
    %c0_174 = arith.constant 0 : index
    %c38_175 = arith.constant 38 : index
    %c0_176 = arith.constant 0 : index
    %156 = vector.load %arg2[%c0_174, %c38_175, %c0_176] : memref<1x328x3xf32, #tpu.memory_space<vmem>>, vector<1x288x3xf32>
    %157 = vector.shape_cast %156 : vector<1x288x3xf32> to vector<288x3xf32>
    %158 = arith.truncf %157 : vector<288x3xf32> to vector<288x3xbf16>
    %c8_177 = arith.constant 8 : index
    %c0_178 = arith.constant 0 : index
    %c0_179 = arith.constant 0 : index
    %159 = vector.load %arg3[%c8_177, %c0_178, %c0_179] : memref<9x3x256xbf16, #tpu.memory_space<vmem>>, vector<1x3x256xbf16>
    %160 = vector.shape_cast %159 : vector<1x3x256xbf16> to vector<3x256xbf16>
    %cst_180 = arith.constant dense<0.000000e+00> : vector<288x256xf32>
    %161 = tpu.matmul %158, %160, %cst_180 {dimension_numbers = #tpu.dot_dimension_numbers<[1], [0], [0], [1], [0, 0, 1, 1], [], []>} : vector<288x3xbf16>, vector<3x256xbf16>, vector<288x256xf32> -> vector<288x256xf32>
    %c0_181 = arith.constant 0 : index
    %c0_182 = arith.constant 0 : index
    %162 = vector.load %arg7[%c0_181, %c0_182] : memref<288x256xf32, #tpu.memory_space<vmem>>, vector<288x256xf32>
    %163 = arith.addf %162, %161 : vector<288x256xf32>
    %c0_183 = arith.constant 0 : index
    %c0_184 = arith.constant 0 : index
    %164 = vector.load %arg7[%c0_183, %c0_184] : memref<288x256xf32, #tpu.memory_space<vmem>>, vector<288x256xf32>
    tpu.vector_store %arg7[%c0_183, %c0_184], %163 {strides = array<i32>} : memref<288x256xf32, #tpu.memory_space<vmem>>, vector<288x256xf32>,
    %c0_185 = arith.constant 0 : index
    %c0_186 = arith.constant 0 : index
    %165 = vector.load %arg7[%c0_185, %c0_186] : memref<288x256xf32, #tpu.memory_space<vmem>>, vector<288x256xf32>
    %c0_187 = arith.constant 0 : index
    %c0_188 = arith.constant 0 : index
    %166 = vector.load %arg4[%c0_187, %c0_188] : memref<1x256xf32, #tpu.memory_space<vmem>>, vector<1x256xf32>
    %167 = vector.broadcast %166 : vector<1x256xf32> to vector<288x256xf32>
    %168 = arith.addf %165, %167 : vector<288x256xf32>
    %cst_189 = arith.constant 0.000000e+00 : f32
    %169 = vector.broadcast %cst_189 : f32 to vector<288x256xf32>
    %170 = arith.maximumf %168, %169 : vector<288x256xf32>
    %c0_190 = arith.constant 0 : index
    %c0_191 = arith.constant 0 : index
    %171 = vector.load %arg7[%c0_190, %c0_191] : memref<288x256xf32, #tpu.memory_space<vmem>>, vector<288x256xf32>
    tpu.vector_store %arg7[%c0_190, %c0_191], %170 {strides = array<i32>} : memref<288x256xf32, #tpu.memory_space<vmem>>, vector<288x256xf32>,
    %c0_192 = arith.constant 0 : index
    %c0_193 = arith.constant 0 : index
    %172 = vector.load %arg6[%c0_192, %c0_193] : memref<288x256xf32, #tpu.memory_space<vmem>>, vector<288x256xf32>
    %c0_194 = arith.constant 0 : index
    %c0_195 = arith.constant 0 : index
    %173 = vector.load %arg7[%c0_194, %c0_195] : memref<288x256xf32, #tpu.memory_space<vmem>>, vector<288x256xf32>
    %174 = arith.mulf %172, %172 : vector<288x256xf32>
    %cst_196 = arith.constant dense<0.000000e+00> : vector<288xf32>
    %175 = vector.multi_reduction <add>, %174, %cst_196 [1] : vector<288x256xf32> to vector<288xf32>
    %176 = vector.shape_cast %175 : vector<288xf32> to vector<288x1xf32>
    %177 = math.sqrt %176 : vector<288x1xf32>
    %178 = arith.mulf %173, %173 : vector<288x256xf32>
    %cst_197 = arith.constant dense<0.000000e+00> : vector<288xf32>
    %179 = vector.multi_reduction <add>, %178, %cst_197 [1] : vector<288x256xf32> to vector<288xf32>
    %180 = vector.shape_cast %179 : vector<288xf32> to vector<288x1xf32>
    %181 = math.sqrt %180 : vector<288x1xf32>
    %cst_198 = arith.constant 1.000000e-10 : f32
    %182 = vector.broadcast %cst_198 : f32 to vector<288x1xf32>
    %183 = arith.addf %177, %182 : vector<288x1xf32>
    %184 = tpu.reciprocal %183 {approx = true} : vector<288x1xf32> -> vector<288x1xf32>
    %185 = vector.broadcast %184 : vector<288x1xf32> to vector<288x256xf32>
    %186 = arith.mulf %172, %185 : vector<288x256xf32>
    %cst_199 = arith.constant 1.000000e-10 : f32
    %187 = vector.broadcast %cst_199 : f32 to vector<288x1xf32>
    %188 = arith.addf %181, %187 : vector<288x1xf32>
    %189 = tpu.reciprocal %188 {approx = true} : vector<288x1xf32> -> vector<288x1xf32>
    %190 = vector.broadcast %189 : vector<288x1xf32> to vector<288x256xf32>
    %191 = arith.mulf %173, %190 : vector<288x256xf32>
    %192 = arith.subf %186, %191 : vector<288x256xf32>
    %193 = arith.mulf %192, %192 : vector<288x256xf32>
    %cst_200 = arith.constant dense<0.000000e+00> : vector<288xf32>
    %194 = vector.multi_reduction <add>, %193, %cst_200 [1] : vector<288x256xf32> to vector<288xf32>
    %195 = vector.shape_cast %194 : vector<288xf32> to vector<288x1xf32>
    %196 = tpu.iota {dimensions = array<i32: 0>} : vector<288x1xi32>
    %c18_i32 = arith.constant 18 : i32
    %c0_i32 = arith.constant 0 : i32
    %197 = arith.cmpi eq, %c18_i32, %c0_i32 : i32
    %c1_i32 = arith.constant 1 : i32
    %198 = arith.select %197, %c1_i32, %c18_i32 : i32
    %199 = vector.broadcast %198 : i32 to vector<288x1xi32>
    %200 = arith.remsi %196, %199 : vector<288x1xi32>
    %c0_i32_201 = arith.constant 0 : i32
    %201 = vector.broadcast %c0_i32_201 : i32 to vector<288x1xi32>
    %202 = arith.cmpi ne, %200, %201 : vector<288x1xi32>
    %c0_i32_202 = arith.constant 0 : i32
    %203 = vector.broadcast %c0_i32_202 : i32 to vector<288x1xi32>
    %204 = arith.cmpi slt, %200, %203 : vector<288x1xi32>
    %c0_i32_203 = arith.constant 0 : i32
    %205 = arith.cmpi slt, %198, %c0_i32_203 : i32
    %206 = vector.broadcast %205 : i1 to vector<288x1xi1>
    %207 = vector.broadcast %206 : vector<288x1xi1> to vector<288x1xi1>
    %208 = arith.xori %204, %207 : vector<288x1xi1>
    %209 = arith.andi %208, %202 : vector<288x1xi1>
    %210 = vector.broadcast %198 : i32 to vector<288x1xi32>
    %211 = arith.addi %200, %210 : vector<288x1xi32>
    %212 = arith.select %209, %211, %200 : vector<288x1xi1>, vector<288x1xi32>
    %c16_i32 = arith.constant 16 : i32
    %213 = vector.broadcast %c16_i32 : i32 to vector<288x1xi32>
    %214 = arith.cmpi slt, %212, %213 : vector<288x1xi32>
    %cst_204 = arith.constant 0.000000e+00 : f32
    %215 = vector.broadcast %cst_204 : f32 to vector<288x1xf32>
    %216 = arith.select %214, %195, %215 : vector<288x1xi1>, vector<288x1xf32>
    %217 = vector.shape_cast %216 : vector<288x1xf32> to vector<1x288x1xf32>
    %cst_205 = arith.constant dense<0.000000e+00> : vector<1xf32>
    %218 = vector.multi_reduction <add>, %217, %cst_205 [1, 2] : vector<1x288x1xf32> to vector<1xf32>
    %219 = vector.shape_cast %218 : vector<1xf32> to vector<1x1x1xf32>
    %220 = vector.extract %219[0, 0, 0] : f32 from vector<1x1x1xf32>
    %cst_206 = arith.constant 3.906250e-03 : f32
    %221 = arith.mulf %220, %cst_206 : f32
    %cst_207 = arith.constant 0.000000e+00 : f32
    %222 = vector.broadcast %cst_207 : f32 to vector<1x1x128xf32>
    %223 = vector.broadcast %221 : f32 to vector<1x1x128xf32>
    %224 = arith.addf %222, %223 : vector<1x1x128xf32>
    %c0_208 = arith.constant 0 : index
    %c0_209 = arith.constant 0 : index
    %c0_210 = arith.constant 0 : index
    %225 = vector.load %arg5[%c0_208, %c0_209, %c0_210] : memref<1x1x128xf32, #tpu.memory_space<vmem>>, vector<1x1x128xf32>
    tpu.vector_store %arg5[%c0_208, %c0_209, %c0_210], %224 {strides = array<i32>} : memref<1x1x128xf32, #tpu.memory_space<vmem>>, vector<1x1x128xf32>,
    return
  }
  func.func @transform_0(%arg0: i32) -> (i32, i32, i32) {
    %c0_i32 = arith.constant 0 : i32
    %c0_i32_0 = arith.constant 0 : i32
    %c0_i32_1 = arith.constant 0 : i32
    return %arg0, %c0_i32, %c0_i32_0 : i32, i32, i32
  }
  func.func @transform_1(%arg0: i32) -> (i32, i32, i32) {
    %c0_i32 = arith.constant 0 : i32
    %c0_i32_0 = arith.constant 0 : i32
    %c0_i32_1 = arith.constant 0 : i32
    return %arg0, %c0_i32, %c0_i32_0 : i32, i32, i32
  }
  func.func @transform_2(%arg0: i32) -> (i32, i32, i32) {
    %c0_i32 = arith.constant 0 : i32
    %c0_i32_0 = arith.constant 0 : i32
    %c0_i32_1 = arith.constant 0 : i32
    %c0_i32_2 = arith.constant 0 : i32
    return %c0_i32, %c0_i32_0, %c0_i32_1 : i32, i32, i32
  }
  func.func @transform_3(%arg0: i32) -> (i32, i32) {
    %c0_i32 = arith.constant 0 : i32
    %c0_i32_0 = arith.constant 0 : i32
    %c0_i32_1 = arith.constant 0 : i32
    return %c0_i32, %c0_i32_0 : i32, i32
  }
  func.func @transform_4(%arg0: i32) -> (i32, i32, i32) {
    %c0_i32 = arith.constant 0 : i32
    %c0_i32_0 = arith.constant 0 : i32
    %c0_i32_1 = arith.constant 0 : i32
    return %arg0, %c0_i32, %c0_i32_0 : i32, i32, i32
  }
}

</mosaic_0001>

<bundles_post_ra>
// kernel: perceptual_similarity_forward.1
= control target key start
LH: loop header
LB: loop body
LE: loop exit
PB: predicated region body
PF: predicated region fallthrough
CT: control target
= control target key end

     0   :  { %s14798_s15 = smov 0   ;;  %s19121_s0 = inlined_call_operand.vmem [shape: f32[2,328,3], index: 0, kind: input, shape index: {}]   ;;  %s19122_s1 = inlined_call_operand.vmem [shape: f32[2,328,3], index: 1, kind: input, shape index: {}]   ;;  %s19123_s2 = inlined_call_operand.vmem [shape: bf16[9,3,256], index: 2, kind: input, shape index: {}]   ;;  %s19124_s3 = inlined_call_operand.vmem [shape: f32[1,256], index: 3, kind: input, shape index: {}]   ;;  %s19125_s4 = inlined_call_operand.vmem [shape: f32[2,1,128], index: 4, kind: output, shape index: {}]  }
   0x1 LB: > { %s12871_s16 = sadd.s32 4294967295, %s14769_s15   ;;  %p12875_p0 = scmp.ge.s32.totalorder %s14769_s15, 1  ;;  %s14769_s15 = sphi %s14798_s15, %s14_s15  }
   0x2   : > { %p172_p1 = scmp.lt.s32.totalorder %s14769_s15, 3 }
   0x4   : > { %p173_p2 = pnand %p12875_p0, %p172_p1 }
   0x6   : > { %176 = sbr.rel (%p173_p2) target bundleno = 2151 (0x867), region = 36 }
   0xd   : > { %v12878_v0 = vld.sshfl [vmem:[%s19123_s2] sm:$0x33 pattern:$0x76325410]  ;;  %vm334_vm0 = vcmask 1040384   ;;  %vm335_vm1 = vcmask 1041408  }
   0xe   : > { %v278_v1 = vcombine.high %v12878_v0, %v12878_v0  ;;  %v12898_v2 = vld.sshfl [vmem:[%s19123_s2 + $0x4] sm:$0x33 pattern:$0x76325410]  ;;  %v14771_v3 = vmov 65535   ;;  %v14772_v5 = vmov 0  }
   0xf   : > { %v336_v4 = vsel %vm334_vm0, 4294967295, %v14771_v3  ;;  %376 = vmatprep.mubr.bf16.mxu0 %v14772_v5  ;;  %v693_v6 = vcombine.high %v12898_v2, %v12898_v2  ;;  %5517 = vmatprep.mubr.bf16.mxu1 %v14772_v5  ;;  %p201_p3 = scmp.lt.s32.totalorder %s12871_s16, 1  ;;  %vm279_vm2 = vcmask 23552  }
  0x10   : > { %v14814_v7 = vsel %vm335_vm1, %v336_v4, 0  ;;  %v14864_v36 = vld.sshfl [vmem:[%s19123_s2 + $0x8] sm:$0x33 pattern:$0x76325410] }
  0x11   : > { %v342_v8 = vand.u32 %v14814_v7, %v278_v1  ;;  %v339_v9 = vand.u32 %v12878_v0, %v14814_v7  ;;  %v752_v10 = vand.u32 %v693_v6, %v14814_v7  ;;  %s19621_s16 = smov (!%p201_p3, %s12871_s16), 1  ;;  %v749_v13 = vand.u32 %v12898_v2, %v14814_v7 }
  0x12   : > { %s14390_s21 = smul.u32 328, %s19621_s16  ;;  %v1247_v37 = vcombine.high %v14864_v36, %v14864_v36  ;;  %s213_s25 = scalar_lea.vmem %s19125_s4, %s19621_s16 }
  0x13   : > { %344 = vmatprep.subr.bf16.mxu0 %v342_v8  ;;  %5485 = vmatprep.subr.bf16.mxu1 %v342_v8 }
  0x14   : > { %345 = vmatpush1.bf16.msra.mxu0 %v339_v9  ;;  %5486 = vmatpush1.bf16.msra.mxu1 %v339_v9  ;;  %s14825_s24 = scalar_lea.vmem %s19121_s0, %s14390_s21  ;;  %s14830_s27 = scalar_lea.vmem %s19122_s1, %s14390_s21  ;;  %v1306_v38 = vand.u32 %v1247_v37, %v14814_v7 }
  0x15   : > { %754 = vmatprep.subr.bf16.mxu0 %v752_v10  ;;  %5894 = vmatprep.subr.bf16.mxu1 %v752_v10  ;;  %v215_v11 = vld [vmem:[%s14825_s24] sm:$0xff]  ;;  %v216_v12 = vld [vmem:[%s14825_s24 + $0x8] sm:$0xff]  ;;  %v217_v18 = vld [vmem:[%s14825_s24 + $0x10] sm:$0xff] }
  0x16   : > { %v5361_v14 = vld [vmem:[%s14830_s27] sm:$0xff]  ;;  %v251_v15 = vpack.c.bf16 %v216_v12, %v215_v11  ;;  %v5362_v16 = vld [vmem:[%s14830_s27 + $0x8] sm:$0xff]  ;;  %v218_v19 = vld [vmem:[%s14825_s24 + $0x18] sm:$0xff] }
  0x17   : > { %v5397_v17 = vpack.c.bf16 %v5362_v16, %v5361_v14  ;;  %v5363_v20 = vld [vmem:[%s14830_s27 + $0x10] sm:$0xff]  ;;  %v5364_v21 = vld [vmem:[%s14830_s27 + $0x18] sm:$0xff]  ;;  %v252_v22 = vpack.c.bf16 %v218_v19, %v217_v18  ;;  %v219_v24 = vld [vmem:[%s14825_s24 + $0x20] sm:$0xff] }
  0x18   : > { %12879 = vmatmul.mubr.msk.bf16.vlgmr.msra.gmra.mrb[0].mxu0 %vm279_vm2, %v251_v15  ;;  %v5398_v23 = vpack.c.bf16 %v5364_v21, %v5363_v20  ;;  %v220_v25 = vld [vmem:[%s14825_s24 + $0x28] sm:$0xff]  ;;  %v5365_v26 = vld [vmem:[%s14830_s27 + $0x20] sm:$0xff]  ;;  %v221_v30 = vld [vmem:[%s14825_s24 + $0x30] sm:$0xff] }
  0x19   : > { %755 = vmatpush1.bf16.msra.mxu0 %v749_v13  ;;  %13058 = vmatmul.mubr.msk.bf16.vlgmr.msra.gmra.mrb[0].mxu1 %vm279_vm2, %v5397_v17  ;;  %v5366_v27 = vld [vmem:[%s14830_s27 + $0x28] sm:$0xff]  ;;  %v253_v28 = vpack.c.bf16 %v220_v25, %v219_v24  ;;  %v222_v31 = vld [vmem:[%s14825_s24 + $0x38] sm:$0xff]  ;;  %v5367_v32 = vld [vmem:[%s14830_s27 + $0x30] sm:$0xff] }
  0x1a   : > { %5895 = vmatpush1.bf16.msra.mxu1 %v749_v13  ;;  %386 = vmatprep.mubr.bf16.mxu0 %v14772_v5  ;;  %v5399_v29 = vpack.c.bf16 %v5366_v27, %v5365_v26  ;;  %v5368_v33 = vld [vmem:[%s14830_s27 + $0x38] sm:$0xff]  ;;  %v254_v34 = vpack.c.bf16 %v222_v31, %v221_v30  ;;  %v223_v39 = vld [vmem:[%s14825_s24 + $0x40] sm:$0xff]  ;;  %v224_v40 = vld [vmem:[%s14825_s24 + $0x48] sm:$0xff] }
  0x1b   : > { %5527 = vmatprep.mubr.bf16.mxu1 %v14772_v5  ;;  %v5400_v35 = vpack.c.bf16 %v5368_v33, %v5367_v32  ;;  %v5369_v41 = vld [vmem:[%s14830_s27 + $0x40] sm:$0xff]  ;;  %v5370_v42 = vld [vmem:[%s14830_s27 + $0x48] sm:$0xff]  ;;  %1308 = vmatprep.subr.bf16.mxu0 %v1306_v38  ;;  %v255_v43 = vpack.c.bf16 %v224_v40, %v223_v39  ;;  %v225_v45 = vld [vmem:[%s14825_s24 + $0x50] sm:$0xff] }
  0x1c   : > { %6447 = vmatprep.subr.bf16.mxu1 %v1306_v38  ;;  %v5401_v44 = vpack.c.bf16 %v5370_v42, %v5369_v41  ;;  %v226_v46 = vld [vmem:[%s14825_s24 + $0x58] sm:$0xff]  ;;  %v5371_v47 = vld [vmem:[%s14830_s27 + $0x50] sm:$0xff]  ;;  %v227_v51 = vld [vmem:[%s14825_s24 + $0x60] sm:$0xff] }
  0x1d   : > { %v5372_v48 = vld [vmem:[%s14830_s27 + $0x58] sm:$0xff]  ;;  %v256_v49 = vpack.c.bf16 %v226_v46, %v225_v45  ;;  %v228_v52 = vld [vmem:[%s14825_s24 + $0x68] sm:$0xff]  ;;  %v5373_v53 = vld [vmem:[%s14830_s27 + $0x60] sm:$0xff] }
  0x1e   : > { %v5402_v50 = vpack.c.bf16 %v5372_v48, %v5371_v47  ;;  %v5374_v54 = vld [vmem:[%s14830_s27 + $0x68] sm:$0xff]  ;;  %v257_v55 = vpack.c.bf16 %v228_v52, %v227_v51  ;;  %v229_v57 = vld [vmem:[%s14825_s24 + $0x70] sm:$0xff]  ;;  %v230_v58 = vld [vmem:[%s14825_s24 + $0x78] sm:$0xff] }
  0x1f   : > { %v5403_v56 = vpack.c.bf16 %v5374_v54, %v5373_v53  ;;  %v5375_v59 = vld [vmem:[%s14830_s27 + $0x70] sm:$0xff]  ;;  %v5376_v60 = vld [vmem:[%s14830_s27 + $0x78] sm:$0xff]  ;;  %v258_v61 = vpack.c.bf16 %v230_v58, %v229_v57  ;;  %v231_v63 = vld [vmem:[%s14825_s24 + $0x80] sm:$0xff] }
  0x20   : > { %12880 = vmatmul.mubr.msk.bf16.gmra.mrb[4].mxu0 %vm279_vm2, %v252_v22  ;;  %v5404_v62 = vpack.c.bf16 %v5376_v60, %v5375_v59  ;;  %v232_v0 = vld [vmem:[%s14825_s24 + $0x88] sm:$0xff]  ;;  %v5377_v1 = vld [vmem:[%s14830_s27 + $0x80] sm:$0xff]  ;;  %v233_v6 = vld [vmem:[%s14825_s24 + $0x90] sm:$0xff] }
  0x21   : > { %13059 = vmatmul.mubr.msk.bf16.gmra.mrb[4].mxu1 %vm279_vm2, %v5398_v23  ;;  %396 = vmatprep.mubr.bf16.mxu0 %v14772_v5  ;;  %v5378_v2 = vld [vmem:[%s14830_s27 + $0x88] sm:$0xff]  ;;  %v259_v3 = vpack.c.bf16 %v232_v0, %v231_v63  ;;  %v234_v8 = vld [vmem:[%s14825_s24 + $0x98] sm:$0xff]  ;;  %v5379_v9 = vld [vmem:[%s14830_s27 + $0x90] sm:$0xff] }
  0x22   : > { %5537 = vmatprep.mubr.bf16.mxu1 %v14772_v5  ;;  %v5405_v4 = vpack.c.bf16 %v5378_v2, %v5377_v1  ;;  %v5380_v10 = vld [vmem:[%s14830_s27 + $0x98] sm:$0xff]  ;;  %v260_v11 = vpack.c.bf16 %v234_v8, %v233_v6  ;;  %v235_v13 = vld [vmem:[%s14825_s24 + $0xa0] sm:$0xff]  ;;  %v236_v14 = vld [vmem:[%s14825_s24 + $0xa8] sm:$0xff] }
  0x23   : > { %v5406_v12 = vpack.c.bf16 %v5380_v10, %v5379_v9  ;;  %v5381_v15 = vld [vmem:[%s14830_s27 + $0xa0] sm:$0xff]  ;;  %v5382_v16 = vld [vmem:[%s14830_s27 + $0xa8] sm:$0xff]  ;;  %v261_v17 = vpack.c.bf16 %v236_v14, %v235_v13  ;;  %v237_v19 = vld [vmem:[%s14825_s24 + $0xb0] sm:$0xff] }
  0x24   : > { %v5407_v18 = vpack.c.bf16 %v5382_v16, %v5381_v15  ;;  %v238_v20 = vld [vmem:[%s14825_s24 + $0xb8] sm:$0xff]  ;;  %v5383_v21 = vld [vmem:[%s14830_s27 + $0xb0] sm:$0xff]  ;;  %v239_v25 = vld [vmem:[%s14825_s24 + $0xc0] sm:$0xff] }
  0x25   : > { %v5384_v22 = vld [vmem:[%s14830_s27 + $0xb8] sm:$0xff]  ;;  %v262_v23 = vpack.c.bf16 %v238_v20, %v237_v19  ;;  %v240_v26 = vld [vmem:[%s14825_s24 + $0xc8] sm:$0xff]  ;;  %v5385_v27 = vld [vmem:[%s14830_s27 + $0xc0] sm:$0xff] }
  0x26   : > { %v5408_v24 = vpack.c.bf16 %v5384_v22, %v5383_v21  ;;  %v241_v31 = vld [vmem:[%s14825_s24 + $0xd0] sm:$0xff]  ;;  %v242_v32 = vld [vmem:[%s14825_s24 + $0xd8] sm:$0xff]  ;;  %v243_v38 = vld [vmem:[%s14825_s24 + $0xe0] sm:$0xff] }
  0x27   : > { %v5387_v33 = vld [vmem:[%s14830_s27 + $0xd0] sm:$0xff]  ;;  %v244_v39 = vld [vmem:[%s14825_s24 + $0xe8] sm:$0xff]  ;;  %v5389_v40 = vld [vmem:[%s14830_s27 + $0xe0] sm:$0xff] }
  0x28   : > { %12881 = vmatmul.mubr.msk.bf16.gmra.mrb[8].mxu0 %vm279_vm2, %v253_v28  ;;  %v5386_v28 = vld [vmem:[%s14830_s27 + $0xc8] sm:$0xff]  ;;  %v265_v42 = vpack.c.bf16 %v244_v39, %v243_v38  ;;  %v246_v45 = vld [vmem:[%s14825_s24 + $0xf8] sm:$0xff]  ;;  %v5391_v46 = vld [vmem:[%s14830_s27 + $0xf0] sm:$0xff] }
  0x29   : > { %13060 = vmatmul.mubr.msk.bf16.gmra.mrb[8].mxu1 %vm279_vm2, %v5399_v29  ;;  %406 = vmatprep.mubr.bf16.mxu0 %v14772_v5  ;;  %v263_v29 = vpack.c.bf16 %v240_v26, %v239_v25  ;;  %v5409_v30 = vpack.c.bf16 %v5386_v28, %v5385_v27  ;;  %v5390_v41 = vld [vmem:[%s14830_s27 + $0xe8] sm:$0xff]  ;;  %v5392_v47 = vld [vmem:[%s14830_s27 + $0xf8] sm:$0xff]  ;;  %v5393_v52 = vld [vmem:[%s14830_s27 + $0x100] sm:$0xff] }
  0x2a   : > { %5547 = vmatprep.mubr.bf16.mxu1 %v14772_v5  ;;  %v248_v51 = vld [vmem:[%s14825_s24 + $0x108] sm:$0xff]  ;;  %v250_v57 = vld [vmem:[%s14825_s24 + $0x118] sm:$0xff]  ;;  %v5395_v58 = vld [vmem:[%s14830_s27 + $0x110] sm:$0xff] }
  0x2b   : > { %v5394_v53 = vld [vmem:[%s14830_s27 + $0x108] sm:$0xff]  ;;  %v5396_v59 = vld [vmem:[%s14830_s27 + $0x118] sm:$0xff] }
  0x2c   : > { %v630_v63 = vld [vmem:[%s14825_s24 + $0x9] sm:$0xff]  ;;  %v5770_v0 = vld [vmem:[%s14830_s27 + $0x1] sm:$0xff]  ;;  %v631_v6 = vld [vmem:[%s14825_s24 + $0x11] sm:$0xff] }
  0x2d   : > { %v5771_v1 = vld [vmem:[%s14830_s27 + $0x9] sm:$0xff]  ;;  %v632_v8 = vld [vmem:[%s14825_s24 + $0x19] sm:$0xff]  ;;  %v5772_v9 = vld [vmem:[%s14830_s27 + $0x11] sm:$0xff] }
  0x2e   : > { %v5773_v10 = vld [vmem:[%s14830_s27 + $0x19] sm:$0xff]  ;;  %v634_v13 = vld [vmem:[%s14825_s24 + $0x29] sm:$0xff]  ;;  %v5774_v15 = vld [vmem:[%s14830_s27 + $0x21] sm:$0xff] }
  0x2f   : > { %v15007_v14 = vld.sshfl [vmem:[%s19123_s2 + $0xc] sm:$0x33 pattern:$0x76325410]  ;;  %v635_v21 = vld [vmem:[%s14825_s24 + $0x31] sm:$0xff]  ;;  %v636_v22 = vld [vmem:[%s14825_s24 + $0x39] sm:$0xff] }
  0x30   : > { %12882 = vmatmul.mubr.msk.bf16.gmra.mrb[12].mxu0 %vm279_vm2, %v254_v34  ;;  %v5388_v34 = vld [vmem:[%s14830_s27 + $0xd8] sm:$0xff]  ;;  %v5775_v16 = vld [vmem:[%s14830_s27 + $0x29] sm:$0xff]  ;;  %v668_v25 = vpack.c.bf16 %v636_v22, %v635_v21  ;;  %v637_v27 = vld [vmem:[%s14825_s24 + $0x41] sm:$0xff] }
  0x31   : > { %13061 = vmatmul.mubr.msk.bf16.gmra.mrb[12].mxu1 %vm279_vm2, %v5400_v35  ;;  %416 = vmatprep.mubr.bf16.mxu0 %v14772_v5  ;;  %v264_v35 = vpack.c.bf16 %v242_v32, %v241_v31  ;;  %v5410_v37 = vpack.c.bf16 %v5388_v34, %v5387_v33  ;;  %v5808_v20 = vpack.c.bf16 %v5775_v16, %v5774_v15  ;;  %v638_v28 = vld [vmem:[%s14825_s24 + $0x49] sm:$0xff]  ;;  %v639_v33 = vld [vmem:[%s14825_s24 + $0x51] sm:$0xff]  ;;  %v640_v34 = vld [vmem:[%s14825_s24 + $0x59] sm:$0xff] }
  0x32   : > { %5557 = vmatprep.mubr.bf16.mxu1 %v14772_v5  ;;  %v669_v31 = vpack.c.bf16 %v638_v28, %v637_v27  ;;  %v670_v38 = vpack.c.bf16 %v640_v34, %v639_v33  ;;  %v654_v15 = vld [vmem:[%s14825_s24 + $0xc9] sm:$0xff]  ;;  %v5794_v16 = vld [vmem:[%s14830_s27 + $0xc1] sm:$0xff]  ;;  %v656_v21 = vld [vmem:[%s14825_s24 + $0xd9] sm:$0xff] }
  0x33   : > { %v5796_v22 = vld [vmem:[%s14830_s27 + $0xd1] sm:$0xff]  ;;  %v658_v27 = vld [vmem:[%s14825_s24 + $0xe9] sm:$0xff]  ;;  %v5798_v28 = vld [vmem:[%s14830_s27 + $0xe1] sm:$0xff] }
  0x34   : > { %v660_v33 = vld [vmem:[%s14825_s24 + $0xf9] sm:$0xff]  ;;  %v5800_v34 = vld [vmem:[%s14830_s27 + $0xf1] sm:$0xff] }
  0x38   : > { %12883 = vmatmul.mubr.msk.bf16.gmra.mrb[16].mxu0 %vm279_vm2, %v255_v43  ;;  %v5411_v43 = vpack.c.bf16 %v5390_v41, %v5389_v40  ;;  %v641_v40 = vld [vmem:[%s14825_s24 + $0x61] sm:$0xff]  ;;  %v642_v41 = vld [vmem:[%s14825_s24 + $0x69] sm:$0xff] }
  0x39   : > { %13062 = vmatmul.mubr.msk.bf16.gmra.mrb[16].mxu1 %vm279_vm2, %v5401_v44  ;;  %426 = vmatprep.mubr.bf16.mxu0 %v14772_v5  ;;  %v245_v44 = vld [vmem:[%s14825_s24 + $0xf0] sm:$0xff] }
  0x3a   : > { %5567 = vmatprep.mubr.bf16.mxu1 %v14772_v5  ;;  %v266_v48 = vpack.c.bf16 %v246_v45, %v245_v44  ;;  %v671_v44 = vpack.c.bf16 %v642_v41, %v641_v40  ;;  %v662_v40 = vld [vmem:[%s14825_s24 + $0x109] sm:$0xff]  ;;  %v5802_v41 = vld [vmem:[%s14830_s27 + $0x101] sm:$0xff] }
  0x40   : > { %12884 = vmatmul.mubr.msk.bf16.gmra.mrb[20].mxu0 %vm279_vm2, %v256_v49  ;;  %v5412_v49 = vpack.c.bf16 %v5392_v47, %v5391_v46  ;;  %v643_v46 = vld [vmem:[%s14825_s24 + $0x71] sm:$0xff]  ;;  %v644_v47 = vld [vmem:[%s14825_s24 + $0x79] sm:$0xff] }
  0x41   : > { %13063 = vmatmul.mubr.msk.bf16.gmra.mrb[20].mxu1 %vm279_vm2, %v5402_v50  ;;  %436 = vmatprep.mubr.bf16.mxu0 %v14772_v5  ;;  %v247_v50 = vld [vmem:[%s14825_s24 + $0x100] sm:$0xff] }
  0x42   : > { %5577 = vmatprep.mubr.bf16.mxu1 %v14772_v5  ;;  %v267_v54 = vpack.c.bf16 %v248_v51, %v247_v50  ;;  %v672_v50 = vpack.c.bf16 %v644_v47, %v643_v46  ;;  %v664_v46 = vld [vmem:[%s14825_s24 + $0x119] sm:$0xff]  ;;  %v5804_v47 = vld [vmem:[%s14830_s27 + $0x111] sm:$0xff] }
  0x48   : > { %12885 = vmatmul.mubr.msk.bf16.gmra.mrb[24].mxu0 %vm279_vm2, %v257_v55  ;;  %v5413_v55 = vpack.c.bf16 %v5394_v53, %v5393_v52  ;;  %v645_v52 = vld [vmem:[%s14825_s24 + $0x81] sm:$0xff]  ;;  %v646_v53 = vld [vmem:[%s14825_s24 + $0x89] sm:$0xff] }
  0x49   : > { %13064 = vmatmul.mubr.msk.bf16.gmra.mrb[24].mxu1 %vm279_vm2, %v5403_v56  ;;  %446 = vmatprep.mubr.bf16.mxu0 %v14772_v5  ;;  %v249_v56 = vld [vmem:[%s14825_s24 + $0x110] sm:$0xff] }
  0x4a   : > { %5587 = vmatprep.mubr.bf16.mxu1 %v14772_v5  ;;  %v268_v60 = vpack.c.bf16 %v250_v57, %v249_v56  ;;  %v673_v56 = vpack.c.bf16 %v646_v53, %v645_v52  ;;  %v1184_v52 = vld [vmem:[%s14825_s24 + $0xa] sm:$0xff]  ;;  %v6323_v53 = vld [vmem:[%s14830_s27 + $0x2] sm:$0xff] }
  0x50   : > { %12886 = vmatmul.mubr.msk.bf16.gmra.mrb[28].mxu0 %vm279_vm2, %v258_v61  ;;  %v5414_v61 = vpack.c.bf16 %v5396_v59, %v5395_v58  ;;  %v647_v58 = vld [vmem:[%s14825_s24 + $0x91] sm:$0xff]  ;;  %v648_v59 = vld [vmem:[%s14825_s24 + $0x99] sm:$0xff] }
  0x51   : > { %13065 = vmatmul.mubr.msk.bf16.gmra.mrb[28].mxu1 %vm279_vm2, %v5404_v62  ;;  %456 = vmatprep.mubr.bf16.mxu0 %v14772_v5  ;;  %v629_v62 = vld [vmem:[%s14825_s24 + $0x1] sm:$0xff] }
  0x52   : > { %5597 = vmatprep.mubr.bf16.mxu1 %v14772_v5  ;;  %v665_v2 = vpack.c.bf16 %v630_v63, %v629_v62  ;;  %v674_v62 = vpack.c.bf16 %v648_v59, %v647_v58  ;;  %v1185_v58 = vld [vmem:[%s14825_s24 + $0x12] sm:$0xff]  ;;  %v1186_v59 = vld [vmem:[%s14825_s24 + $0x1a] sm:$0xff] }
  0x58   : > { %12887 = vmatmul.mubr.msk.bf16.gmra.mrb[32].mxu0 %vm279_vm2, %v259_v3  ;;  %v1303_v3 = vand.u32 %v14864_v36, %v14814_v7  ;;  %v666_v36 = vpack.c.bf16 %v632_v8, %v631_v6  ;;  %v651_v8 = vld [vmem:[%s14825_s24 + $0xb1] sm:$0xff] }
  0x59   : > { %13066 = vmatmul.mubr.msk.bf16.gmra.mrb[32].mxu1 %vm279_vm2, %v5405_v4  ;;  %466 = vmatprep.mubr.bf16.mxu0 %v14772_v5  ;;  %v5806_v4 = vpack.c.bf16 %v5771_v1, %v5770_v0  ;;  %v649_v0 = vld [vmem:[%s14825_s24 + $0xa1] sm:$0xff]  ;;  %v650_v1 = vld [vmem:[%s14825_s24 + $0xa9] sm:$0xff] }
  0x5a   : > { %5607 = vmatprep.mubr.bf16.mxu1 %v14772_v5 }
  0x60   : > { %12888 = vmatmul.mubr.msk.bf16.gmra.mrb[36].mxu0 %vm279_vm2, %v260_v11  ;;  %v5807_v11 = vpack.c.bf16 %v5773_v10, %v5772_v9  ;;  %v652_v9 = vld [vmem:[%s14825_s24 + $0xb9] sm:$0xff]  ;;  %v5792_v10 = vld [vmem:[%s14830_s27 + $0xb1] sm:$0xff] }
  0x61   : > { %13067 = vmatmul.mubr.msk.bf16.gmra.mrb[36].mxu1 %vm279_vm2, %v5406_v12  ;;  %476 = vmatprep.mubr.bf16.mxu0 %v14772_v5  ;;  %v633_v12 = vld [vmem:[%s14825_s24 + $0x21] sm:$0xff] }
  0x62   : > { %5617 = vmatprep.mubr.bf16.mxu1 %v14772_v5 }
  0x68   : > { %12889 = vmatmul.mubr.msk.bf16.gmra.mrb[40].mxu0 %vm279_vm2, %v261_v17  ;;  %v1801_v17 = vcombine.high %v15007_v14, %v15007_v14 }
  0x69   : > { %13068 = vmatmul.mubr.msk.bf16.gmra.mrb[40].mxu1 %vm279_vm2, %v5407_v18  ;;  %486 = vmatprep.mubr.bf16.mxu0 %v14772_v5  ;;  %v667_v18 = vpack.c.bf16 %v634_v13, %v633_v12  ;;  %v653_v13 = vld [vmem:[%s14825_s24 + $0xc1] sm:$0xff] }
  0x6a   : > { %5627 = vmatprep.mubr.bf16.mxu1 %v14772_v5  ;;  %v1860_v19 = vand.u32 %v1801_v17, %v14814_v7  ;;  %v5795_v17 = vld [vmem:[%s14830_s27 + $0xc9] sm:$0xff] }
  0x70   : > { %12890 = vmatmul.mubr.msk.bf16.gmra.mrb[44].mxu0 %vm279_vm2, %v262_v23  ;;  %v5776_v23 = vld [vmem:[%s14830_s27 + $0x31] sm:$0xff] }
  0x71   : > { %13069 = vmatmul.mubr.msk.bf16.gmra.mrb[44].mxu1 %vm279_vm2, %v5408_v24  ;;  %496 = vmatprep.mubr.bf16.mxu0 %v14772_v5  ;;  %v5777_v24 = vld [vmem:[%s14830_s27 + $0x39] sm:$0xff] }
  0x72   : > { %5637 = vmatprep.mubr.bf16.mxu1 %v14772_v5  ;;  %v5809_v26 = vpack.c.bf16 %v5777_v24, %v5776_v23  ;;  %v5797_v23 = vld [vmem:[%s14830_s27 + $0xd9] sm:$0xff] }
  0x78   : > { %12891 = vmatmul.mubr.msk.bf16.gmra.mrb[48].mxu0 %vm279_vm2, %v263_v29  ;;  %v5778_v29 = vld [vmem:[%s14830_s27 + $0x41] sm:$0xff] }
  0x79   : > { %13070 = vmatmul.mubr.msk.bf16.gmra.mrb[48].mxu1 %vm279_vm2, %v5409_v30  ;;  %506 = vmatprep.mubr.bf16.mxu0 %v14772_v5  ;;  %v5779_v30 = vld [vmem:[%s14830_s27 + $0x49] sm:$0xff] }
  0x7a   : > { %5647 = vmatprep.mubr.bf16.mxu1 %v14772_v5  ;;  %v5810_v32 = vpack.c.bf16 %v5779_v30, %v5778_v29  ;;  %v5799_v29 = vld [vmem:[%s14830_s27 + $0xe9] sm:$0xff] }
  0x80   : > { %12892 = vmatmul.mubr.msk.bf16.gmra.mrb[52].mxu0 %vm279_vm2, %v264_v35  ;;  %v5780_v35 = vld [vmem:[%s14830_s27 + $0x51] sm:$0xff] }
  0x81   : > { %13071 = vmatmul.mubr.msk.bf16.gmra.mrb[52].mxu1 %vm279_vm2, %v5410_v37  ;;  %516 = vmatprep.mubr.bf16.mxu0 %v14772_v5  ;;  %v5781_v37 = vld [vmem:[%s14830_s27 + $0x59] sm:$0xff] }
  0x82   : > { %5657 = vmatprep.mubr.bf16.mxu1 %v14772_v5  ;;  %v5811_v39 = vpack.c.bf16 %v5781_v37, %v5780_v35  ;;  %v5801_v35 = vld [vmem:[%s14830_s27 + $0xf9] sm:$0xff] }
  0x88   : > { %12893 = vmatmul.mubr.msk.bf16.gmra.mrb[56].mxu0 %vm279_vm2, %v265_v42  ;;  %v5782_v42 = vld [vmem:[%s14830_s27 + $0x61] sm:$0xff] }
  0x89   : > { %13072 = vmatmul.mubr.msk.bf16.gmra.mrb[56].mxu1 %vm279_vm2, %v5411_v43  ;;  %526 = vmatprep.mubr.bf16.mxu0 %v14772_v5  ;;  %v5783_v43 = vld [vmem:[%s14830_s27 + $0x69] sm:$0xff] }
  0x8a   : > { %5667 = vmatprep.mubr.bf16.mxu1 %v14772_v5  ;;  %v5812_v45 = vpack.c.bf16 %v5783_v43, %v5782_v42  ;;  %v5803_v42 = vld [vmem:[%s14830_s27 + $0x109] sm:$0xff] }
  0x90   : > { %12894 = vmatmul.mubr.msk.bf16.gmra.mrb[60].mxu0 %vm279_vm2, %v266_v48  ;;  %v5784_v48 = vld [vmem:[%s14830_s27 + $0x71] sm:$0xff] }
  0x91   : > { %13073 = vmatmul.mubr.msk.bf16.gmra.mrb[60].mxu1 %vm279_vm2, %v5412_v49  ;;  %536 = vmatprep.mubr.bf16.mxu0 %v14772_v5  ;;  %v5785_v49 = vld [vmem:[%s14830_s27 + $0x79] sm:$0xff] }
  0x92   : > { %5677 = vmatprep.mubr.bf16.mxu1 %v14772_v5  ;;  %v5813_v51 = vpack.c.bf16 %v5785_v49, %v5784_v48  ;;  %v5805_v48 = vld [vmem:[%s14830_s27 + $0x119] sm:$0xff] }
  0x98   : > { %12895 = vmatmul.mubr.msk.bf16.gmra.mrb[64].mxu0 %vm279_vm2, %v267_v54  ;;  %v5786_v54 = vld [vmem:[%s14830_s27 + $0x81] sm:$0xff] }
  0x99   : > { %13074 = vmatmul.mubr.msk.bf16.gmra.mrb[64].mxu1 %vm279_vm2, %v5413_v55  ;;  %546 = vmatprep.mubr.bf16.mxu0 %v14772_v5  ;;  %v5787_v55 = vld [vmem:[%s14830_s27 + $0x89] sm:$0xff] }
  0x9a   : > { %5687 = vmatprep.mubr.bf16.mxu1 %v14772_v5  ;;  %v5814_v57 = vpack.c.bf16 %v5787_v55, %v5786_v54  ;;  %v6324_v54 = vld [vmem:[%s14830_s27 + $0xa] sm:$0xff] }
  0xa0   : > { %12896 = vmatmul.mubr.msk.bf16.gmra.mrb[68].mxu0 %vm279_vm2, %v268_v60  ;;  %v5788_v60 = vld [vmem:[%s14830_s27 + $0x91] sm:$0xff] }
  0xa1   : > { %13075 = vmatmul.mubr.msk.bf16.gmra.mrb[68].mxu1 %vm279_vm2, %v5414_v61  ;;  %786 = vmatprep.mubr.bf16.mxu0 %v14772_v5  ;;  %v5789_v61 = vld [vmem:[%s14830_s27 + $0x99] sm:$0xff] }
  0xa2   : > { %5926 = vmatprep.mubr.bf16.mxu1 %v14772_v5  ;;  %v5815_v63 = vpack.c.bf16 %v5789_v61, %v5788_v60  ;;  %v6325_v60 = vld [vmem:[%s14830_s27 + $0x12] sm:$0xff]  ;;  %v6326_v61 = vld [vmem:[%s14830_s27 + $0x1a] sm:$0xff] }
  0xa8   : > { %12899 = vmatmul.mubr.msk.bf16.vlgmr.msra.gmra.mrb[0].mxu0 %vm279_vm2, %v665_v2  ;;  %v5790_v2 = vld [vmem:[%s14830_s27 + $0xa1] sm:$0xff] }
  0xa9   : > { %1309 = vmatpush1.bf16.msra.mxu0 %v1303_v3  ;;  %13078 = vmatmul.mubr.msk.bf16.vlgmr.msra.gmra.mrb[0].mxu1 %vm279_vm2, %v5806_v4  ;;  %v675_v4 = vpack.c.bf16 %v650_v1, %v649_v0  ;;  %v1188_v0 = vld [vmem:[%s14825_s24 + $0x2a] sm:$0xff] }
  0xaa   : > { %6448 = vmatpush1.bf16.msra.mxu1 %v1303_v3  ;;  %796 = vmatprep.mubr.bf16.mxu0 %v14772_v5  ;;  %v5791_v3 = vld [vmem:[%s14830_s27 + $0xa9] sm:$0xff] }
  0xab   : > { %5936 = vmatprep.mubr.bf16.mxu1 %v14772_v5  ;;  %1862 = vmatprep.subr.bf16.mxu0 %v1860_v19  ;;  %v5816_v6 = vpack.c.bf16 %v5791_v3, %v5790_v2  ;;  %v15167_v1 = vld.sshfl [vmem:[%s19123_s2 + $0x10] sm:$0x33 pattern:$0x76325410]  ;;  %v6327_v2 = vld [vmem:[%s14830_s27 + $0x22] sm:$0xff] }
  0xac   : > { %7000 = vmatprep.subr.bf16.mxu1 %v1860_v19  ;;  %v5818_v19 = vpack.c.bf16 %v5795_v17, %v5794_v16  ;;  %v6328_v3 = vld [vmem:[%s14830_s27 + $0x2a] sm:$0xff]  ;;  %v1191_v16 = vld [vmem:[%s14825_s24 + $0x42] sm:$0xff] }
  0xad   : > { %v1192_v17 = vld [vmem:[%s14825_s24 + $0x4a] sm:$0xff] }
  0xb0   : > { %12900 = vmatmul.mubr.msk.bf16.gmra.mrb[4].mxu0 %vm279_vm2, %v666_v36  ;;  %v5793_v36 = vld [vmem:[%s14830_s27 + $0xb9] sm:$0xff] }
  0xb1   : > { %13079 = vmatmul.mubr.msk.bf16.gmra.mrb[4].mxu1 %vm279_vm2, %v5807_v11  ;;  %806 = vmatprep.mubr.bf16.mxu0 %v14772_v5  ;;  %v676_v11 = vpack.c.bf16 %v652_v9, %v651_v8  ;;  %v5817_v12 = vpack.c.bf16 %v5793_v36, %v5792_v10  ;;  %v15177_v9 = vpack.c.bf16 %v6328_v3, %v6327_v2  ;;  %v1189_v10 = vld [vmem:[%s14825_s24 + $0x32] sm:$0xff]  ;;  %v1190_v36 = vld [vmem:[%s14825_s24 + $0x3a] sm:$0xff]  ;;  %v1207_v3 = vld [vmem:[%s14825_s24 + $0xc2] sm:$0xff] }
  0xb2   : > { %5946 = vmatprep.mubr.bf16.mxu1 %v14772_v5 }
  0xb8   : > { %12901 = vmatmul.mubr.msk.bf16.gmra.mrb[8].mxu0 %vm279_vm2, %v667_v18  ;;  %v677_v18 = vpack.c.bf16 %v654_v15, %v653_v13  ;;  %v15189_v13 = vpack.c.bf16 %v1190_v36, %v1189_v10  ;;  %v6348_v10 = vld [vmem:[%s14830_s27 + $0xca] sm:$0xff] }
  0xb9   : > { %13080 = vmatmul.mubr.msk.bf16.gmra.mrb[8].mxu1 %vm279_vm2, %v5808_v20  ;;  %816 = vmatprep.mubr.bf16.mxu0 %v14772_v5  ;;  %v655_v20 = vld [vmem:[%s14825_s24 + $0xd1] sm:$0xff] }
  0xba   : > { %5956 = vmatprep.mubr.bf16.mxu1 %v14772_v5  ;;  %v678_v24 = vpack.c.bf16 %v656_v21, %v655_v20  ;;  %v15203_v20 = vpack.c.bf16 %v1192_v17, %v1191_v16  ;;  %v1210_v16 = vld [vmem:[%s14825_s24 + $0xda] sm:$0xff]  ;;  %v6349_v17 = vld [vmem:[%s14830_s27 + $0xd2] sm:$0xff] }
  0xc0   : > { %12902 = vmatmul.mubr.msk.bf16.gmra.mrb[12].mxu0 %vm279_vm2, %v668_v25  ;;  %v5819_v25 = vpack.c.bf16 %v5797_v23, %v5796_v22  ;;  %v1193_v22 = vld [vmem:[%s14825_s24 + $0x52] sm:$0xff]  ;;  %v1194_v23 = vld [vmem:[%s14825_s24 + $0x5a] sm:$0xff] }
  0xc1   : > { %13081 = vmatmul.mubr.msk.bf16.gmra.mrb[12].mxu1 %vm279_vm2, %v5809_v26  ;;  %826 = vmatprep.mubr.bf16.mxu0 %v14772_v5  ;;  %v657_v26 = vld [vmem:[%s14825_s24 + $0xe1] sm:$0xff] }
  0xc2   : > { %5966 = vmatprep.mubr.bf16.mxu1 %v14772_v5  ;;  %v679_v30 = vpack.c.bf16 %v658_v27, %v657_v26  ;;  %v15217_v26 = vpack.c.bf16 %v1194_v23, %v1193_v22  ;;  %v1211_v23 = vld [vmem:[%s14825_s24 + $0xe2] sm:$0xff] }
  0xc8   : > { %12903 = vmatmul.mubr.msk.bf16.gmra.mrb[16].mxu0 %vm279_vm2, %v669_v31  ;;  %v5820_v31 = vpack.c.bf16 %v5799_v29, %v5798_v28  ;;  %v1195_v28 = vld [vmem:[%s14825_s24 + $0x62] sm:$0xff]  ;;  %v1196_v29 = vld [vmem:[%s14825_s24 + $0x6a] sm:$0xff] }
  0xc9   : > { %13082 = vmatmul.mubr.msk.bf16.gmra.mrb[16].mxu1 %vm279_vm2, %v5810_v32  ;;  %836 = vmatprep.mubr.bf16.mxu0 %v14772_v5  ;;  %v659_v32 = vld [vmem:[%s14825_s24 + $0xf1] sm:$0xff] }
  0xca   : > { %5976 = vmatprep.mubr.bf16.mxu1 %v14772_v5  ;;  %v680_v37 = vpack.c.bf16 %v660_v33, %v659_v32  ;;  %v15231_v32 = vpack.c.bf16 %v1196_v29, %v1195_v28  ;;  %v6352_v28 = vld [vmem:[%s14830_s27 + $0xea] sm:$0xff] }
  0xd0   : > { %12904 = vmatmul.mubr.msk.bf16.gmra.mrb[20].mxu0 %vm279_vm2, %v670_v38  ;;  %v5821_v38 = vpack.c.bf16 %v5801_v35, %v5800_v34  ;;  %v1197_v34 = vld [vmem:[%s14825_s24 + $0x72] sm:$0xff]  ;;  %v1198_v35 = vld [vmem:[%s14825_s24 + $0x7a] sm:$0xff] }
  0xd1   : > { %13083 = vmatmul.mubr.msk.bf16.gmra.mrb[20].mxu1 %vm279_vm2, %v5811_v39  ;;  %846 = vmatprep.mubr.bf16.mxu0 %v14772_v5  ;;  %v661_v39 = vld [vmem:[%s14825_s24 + $0x101] sm:$0xff] }
  0xd2   : > { %5986 = vmatprep.mubr.bf16.mxu1 %v14772_v5  ;;  %v681_v43 = vpack.c.bf16 %v662_v40, %v661_v39  ;;  %v15245_v39 = vpack.c.bf16 %v1198_v35, %v1197_v34  ;;  %v1214_v34 = vld [vmem:[%s14825_s24 + $0xfa] sm:$0xff]  ;;  %v6353_v35 = vld [vmem:[%s14830_s27 + $0xf2] sm:$0xff] }
  0xd8   : > { %12905 = vmatmul.mubr.msk.bf16.gmra.mrb[24].mxu0 %vm279_vm2, %v671_v44  ;;  %v5822_v44 = vpack.c.bf16 %v5803_v42, %v5802_v41  ;;  %v1199_v41 = vld [vmem:[%s14825_s24 + $0x82] sm:$0xff]  ;;  %v1200_v42 = vld [vmem:[%s14825_s24 + $0x8a] sm:$0xff] }
  0xd9   : > { %13084 = vmatmul.mubr.msk.bf16.gmra.mrb[24].mxu1 %vm279_vm2, %v5812_v45  ;;  %856 = vmatprep.mubr.bf16.mxu0 %v14772_v5  ;;  %v663_v45 = vld [vmem:[%s14825_s24 + $0x111] sm:$0xff] }
  0xda   : > { %5996 = vmatprep.mubr.bf16.mxu1 %v14772_v5  ;;  %v682_v49 = vpack.c.bf16 %v664_v46, %v663_v45  ;;  %v15259_v45 = vpack.c.bf16 %v1200_v42, %v1199_v41  ;;  %v1215_v42 = vld [vmem:[%s14825_s24 + $0x102] sm:$0xff] }
  0xe0   : > { %12906 = vmatmul.mubr.msk.bf16.gmra.mrb[28].mxu0 %vm279_vm2, %v672_v50  ;;  %v5823_v50 = vpack.c.bf16 %v5805_v48, %v5804_v47  ;;  %v1201_v47 = vld [vmem:[%s14825_s24 + $0x92] sm:$0xff]  ;;  %v1202_v48 = vld [vmem:[%s14825_s24 + $0x9a] sm:$0xff] }
  0xe1   : > { %13085 = vmatmul.mubr.msk.bf16.gmra.mrb[28].mxu1 %vm279_vm2, %v5813_v51  ;;  %866 = vmatprep.mubr.bf16.mxu0 %v14772_v5  ;;  %v1183_v51 = vld [vmem:[%s14825_s24 + $0x2] sm:$0xff] }
  0xe2   : > { %6006 = vmatprep.mubr.bf16.mxu1 %v14772_v5  ;;  %v1219_v55 = vpack.c.bf16 %v1184_v52, %v1183_v51  ;;  %v15273_v51 = vpack.c.bf16 %v1202_v48, %v1201_v47  ;;  %v6356_v47 = vld [vmem:[%s14830_s27 + $0x10a] sm:$0xff] }
  0xe8   : > { %12907 = vmatmul.mubr.msk.bf16.gmra.mrb[32].mxu0 %vm279_vm2, %v673_v56  ;;  %v1857_v56 = vand.u32 %v15007_v14, %v14814_v7  ;;  %v15153_v14 = vpack.c.bf16 %v1186_v59, %v1185_v58  ;;  %v1205_v59 = vld [vmem:[%s14825_s24 + $0xb2] sm:$0xff] }
  0xe9   : > { %13086 = vmatmul.mubr.msk.bf16.gmra.mrb[32].mxu1 %vm279_vm2, %v5814_v57  ;;  %876 = vmatprep.mubr.bf16.mxu0 %v14772_v5  ;;  %v6359_v57 = vpack.c.bf16 %v6324_v54, %v6323_v53  ;;  %v1203_v53 = vld [vmem:[%s14825_s24 + $0xa2] sm:$0xff]  ;;  %v1204_v54 = vld [vmem:[%s14825_s24 + $0xaa] sm:$0xff] }
  0xea   : > { %6016 = vmatprep.mubr.bf16.mxu1 %v14772_v5 }
  0xf0   : > { %12908 = vmatmul.mubr.msk.bf16.gmra.mrb[36].mxu0 %vm279_vm2, %v674_v62  ;;  %v15155_v62 = vpack.c.bf16 %v6326_v61, %v6325_v60  ;;  %v1206_v60 = vld [vmem:[%s14825_s24 + $0xba] sm:$0xff]  ;;  %v6345_v61 = vld [vmem:[%s14830_s27 + $0xb2] sm:$0xff] }
  0xf1   : > { %13087 = vmatmul.mubr.msk.bf16.gmra.mrb[36].mxu1 %vm279_vm2, %v5815_v63  ;;  %886 = vmatprep.mubr.bf16.mxu0 %v14772_v5  ;;  %v1187_v63 = vld [vmem:[%s14825_s24 + $0x22] sm:$0xff] }
  0xf2   : > { %6026 = vmatprep.mubr.bf16.mxu1 %v14772_v5 }
  0xf8   : > { %12909 = vmatmul.mubr.msk.bf16.gmra.mrb[40].mxu0 %vm279_vm2, %v675_v4  ;;  %v2355_v4 = vcombine.high %v15167_v1, %v15167_v1 }
  0xf9   : > { %13088 = vmatmul.mubr.msk.bf16.gmra.mrb[40].mxu1 %vm279_vm2, %v5816_v6  ;;  %896 = vmatprep.mubr.bf16.mxu0 %v14772_v5  ;;  %v15174_v6 = vpack.c.bf16 %v1188_v0, %v1187_v63  ;;  %v6346_v63 = vld [vmem:[%s14830_s27 + $0xba] sm:$0xff]  ;;  %v15301_v0 = vpack.c.bf16 %v1206_v60, %v1205_v59  ;;  %v2411_v60 = vand.u32 %v15167_v1, %v14814_v7 }
  0xfa   : > { %6036 = vmatprep.mubr.bf16.mxu1 %v14772_v5  ;;  %v2414_v8 = vand.u32 %v2355_v4, %v14814_v7  ;;  %v15303_v2 = vpack.c.bf16 %v6346_v63, %v6345_v61  ;;  %v1208_v4 = vld [vmem:[%s14825_s24 + $0xca] sm:$0xff]  ;;  %v2295_v63 = vld [vmem:[%s14825_s24 + $0x33] sm:$0xff] }
  0xfb   : > { %v15315_v36 = vpack.c.bf16 %v1208_v4, %v1207_v3  ;;  %v7433_v3 = vld [vmem:[%s14830_s27 + $0x33] sm:$0xff]  ;;  %v7434_v4 = vld [vmem:[%s14830_s27 + $0x3b] sm:$0xff] }
 0x100   : > { %12910 = vmatmul.mubr.msk.bf16.gmra.mrb[44].mxu0 %vm279_vm2, %v676_v11  ;;  %v6329_v11 = vld [vmem:[%s14830_s27 + $0x32] sm:$0xff] }
 0x101   : > { %13089 = vmatmul.mubr.msk.bf16.gmra.mrb[44].mxu1 %vm279_vm2, %v5817_v12  ;;  %906 = vmatprep.mubr.bf16.mxu0 %v14772_v5  ;;  %v6330_v12 = vld [vmem:[%s14830_s27 + $0x3a] sm:$0xff] }
 0x102   : > { %6046 = vmatprep.mubr.bf16.mxu1 %v14772_v5  ;;  %v15191_v15 = vpack.c.bf16 %v6330_v12, %v6329_v11  ;;  %v1209_v12 = vld [vmem:[%s14825_s24 + $0xd2] sm:$0xff] }
 0x108   : > { %12911 = vmatmul.mubr.msk.bf16.gmra.mrb[48].mxu0 %vm279_vm2, %v677_v18  ;;  %v6331_v18 = vld [vmem:[%s14830_s27 + $0x42] sm:$0xff] }
 0x109   : > { %13090 = vmatmul.mubr.msk.bf16.gmra.mrb[48].mxu1 %vm279_vm2, %v5818_v19  ;;  %916 = vmatprep.mubr.bf16.mxu0 %v14772_v5  ;;  %v6332_v19 = vld [vmem:[%s14830_s27 + $0x4a] sm:$0xff] }
 0x10a   : > { %6056 = vmatprep.mubr.bf16.mxu1 %v14772_v5  ;;  %v15205_v21 = vpack.c.bf16 %v6332_v19, %v6331_v18  ;;  %v6350_v18 = vld [vmem:[%s14830_s27 + $0xda] sm:$0xff]  ;;  %v15329_v19 = vpack.c.bf16 %v1210_v16, %v1209_v12  ;;  %v2297_v12 = vld [vmem:[%s14825_s24 + $0x43] sm:$0xff]  ;;  %v2298_v16 = vld [vmem:[%s14825_s24 + $0x4b] sm:$0xff] }
 0x10b   : > { %v15331_v22 = vpack.c.bf16 %v6350_v18, %v6349_v17  ;;  %v7435_v17 = vld [vmem:[%s14830_s27 + $0x43] sm:$0xff]  ;;  %v7436_v18 = vld [vmem:[%s14830_s27 + $0x4b] sm:$0xff] }
 0x110   : > { %12912 = vmatmul.mubr.msk.bf16.gmra.mrb[52].mxu0 %vm279_vm2, %v678_v24  ;;  %v6333_v24 = vld [vmem:[%s14830_s27 + $0x52] sm:$0xff] }
 0x111   : > { %13091 = vmatmul.mubr.msk.bf16.gmra.mrb[52].mxu1 %vm279_vm2, %v5819_v25  ;;  %926 = vmatprep.mubr.bf16.mxu0 %v14772_v5  ;;  %v6334_v25 = vld [vmem:[%s14830_s27 + $0x5a] sm:$0xff] }
 0x112   : > { %6066 = vmatprep.mubr.bf16.mxu1 %v14772_v5  ;;  %v15219_v27 = vpack.c.bf16 %v6334_v25, %v6333_v24  ;;  %v1212_v24 = vld [vmem:[%s14825_s24 + $0xea] sm:$0xff]  ;;  %v6351_v25 = vld [vmem:[%s14830_s27 + $0xe2] sm:$0xff] }
 0x113   : > { %v15343_v29 = vpack.c.bf16 %v1212_v24, %v1211_v23  ;;  %v2299_v23 = vld [vmem:[%s14825_s24 + $0x53] sm:$0xff]  ;;  %v2300_v24 = vld [vmem:[%s14825_s24 + $0x5b] sm:$0xff] }
 0x118   : > { %12913 = vmatmul.mubr.msk.bf16.gmra.mrb[56].mxu0 %vm279_vm2, %v679_v30  ;;  %v6335_v30 = vld [vmem:[%s14830_s27 + $0x62] sm:$0xff] }
 0x119   : > { %13092 = vmatmul.mubr.msk.bf16.gmra.mrb[56].mxu1 %vm279_vm2, %v5820_v31  ;;  %936 = vmatprep.mubr.bf16.mxu0 %v14772_v5  ;;  %v6336_v31 = vld [vmem:[%s14830_s27 + $0x6a] sm:$0xff] }
 0x11a   : > { %6076 = vmatprep.mubr.bf16.mxu1 %v14772_v5  ;;  %v15233_v33 = vpack.c.bf16 %v6336_v31, %v6335_v30  ;;  %v15345_v30 = vpack.c.bf16 %v6352_v28, %v6351_v25  ;;  %v1213_v31 = vld [vmem:[%s14825_s24 + $0xf2] sm:$0xff]  ;;  %v7438_v28 = vld [vmem:[%s14830_s27 + $0x5b] sm:$0xff] }
 0x11b   : > { %v7437_v25 = vld [vmem:[%s14830_s27 + $0x53] sm:$0xff] }
 0x120   : > { %12914 = vmatmul.mubr.msk.bf16.gmra.mrb[60].mxu0 %vm279_vm2, %v680_v37  ;;  %v6337_v37 = vld [vmem:[%s14830_s27 + $0x72] sm:$0xff] }
 0x121   : > { %13093 = vmatmul.mubr.msk.bf16.gmra.mrb[60].mxu1 %vm279_vm2, %v5821_v38  ;;  %946 = vmatprep.mubr.bf16.mxu0 %v14772_v5  ;;  %v6338_v38 = vld [vmem:[%s14830_s27 + $0x7a] sm:$0xff] }
 0x122   : > { %6086 = vmatprep.mubr.bf16.mxu1 %v14772_v5  ;;  %v15247_v40 = vpack.c.bf16 %v6338_v38, %v6337_v37  ;;  %v6354_v37 = vld [vmem:[%s14830_s27 + $0xfa] sm:$0xff]  ;;  %v15357_v38 = vpack.c.bf16 %v1214_v34, %v1213_v31  ;;  %v2301_v31 = vld [vmem:[%s14825_s24 + $0x63] sm:$0xff]  ;;  %v2302_v34 = vld [vmem:[%s14825_s24 + $0x6b] sm:$0xff] }
 0x123   : > { %v15359_v41 = vpack.c.bf16 %v6354_v37, %v6353_v35  ;;  %v7439_v35 = vld [vmem:[%s14830_s27 + $0x63] sm:$0xff]  ;;  %v7440_v37 = vld [vmem:[%s14830_s27 + $0x6b] sm:$0xff] }
 0x128   : > { %12915 = vmatmul.mubr.msk.bf16.gmra.mrb[64].mxu0 %vm279_vm2, %v681_v43  ;;  %v6339_v43 = vld [vmem:[%s14830_s27 + $0x82] sm:$0xff] }
 0x129   : > { %13094 = vmatmul.mubr.msk.bf16.gmra.mrb[64].mxu1 %vm279_vm2, %v5822_v44  ;;  %956 = vmatprep.mubr.bf16.mxu0 %v14772_v5  ;;  %v6340_v44 = vld [vmem:[%s14830_s27 + $0x8a] sm:$0xff] }
 0x12a   : > { %6096 = vmatprep.mubr.bf16.mxu1 %v14772_v5  ;;  %v15261_v46 = vpack.c.bf16 %v6340_v44, %v6339_v43  ;;  %v1216_v43 = vld [vmem:[%s14825_s24 + $0x10a] sm:$0xff]  ;;  %v6355_v44 = vld [vmem:[%s14830_s27 + $0x102] sm:$0xff] }
 0x12b   : > { %v15371_v48 = vpack.c.bf16 %v1216_v43, %v1215_v42  ;;  %v2303_v42 = vld [vmem:[%s14825_s24 + $0x73] sm:$0xff]  ;;  %v2304_v43 = vld [vmem:[%s14825_s24 + $0x7b] sm:$0xff] }
 0x130   : > { %12916 = vmatmul.mubr.msk.bf16.gmra.mrb[68].mxu0 %vm279_vm2, %v682_v49  ;;  %v6341_v49 = vld [vmem:[%s14830_s27 + $0x92] sm:$0xff] }
 0x131   : > { %13095 = vmatmul.mubr.msk.bf16.gmra.mrb[68].mxu1 %vm279_vm2, %v5823_v50  ;;  %1340 = vmatprep.mubr.bf16.mxu0 %v14772_v5  ;;  %v6342_v50 = vld [vmem:[%s14830_s27 + $0x9a] sm:$0xff] }
 0x132   : > { %6479 = vmatprep.mubr.bf16.mxu1 %v14772_v5  ;;  %v15275_v52 = vpack.c.bf16 %v6342_v50, %v6341_v49  ;;  %v15373_v49 = vpack.c.bf16 %v6356_v47, %v6355_v44  ;;  %v1217_v50 = vld [vmem:[%s14825_s24 + $0x112] sm:$0xff]  ;;  %v7442_v47 = vld [vmem:[%s14830_s27 + $0x7b] sm:$0xff] }
 0x133   : > { %v7441_v44 = vld [vmem:[%s14830_s27 + $0x73] sm:$0xff] }
 0x138   : > { %12919 = vmatmul.mubr.msk.bf16.vlgmr.msra.gmra.mrb[0].mxu0 %vm279_vm2, %v1219_v55  ;;  %v6343_v55 = vld [vmem:[%s14830_s27 + $0xa2] sm:$0xff] }
 0x139   : > { %1863 = vmatpush1.bf16.msra.mxu0 %v1857_v56  ;;  %13098 = vmatmul.mubr.msk.bf16.vlgmr.msra.gmra.mrb[0].mxu1 %vm279_vm2, %v6359_v57  ;;  %v15287_v57 = vpack.c.bf16 %v1204_v54, %v1203_v53  ;;  %v1218_v53 = vld [vmem:[%s14825_s24 + $0x11a] sm:$0xff]  ;;  %v6357_v54 = vld [vmem:[%s14830_s27 + $0x112] sm:$0xff] }
 0x13a   : > { %7001 = vmatpush1.bf16.msra.mxu1 %v1857_v56  ;;  %1350 = vmatprep.mubr.bf16.mxu0 %v14772_v5  ;;  %v6344_v56 = vld [vmem:[%s14830_s27 + $0xaa] sm:$0xff] }
 0x13b   : > { %6489 = vmatprep.mubr.bf16.mxu1 %v14772_v5  ;;  %2416 = vmatprep.subr.bf16.mxu0 %v2414_v8  ;;  %v15289_v58 = vpack.c.bf16 %v6344_v56, %v6343_v55  ;;  %v6358_v55 = vld [vmem:[%s14830_s27 + $0x11a] sm:$0xff]  ;;  %v15385_v56 = vpack.c.bf16 %v1218_v53, %v1217_v50  ;;  %v2305_v50 = vld [vmem:[%s14825_s24 + $0x83] sm:$0xff]  ;;  %v2306_v53 = vld [vmem:[%s14825_s24 + $0x8b] sm:$0xff] }
 0x13c   : > { %7553 = vmatprep.subr.bf16.mxu1 %v2414_v8  ;;  %v6347_v8 = vld [vmem:[%s14830_s27 + $0xc2] sm:$0xff]  ;;  %v15387_v59 = vpack.c.bf16 %v6358_v55, %v6357_v54  ;;  %v7444_v55 = vld [vmem:[%s14830_s27 + $0x8b] sm:$0xff] }
 0x13d   : > { %v15317_v11 = vpack.c.bf16 %v6348_v10, %v6347_v8  ;;  %v7443_v54 = vld [vmem:[%s14830_s27 + $0x83] sm:$0xff] }
 0x140   : > { %12920 = vmatmul.mubr.msk.bf16.gmra.mrb[4].mxu0 %vm279_vm2, %v15153_v14 }
 0x141   : > { %13099 = vmatmul.mubr.msk.bf16.gmra.mrb[4].mxu1 %vm279_vm2, %v15155_v62  ;;  %1360 = vmatprep.mubr.bf16.mxu0 %v14772_v5 }
 0x142   : > { %6499 = vmatprep.mubr.bf16.mxu1 %v14772_v5 }
 0x148   : > { %12921 = vmatmul.mubr.msk.bf16.gmra.mrb[8].mxu0 %vm279_vm2, %v15174_v6 }
 0x149   : > { %13100 = vmatmul.mubr.msk.bf16.gmra.mrb[8].mxu1 %vm279_vm2, %v15177_v9  ;;  %1370 = vmatprep.mubr.bf16.mxu0 %v14772_v5 }
 0x14a   : > { %6509 = vmatprep.mubr.bf16.mxu1 %v14772_v5 }
 0x150   : > { %12922 = vmatmul.mubr.msk.bf16.gmra.mrb[12].mxu0 %vm279_vm2, %v15189_v13 }
 0x151   : > { %13101 = vmatmul.mubr.msk.bf16.gmra.mrb[12].mxu1 %vm279_vm2, %v15191_v15  ;;  %1380 = vmatprep.mubr.bf16.mxu0 %v14772_v5 }
 0x152   : > { %6519 = vmatprep.mubr.bf16.mxu1 %v14772_v5 }
 0x158   : > { %12923 = vmatmul.mubr.msk.bf16.gmra.mrb[16].mxu0 %vm279_vm2, %v15203_v20 }
 0x159   : > { %13102 = vmatmul.mubr.msk.bf16.gmra.mrb[16].mxu1 %vm279_vm2, %v15205_v21  ;;  %1390 = vmatprep.mubr.bf16.mxu0 %v14772_v5 }
 0x15a   : > { %6529 = vmatprep.mubr.bf16.mxu1 %v14772_v5 }
 0x160   : > { %12924 = vmatmul.mubr.msk.bf16.gmra.mrb[20].mxu0 %vm279_vm2, %v15217_v26 }
 0x161   : > { %13103 = vmatmul.mubr.msk.bf16.gmra.mrb[20].mxu1 %vm279_vm2, %v15219_v27  ;;  %1400 = vmatprep.mubr.bf16.mxu0 %v14772_v5 }
 0x162   : > { %6539 = vmatprep.mubr.bf16.mxu1 %v14772_v5 }
 0x168   : > { %12925 = vmatmul.mubr.msk.bf16.gmra.mrb[24].mxu0 %vm279_vm2, %v15231_v32 }
 0x169   : > { %13104 = vmatmul.mubr.msk.bf16.gmra.mrb[24].mxu1 %vm279_vm2, %v15233_v33  ;;  %1410 = vmatprep.mubr.bf16.mxu0 %v14772_v5 }
 0x16a   : > { %6549 = vmatprep.mubr.bf16.mxu1 %v14772_v5 }
 0x170   : > { %12926 = vmatmul.mubr.msk.bf16.gmra.mrb[28].mxu0 %vm279_vm2, %v15245_v39 }
 0x171   : > { %13105 = vmatmul.mubr.msk.bf16.gmra.mrb[28].mxu1 %vm279_vm2, %v15247_v40  ;;  %1420 = vmatprep.mubr.bf16.mxu0 %v14772_v5 }
 0x172   : > { %6559 = vmatprep.mubr.bf16.mxu1 %v14772_v5 }
 0x178   : > { %12927 = vmatmul.mubr.msk.bf16.gmra.mrb[32].mxu0 %vm279_vm2, %v15259_v45 }
 0x179   : > { %13106 = vmatmul.mubr.msk.bf16.gmra.mrb[32].mxu1 %vm279_vm2, %v15261_v46  ;;  %1430 = vmatprep.mubr.bf16.mxu0 %v14772_v5 }
 0x17a   : > { %6569 = vmatprep.mubr.bf16.mxu1 %v14772_v5 }
 0x180   : > { %12928 = vmatmul.mubr.msk.bf16.gmra.mrb[36].mxu0 %vm279_vm2, %v15273_v51 }
 0x181   : > { %13107 = vmatmul.mubr.msk.bf16.gmra.mrb[36].mxu1 %vm279_vm2, %v15275_v52  ;;  %1440 = vmatprep.mubr.bf16.mxu0 %v14772_v5 }
 0x182   : > { %6579 = vmatprep.mubr.bf16.mxu1 %v14772_v5 }
 0x188   : > { %12929 = vmatmul.mubr.msk.bf16.gmra.mrb[40].mxu0 %vm279_vm2, %v15287_v57 }
 0x189   : > { %13108 = vmatmul.mubr.msk.bf16.gmra.mrb[40].mxu1 %vm279_vm2, %v15289_v58  ;;  %1450 = vmatprep.mubr.bf16.mxu0 %v14772_v5 }
 0x18a   : > { %6589 = vmatprep.mubr.bf16.mxu1 %v14772_v5 }
 0x190   : > { %12930 = vmatmul.mubr.msk.bf16.gmra.mrb[44].mxu0 %vm279_vm2, %v15301_v0 }
 0x191   : > { %13109 = vmatmul.mubr.msk.bf16.gmra.mrb[44].mxu1 %vm279_vm2, %v15303_v2  ;;  %1460 = vmatprep.mubr.bf16.mxu0 %v14772_v5 }
 0x192   : > { %6599 = vmatprep.mubr.bf16.mxu1 %v14772_v5 }
 0x198   : > { %12931 = vmatmul.mubr.msk.bf16.gmra.mrb[48].mxu0 %vm279_vm2, %v15315_v36 }
 0x199   : > { %13110 = vmatmul.mubr.msk.bf16.gmra.mrb[48].mxu1 %vm279_vm2, %v15317_v11  ;;  %1470 = vmatprep.mubr.bf16.mxu0 %v14772_v5 }
 0x19a   : > { %6609 = vmatprep.mubr.bf16.mxu1 %v14772_v5 }
 0x1a0   : > { %12932 = vmatmul.mubr.msk.bf16.gmra.mrb[52].mxu0 %vm279_vm2, %v15329_v19 }
 0x1a1   : > { %13111 = vmatmul.mubr.msk.bf16.gmra.mrb[52].mxu1 %vm279_vm2, %v15331_v22  ;;  %1480 = vmatprep.mubr.bf16.mxu0 %v14772_v5 }
 0x1a2   : > { %6619 = vmatprep.mubr.bf16.mxu1 %v14772_v5 }
 0x1a8   : > { %12933 = vmatmul.mubr.msk.bf16.gmra.mrb[56].mxu0 %vm279_vm2, %v15343_v29 }
 0x1a9   : > { %13112 = vmatmul.mubr.msk.bf16.gmra.mrb[56].mxu1 %vm279_vm2, %v15345_v30  ;;  %1490 = vmatprep.mubr.bf16.mxu0 %v14772_v5 }
 0x1aa   : > { %6629 = vmatprep.mubr.bf16.mxu1 %v14772_v5 }
 0x1b0   : > { %12934 = vmatmul.mubr.msk.bf16.gmra.mrb[60].mxu0 %vm279_vm2, %v15357_v38 }
 0x1b1   : > { %13113 = vmatmul.mubr.msk.bf16.gmra.mrb[60].mxu1 %vm279_vm2, %v15359_v41  ;;  %1500 = vmatprep.mubr.bf16.mxu0 %v14772_v5 }
 0x1b2   : > { %6639 = vmatprep.mubr.bf16.mxu1 %v14772_v5 }
 0x1b8   : > { %12935 = vmatmul.mubr.msk.bf16.gmra.mrb[64].mxu0 %vm279_vm2, %v15371_v48 }
 0x1b9   : > { %13114 = vmatmul.mubr.msk.bf16.gmra.mrb[64].mxu1 %vm279_vm2, %v15373_v49  ;;  %1510 = vmatprep.mubr.bf16.mxu0 %v14772_v5 }
 0x1ba   : > { %6649 = vmatprep.mubr.bf16.mxu1 %v14772_v5 }
 0x1c0   : > { %12936 = vmatmul.mubr.msk.bf16.gmra.mrb[68].mxu0 %vm279_vm2, %v15385_v56 }
 0x1c1   : > { %13115 = vmatmul.mubr.msk.bf16.gmra.mrb[68].mxu1 %vm279_vm2, %v15387_v59  ;;  %1894 = vmatprep.mubr.bf16.mxu0 %v14772_v5 }
 0x1c2   : > { %7032 = vmatprep.mubr.bf16.mxu1 %v14772_v5 }
 0x1c8   : > { %12939 = vmatmul.mubr.msk.bf16.vlgmr.msra.gmra.mrb[0].mxu0 %vm279_vm2, %v15153_v14  ;;  %v15411_v14 = vld.sshfl [vmem:[%s19123_s2 + $0x14] sm:$0x33 pattern:$0x76325410] }
 0x1c9   : > { %2417 = vmatpush1.bf16.msra.mxu0 %v2411_v60  ;;  %13118 = vmatmul.mubr.msk.bf16.vlgmr.msra.gmra.mrb[0].mxu1 %vm279_vm2, %v15155_v62  ;;  %v2909_v62 = vcombine.high %v15411_v14, %v15411_v14 }
 0x1ca   : > { %7554 = vmatpush1.bf16.msra.mxu1 %v2411_v60  ;;  %1904 = vmatprep.mubr.bf16.mxu0 %v14772_v5  ;;  %v2307_v60 = vld [vmem:[%s14825_s24 + $0x93] sm:$0xff] }
 0x1cb   : > { %7042 = vmatprep.mubr.bf16.mxu1 %v14772_v5  ;;  %v2968_v1 = vand.u32 %v2909_v62, %v14814_v7  ;;  %v7445_v62 = vld [vmem:[%s14830_s27 + $0x93] sm:$0xff] }
 0x1cd   : > { %2970 = vmatprep.subr.bf16.mxu0 %v2968_v1  ;;  %8106 = vmatprep.subr.bf16.mxu1 %v2968_v1  ;;  %v7446_v1 = vld [vmem:[%s14830_s27 + $0x9b] sm:$0xff] }
 0x1d0   : > { %12940 = vmatmul.mubr.msk.bf16.gmra.mrb[4].mxu0 %vm279_vm2, %v15174_v6  ;;  %v1771_v6 = vld [vmem:[%s14825_s24 + $0x122] sm:$0xff] }
 0x1d1   : > { %13119 = vmatmul.mubr.msk.bf16.gmra.mrb[4].mxu1 %vm279_vm2, %v15177_v9  ;;  %1914 = vmatprep.mubr.bf16.mxu0 %v14772_v5  ;;  %v1772_v9 = vld [vmem:[%s14825_s24 + $0x12a] sm:$0xff] }
 0x1d2   : > { %7052 = vmatprep.mubr.bf16.mxu1 %v14772_v5 }
 0x1d8   : > { %12941 = vmatmul.mubr.msk.bf16.gmra.mrb[8].mxu0 %vm279_vm2, %v15189_v13  ;;  %v6910_v13 = vld [vmem:[%s14830_s27 + $0x122] sm:$0xff] }
 0x1d9   : > { %13120 = vmatmul.mubr.msk.bf16.gmra.mrb[8].mxu1 %vm279_vm2, %v15191_v15  ;;  %1924 = vmatprep.mubr.bf16.mxu0 %v14772_v5  ;;  %v6911_v15 = vld [vmem:[%s14830_s27 + $0x12a] sm:$0xff] }
 0x1da   : > { %7062 = vmatprep.mubr.bf16.mxu1 %v14772_v5 }
 0x1e0   : > { %12942 = vmatmul.mubr.msk.bf16.gmra.mrb[12].mxu0 %vm279_vm2, %v15203_v20  ;;  %v1790_v20 = vpack.c.bf16 %v1772_v9, %v1771_v6  ;;  %v7473_v9 = vpack.c.bf16 %v7446_v1, %v7445_v62  ;;  %v7983_v62 = vld [vmem:[%s14830_s27 + $0x1c] sm:$0xff] }
 0x1e1   : > { %13121 = vmatmul.mubr.msk.bf16.gmra.mrb[12].mxu1 %vm279_vm2, %v15205_v21  ;;  %1934 = vmatprep.mubr.bf16.mxu0 %v14772_v5  ;;  %v6929_v21 = vpack.c.bf16 %v6911_v15, %v6910_v13  ;;  %v2309_v13 = vld [vmem:[%s14825_s24 + $0xa3] sm:$0xff]  ;;  %v2310_v15 = vld [vmem:[%s14825_s24 + $0xab] sm:$0xff] }
 0x1e2   : > { %7072 = vmatprep.mubr.bf16.mxu1 %v14772_v5 }
 0x1e8   : > { %12943 = vmatmul.mubr.msk.bf16.gmra.mrb[16].mxu0 %vm279_vm2, %v15217_v26  ;;  %v2291_v26 = vld [vmem:[%s14825_s24 + $0x13] sm:$0xff] }
 0x1e9   : > { %13122 = vmatmul.mubr.msk.bf16.gmra.mrb[16].mxu1 %vm279_vm2, %v15219_v27  ;;  %1944 = vmatprep.mubr.bf16.mxu0 %v14772_v5  ;;  %v2292_v27 = vld [vmem:[%s14825_s24 + $0x1b] sm:$0xff] }
 0x1ea   : > { %7082 = vmatprep.mubr.bf16.mxu1 %v14772_v5 }
 0x1f0   : > { %12944 = vmatmul.mubr.msk.bf16.gmra.mrb[20].mxu0 %vm279_vm2, %v15231_v32  ;;  %v7429_v32 = vld [vmem:[%s14830_s27 + $0x13] sm:$0xff] }
 0x1f1   : > { %13123 = vmatmul.mubr.msk.bf16.gmra.mrb[20].mxu1 %vm279_vm2, %v15233_v33  ;;  %1954 = vmatprep.mubr.bf16.mxu0 %v14772_v5  ;;  %v7430_v33 = vld [vmem:[%s14830_s27 + $0x1b] sm:$0xff] }
 0x1f2   : > { %7092 = vmatprep.mubr.bf16.mxu1 %v14772_v5 }
 0x1f8   : > { %12945 = vmatmul.mubr.msk.bf16.gmra.mrb[24].mxu0 %vm279_vm2, %v15245_v39  ;;  %v2327_v39 = vpack.c.bf16 %v2292_v27, %v2291_v26  ;;  %v2336_v26 = vpack.c.bf16 %v2310_v15, %v2309_v13  ;;  %v2847_v13 = vld [vmem:[%s14825_s24 + $0x24] sm:$0xff]  ;;  %v2848_v15 = vld [vmem:[%s14825_s24 + $0x2c] sm:$0xff] }
 0x1f9   : > { %13124 = vmatmul.mubr.msk.bf16.gmra.mrb[24].mxu1 %vm279_vm2, %v15247_v40  ;;  %1964 = vmatprep.mubr.bf16.mxu0 %v14772_v5  ;;  %v2965_v40 = vand.u32 %v15411_v14, %v14814_v7  ;;  %v2308_v14 = vld [vmem:[%s14825_s24 + $0x9b] sm:$0xff] }
 0x1fa   : > { %7102 = vmatprep.mubr.bf16.mxu1 %v14772_v5  ;;  %v2335_v6 = vpack.c.bf16 %v2308_v14, %v2307_v60  ;;  %v2846_v60 = vld [vmem:[%s14825_s24 + $0x1c] sm:$0xff]  ;;  %v7982_v14 = vld [vmem:[%s14830_s27 + $0x14] sm:$0xff] }
 0x200   : > { %12946 = vmatmul.mubr.msk.bf16.gmra.mrb[28].mxu0 %vm279_vm2, %v15259_v45  ;;  %v7465_v45 = vpack.c.bf16 %v7430_v33, %v7429_v32  ;;  %v2311_v32 = vld [vmem:[%s14825_s24 + $0xb3] sm:$0xff]  ;;  %v2312_v33 = vld [vmem:[%s14825_s24 + $0xbb] sm:$0xff] }
 0x201   : > { %13125 = vmatmul.mubr.msk.bf16.gmra.mrb[28].mxu1 %vm279_vm2, %v15261_v46  ;;  %1974 = vmatprep.mubr.bf16.mxu0 %v14772_v5  ;;  %v2293_v46 = vld [vmem:[%s14825_s24 + $0x23] sm:$0xff] }
 0x202   : > { %7112 = vmatprep.mubr.bf16.mxu1 %v14772_v5 }
 0x208   : > { %12947 = vmatmul.mubr.msk.bf16.gmra.mrb[32].mxu0 %vm279_vm2, %v15273_v51  ;;  %v2294_v51 = vld [vmem:[%s14825_s24 + $0x2b] sm:$0xff] }
 0x209   : > { %13126 = vmatmul.mubr.msk.bf16.gmra.mrb[32].mxu1 %vm279_vm2, %v15275_v52  ;;  %1984 = vmatprep.mubr.bf16.mxu0 %v14772_v5  ;;  %v7431_v52 = vld [vmem:[%s14830_s27 + $0x23] sm:$0xff] }
 0x20a   : > { %7122 = vmatprep.mubr.bf16.mxu1 %v14772_v5 }
 0x210   : > { %12948 = vmatmul.mubr.msk.bf16.gmra.mrb[36].mxu0 %vm279_vm2, %v15287_v57  ;;  %v7432_v57 = vld [vmem:[%s14830_s27 + $0x2b] sm:$0xff] }
 0x211   : > { %13127 = vmatmul.mubr.msk.bf16.gmra.mrb[36].mxu1 %vm279_vm2, %v15289_v58  ;;  %1994 = vmatprep.mubr.bf16.mxu0 %v14772_v5  ;;  %v2328_v58 = vpack.c.bf16 %v2294_v51, %v2293_v46  ;;  %v7466_v61 = vpack.c.bf16 %v7432_v57, %v7431_v52  ;;  %v2313_v51 = vld [vmem:[%s14825_s24 + $0xc3] sm:$0xff]  ;;  %v2314_v52 = vld [vmem:[%s14825_s24 + $0xcb] sm:$0xff] }
 0x212   : > { %7132 = vmatprep.mubr.bf16.mxu1 %v14772_v5  ;;  %v7451_v57 = vld [vmem:[%s14830_s27 + $0xc3] sm:$0xff] }
 0x218   : > { %12949 = vmatmul.mubr.msk.bf16.gmra.mrb[40].mxu0 %vm279_vm2, %v15301_v0  ;;  %v2296_v0 = vld [vmem:[%s14825_s24 + $0x3b] sm:$0xff] }
 0x219   : > { %13128 = vmatmul.mubr.msk.bf16.gmra.mrb[40].mxu1 %vm279_vm2, %v15303_v2  ;;  %2004 = vmatprep.mubr.bf16.mxu0 %v14772_v5  ;;  %v15537_v2 = vld.sshfl [vmem:[%s19123_s2 + $0x18] sm:$0x33 pattern:$0x76325410]  ;;  %v2329_v10 = vpack.c.bf16 %v2296_v0, %v2295_v63 }
 0x21a   : > { %7142 = vmatprep.mubr.bf16.mxu1 %v14772_v5  ;;  %v3463_v8 = vcombine.high %v15537_v2, %v15537_v2  ;;  %v2315_v0 = vld [vmem:[%s14825_s24 + $0xd3] sm:$0xff] }
 0x220   : > { %12950 = vmatmul.mubr.msk.bf16.gmra.mrb[44].mxu0 %vm279_vm2, %v15315_v36  ;;  %v3522_v36 = vand.u32 %v3463_v8, %v14814_v7  ;;  %v7454_v8 = vld [vmem:[%s14830_s27 + $0xdb] sm:$0xff] }
 0x221   : > { %13129 = vmatmul.mubr.msk.bf16.gmra.mrb[44].mxu1 %vm279_vm2, %v15317_v11  ;;  %2014 = vmatprep.mubr.bf16.mxu0 %v14772_v5  ;;  %v7467_v11 = vpack.c.bf16 %v7434_v4, %v7433_v3  ;;  %v2316_v3 = vld [vmem:[%s14825_s24 + $0xdb] sm:$0xff]  ;;  %v7453_v4 = vld [vmem:[%s14830_s27 + $0xd3] sm:$0xff] }
 0x222   : > { %7152 = vmatprep.mubr.bf16.mxu1 %v14772_v5 }
 0x228   : > { %12951 = vmatmul.mubr.msk.bf16.gmra.mrb[48].mxu0 %vm279_vm2, %v15329_v19  ;;  %v2330_v19 = vpack.c.bf16 %v2298_v16, %v2297_v12  ;;  %v2318_v12 = vld [vmem:[%s14825_s24 + $0xeb] sm:$0xff]  ;;  %v7455_v16 = vld [vmem:[%s14830_s27 + $0xe3] sm:$0xff] }
 0x229   : > { %13130 = vmatmul.mubr.msk.bf16.gmra.mrb[48].mxu1 %vm279_vm2, %v15331_v22  ;;  %2024 = vmatprep.mubr.bf16.mxu0 %v14772_v5  ;;  %v7468_v22 = vpack.c.bf16 %v7436_v18, %v7435_v17  ;;  %v7456_v17 = vld [vmem:[%s14830_s27 + $0xeb] sm:$0xff] }
 0x22a   : > { %7162 = vmatprep.mubr.bf16.mxu1 %v14772_v5 }
 0x230   : > { %12952 = vmatmul.mubr.msk.bf16.gmra.mrb[52].mxu0 %vm279_vm2, %v15343_v29  ;;  %v2331_v29 = vpack.c.bf16 %v2300_v24, %v2299_v23  ;;  %v2320_v23 = vld [vmem:[%s14825_s24 + $0xfb] sm:$0xff]  ;;  %v7457_v24 = vld [vmem:[%s14830_s27 + $0xf3] sm:$0xff] }
 0x231   : > { %13131 = vmatmul.mubr.msk.bf16.gmra.mrb[52].mxu1 %vm279_vm2, %v15345_v30  ;;  %2034 = vmatprep.mubr.bf16.mxu0 %v14772_v5  ;;  %v7469_v30 = vpack.c.bf16 %v7438_v28, %v7437_v25  ;;  %v7458_v25 = vld [vmem:[%s14830_s27 + $0xfb] sm:$0xff] }
 0x232   : > { %7172 = vmatprep.mubr.bf16.mxu1 %v14772_v5 }
 0x238   : > { %12953 = vmatmul.mubr.msk.bf16.gmra.mrb[56].mxu0 %vm279_vm2, %v15357_v38  ;;  %v2332_v38 = vpack.c.bf16 %v2302_v34, %v2301_v31  ;;  %v2322_v31 = vld [vmem:[%s14825_s24 + $0x10b] sm:$0xff]  ;;  %v7459_v34 = vld [vmem:[%s14830_s27 + $0x103] sm:$0xff] }
 0x239   : > { %13132 = vmatmul.mubr.msk.bf16.gmra.mrb[56].mxu1 %vm279_vm2, %v15359_v41  ;;  %2044 = vmatprep.mubr.bf16.mxu0 %v14772_v5  ;;  %v7470_v41 = vpack.c.bf16 %v7440_v37, %v7439_v35  ;;  %v7460_v35 = vld [vmem:[%s14830_s27 + $0x10b] sm:$0xff] }
 0x23a   : > { %7182 = vmatprep.mubr.bf16.mxu1 %v14772_v5 }
 0x240   : > { %12954 = vmatmul.mubr.msk.bf16.gmra.mrb[60].mxu0 %vm279_vm2, %v15371_v48  ;;  %v2333_v48 = vpack.c.bf16 %v2304_v43, %v2303_v42  ;;  %v2324_v42 = vld [vmem:[%s14825_s24 + $0x11b] sm:$0xff]  ;;  %v7461_v43 = vld [vmem:[%s14830_s27 + $0x113] sm:$0xff] }
 0x241   : > { %13133 = vmatmul.mubr.msk.bf16.gmra.mrb[60].mxu1 %vm279_vm2, %v15373_v49  ;;  %2054 = vmatprep.mubr.bf16.mxu0 %v14772_v5  ;;  %v7471_v49 = vpack.c.bf16 %v7442_v47, %v7441_v44  ;;  %v7462_v44 = vld [vmem:[%s14830_s27 + $0x11b] sm:$0xff] }
 0x242   : > { %7192 = vmatprep.mubr.bf16.mxu1 %v14772_v5 }
 0x248   : > { %12955 = vmatmul.mubr.msk.bf16.gmra.mrb[64].mxu0 %vm279_vm2, %v15385_v56  ;;  %v2334_v56 = vpack.c.bf16 %v2306_v53, %v2305_v50  ;;  %v2326_v50 = vld [vmem:[%s14825_s24 + $0x12b] sm:$0xff]  ;;  %v7463_v53 = vld [vmem:[%s14830_s27 + $0x123] sm:$0xff] }
 0x249   : > { %13134 = vmatmul.mubr.msk.bf16.gmra.mrb[64].mxu1 %vm279_vm2, %v15387_v59  ;;  %2064 = vmatprep.mubr.bf16.mxu0 %v14772_v5  ;;  %v7472_v59 = vpack.c.bf16 %v7444_v55, %v7443_v54  ;;  %v7464_v54 = vld [vmem:[%s14830_s27 + $0x12b] sm:$0xff] }
 0x24a   : > { %7202 = vmatprep.mubr.bf16.mxu1 %v14772_v5 }
 0x250   : > { %12956 = vmatmul.mubr.msk.bf16.gmra.mrb[68].mxu0 %vm279_vm2, %v1790_v20  ;;  %v7447_v20 = vld [vmem:[%s14830_s27 + $0xa3] sm:$0xff] }
 0x251   : > { %13135 = vmatmul.mubr.msk.bf16.gmra.mrb[68].mxu1 %vm279_vm2, %v6929_v21  ;;  %2448 = vmatprep.mubr.bf16.mxu0 %v14772_v5  ;;  %v7448_v21 = vld [vmem:[%s14830_s27 + $0xab] sm:$0xff] }
 0x252   : > { %7585 = vmatprep.mubr.bf16.mxu1 %v14772_v5  ;;  %v7474_v27 = vpack.c.bf16 %v7448_v21, %v7447_v20  ;;  %v7984_v20 = vld [vmem:[%s14830_s27 + $0x24] sm:$0xff]  ;;  %v7985_v21 = vld [vmem:[%s14830_s27 + $0x2c] sm:$0xff] }
 0x258   : > { %12959 = vmatmul.mubr.msk.bf16.vlgmr.msra.gmra.mrb[0].mxu0 %vm279_vm2, %v2327_v39  ;;  %v7449_v39 = vld [vmem:[%s14830_s27 + $0xb3] sm:$0xff] }
 0x259   : > { %2971 = vmatpush1.bf16.msra.mxu0 %v2965_v40  ;;  %13138 = vmatmul.mubr.msk.bf16.vlgmr.msra.gmra.mrb[0].mxu1 %vm279_vm2, %v7465_v45  ;;  %v2337_v45 = vpack.c.bf16 %v2312_v33, %v2311_v32  ;;  %v2850_v32 = vld [vmem:[%s14825_s24 + $0x3c] sm:$0xff] }
 0x25a   : > { %8107 = vmatpush1.bf16.msra.mxu1 %v2965_v40  ;;  %2458 = vmatprep.mubr.bf16.mxu0 %v14772_v5  ;;  %v7450_v40 = vld [vmem:[%s14830_s27 + $0xbb] sm:$0xff] }
 0x25b   : > { %7595 = vmatprep.mubr.bf16.mxu1 %v14772_v5  ;;  %3524 = vmatprep.subr.bf16.mxu0 %v3522_v36  ;;  %v7475_v46 = vpack.c.bf16 %v7450_v40, %v7449_v39  ;;  %v15697_v33 = vld.sshfl [vmem:[%s19123_s2 + $0x1c] sm:$0x33 pattern:$0x76325410]  ;;  %v7986_v39 = vld [vmem:[%s14830_s27 + $0x34] sm:$0xff] }
 0x25c   : > { %8659 = vmatprep.subr.bf16.mxu1 %v3522_v36  ;;  %v7477_v36 = vpack.c.bf16 %v7454_v8, %v7453_v4  ;;  %v7987_v40 = vld [vmem:[%s14830_s27 + $0x3c] sm:$0xff]  ;;  %v2853_v4 = vld [vmem:[%s14825_s24 + $0x54] sm:$0xff] }
 0x25d   : > { %v2854_v8 = vld [vmem:[%s14825_s24 + $0x5c] sm:$0xff] }
 0x260   : > { %12960 = vmatmul.mubr.msk.bf16.gmra.mrb[4].mxu0 %vm279_vm2, %v2328_v58  ;;  %v7452_v58 = vld [vmem:[%s14830_s27 + $0xcb] sm:$0xff] }
 0x261   : > { %13139 = vmatmul.mubr.msk.bf16.gmra.mrb[4].mxu1 %vm279_vm2, %v7466_v61  ;;  %2468 = vmatprep.mubr.bf16.mxu0 %v14772_v5  ;;  %v2338_v61 = vpack.c.bf16 %v2314_v52, %v2313_v51  ;;  %v7476_v63 = vpack.c.bf16 %v7452_v58, %v7451_v57  ;;  %v15707_v52 = vpack.c.bf16 %v7987_v40, %v7986_v39  ;;  %v2851_v57 = vld [vmem:[%s14825_s24 + $0x44] sm:$0xff]  ;;  %v2852_v58 = vld [vmem:[%s14825_s24 + $0x4c] sm:$0xff]  ;;  %v2869_v40 = vld [vmem:[%s14825_s24 + $0xd4] sm:$0xff] }
 0x262   : > { %7605 = vmatprep.mubr.bf16.mxu1 %v14772_v5 }
 0x268   : > { %12961 = vmatmul.mubr.msk.bf16.gmra.mrb[8].mxu0 %vm279_vm2, %v2329_v10  ;;  %v2339_v10 = vpack.c.bf16 %v2316_v3, %v2315_v0  ;;  %v15719_v0 = vpack.c.bf16 %v2852_v58, %v2851_v57  ;;  %v8007_v57 = vld [vmem:[%s14830_s27 + $0xdc] sm:$0xff] }
 0x269   : > { %13140 = vmatmul.mubr.msk.bf16.gmra.mrb[8].mxu1 %vm279_vm2, %v7467_v11  ;;  %2478 = vmatprep.mubr.bf16.mxu0 %v14772_v5  ;;  %v2317_v11 = vld [vmem:[%s14825_s24 + $0xe3] sm:$0xff] }
 0x26a   : > { %7615 = vmatprep.mubr.bf16.mxu1 %v14772_v5  ;;  %v2340_v18 = vpack.c.bf16 %v2318_v12, %v2317_v11  ;;  %v15733_v11 = vpack.c.bf16 %v2854_v8, %v2853_v4  ;;  %v2872_v4 = vld [vmem:[%s14825_s24 + $0xec] sm:$0xff]  ;;  %v8008_v8 = vld [vmem:[%s14830_s27 + $0xe4] sm:$0xff] }
 0x270   : > { %12962 = vmatmul.mubr.msk.bf16.gmra.mrb[12].mxu0 %vm279_vm2, %v2330_v19  ;;  %v7478_v19 = vpack.c.bf16 %v7456_v17, %v7455_v16  ;;  %v2855_v16 = vld [vmem:[%s14825_s24 + $0x64] sm:$0xff]  ;;  %v2856_v17 = vld [vmem:[%s14825_s24 + $0x6c] sm:$0xff] }
 0x271   : > { %13141 = vmatmul.mubr.msk.bf16.gmra.mrb[12].mxu1 %vm279_vm2, %v7468_v22  ;;  %2488 = vmatprep.mubr.bf16.mxu0 %v14772_v5  ;;  %v2319_v22 = vld [vmem:[%s14825_s24 + $0xf3] sm:$0xff] }
 0x272   : > { %7625 = vmatprep.mubr.bf16.mxu1 %v14772_v5  ;;  %v2341_v28 = vpack.c.bf16 %v2320_v23, %v2319_v22  ;;  %v15747_v22 = vpack.c.bf16 %v2856_v17, %v2855_v16  ;;  %v2873_v17 = vld [vmem:[%s14825_s24 + $0xf4] sm:$0xff] }
 0x278   : > { %12963 = vmatmul.mubr.msk.bf16.gmra.mrb[16].mxu0 %vm279_vm2, %v2331_v29  ;;  %v7479_v29 = vpack.c.bf16 %v7458_v25, %v7457_v24  ;;  %v2857_v24 = vld [vmem:[%s14825_s24 + $0x74] sm:$0xff]  ;;  %v2858_v25 = vld [vmem:[%s14825_s24 + $0x7c] sm:$0xff] }
 0x279   : > { %13142 = vmatmul.mubr.msk.bf16.gmra.mrb[16].mxu1 %vm279_vm2, %v7469_v30  ;;  %2498 = vmatprep.mubr.bf16.mxu0 %v14772_v5  ;;  %v2321_v30 = vld [vmem:[%s14825_s24 + $0x103] sm:$0xff] }
 0x27a   : > { %7635 = vmatprep.mubr.bf16.mxu1 %v14772_v5  ;;  %v2342_v37 = vpack.c.bf16 %v2322_v31, %v2321_v30  ;;  %v15761_v30 = vpack.c.bf16 %v2858_v25, %v2857_v24  ;;  %v8011_v24 = vld [vmem:[%s14830_s27 + $0xfc] sm:$0xff] }
 0x280   : > { %12964 = vmatmul.mubr.msk.bf16.gmra.mrb[20].mxu0 %vm279_vm2, %v2332_v38  ;;  %v7480_v38 = vpack.c.bf16 %v7460_v35, %v7459_v34  ;;  %v2859_v34 = vld [vmem:[%s14825_s24 + $0x84] sm:$0xff]  ;;  %v2860_v35 = vld [vmem:[%s14825_s24 + $0x8c] sm:$0xff] }
 0x281   : > { %13143 = vmatmul.mubr.msk.bf16.gmra.mrb[20].mxu1 %vm279_vm2, %v7470_v41  ;;  %2508 = vmatprep.mubr.bf16.mxu0 %v14772_v5  ;;  %v2323_v41 = vld [vmem:[%s14825_s24 + $0x113] sm:$0xff] }
 0x282   : > { %7645 = vmatprep.mubr.bf16.mxu1 %v14772_v5  ;;  %v2343_v47 = vpack.c.bf16 %v2324_v42, %v2323_v41  ;;  %v15775_v41 = vpack.c.bf16 %v2860_v35, %v2859_v34  ;;  %v2876_v34 = vld [vmem:[%s14825_s24 + $0x10c] sm:$0xff]  ;;  %v8012_v35 = vld [vmem:[%s14830_s27 + $0x104] sm:$0xff] }
 0x288   : > { %12965 = vmatmul.mubr.msk.bf16.gmra.mrb[24].mxu0 %vm279_vm2, %v2333_v48  ;;  %v7481_v48 = vpack.c.bf16 %v7462_v44, %v7461_v43  ;;  %v2861_v43 = vld [vmem:[%s14825_s24 + $0x94] sm:$0xff]  ;;  %v2862_v44 = vld [vmem:[%s14825_s24 + $0x9c] sm:$0xff] }
 0x289   : > { %13144 = vmatmul.mubr.msk.bf16.gmra.mrb[24].mxu1 %vm279_vm2, %v7471_v49  ;;  %2518 = vmatprep.mubr.bf16.mxu0 %v14772_v5  ;;  %v2325_v49 = vld [vmem:[%s14825_s24 + $0x123] sm:$0xff] }
 0x28a   : > { %7655 = vmatprep.mubr.bf16.mxu1 %v14772_v5  ;;  %v2344_v55 = vpack.c.bf16 %v2326_v50, %v2325_v49  ;;  %v15789_v49 = vpack.c.bf16 %v2862_v44, %v2861_v43  ;;  %v2877_v44 = vld [vmem:[%s14825_s24 + $0x114] sm:$0xff] }
 0x290   : > { %12966 = vmatmul.mubr.msk.bf16.gmra.mrb[28].mxu0 %vm279_vm2, %v2334_v56  ;;  %v7482_v56 = vpack.c.bf16 %v7464_v54, %v7463_v53  ;;  %v2863_v53 = vld [vmem:[%s14825_s24 + $0xa4] sm:$0xff]  ;;  %v2864_v54 = vld [vmem:[%s14825_s24 + $0xac] sm:$0xff] }
 0x291   : > { %13145 = vmatmul.mubr.msk.bf16.gmra.mrb[28].mxu1 %vm279_vm2, %v7472_v59  ;;  %2528 = vmatprep.mubr.bf16.mxu0 %v14772_v5  ;;  %v2845_v59 = vld [vmem:[%s14825_s24 + $0x14] sm:$0xff] }
 0x292   : > { %7665 = vmatprep.mubr.bf16.mxu1 %v14772_v5  ;;  %v2881_v1 = vpack.c.bf16 %v2846_v60, %v2845_v59  ;;  %v15803_v59 = vpack.c.bf16 %v2864_v54, %v2863_v53  ;;  %v8015_v53 = vld [vmem:[%s14830_s27 + $0x11c] sm:$0xff] }
 0x298   : > { %12967 = vmatmul.mubr.msk.bf16.gmra.mrb[32].mxu0 %vm279_vm2, %v2335_v6  ;;  %v3519_v6 = vand.u32 %v15537_v2, %v14814_v7  ;;  %v15683_v2 = vpack.c.bf16 %v2848_v15, %v2847_v13  ;;  %v2867_v15 = vld [vmem:[%s14825_s24 + $0xc4] sm:$0xff] }
 0x299   : > { %13146 = vmatmul.mubr.msk.bf16.gmra.mrb[32].mxu1 %vm279_vm2, %v7473_v9  ;;  %2538 = vmatprep.mubr.bf16.mxu0 %v14772_v5  ;;  %v8018_v9 = vpack.c.bf16 %v7983_v62, %v7982_v14  ;;  %v2865_v14 = vld [vmem:[%s14825_s24 + $0xb4] sm:$0xff]  ;;  %v2866_v62 = vld [vmem:[%s14825_s24 + $0xbc] sm:$0xff] }
 0x29a   : > { %7675 = vmatprep.mubr.bf16.mxu1 %v14772_v5 }
 0x2a0   : > { %12968 = vmatmul.mubr.msk.bf16.gmra.mrb[36].mxu0 %vm279_vm2, %v2336_v26  ;;  %v15685_v26 = vpack.c.bf16 %v7985_v21, %v7984_v20  ;;  %v2868_v20 = vld [vmem:[%s14825_s24 + $0xcc] sm:$0xff]  ;;  %v8004_v21 = vld [vmem:[%s14830_s27 + $0xc4] sm:$0xff] }
 0x2a1   : > { %13147 = vmatmul.mubr.msk.bf16.gmra.mrb[36].mxu1 %vm279_vm2, %v7474_v27  ;;  %2548 = vmatprep.mubr.bf16.mxu0 %v14772_v5  ;;  %v2849_v27 = vld [vmem:[%s14825_s24 + $0x34] sm:$0xff] }
 0x2a2   : > { %7685 = vmatprep.mubr.bf16.mxu1 %v14772_v5 }
 0x2a8   : > { %12969 = vmatmul.mubr.msk.bf16.gmra.mrb[40].mxu0 %vm279_vm2, %v2337_v45  ;;  %v4017_v45 = vcombine.high %v15697_v33, %v15697_v33 }
 0x2a9   : > { %13148 = vmatmul.mubr.msk.bf16.gmra.mrb[40].mxu1 %vm279_vm2, %v7475_v46  ;;  %2558 = vmatprep.mubr.bf16.mxu0 %v14772_v5  ;;  %v15704_v46 = vpack.c.bf16 %v2850_v32, %v2849_v27  ;;  %v8005_v27 = vld [vmem:[%s14830_s27 + $0xcc] sm:$0xff]  ;;  %v15831_v32 = vpack.c.bf16 %v2868_v20, %v2867_v15  ;;  %v4073_v20 = vand.u32 %v15697_v33, %v14814_v7 }
 0x2aa   : > { %7695 = vmatprep.mubr.bf16.mxu1 %v14772_v5  ;;  %v4076_v51 = vand.u32 %v4017_v45, %v14814_v7  ;;  %v15833_v39 = vpack.c.bf16 %v8005_v27, %v8004_v21  ;;  %v2870_v45 = vld [vmem:[%s14825_s24 + $0xdc] sm:$0xff]  ;;  %v3957_v21 = vld [vmem:[%s14825_s24 + $0x45] sm:$0xff]  ;;  %v3958_v27 = vld [vmem:[%s14825_s24 + $0x4d] sm:$0xff] }
 0x2ab   : > { %v15845_v58 = vpack.c.bf16 %v2870_v45, %v2869_v40  ;;  %v3991_v40 = vpack.c.bf16 %v3958_v27, %v3957_v21  ;;  %v9113_v21 = vld [vmem:[%s14830_s27 + $0xed] sm:$0xff] }
 0x2b0   : > { %12970 = vmatmul.mubr.msk.bf16.gmra.mrb[44].mxu0 %vm279_vm2, %v2338_v61  ;;  %v7988_v61 = vld [vmem:[%s14830_s27 + $0x44] sm:$0xff] }
 0x2b1   : > { %13149 = vmatmul.mubr.msk.bf16.gmra.mrb[44].mxu1 %vm279_vm2, %v7476_v63  ;;  %2568 = vmatprep.mubr.bf16.mxu0 %v14772_v5  ;;  %v7989_v63 = vld [vmem:[%s14830_s27 + $0x4c] sm:$0xff] }
 0x2b2   : > { %7705 = vmatprep.mubr.bf16.mxu1 %v14772_v5  ;;  %v15721_v3 = vpack.c.bf16 %v7989_v63, %v7988_v61  ;;  %v2871_v63 = vld [vmem:[%s14825_s24 + $0xe4] sm:$0xff] }
 0x2b8   : > { %12971 = vmatmul.mubr.msk.bf16.gmra.mrb[48].mxu0 %vm279_vm2, %v2339_v10  ;;  %v7990_v10 = vld [vmem:[%s14830_s27 + $0x54] sm:$0xff] }
 0x2b9   : > { %13150 = vmatmul.mubr.msk.bf16.gmra.mrb[48].mxu1 %vm279_vm2, %v7477_v36  ;;  %2578 = vmatprep.mubr.bf16.mxu0 %v14772_v5  ;;  %v7991_v36 = vld [vmem:[%s14830_s27 + $0x5c] sm:$0xff] }
 0x2ba   : > { %7715 = vmatprep.mubr.bf16.mxu1 %v14772_v5  ;;  %v15735_v12 = vpack.c.bf16 %v7991_v36, %v7990_v10  ;;  %v8009_v10 = vld [vmem:[%s14830_s27 + $0xec] sm:$0xff]  ;;  %v15859_v36 = vpack.c.bf16 %v2872_v4, %v2871_v63 }
 0x2bb   : > { %v15861_v16 = vpack.c.bf16 %v8009_v10, %v8008_v8  ;;  %v3961_v8 = vld [vmem:[%s14825_s24 + $0x65] sm:$0xff]  ;;  %v3962_v10 = vld [vmem:[%s14825_s24 + $0x6d] sm:$0xff] }
 0x2c0   : > { %12972 = vmatmul.mubr.msk.bf16.gmra.mrb[52].mxu0 %vm279_vm2, %v2340_v18  ;;  %v7992_v18 = vld [vmem:[%s14830_s27 + $0x64] sm:$0xff] }
 0x2c1   : > { %13151 = vmatmul.mubr.msk.bf16.gmra.mrb[52].mxu1 %vm279_vm2, %v7478_v19  ;;  %2588 = vmatprep.mubr.bf16.mxu0 %v14772_v5  ;;  %v7993_v19 = vld [vmem:[%s14830_s27 + $0x6c] sm:$0xff] }
 0x2c2   : > { %7725 = vmatprep.mubr.bf16.mxu1 %v14772_v5  ;;  %v15749_v23 = vpack.c.bf16 %v7993_v19, %v7992_v18  ;;  %v2874_v18 = vld [vmem:[%s14825_s24 + $0xfc] sm:$0xff]  ;;  %v8010_v19 = vld [vmem:[%s14830_s27 + $0xf4] sm:$0xff] }
 0x2c3   : > { %v15873_v25 = vpack.c.bf16 %v2874_v18, %v2873_v17  ;;  %v3993_v17 = vpack.c.bf16 %v3962_v10, %v3961_v8  ;;  %v9117_v8 = vld [vmem:[%s14830_s27 + $0x10d] sm:$0xff] }
 0x2c8   : > { %12973 = vmatmul.mubr.msk.bf16.gmra.mrb[56].mxu0 %vm279_vm2, %v2341_v28  ;;  %v7994_v28 = vld [vmem:[%s14830_s27 + $0x74] sm:$0xff] }
 0x2c9   : > { %13152 = vmatmul.mubr.msk.bf16.gmra.mrb[56].mxu1 %vm279_vm2, %v7479_v29  ;;  %2598 = vmatprep.mubr.bf16.mxu0 %v14772_v5  ;;  %v7995_v29 = vld [vmem:[%s14830_s27 + $0x7c] sm:$0xff] }
 0x2ca   : > { %7735 = vmatprep.mubr.bf16.mxu1 %v14772_v5  ;;  %v15763_v31 = vpack.c.bf16 %v7995_v29, %v7994_v28  ;;  %v15875_v28 = vpack.c.bf16 %v8011_v24, %v8010_v19  ;;  %v2875_v29 = vld [vmem:[%s14825_s24 + $0x104] sm:$0xff]  ;;  %v3963_v19 = vld [vmem:[%s14825_s24 + $0x75] sm:$0xff] }
 0x2cb   : > { %v3964_v24 = vld [vmem:[%s14825_s24 + $0x7d] sm:$0xff] }
 0x2d0   : > { %12974 = vmatmul.mubr.msk.bf16.gmra.mrb[60].mxu0 %vm279_vm2, %v2342_v37  ;;  %v7996_v37 = vld [vmem:[%s14830_s27 + $0x84] sm:$0xff] }
 0x2d1   : > { %13153 = vmatmul.mubr.msk.bf16.gmra.mrb[60].mxu1 %vm279_vm2, %v7480_v38  ;;  %2608 = vmatprep.mubr.bf16.mxu0 %v14772_v5  ;;  %v7997_v38 = vld [vmem:[%s14830_s27 + $0x8c] sm:$0xff] }
 0x2d2   : > { %7745 = vmatprep.mubr.bf16.mxu1 %v14772_v5  ;;  %v15777_v42 = vpack.c.bf16 %v7997_v38, %v7996_v37  ;;  %v8013_v37 = vld [vmem:[%s14830_s27 + $0x10c] sm:$0xff]  ;;  %v15887_v38 = vpack.c.bf16 %v2876_v34, %v2875_v29  ;;  %v3994_v29 = vpack.c.bf16 %v3964_v24, %v3963_v19  ;;  %v9119_v19 = vld [vmem:[%s14830_s27 + $0x11d] sm:$0xff] }
 0x2d3   : > { %v15889_v43 = vpack.c.bf16 %v8013_v37, %v8012_v35  ;;  %v3965_v35 = vld [vmem:[%s14825_s24 + $0x85] sm:$0xff]  ;;  %v3966_v37 = vld [vmem:[%s14825_s24 + $0x8d] sm:$0xff] }
 0x2d8   : > { %12975 = vmatmul.mubr.msk.bf16.gmra.mrb[64].mxu0 %vm279_vm2, %v2343_v47  ;;  %v7998_v47 = vld [vmem:[%s14830_s27 + $0x94] sm:$0xff] }
 0x2d9   : > { %13154 = vmatmul.mubr.msk.bf16.gmra.mrb[64].mxu1 %vm279_vm2, %v7481_v48  ;;  %2618 = vmatprep.mubr.bf16.mxu0 %v14772_v5  ;;  %v7999_v48 = vld [vmem:[%s14830_s27 + $0x9c] sm:$0xff] }
 0x2da   : > { %7755 = vmatprep.mubr.bf16.mxu1 %v14772_v5  ;;  %v15791_v50 = vpack.c.bf16 %v7999_v48, %v7998_v47  ;;  %v2878_v47 = vld [vmem:[%s14825_s24 + $0x11c] sm:$0xff]  ;;  %v8014_v48 = vld [vmem:[%s14830_s27 + $0x114] sm:$0xff] }
 0x2db   : > { %v15901_v54 = vpack.c.bf16 %v2878_v47, %v2877_v44  ;;  %v3995_v44 = vpack.c.bf16 %v3966_v37, %v3965_v35  ;;  %v9121_v35 = vld [vmem:[%s14830_s27 + $0x12d] sm:$0xff] }
 0x2e0   : > { %12976 = vmatmul.mubr.msk.bf16.gmra.mrb[68].mxu0 %vm279_vm2, %v2344_v55  ;;  %v8000_v55 = vld [vmem:[%s14830_s27 + $0xa4] sm:$0xff] }
 0x2e1   : > { %13155 = vmatmul.mubr.msk.bf16.gmra.mrb[68].mxu1 %vm279_vm2, %v7482_v56  ;;  %3002 = vmatprep.mubr.bf16.mxu0 %v14772_v5  ;;  %v8001_v56 = vld [vmem:[%s14830_s27 + $0xac] sm:$0xff] }
 0x2e2   : > { %8138 = vmatprep.mubr.bf16.mxu1 %v14772_v5  ;;  %v15805_v60 = vpack.c.bf16 %v8001_v56, %v8000_v55  ;;  %v15903_v55 = vpack.c.bf16 %v8015_v53, %v8014_v48  ;;  %v2879_v56 = vld [vmem:[%s14825_s24 + $0x124] sm:$0xff]  ;;  %v3967_v48 = vld [vmem:[%s14825_s24 + $0x95] sm:$0xff] }
 0x2e3   : > { %v3968_v53 = vld [vmem:[%s14825_s24 + $0x9d] sm:$0xff] }
 0x2e8   : > { %12979 = vmatmul.mubr.msk.bf16.vlgmr.msra.gmra.mrb[0].mxu0 %vm279_vm2, %v2881_v1  ;;  %v8002_v1 = vld [vmem:[%s14830_s27 + $0xb4] sm:$0xff] }
 0x2e9   : > { %3525 = vmatpush1.bf16.msra.mxu0 %v3519_v6  ;;  %13158 = vmatmul.mubr.msk.bf16.vlgmr.msra.gmra.mrb[0].mxu1 %vm279_vm2, %v8018_v9  ;;  %v15817_v9 = vpack.c.bf16 %v2866_v62, %v2865_v14  ;;  %v2880_v14 = vld [vmem:[%s14825_s24 + $0x12c] sm:$0xff]  ;;  %v8016_v62 = vld [vmem:[%s14830_s27 + $0x124] sm:$0xff] }
 0x2ea   : > { %8660 = vmatpush1.bf16.msra.mxu1 %v3519_v6  ;;  %3012 = vmatprep.mubr.bf16.mxu0 %v14772_v5  ;;  %v8003_v6 = vld [vmem:[%s14830_s27 + $0xbc] sm:$0xff] }
 0x2eb   : > { %8148 = vmatprep.mubr.bf16.mxu1 %v14772_v5  ;;  %4078 = vmatprep.subr.bf16.mxu0 %v4076_v51  ;;  %v15819_v13 = vpack.c.bf16 %v8003_v6, %v8002_v1  ;;  %v8017_v1 = vld [vmem:[%s14830_s27 + $0x12c] sm:$0xff]  ;;  %v15915_v6 = vpack.c.bf16 %v2880_v14, %v2879_v56  ;;  %v3996_v56 = vpack.c.bf16 %v3968_v53, %v3967_v48  ;;  %v9123_v48 = vld [vmem:[%s14830_s27 + $0x13d] sm:$0xff] }
 0x2ec   : > { %9212 = vmatprep.subr.bf16.mxu1 %v4076_v51  ;;  %v8006_v51 = vld [vmem:[%s14830_s27 + $0xd4] sm:$0xff]  ;;  %v15917_v15 = vpack.c.bf16 %v8017_v1, %v8016_v62  ;;  %v3969_v62 = vld [vmem:[%s14825_s24 + $0xa5] sm:$0xff] }
 0x2ed   : > { %v15847_v61 = vpack.c.bf16 %v8007_v57, %v8006_v51  ;;  %v3959_v51 = vld [vmem:[%s14825_s24 + $0x55] sm:$0xff]  ;;  %v3960_v57 = vld [vmem:[%s14825_s24 + $0x5d] sm:$0xff]  ;;  %v3970_v1 = vld [vmem:[%s14825_s24 + $0xad] sm:$0xff] }
 0x2ee   : > { %v3992_v63 = vpack.c.bf16 %v3960_v57, %v3959_v51  ;;  %v9115_v51 = vld [vmem:[%s14830_s27 + $0xfd] sm:$0xff] }
 0x2f0   : > { %12980 = vmatmul.mubr.msk.bf16.gmra.mrb[4].mxu0 %vm279_vm2, %v15683_v2 }
 0x2f1   : > { %13159 = vmatmul.mubr.msk.bf16.gmra.mrb[4].mxu1 %vm279_vm2, %v15685_v26  ;;  %3022 = vmatprep.mubr.bf16.mxu0 %v14772_v5 }
 0x2f2   : > { %8158 = vmatprep.mubr.bf16.mxu1 %v14772_v5 }
 0x2f8   : > { %12981 = vmatmul.mubr.msk.bf16.gmra.mrb[8].mxu0 %vm279_vm2, %v15704_v46 }
 0x2f9   : > { %13160 = vmatmul.mubr.msk.bf16.gmra.mrb[8].mxu1 %vm279_vm2, %v15707_v52  ;;  %3032 = vmatprep.mubr.bf16.mxu0 %v14772_v5 }
 0x2fa   : > { %8168 = vmatprep.mubr.bf16.mxu1 %v14772_v5 }
 0x300   : > { %12982 = vmatmul.mubr.msk.bf16.gmra.mrb[12].mxu0 %vm279_vm2, %v15719_v0 }
 0x301   : > { %13161 = vmatmul.mubr.msk.bf16.gmra.mrb[12].mxu1 %vm279_vm2, %v15721_v3  ;;  %3042 = vmatprep.mubr.bf16.mxu0 %v14772_v5 }
 0x302   : > { %8178 = vmatprep.mubr.bf16.mxu1 %v14772_v5 }
 0x308   : > { %12983 = vmatmul.mubr.msk.bf16.gmra.mrb[16].mxu0 %vm279_vm2, %v15733_v11 }
 0x309   : > { %13162 = vmatmul.mubr.msk.bf16.gmra.mrb[16].mxu1 %vm279_vm2, %v15735_v12  ;;  %3052 = vmatprep.mubr.bf16.mxu0 %v14772_v5 }
 0x30a   : > { %8188 = vmatprep.mubr.bf16.mxu1 %v14772_v5 }
 0x310   : > { %12984 = vmatmul.mubr.msk.bf16.gmra.mrb[20].mxu0 %vm279_vm2, %v15747_v22 }
 0x311   : > { %13163 = vmatmul.mubr.msk.bf16.gmra.mrb[20].mxu1 %vm279_vm2, %v15749_v23  ;;  %3062 = vmatprep.mubr.bf16.mxu0 %v14772_v5 }
 0x312   : > { %8198 = vmatprep.mubr.bf16.mxu1 %v14772_v5 }
 0x318   : > { %12985 = vmatmul.mubr.msk.bf16.gmra.mrb[24].mxu0 %vm279_vm2, %v15761_v30 }
 0x319   : > { %13164 = vmatmul.mubr.msk.bf16.gmra.mrb[24].mxu1 %vm279_vm2, %v15763_v31  ;;  %3072 = vmatprep.mubr.bf16.mxu0 %v14772_v5 }
 0x31a   : > { %8208 = vmatprep.mubr.bf16.mxu1 %v14772_v5 }
 0x320   : > { %12986 = vmatmul.mubr.msk.bf16.gmra.mrb[28].mxu0 %vm279_vm2, %v15775_v41 }
 0x321   : > { %13165 = vmatmul.mubr.msk.bf16.gmra.mrb[28].mxu1 %vm279_vm2, %v15777_v42  ;;  %3082 = vmatprep.mubr.bf16.mxu0 %v14772_v5 }
 0x322   : > { %8218 = vmatprep.mubr.bf16.mxu1 %v14772_v5 }
 0x328   : > { %12987 = vmatmul.mubr.msk.bf16.gmra.mrb[32].mxu0 %vm279_vm2, %v15789_v49 }
 0x329   : > { %13166 = vmatmul.mubr.msk.bf16.gmra.mrb[32].mxu1 %vm279_vm2, %v15791_v50  ;;  %3092 = vmatprep.mubr.bf16.mxu0 %v14772_v5 }
 0x32a   : > { %8228 = vmatprep.mubr.bf16.mxu1 %v14772_v5 }
 0x330   : > { %12988 = vmatmul.mubr.msk.bf16.gmra.mrb[36].mxu0 %vm279_vm2, %v15803_v59 }
 0x331   : > { %13167 = vmatmul.mubr.msk.bf16.gmra.mrb[36].mxu1 %vm279_vm2, %v15805_v60  ;;  %3102 = vmatprep.mubr.bf16.mxu0 %v14772_v5 }
 0x332   : > { %8238 = vmatprep.mubr.bf16.mxu1 %v14772_v5 }
 0x338   : > { %12989 = vmatmul.mubr.msk.bf16.gmra.mrb[40].mxu0 %vm279_vm2, %v15817_v9 }
 0x339   : > { %13168 = vmatmul.mubr.msk.bf16.gmra.mrb[40].mxu1 %vm279_vm2, %v15819_v13  ;;  %3112 = vmatprep.mubr.bf16.mxu0 %v14772_v5 }
 0x33a   : > { %8248 = vmatprep.mubr.bf16.mxu1 %v14772_v5 }
 0x340   : > { %12990 = vmatmul.mubr.msk.bf16.gmra.mrb[44].mxu0 %vm279_vm2, %v15831_v32 }
 0x341   : > { %13169 = vmatmul.mubr.msk.bf16.gmra.mrb[44].mxu1 %vm279_vm2, %v15833_v39  ;;  %3122 = vmatprep.mubr.bf16.mxu0 %v14772_v5 }
 0x342   : > { %8258 = vmatprep.mubr.bf16.mxu1 %v14772_v5 }
 0x348   : > { %12991 = vmatmul.mubr.msk.bf16.gmra.mrb[48].mxu0 %vm279_vm2, %v15845_v58 }
 0x349   : > { %13170 = vmatmul.mubr.msk.bf16.gmra.mrb[48].mxu1 %vm279_vm2, %v15847_v61  ;;  %3132 = vmatprep.mubr.bf16.mxu0 %v14772_v5 }
 0x34a   : > { %8268 = vmatprep.mubr.bf16.mxu1 %v14772_v5 }
 0x350   : > { %12992 = vmatmul.mubr.msk.bf16.gmra.mrb[52].mxu0 %vm279_vm2, %v15859_v36 }
 0x351   : > { %13171 = vmatmul.mubr.msk.bf16.gmra.mrb[52].mxu1 %vm279_vm2, %v15861_v16  ;;  %3142 = vmatprep.mubr.bf16.mxu0 %v14772_v5 }
 0x352   : > { %8278 = vmatprep.mubr.bf16.mxu1 %v14772_v5 }
 0x358   : > { %12993 = vmatmul.mubr.msk.bf16.gmra.mrb[56].mxu0 %vm279_vm2, %v15873_v25 }
 0x359   : > { %13172 = vmatmul.mubr.msk.bf16.gmra.mrb[56].mxu1 %vm279_vm2, %v15875_v28  ;;  %3152 = vmatprep.mubr.bf16.mxu0 %v14772_v5 }
 0x35a   : > { %8288 = vmatprep.mubr.bf16.mxu1 %v14772_v5 }
 0x360   : > { %12994 = vmatmul.mubr.msk.bf16.gmra.mrb[60].mxu0 %vm279_vm2, %v15887_v38 }
 0x361   : > { %13173 = vmatmul.mubr.msk.bf16.gmra.mrb[60].mxu1 %vm279_vm2, %v15889_v43  ;;  %3162 = vmatprep.mubr.bf16.mxu0 %v14772_v5 }
 0x362   : > { %8298 = vmatprep.mubr.bf16.mxu1 %v14772_v5 }
 0x368   : > { %12995 = vmatmul.mubr.msk.bf16.gmra.mrb[64].mxu0 %vm279_vm2, %v15901_v54 }
 0x369   : > { %13174 = vmatmul.mubr.msk.bf16.gmra.mrb[64].mxu1 %vm279_vm2, %v15903_v55  ;;  %3172 = vmatprep.mubr.bf16.mxu0 %v14772_v5 }
 0x36a   : > { %8308 = vmatprep.mubr.bf16.mxu1 %v14772_v5 }
 0x370   : > { %12996 = vmatmul.mubr.msk.bf16.gmra.mrb[68].mxu0 %vm279_vm2, %v15915_v6 }
 0x371   : > { %13175 = vmatmul.mubr.msk.bf16.gmra.mrb[68].mxu1 %vm279_vm2, %v15917_v15  ;;  %3556 = vmatprep.mubr.bf16.mxu0 %v14772_v5 }
 0x372   : > { %8691 = vmatprep.mubr.bf16.mxu1 %v14772_v5 }
 0x378   : > { %12999 = vmatmul.mubr.msk.bf16.vlgmr.msra.gmra.mrb[0].mxu0 %vm279_vm2, %v15683_v2  ;;  %v15941_v2 = vld.sshfl [vmem:[%s19123_s2 + $0x20] sm:$0x33 pattern:$0x76325410] }
 0x379   : > { %4079 = vmatpush1.bf16.msra.mxu0 %v4073_v20  ;;  %13178 = vmatmul.mubr.msk.bf16.vlgmr.msra.gmra.mrb[0].mxu1 %vm279_vm2, %v15685_v26  ;;  %v4571_v26 = vcombine.high %v15941_v2, %v15941_v2 }
 0x37a   : > { %9213 = vmatpush1.bf16.msra.mxu1 %v4073_v20  ;;  %3566 = vmatprep.mubr.bf16.mxu0 %v14772_v5  ;;  %v3997_v20 = vpack.c.bf16 %v3970_v1, %v3969_v62  ;;  %v9642_v62 = vld [vmem:[%s14830_s27 + $0x2e] sm:$0xff] }
 0x37b   : > { %8701 = vmatprep.mubr.bf16.mxu1 %v14772_v5  ;;  %v4630_v33 = vand.u32 %v4571_v26, %v14814_v7  ;;  %v3971_v26 = vld [vmem:[%s14825_s24 + $0xb5] sm:$0xff] }
 0x37d   : > { %4632 = vmatprep.subr.bf16.mxu0 %v4630_v33  ;;  %9765 = vmatprep.subr.bf16.mxu1 %v4630_v33  ;;  %v3972_v33 = vld [vmem:[%s14825_s24 + $0xbd] sm:$0xff] }
 0x380   : > { %13000 = vmatmul.mubr.msk.bf16.gmra.mrb[4].mxu0 %vm279_vm2, %v15704_v46  ;;  %v3433_v46 = vld [vmem:[%s14825_s24 + $0x134] sm:$0xff] }
 0x381   : > { %13179 = vmatmul.mubr.msk.bf16.gmra.mrb[4].mxu1 %vm279_vm2, %v15707_v52  ;;  %3576 = vmatprep.mubr.bf16.mxu0 %v14772_v5  ;;  %v3434_v52 = vld [vmem:[%s14825_s24 + $0x13c] sm:$0xff] }
 0x382   : > { %8711 = vmatprep.mubr.bf16.mxu1 %v14772_v5 }
 0x388   : > { %13001 = vmatmul.mubr.msk.bf16.gmra.mrb[8].mxu0 %vm279_vm2, %v15719_v0  ;;  %v8569_v0 = vld [vmem:[%s14830_s27 + $0x134] sm:$0xff] }
 0x389   : > { %13180 = vmatmul.mubr.msk.bf16.gmra.mrb[8].mxu1 %vm279_vm2, %v15721_v3  ;;  %3586 = vmatprep.mubr.bf16.mxu0 %v14772_v5  ;;  %v8570_v3 = vld [vmem:[%s14830_s27 + $0x13c] sm:$0xff] }
 0x38a   : > { %8721 = vmatprep.mubr.bf16.mxu1 %v14772_v5 }
 0x390   : > { %13002 = vmatmul.mubr.msk.bf16.gmra.mrb[12].mxu0 %vm279_vm2, %v15733_v11  ;;  %v3452_v11 = vpack.c.bf16 %v3434_v52, %v3433_v46  ;;  %v9106_v46 = vld [vmem:[%s14830_s27 + $0xb5] sm:$0xff]  ;;  %v9107_v52 = vld [vmem:[%s14830_s27 + $0xbd] sm:$0xff] }
 0x391   : > { %13181 = vmatmul.mubr.msk.bf16.gmra.mrb[12].mxu1 %vm279_vm2, %v15735_v12  ;;  %3596 = vmatprep.mubr.bf16.mxu0 %v14772_v5  ;;  %v8588_v12 = vpack.c.bf16 %v8570_v3, %v8569_v0  ;;  %v3998_v0 = vpack.c.bf16 %v3972_v33, %v3971_v26  ;;  %v9133_v3 = vpack.c.bf16 %v9107_v52, %v9106_v46  ;;  %v9644_v26 = vld [vmem:[%s14830_s27 + $0x3e] sm:$0xff]  ;;  %v4511_v52 = vld [vmem:[%s14825_s24 + $0x46] sm:$0xff] }
 0x392   : > { %8731 = vmatprep.mubr.bf16.mxu1 %v14772_v5 }
 0x398   : > { %13003 = vmatmul.mubr.msk.bf16.gmra.mrb[16].mxu0 %vm279_vm2, %v15747_v22  ;;  %v3953_v22 = vld [vmem:[%s14825_s24 + $0x25] sm:$0xff] }
 0x399   : > { %13182 = vmatmul.mubr.msk.bf16.gmra.mrb[16].mxu1 %vm279_vm2, %v15749_v23  ;;  %3606 = vmatprep.mubr.bf16.mxu0 %v14772_v5  ;;  %v3954_v23 = vld [vmem:[%s14825_s24 + $0x2d] sm:$0xff] }
 0x39a   : > { %8741 = vmatprep.mubr.bf16.mxu1 %v14772_v5 }
 0x3a0   : > { %13004 = vmatmul.mubr.msk.bf16.gmra.mrb[20].mxu0 %vm279_vm2, %v15761_v30  ;;  %v9088_v30 = vld [vmem:[%s14830_s27 + $0x25] sm:$0xff] }
 0x3a1   : > { %13183 = vmatmul.mubr.msk.bf16.gmra.mrb[20].mxu1 %vm279_vm2, %v15763_v31  ;;  %3616 = vmatprep.mubr.bf16.mxu0 %v14772_v5  ;;  %v9089_v31 = vld [vmem:[%s14830_s27 + $0x2d] sm:$0xff] }
 0x3a2   : > { %8751 = vmatprep.mubr.bf16.mxu1 %v14772_v5 }
 0x3a8   : > { %13005 = vmatmul.mubr.msk.bf16.gmra.mrb[24].mxu0 %vm279_vm2, %v15775_v41  ;;  %v3989_v41 = vpack.c.bf16 %v3954_v23, %v3953_v22  ;;  %v9108_v22 = vld [vmem:[%s14830_s27 + $0xc5] sm:$0xff]  ;;  %v9109_v23 = vld [vmem:[%s14830_s27 + $0xcd] sm:$0xff] }
 0x3a9   : > { %13184 = vmatmul.mubr.msk.bf16.gmra.mrb[24].mxu1 %vm279_vm2, %v15777_v42  ;;  %3626 = vmatprep.mubr.bf16.mxu0 %v14772_v5  ;;  %v4627_v42 = vand.u32 %v15941_v2, %v14814_v7 }
 0x3aa   : > { %8761 = vmatprep.mubr.bf16.mxu1 %v14772_v5 }
 0x3b0   : > { %13006 = vmatmul.mubr.msk.bf16.gmra.mrb[28].mxu0 %vm279_vm2, %v15789_v49  ;;  %v9124_v49 = vpack.c.bf16 %v9089_v31, %v9088_v30  ;;  %v9134_v31 = vpack.c.bf16 %v9109_v23, %v9108_v22  ;;  %v4513_v23 = vld [vmem:[%s14825_s24 + $0x56] sm:$0xff] }
 0x3b1   : > { %13185 = vmatmul.mubr.msk.bf16.gmra.mrb[28].mxu1 %vm279_vm2, %v15791_v50  ;;  %3636 = vmatprep.mubr.bf16.mxu0 %v14772_v5  ;;  %v3955_v50 = vld [vmem:[%s14825_s24 + $0x35] sm:$0xff] }
 0x3b2   : > { %8771 = vmatprep.mubr.bf16.mxu1 %v14772_v5 }
 0x3b8   : > { %13007 = vmatmul.mubr.msk.bf16.gmra.mrb[32].mxu0 %vm279_vm2, %v15803_v59  ;;  %v3956_v59 = vld [vmem:[%s14825_s24 + $0x3d] sm:$0xff] }
 0x3b9   : > { %13186 = vmatmul.mubr.msk.bf16.gmra.mrb[32].mxu1 %vm279_vm2, %v15805_v60  ;;  %3646 = vmatprep.mubr.bf16.mxu0 %v14772_v5  ;;  %v9090_v60 = vld [vmem:[%s14830_s27 + $0x35] sm:$0xff]  ;;  %v3990_v7 = vpack.c.bf16 %v3956_v59, %v3955_v50  ;;  %v9111_v50 = vld [vmem:[%s14830_s27 + $0xdd] sm:$0xff] }
 0x3ba   : > { %8781 = vmatprep.mubr.bf16.mxu1 %v14772_v5 }
 0x3c0   : > { %13008 = vmatmul.mubr.msk.bf16.gmra.mrb[36].mxu0 %vm279_vm2, %v15817_v9  ;;  %v9091_v9 = vld [vmem:[%s14830_s27 + $0x3d] sm:$0xff] }
 0x3c1   : > { %13187 = vmatmul.mubr.msk.bf16.gmra.mrb[36].mxu1 %vm279_vm2, %v15819_v13  ;;  %3656 = vmatprep.mubr.bf16.mxu0 %v14772_v5  ;;  %v9125_v13 = vpack.c.bf16 %v9091_v9, %v9090_v60  ;;  %v3977_v9 = vld [vmem:[%s14825_s24 + $0xe5] sm:$0xff] }
 0x3c2   : > { %8791 = vmatprep.mubr.bf16.mxu1 %v14772_v5 }
 0x3c8   : > { %13009 = vmatmul.mubr.msk.bf16.gmra.mrb[40].mxu0 %vm279_vm2, %v15831_v32  ;;  %v9092_v32 = vld [vmem:[%s14830_s27 + $0x45] sm:$0xff] }
 0x3c9   : > { %13188 = vmatmul.mubr.msk.bf16.gmra.mrb[40].mxu1 %vm279_vm2, %v15833_v39  ;;  %3666 = vmatprep.mubr.bf16.mxu0 %v14772_v5  ;;  %v9093_v39 = vld [vmem:[%s14830_s27 + $0x4d] sm:$0xff] }
 0x3ca   : > { %8801 = vmatprep.mubr.bf16.mxu1 %v14772_v5  ;;  %v9126_v45 = vpack.c.bf16 %v9093_v39, %v9092_v32  ;;  %v3979_v39 = vld [vmem:[%s14825_s24 + $0xf5] sm:$0xff] }
 0x3d0   : > { %13010 = vmatmul.mubr.msk.bf16.gmra.mrb[44].mxu0 %vm279_vm2, %v15845_v58  ;;  %v9094_v58 = vld [vmem:[%s14830_s27 + $0x55] sm:$0xff] }
 0x3d1   : > { %13189 = vmatmul.mubr.msk.bf16.gmra.mrb[44].mxu1 %vm279_vm2, %v15847_v61  ;;  %3676 = vmatprep.mubr.bf16.mxu0 %v14772_v5  ;;  %v9095_v61 = vld [vmem:[%s14830_s27 + $0x5d] sm:$0xff] }
 0x3d2   : > { %8811 = vmatprep.mubr.bf16.mxu1 %v14772_v5  ;;  %v9127_v4 = vpack.c.bf16 %v9095_v61, %v9094_v58  ;;  %v3981_v61 = vld [vmem:[%s14825_s24 + $0x105] sm:$0xff] }
 0x3d8   : > { %13011 = vmatmul.mubr.msk.bf16.gmra.mrb[48].mxu0 %vm279_vm2, %v15859_v36  ;;  %v9096_v36 = vld [vmem:[%s14830_s27 + $0x65] sm:$0xff] }
 0x3d9   : > { %13190 = vmatmul.mubr.msk.bf16.gmra.mrb[48].mxu1 %vm279_vm2, %v15861_v16  ;;  %3686 = vmatprep.mubr.bf16.mxu0 %v14772_v5  ;;  %v9097_v16 = vld [vmem:[%s14830_s27 + $0x6d] sm:$0xff] }
 0x3da   : > { %8821 = vmatprep.mubr.bf16.mxu1 %v14772_v5  ;;  %v9128_v18 = vpack.c.bf16 %v9097_v16, %v9096_v36  ;;  %v3983_v16 = vld [vmem:[%s14825_s24 + $0x115] sm:$0xff] }
 0x3e0   : > { %13012 = vmatmul.mubr.msk.bf16.gmra.mrb[52].mxu0 %vm279_vm2, %v15873_v25  ;;  %v9098_v25 = vld [vmem:[%s14830_s27 + $0x75] sm:$0xff] }
 0x3e1   : > { %13191 = vmatmul.mubr.msk.bf16.gmra.mrb[52].mxu1 %vm279_vm2, %v15875_v28  ;;  %3696 = vmatprep.mubr.bf16.mxu0 %v14772_v5  ;;  %v9099_v28 = vld [vmem:[%s14830_s27 + $0x7d] sm:$0xff] }
 0x3e2   : > { %8831 = vmatprep.mubr.bf16.mxu1 %v14772_v5  ;;  %v9129_v34 = vpack.c.bf16 %v9099_v28, %v9098_v25  ;;  %v3985_v28 = vld [vmem:[%s14825_s24 + $0x125] sm:$0xff] }
 0x3e8   : > { %13013 = vmatmul.mubr.msk.bf16.gmra.mrb[56].mxu0 %vm279_vm2, %v15887_v38  ;;  %v9100_v38 = vld [vmem:[%s14830_s27 + $0x85] sm:$0xff] }
 0x3e9   : > { %13192 = vmatmul.mubr.msk.bf16.gmra.mrb[56].mxu1 %vm279_vm2, %v15889_v43  ;;  %3706 = vmatprep.mubr.bf16.mxu0 %v14772_v5  ;;  %v9101_v43 = vld [vmem:[%s14830_s27 + $0x8d] sm:$0xff] }
 0x3ea   : > { %8841 = vmatprep.mubr.bf16.mxu1 %v14772_v5  ;;  %v9130_v47 = vpack.c.bf16 %v9101_v43, %v9100_v38  ;;  %v3987_v43 = vld [vmem:[%s14825_s24 + $0x135] sm:$0xff] }
 0x3f0   : > { %13014 = vmatmul.mubr.msk.bf16.gmra.mrb[60].mxu0 %vm279_vm2, %v15901_v54  ;;  %v9102_v54 = vld [vmem:[%s14830_s27 + $0x95] sm:$0xff] }
 0x3f1   : > { %13193 = vmatmul.mubr.msk.bf16.gmra.mrb[60].mxu1 %vm279_vm2, %v15903_v55  ;;  %3716 = vmatprep.mubr.bf16.mxu0 %v14772_v5  ;;  %v9103_v55 = vld [vmem:[%s14830_s27 + $0x9d] sm:$0xff] }
 0x3f2   : > { %8851 = vmatprep.mubr.bf16.mxu1 %v14772_v5  ;;  %v9131_v14 = vpack.c.bf16 %v9103_v55, %v9102_v54  ;;  %v4507_v55 = vld [vmem:[%s14825_s24 + $0x26] sm:$0xff] }
 0x3f8   : > { %13015 = vmatmul.mubr.msk.bf16.gmra.mrb[64].mxu0 %vm279_vm2, %v15915_v6  ;;  %v9104_v6 = vld [vmem:[%s14830_s27 + $0xa5] sm:$0xff] }
 0x3f9   : > { %13194 = vmatmul.mubr.msk.bf16.gmra.mrb[64].mxu1 %vm279_vm2, %v15917_v15  ;;  %3726 = vmatprep.mubr.bf16.mxu0 %v14772_v5  ;;  %v9105_v15 = vld [vmem:[%s14830_s27 + $0xad] sm:$0xff] }
 0x3fa   : > { %8861 = vmatprep.mubr.bf16.mxu1 %v14772_v5  ;;  %v9132_v2 = vpack.c.bf16 %v9105_v15, %v9104_v6  ;;  %v4509_v15 = vld [vmem:[%s14825_s24 + $0x36] sm:$0xff] }
 0x400   : > { %13016 = vmatmul.mubr.msk.bf16.gmra.mrb[68].mxu0 %vm279_vm2, %v3452_v11  ;;  %v3973_v11 = vld [vmem:[%s14825_s24 + $0xc5] sm:$0xff] }
 0x401   : > { %13195 = vmatmul.mubr.msk.bf16.gmra.mrb[68].mxu1 %vm279_vm2, %v8588_v12  ;;  %4110 = vmatprep.mubr.bf16.mxu0 %v14772_v5  ;;  %v3974_v12 = vld [vmem:[%s14825_s24 + $0xcd] sm:$0xff] }
 0x402   : > { %9244 = vmatprep.mubr.bf16.mxu1 %v14772_v5  ;;  %v3999_v30 = vpack.c.bf16 %v3974_v12, %v3973_v11  ;;  %v9646_v11 = vld [vmem:[%s14830_s27 + $0x4e] sm:$0xff] }
 0x408   : > { %13019 = vmatmul.mubr.msk.bf16.vlgmr.msra.gmra.mrb[0].mxu0 %vm279_vm2, %v3989_v41  ;;  %v3975_v41 = vld [vmem:[%s14825_s24 + $0xd5] sm:$0xff] }
 0x409   : > { %4633 = vmatpush1.bf16.msra.mxu0 %v4627_v42  ;;  %13198 = vmatmul.mubr.msk.bf16.vlgmr.msra.gmra.mrb[0].mxu1 %vm279_vm2, %v9124_v49  ;;  %v9110_v49 = vld [vmem:[%s14830_s27 + $0xd5] sm:$0xff] }
 0x40a   : > { %9766 = vmatpush1.bf16.msra.mxu1 %v4627_v42  ;;  %4120 = vmatprep.mubr.bf16.mxu0 %v14772_v5  ;;  %v3976_v42 = vld [vmem:[%s14825_s24 + $0xdd] sm:$0xff]  ;;  %v9135_v60 = vpack.c.bf16 %v9111_v50, %v9110_v49  ;;  %v4515_v50 = vld [vmem:[%s14825_s24 + $0x66] sm:$0xff] }
 0x40b   : > { %9254 = vmatprep.mubr.bf16.mxu1 %v14772_v5  ;;  %v4000_v59 = vpack.c.bf16 %v3976_v42, %v3975_v41  ;;  %v9648_v41 = vld [vmem:[%s14830_s27 + $0x5e] sm:$0xff] }
 0x410   : > { %13020 = vmatmul.mubr.msk.bf16.gmra.mrb[4].mxu0 %vm279_vm2, %v3990_v7  ;;  %v3978_v7 = vld [vmem:[%s14825_s24 + $0xed] sm:$0xff] }
 0x411   : > { %13199 = vmatmul.mubr.msk.bf16.gmra.mrb[4].mxu1 %vm279_vm2, %v9125_v13  ;;  %4130 = vmatprep.mubr.bf16.mxu0 %v14772_v5  ;;  %v9112_v13 = vld [vmem:[%s14830_s27 + $0xe5] sm:$0xff]  ;;  %v4001_v27 = vpack.c.bf16 %v3978_v7, %v3977_v9  ;;  %v9650_v9 = vld [vmem:[%s14830_s27 + $0x6e] sm:$0xff] }
 0x412   : > { %9264 = vmatprep.mubr.bf16.mxu1 %v14772_v5  ;;  %v9136_v32 = vpack.c.bf16 %v9113_v21, %v9112_v13  ;;  %v4517_v21 = vld [vmem:[%s14825_s24 + $0x76] sm:$0xff] }
 0x418   : > { %13021 = vmatmul.mubr.msk.bf16.gmra.mrb[8].mxu0 %vm279_vm2, %v3991_v40  ;;  %v3980_v40 = vld [vmem:[%s14825_s24 + $0xfd] sm:$0xff] }
 0x419   : > { %13200 = vmatmul.mubr.msk.bf16.gmra.mrb[8].mxu1 %vm279_vm2, %v9126_v45  ;;  %4140 = vmatprep.mubr.bf16.mxu0 %v14772_v5  ;;  %v9114_v45 = vld [vmem:[%s14830_s27 + $0xf5] sm:$0xff]  ;;  %v4002_v57 = vpack.c.bf16 %v3980_v40, %v3979_v39  ;;  %v9652_v39 = vld [vmem:[%s14830_s27 + $0x7e] sm:$0xff] }
 0x41a   : > { %9274 = vmatprep.mubr.bf16.mxu1 %v14772_v5  ;;  %v9137_v58 = vpack.c.bf16 %v9115_v51, %v9114_v45  ;;  %v4519_v51 = vld [vmem:[%s14825_s24 + $0x86] sm:$0xff] }
 0x420   : > { %13022 = vmatmul.mubr.msk.bf16.gmra.mrb[12].mxu0 %vm279_vm2, %v3992_v63  ;;  %v3982_v63 = vld [vmem:[%s14825_s24 + $0x10d] sm:$0xff] }
 0x421   : > { %13201 = vmatmul.mubr.msk.bf16.gmra.mrb[12].mxu1 %vm279_vm2, %v9127_v4  ;;  %4150 = vmatprep.mubr.bf16.mxu0 %v14772_v5  ;;  %v9116_v4 = vld [vmem:[%s14830_s27 + $0x105] sm:$0xff]  ;;  %v4003_v10 = vpack.c.bf16 %v3982_v63, %v3981_v61  ;;  %v9654_v61 = vld [vmem:[%s14830_s27 + $0x8e] sm:$0xff] }
 0x422   : > { %9284 = vmatprep.mubr.bf16.mxu1 %v14772_v5  ;;  %v9138_v36 = vpack.c.bf16 %v9117_v8, %v9116_v4  ;;  %v4521_v8 = vld [vmem:[%s14825_s24 + $0x96] sm:$0xff] }
 0x428   : > { %13023 = vmatmul.mubr.msk.bf16.gmra.mrb[16].mxu0 %vm279_vm2, %v3993_v17  ;;  %v3984_v17 = vld [vmem:[%s14825_s24 + $0x11d] sm:$0xff] }
 0x429   : > { %13202 = vmatmul.mubr.msk.bf16.gmra.mrb[16].mxu1 %vm279_vm2, %v9128_v18  ;;  %4160 = vmatprep.mubr.bf16.mxu0 %v14772_v5  ;;  %v9118_v18 = vld [vmem:[%s14830_s27 + $0x115] sm:$0xff]  ;;  %v4004_v24 = vpack.c.bf16 %v3984_v17, %v3983_v16  ;;  %v9656_v16 = vld [vmem:[%s14830_s27 + $0x9e] sm:$0xff] }
 0x42a   : > { %9294 = vmatprep.mubr.bf16.mxu1 %v14772_v5  ;;  %v9139_v25 = vpack.c.bf16 %v9119_v19, %v9118_v18  ;;  %v4523_v19 = vld [vmem:[%s14825_s24 + $0xa6] sm:$0xff] }
 0x430   : > { %13024 = vmatmul.mubr.msk.bf16.gmra.mrb[20].mxu0 %vm279_vm2, %v3994_v29  ;;  %v3986_v29 = vld [vmem:[%s14825_s24 + $0x12d] sm:$0xff] }
 0x431   : > { %13203 = vmatmul.mubr.msk.bf16.gmra.mrb[20].mxu1 %vm279_vm2, %v9129_v34  ;;  %4170 = vmatprep.mubr.bf16.mxu0 %v14772_v5  ;;  %v9120_v34 = vld [vmem:[%s14830_s27 + $0x125] sm:$0xff]  ;;  %v4005_v37 = vpack.c.bf16 %v3986_v29, %v3985_v28  ;;  %v9658_v28 = vld [vmem:[%s14830_s27 + $0xae] sm:$0xff] }
 0x432   : > { %9304 = vmatprep.mubr.bf16.mxu1 %v14772_v5  ;;  %v9140_v38 = vpack.c.bf16 %v9121_v35, %v9120_v34  ;;  %v4525_v35 = vld [vmem:[%s14825_s24 + $0xb6] sm:$0xff] }
 0x438   : > { %13025 = vmatmul.mubr.msk.bf16.gmra.mrb[24].mxu0 %vm279_vm2, %v3995_v44  ;;  %v3988_v44 = vld [vmem:[%s14825_s24 + $0x13d] sm:$0xff] }
 0x439   : > { %13204 = vmatmul.mubr.msk.bf16.gmra.mrb[24].mxu1 %vm279_vm2, %v9130_v47  ;;  %4180 = vmatprep.mubr.bf16.mxu0 %v14772_v5  ;;  %v9122_v47 = vld [vmem:[%s14830_s27 + $0x135] sm:$0xff]  ;;  %v4006_v53 = vpack.c.bf16 %v3988_v44, %v3987_v43  ;;  %v9660_v43 = vld [vmem:[%s14830_s27 + $0xbe] sm:$0xff] }
 0x43a   : > { %9314 = vmatprep.mubr.bf16.mxu1 %v14772_v5  ;;  %v9141_v54 = vpack.c.bf16 %v9123_v48, %v9122_v47  ;;  %v4527_v48 = vld [vmem:[%s14825_s24 + $0xc6] sm:$0xff] }
 0x440   : > { %13026 = vmatmul.mubr.msk.bf16.gmra.mrb[28].mxu0 %vm279_vm2, %v3996_v56  ;;  %v4508_v56 = vld [vmem:[%s14825_s24 + $0x2e] sm:$0xff] }
 0x441   : > { %13205 = vmatmul.mubr.msk.bf16.gmra.mrb[28].mxu1 %vm279_vm2, %v9131_v14  ;;  %4190 = vmatprep.mubr.bf16.mxu0 %v14772_v5  ;;  %v9641_v14 = vld [vmem:[%s14830_s27 + $0x26] sm:$0xff]  ;;  %v4543_v1 = vpack.c.bf16 %v4508_v56, %v4507_v55  ;;  %v9662_v55 = vld [vmem:[%s14830_s27 + $0xce] sm:$0xff] }
 0x442   : > { %9324 = vmatprep.mubr.bf16.mxu1 %v14772_v5  ;;  %v9677_v6 = vpack.c.bf16 %v9642_v62, %v9641_v14  ;;  %v4529_v62 = vld [vmem:[%s14825_s24 + $0xd6] sm:$0xff] }
 0x448   : > { %13027 = vmatmul.mubr.msk.bf16.gmra.mrb[32].mxu0 %vm279_vm2, %v3997_v20  ;;  %v4510_v20 = vld [vmem:[%s14825_s24 + $0x3e] sm:$0xff] }
 0x449   : > { %13206 = vmatmul.mubr.msk.bf16.gmra.mrb[32].mxu1 %vm279_vm2, %v9132_v2  ;;  %4200 = vmatprep.mubr.bf16.mxu0 %v14772_v5  ;;  %v9643_v2 = vld [vmem:[%s14830_s27 + $0x36] sm:$0xff]  ;;  %v4544_v33 = vpack.c.bf16 %v4510_v20, %v4509_v15  ;;  %v9664_v15 = vld [vmem:[%s14830_s27 + $0xde] sm:$0xff] }
 0x44a   : > { %9334 = vmatprep.mubr.bf16.mxu1 %v14772_v5  ;;  %v9678_v46 = vpack.c.bf16 %v9644_v26, %v9643_v2  ;;  %v4531_v26 = vld [vmem:[%s14825_s24 + $0xe6] sm:$0xff] }
 0x450   : > { %13028 = vmatmul.mubr.msk.bf16.gmra.mrb[36].mxu0 %vm279_vm2, %v3998_v0  ;;  %v4512_v0 = vld [vmem:[%s14825_s24 + $0x4e] sm:$0xff] }
 0x451   : > { %13207 = vmatmul.mubr.msk.bf16.gmra.mrb[36].mxu1 %vm279_vm2, %v9133_v3  ;;  %4210 = vmatprep.mubr.bf16.mxu0 %v14772_v5  ;;  %v9645_v3 = vld [vmem:[%s14830_s27 + $0x46] sm:$0xff]  ;;  %v4545_v12 = vpack.c.bf16 %v4512_v0, %v4511_v52  ;;  %v9666_v52 = vld [vmem:[%s14830_s27 + $0xee] sm:$0xff] }
 0x452   : > { %9344 = vmatprep.mubr.bf16.mxu1 %v14772_v5  ;;  %v9679_v22 = vpack.c.bf16 %v9646_v11, %v9645_v3  ;;  %v4533_v11 = vld [vmem:[%s14825_s24 + $0xf6] sm:$0xff] }
 0x458   : > { %13029 = vmatmul.mubr.msk.bf16.gmra.mrb[40].mxu0 %vm279_vm2, %v3999_v30  ;;  %v4514_v30 = vld [vmem:[%s14825_s24 + $0x5e] sm:$0xff] }
 0x459   : > { %13208 = vmatmul.mubr.msk.bf16.gmra.mrb[40].mxu1 %vm279_vm2, %v9134_v31  ;;  %4220 = vmatprep.mubr.bf16.mxu0 %v14772_v5  ;;  %v9647_v31 = vld [vmem:[%s14830_s27 + $0x56] sm:$0xff]  ;;  %v4546_v42 = vpack.c.bf16 %v4514_v30, %v4513_v23  ;;  %v9668_v23 = vld [vmem:[%s14830_s27 + $0xfe] sm:$0xff] }
 0x45a   : > { %9354 = vmatprep.mubr.bf16.mxu1 %v14772_v5  ;;  %v9680_v49 = vpack.c.bf16 %v9648_v41, %v9647_v31  ;;  %v4535_v41 = vld [vmem:[%s14825_s24 + $0x106] sm:$0xff] }
 0x460   : > { %13030 = vmatmul.mubr.msk.bf16.gmra.mrb[44].mxu0 %vm279_vm2, %v4000_v59  ;;  %v4516_v59 = vld [vmem:[%s14825_s24 + $0x6e] sm:$0xff] }
 0x461   : > { %13209 = vmatmul.mubr.msk.bf16.gmra.mrb[44].mxu1 %vm279_vm2, %v9135_v60  ;;  %4230 = vmatprep.mubr.bf16.mxu0 %v14772_v5  ;;  %v9649_v60 = vld [vmem:[%s14830_s27 + $0x66] sm:$0xff]  ;;  %v4547_v7 = vpack.c.bf16 %v4516_v59, %v4515_v50  ;;  %v9670_v50 = vld [vmem:[%s14830_s27 + $0x10e] sm:$0xff] }
 0x462   : > { %9364 = vmatprep.mubr.bf16.mxu1 %v14772_v5  ;;  %v9681_v13 = vpack.c.bf16 %v9650_v9, %v9649_v60  ;;  %v4537_v9 = vld [vmem:[%s14825_s24 + $0x116] sm:$0xff] }
 0x468   : > { %13031 = vmatmul.mubr.msk.bf16.gmra.mrb[48].mxu0 %vm279_vm2, %v4001_v27  ;;  %v4518_v27 = vld [vmem:[%s14825_s24 + $0x7e] sm:$0xff] }
 0x469   : > { %13210 = vmatmul.mubr.msk.bf16.gmra.mrb[48].mxu1 %vm279_vm2, %v9136_v32  ;;  %4240 = vmatprep.mubr.bf16.mxu0 %v14772_v5  ;;  %v9651_v32 = vld [vmem:[%s14830_s27 + $0x76] sm:$0xff]  ;;  %v4548_v40 = vpack.c.bf16 %v4518_v27, %v4517_v21  ;;  %v9672_v21 = vld [vmem:[%s14830_s27 + $0x11e] sm:$0xff] }
 0x46a   : > { %9374 = vmatprep.mubr.bf16.mxu1 %v14772_v5  ;;  %v9682_v45 = vpack.c.bf16 %v9652_v39, %v9651_v32  ;;  %v4539_v39 = vld [vmem:[%s14825_s24 + $0x126] sm:$0xff] }
 0x470   : > { %13032 = vmatmul.mubr.msk.bf16.gmra.mrb[52].mxu0 %vm279_vm2, %v4002_v57  ;;  %v4520_v57 = vld [vmem:[%s14825_s24 + $0x8e] sm:$0xff] }
 0x471   : > { %13211 = vmatmul.mubr.msk.bf16.gmra.mrb[52].mxu1 %vm279_vm2, %v9137_v58  ;;  %4250 = vmatprep.mubr.bf16.mxu0 %v14772_v5  ;;  %v9653_v58 = vld [vmem:[%s14830_s27 + $0x86] sm:$0xff]  ;;  %v4549_v63 = vpack.c.bf16 %v4520_v57, %v4519_v51  ;;  %v9674_v51 = vld [vmem:[%s14830_s27 + $0x12e] sm:$0xff] }
 0x472   : > { %9384 = vmatprep.mubr.bf16.mxu1 %v14772_v5  ;;  %v9683_v4 = vpack.c.bf16 %v9654_v61, %v9653_v58  ;;  %v4541_v61 = vld [vmem:[%s14825_s24 + $0x136] sm:$0xff] }
 0x478   : > { %13033 = vmatmul.mubr.msk.bf16.gmra.mrb[56].mxu0 %vm279_vm2, %v4003_v10  ;;  %v4522_v10 = vld [vmem:[%s14825_s24 + $0x9e] sm:$0xff] }
 0x479   : > { %13212 = vmatmul.mubr.msk.bf16.gmra.mrb[56].mxu1 %vm279_vm2, %v9138_v36  ;;  %4260 = vmatprep.mubr.bf16.mxu0 %v14772_v5  ;;  %v9655_v36 = vld [vmem:[%s14830_s27 + $0x96] sm:$0xff]  ;;  %v4550_v17 = vpack.c.bf16 %v4522_v10, %v4521_v8  ;;  %v9676_v8 = vld [vmem:[%s14830_s27 + $0x13e] sm:$0xff] }
 0x47a   : > { %9394 = vmatprep.mubr.bf16.mxu1 %v14772_v5  ;;  %v9684_v18 = vpack.c.bf16 %v9656_v16, %v9655_v36  ;;  %v5135_v16 = vlaneseq }
 0x480   : > { %13034 = vmatmul.mubr.msk.bf16.gmra.mrb[60].mxu0 %vm279_vm2, %v4004_v24  ;;  %v4524_v24 = vld [vmem:[%s14825_s24 + $0xae] sm:$0xff] }
 0x481   : > { %13213 = vmatmul.mubr.msk.bf16.gmra.mrb[60].mxu1 %vm279_vm2, %v9139_v25  ;;  %4270 = vmatprep.mubr.bf16.mxu0 %v14772_v5  ;;  %v9657_v25 = vld [vmem:[%s14830_s27 + $0xa6] sm:$0xff]  ;;  %v4551_v29 = vpack.c.bf16 %v4524_v24, %v4523_v19  ;;  %v5133_v19 = vld [vmem:[%s19124_s3] sm:$0x3] }
 0x482   : > { %9404 = vmatprep.mubr.bf16.mxu1 %v14772_v5  ;;  %v9685_v34 = vpack.c.bf16 %v9658_v28, %v9657_v25 }
 0x488   : > { %13035 = vmatmul.mubr.msk.bf16.gmra.mrb[64].mxu0 %vm279_vm2, %v4005_v37  ;;  %v4526_v37 = vld [vmem:[%s14825_s24 + $0xbe] sm:$0xff] }
 0x489   : > { %13214 = vmatmul.mubr.msk.bf16.gmra.mrb[64].mxu1 %vm279_vm2, %v9140_v38  ;;  %4280 = vmatprep.mubr.bf16.mxu0 %v14772_v5  ;;  %v9659_v38 = vld [vmem:[%s14830_s27 + $0xb6] sm:$0xff]  ;;  %v4552_v44 = vpack.c.bf16 %v4526_v37, %v4525_v35 }
 0x48a   : > { %9414 = vmatprep.mubr.bf16.mxu1 %v14772_v5  ;;  %v9686_v47 = vpack.c.bf16 %v9660_v43, %v9659_v38 }
 0x490   : > { %13036 = vmatmul.mubr.msk.bf16.gmra.mrb[68].mxu0 %vm279_vm2, %v4006_v53  ;;  %v4528_v53 = vld [vmem:[%s14825_s24 + $0xce] sm:$0xff] }
 0x491   : > { %13215 = vmatmul.mubr.msk.bf16.gmra.mrb[68].mxu1 %vm279_vm2, %v9141_v54  ;;  %4664 = vmatprep.mubr.bf16.mxu0 %v14772_v5  ;;  %v9661_v54 = vld [vmem:[%s14830_s27 + $0xc6] sm:$0xff]  ;;  %v4553_v56 = vpack.c.bf16 %v4528_v53, %v4527_v48 }
 0x492   : > { %9797 = vmatprep.mubr.bf16.mxu1 %v14772_v5  ;;  %v9687_v14 = vpack.c.bf16 %v9662_v55, %v9661_v54 }
 0x498   : > { %13039 = vmatmul.mubr.msk.bf16.vlgmr.msra.gmra.mrb[0].mxu0 %vm279_vm2, %v4543_v1  ;;  %v4530_v1 = vld [vmem:[%s14825_s24 + $0xde] sm:$0xff] }
 0x499   : > { %13218 = vmatmul.mubr.msk.bf16.vlgmr.msra.gmra.mrb[0].mxu1 %vm279_vm2, %v9677_v6  ;;  %4674 = vmatprep.mubr.bf16.mxu0 %v14772_v5  ;;  %v9663_v6 = vld [vmem:[%s14830_s27 + $0xd6] sm:$0xff]  ;;  %v4554_v20 = vpack.c.bf16 %v4530_v1, %v4529_v62 }
 0x49a   : > { %9807 = vmatprep.mubr.bf16.mxu1 %v14772_v5  ;;  %v9688_v2 = vpack.c.bf16 %v9664_v15, %v9663_v6 }
 0x4a0   : > { %13040 = vmatmul.mubr.msk.bf16.gmra.mrb[4].mxu0 %vm279_vm2, %v4544_v33  ;;  %v4532_v33 = vld [vmem:[%s14825_s24 + $0xee] sm:$0xff] }
 0x4a1   : > { %13219 = vmatmul.mubr.msk.bf16.gmra.mrb[4].mxu1 %vm279_vm2, %v9678_v46  ;;  %4684 = vmatprep.mubr.bf16.mxu0 %v14772_v5  ;;  %v9665_v46 = vld [vmem:[%s14830_s27 + $0xe6] sm:$0xff]  ;;  %v4555_v0 = vpack.c.bf16 %v4532_v33, %v4531_v26 }
 0x4a2   : > { %9817 = vmatprep.mubr.bf16.mxu1 %v14772_v5  ;;  %v9689_v3 = vpack.c.bf16 %v9666_v52, %v9665_v46 }
 0x4a8   : > { %13041 = vmatmul.mubr.msk.bf16.gmra.mrb[8].mxu0 %vm279_vm2, %v4545_v12  ;;  %v4534_v12 = vld [vmem:[%s14825_s24 + $0xfe] sm:$0xff] }
 0x4a9   : > { %13220 = vmatmul.mubr.msk.bf16.gmra.mrb[8].mxu1 %vm279_vm2, %v9679_v22  ;;  %4694 = vmatprep.mubr.bf16.mxu0 %v14772_v5  ;;  %v9667_v22 = vld [vmem:[%s14830_s27 + $0xf6] sm:$0xff]  ;;  %v4556_v30 = vpack.c.bf16 %v4534_v12, %v4533_v11 }
 0x4aa   : > { %9827 = vmatprep.mubr.bf16.mxu1 %v14772_v5  ;;  %v9690_v31 = vpack.c.bf16 %v9668_v23, %v9667_v22 }
 0x4b0   : > { %13042 = vmatmul.mubr.msk.bf16.gmra.mrb[12].mxu0 %vm279_vm2, %v4546_v42  ;;  %v4536_v42 = vld [vmem:[%s14825_s24 + $0x10e] sm:$0xff] }
 0x4b1   : > { %13221 = vmatmul.mubr.msk.bf16.gmra.mrb[12].mxu1 %vm279_vm2, %v9680_v49  ;;  %4704 = vmatprep.mubr.bf16.mxu0 %v14772_v5  ;;  %v9669_v49 = vld [vmem:[%s14830_s27 + $0x106] sm:$0xff]  ;;  %v4557_v59 = vpack.c.bf16 %v4536_v42, %v4535_v41 }
 0x4b2   : > { %9837 = vmatprep.mubr.bf16.mxu1 %v14772_v5  ;;  %v9691_v60 = vpack.c.bf16 %v9670_v50, %v9669_v49 }
 0x4b8   : > { %13043 = vmatmul.mubr.msk.bf16.gmra.mrb[16].mxu0 %vm279_vm2, %v4547_v7  ;;  %v4538_v7 = vld [vmem:[%s14825_s24 + $0x11e] sm:$0xff] }
 0x4b9   : > { %13222 = vmatmul.mubr.msk.bf16.gmra.mrb[16].mxu1 %vm279_vm2, %v9681_v13  ;;  %4714 = vmatprep.mubr.bf16.mxu0 %v14772_v5  ;;  %v9671_v13 = vld [vmem:[%s14830_s27 + $0x116] sm:$0xff]  ;;  %v4558_v27 = vpack.c.bf16 %v4538_v7, %v4537_v9 }
 0x4ba   : > { %9847 = vmatprep.mubr.bf16.mxu1 %v14772_v5  ;;  %v9692_v32 = vpack.c.bf16 %v9672_v21, %v9671_v13 }
 0x4c0   : > { %13044 = vmatmul.mubr.msk.bf16.gmra.mrb[20].mxu0 %vm279_vm2, %v4548_v40  ;;  %v4540_v40 = vld [vmem:[%s14825_s24 + $0x12e] sm:$0xff] }
 0x4c1   : > { %13223 = vmatmul.mubr.msk.bf16.gmra.mrb[20].mxu1 %vm279_vm2, %v9682_v45  ;;  %4724 = vmatprep.mubr.bf16.mxu0 %v14772_v5  ;;  %v9673_v45 = vld [vmem:[%s14830_s27 + $0x126] sm:$0xff]  ;;  %v4559_v57 = vpack.c.bf16 %v4540_v40, %v4539_v39 }
 0x4c2   : > { %9857 = vmatprep.mubr.bf16.mxu1 %v14772_v5  ;;  %v9693_v58 = vpack.c.bf16 %v9674_v51, %v9673_v45 }
 0x4c8   : > { %13045 = vmatmul.mubr.msk.bf16.gmra.mrb[24].mxu0 %vm279_vm2, %v4549_v63  ;;  %v4542_v63 = vld [vmem:[%s14825_s24 + $0x13e] sm:$0xff] }
 0x4c9   : > { %13224 = vmatmul.mubr.msk.bf16.gmra.mrb[24].mxu1 %vm279_vm2, %v9683_v4  ;;  %4734 = vmatprep.mubr.bf16.mxu0 %v14772_v5  ;;  %v9675_v4 = vld [vmem:[%s14830_s27 + $0x136] sm:$0xff]  ;;  %v4560_v10 = vpack.c.bf16 %v4542_v63, %v4541_v61 }
 0x4ca   : > { %9867 = vmatprep.mubr.bf16.mxu1 %v14772_v5  ;;  %v9694_v36 = vpack.c.bf16 %v9676_v8, %v9675_v4 }
 0x4d0   : > { %13046 = vmatmul.mubr.msk.bf16.gmra.mrb[28].mxu0 %vm279_vm2, %v4550_v17  ;;  %v16333_v17 = vshrl.u32 %v5135_v16, 7 }
 0x4d1   : > { %13225 = vmatmul.mubr.msk.bf16.gmra.mrb[28].mxu1 %vm279_vm2, %v9684_v18  ;;  %4744 = vmatprep.mubr.bf16.mxu0 %v14772_v5 }
 0x4d2   : > { %9877 = vmatprep.mubr.bf16.mxu1 %v14772_v5  ;;  %19244 = vst [vmem:[#allocation4_spill] sm:$0xff] %v16333_v17  ;;  %v5137_v18 = vsub.s32 0, %v16333_v17  ;;  %v5141_v24 = vsub.s32 1, %v16333_v17 }
 0x4d4   : > { %v16343_v25 = vrot.slane %v5133_v19, %v5137_v18 }
 0x4d8   : > { %13047 = vmatmul.mubr.msk.bf16.gmra.mrb[32].mxu0 %vm279_vm2, %v4551_v29  ;;  %v16347_v29 = vrot.slane %v5133_v19, %v5141_v24 }
 0x4d9   : > { %13226 = vmatmul.mubr.msk.bf16.gmra.mrb[32].mxu1 %vm279_vm2, %v9685_v34  ;;  %4754 = vmatprep.mubr.bf16.mxu0 %v14772_v5 }
 0x4da   : > { %9887 = vmatprep.mubr.bf16.mxu1 %v14772_v5 }
 0x4e0   : > { %13048 = vmatmul.mubr.msk.bf16.gmra.mrb[36].mxu0 %vm279_vm2, %v4552_v44 }
 0x4e1   : > { %13227 = vmatmul.mubr.msk.bf16.gmra.mrb[36].mxu1 %vm279_vm2, %v9686_v47  ;;  %4764 = vmatprep.mubr.bf16.mxu0 %v14772_v5 }
 0x4e2   : > { %9897 = vmatprep.mubr.bf16.mxu1 %v14772_v5 }
 0x4e8   : > { %13049 = vmatmul.mubr.msk.bf16.gmra.mrb[40].mxu0 %vm279_vm2, %v4553_v56 }
 0x4e9   : > { %13228 = vmatmul.mubr.msk.bf16.gmra.mrb[40].mxu1 %vm279_vm2, %v9687_v14  ;;  %4774 = vmatprep.mubr.bf16.mxu0 %v14772_v5 }
 0x4ea   : > { %9907 = vmatprep.mubr.bf16.mxu1 %v14772_v5 }
 0x4f0   : > { %13050 = vmatmul.mubr.msk.bf16.gmra.mrb[44].mxu0 %vm279_vm2, %v4554_v20 }
 0x4f1   : > { %13229 = vmatmul.mubr.msk.bf16.gmra.mrb[44].mxu1 %vm279_vm2, %v9688_v2  ;;  %4784 = vmatprep.mubr.bf16.mxu0 %v14772_v5 }
 0x4f2   : > { %9917 = vmatprep.mubr.bf16.mxu1 %v14772_v5 }
 0x4f8   : > { %13051 = vmatmul.mubr.msk.bf16.gmra.mrb[48].mxu0 %vm279_vm2, %v4555_v0 }
 0x4f9   : > { %13230 = vmatmul.mubr.msk.bf16.gmra.mrb[48].mxu1 %vm279_vm2, %v9689_v3  ;;  %4794 = vmatprep.mubr.bf16.mxu0 %v14772_v5 }
 0x4fa   : > { %9927 = vmatprep.mubr.bf16.mxu1 %v14772_v5 }
 0x500   : > { %13052 = vmatmul.mubr.msk.bf16.gmra.mrb[52].mxu0 %vm279_vm2, %v4556_v30 }
 0x501   : > { %13231 = vmatmul.mubr.msk.bf16.gmra.mrb[52].mxu1 %vm279_vm2, %v9690_v31  ;;  %4804 = vmatprep.mubr.bf16.mxu0 %v14772_v5 }
 0x502   : > { %9937 = vmatprep.mubr.bf16.mxu1 %v14772_v5 }
 0x508   : > { %13053 = vmatmul.mubr.msk.bf16.gmra.mrb[56].mxu0 %vm279_vm2, %v4557_v59 }
 0x509   : > { %13232 = vmatmul.mubr.msk.bf16.gmra.mrb[56].mxu1 %vm279_vm2, %v9691_v60  ;;  %4814 = vmatprep.mubr.bf16.mxu0 %v14772_v5 }
 0x50a   : > { %9947 = vmatprep.mubr.bf16.mxu1 %v14772_v5 }
 0x510   : > { %13054 = vmatmul.mubr.msk.bf16.gmra.mrb[60].mxu0 %vm279_vm2, %v4558_v27 }
 0x511   : > { %13233 = vmatmul.mubr.msk.bf16.gmra.mrb[60].mxu1 %vm279_vm2, %v9692_v32  ;;  %4824 = vmatprep.mubr.bf16.mxu0 %v14772_v5 }
 0x512   : > { %9957 = vmatprep.mubr.bf16.mxu1 %v14772_v5 }
 0x518   : > { %13055 = vmatmul.mubr.msk.bf16.gmra.mrb[64].mxu0 %vm279_vm2, %v4559_v57 }
 0x519   : > { %13234 = vmatmul.mubr.msk.bf16.gmra.mrb[64].mxu1 %vm279_vm2, %v9693_v58  ;;  %4834 = vmatprep.mubr.bf16.mxu0 %v14772_v5 }
 0x51a   : > { %9967 = vmatprep.mubr.bf16.mxu1 %v14772_v5  ;;  %v10266_v5 = vld [vmem:[%s19124_s3] sm:$0x3] }
 0x51b   : > { %v16345_v28 = vrot.slane %v10266_v5, %v5137_v18  ;;  %v16349_v34 = vrot.slane %v10266_v5, %v5141_v24 }
 0x520   : > { %13056 = vmatmul.mubr.msk.bf16.gmra.mrb[68].mxu0 %vm279_vm2, %v4560_v10 }
 0x521   : > { %13235 = vmatmul.mubr.msk.bf16.gmra.mrb[68].mxu1 %vm279_vm2, %v9694_v36 }
 0x56b   : > { %v4666_v35 = vpop.f32.mrb[0].mxu0 }
 0x56c   : > { %v5145_v37 = vadd.f32 %v16343_v25, %v4666_v35  ;;  %v9799_v38 = vpop.f32.mrb[0].mxu1  ;;  %v4668_v43 = vpop.f32.mrb[1].mxu0 }
 0x56d   : > { %v10278_v44 = vadd.f32 %v16345_v28, %v9799_v38  ;;  %v5146_v47 = vadd.f32 %v16347_v29, %v4668_v43  ;;  %v9801_v48 = vpop.f32.mrb[1].mxu1  ;;  %v4670_v53 = vpop.f32.mrb[2].mxu0 }
 0x56e   : > { %v16354_v54 = vmax.f32 %v5145_v37, 0.0  ;;  %v10279_v55 = vadd.f32 %v16349_v34, %v9801_v48  ;;  %v5147_v56 = vadd.f32 %v16343_v25, %v4670_v53  ;;  %v9803_v14 = vpop.f32.mrb[2].mxu1  ;;  %v4672_v62 = vpop.f32.mrb[3].mxu0 }
 0x56f   : > { %v16358_v1 = vmax.f32 %v10278_v44, 0.0  ;;  %v16360_v6 = vmax.f32 %v5146_v47, 0.0  ;;  %v10280_v15 = vadd.f32 %v16345_v28, %v9803_v14  ;;  %v5148_v20 = vadd.f32 %v16347_v29, %v4672_v62  ;;  %v9805_v2 = vpop.f32.mrb[3].mxu1 }
 0x570   : > { %v16364_v26 = vmax.f32 %v10279_v55, 0.0  ;;  %v16366_v33 = vmax.f32 %v5147_v56, 0.0  ;;  %v10281_v46 = vadd.f32 %v16349_v34, %v9805_v2  ;;  %v10638_v52 = vmul.f32 %v16354_v54, %v16354_v54 }
 0x571   : > { %v16371_v0 = vmax.f32 %v10280_v15, 0.0  ;;  %v16373_v3 = vmax.f32 %v5148_v20, 0.0  ;;  %v11070_v11 = vmul.f32 %v16358_v1, %v16358_v1  ;;  %v10639_v12 = vmul.f32 %v16360_v6, %v16360_v6 }
 0x572   : > { %v10640_v22 = vmul.f32 %v16366_v33, %v16366_v33  ;;  %v16381_v23 = vmax.f32 %v10281_v46, 0.0  ;;  %v11071_v30 = vmul.f32 %v16364_v26, %v16364_v26 }
 0x573   : > { %v11072_v31 = vmul.f32 %v16371_v0, %v16371_v0  ;;  %v10641_v41 = vmul.f32 %v16373_v3, %v16373_v3  ;;  %v4676_v42 = vpop.f32.mrb[4].mxu0  ;;  %v10710_v49 = vadd.f32 %v10639_v12, %v10638_v52 }
 0x574   : > { %v11073_v50 = vmul.f32 %v16381_v23, %v16381_v23  ;;  %v5149_v59 = vadd.f32 %v16343_v25, %v4676_v42  ;;  %v9809_v60 = vpop.f32.mrb[4].mxu1  ;;  %v4678_v9 = vpop.f32.mrb[5].mxu0  ;;  %v11142_v7 = vadd.f32 %v11071_v30, %v11070_v11 }
 0x575   : > { %v10282_v13 = vadd.f32 %v16345_v28, %v9809_v60  ;;  %v5150_v21 = vadd.f32 %v16347_v29, %v4678_v9  ;;  %v9811_v27 = vpop.f32.mrb[5].mxu1  ;;  %10711 = vadd.xlane.f32.xlu0 %v10710_v49  ;;  %v4680_v32 = vpop.f32.mrb[6].mxu0  ;;  %v10713_v39 = vadd.f32 %v10641_v41, %v10640_v22 }
 0x576   : > { %v16394_v40 = vmax.f32 %v5149_v59, 0.0  ;;  %v10283_v45 = vadd.f32 %v16349_v34, %v9811_v27  ;;  %11143 = vadd.xlane.f32.xlu1 %v11142_v7  ;;  %v9813_v51 = vpop.f32.mrb[6].mxu1  ;;  %v5151_v57 = vadd.f32 %v16343_v25, %v4680_v32  ;;  %v4682_v58 = vpop.f32.mrb[7].mxu0  ;;  %v11145_v61 = vadd.f32 %v11073_v50, %v11072_v31 }
 0x577   : > { %v16398_v63 = vmax.f32 %v10282_v13, 0.0  ;;  %v16400_v4 = vmax.f32 %v5150_v21, 0.0  ;;  %v10284_v8 = vadd.f32 %v16345_v28, %v9813_v51  ;;  %v5152_v10 = vadd.f32 %v16347_v29, %v4682_v58  ;;  %v9815_v36 = vpop.f32.mrb[7].mxu1 }
 0x578   : > { %v10642_v16 = vmul.f32 %v16394_v40, %v16394_v40  ;;  %v16406_v18 = vmax.f32 %v10283_v45, 0.0  ;;  %v16408_v19 = vmax.f32 %v5151_v57, 0.0  ;;  %v10285_v24 = vadd.f32 %v16349_v34, %v9815_v36 }
 0x579   : > { %v11074_v5 = vmul.f32 %v16398_v63, %v16398_v63  ;;  %v10643_v35 = vmul.f32 %v16400_v4, %v16400_v4  ;;  %v16415_v37 = vmax.f32 %v10284_v8, 0.0  ;;  %v16417_v38 = vmax.f32 %v5152_v10, 0.0  ;;  %10714 = vadd.xlane.f32.xlu0 %v10713_v39 }
 0x57a   : > { %v11075_v43 = vmul.f32 %v16406_v18, %v16406_v18  ;;  %v10644_v44 = vmul.f32 %v16408_v19, %v16408_v19  ;;  %v16423_v47 = vmax.f32 %v10285_v24, 0.0  ;;  %11146 = vadd.xlane.f32.xlu1 %v11145_v61 }
 0x57b   : > { %v11076_v48 = vmul.f32 %v16415_v37, %v16415_v37  ;;  %v10645_v53 = vmul.f32 %v16417_v38, %v16417_v38  ;;  %v4686_v55 = vpop.f32.mrb[8].mxu0  ;;  %v10716_v56 = vadd.f32 %v10643_v35, %v10642_v16 }
 0x57c   : > { %v11077_v14 = vmul.f32 %v16423_v47, %v16423_v47  ;;  %v5153_v62 = vadd.f32 %v16343_v25, %v4686_v55  ;;  %v9819_v15 = vpop.f32.mrb[8].mxu1  ;;  %v4688_v20 = vpop.f32.mrb[9].mxu0  ;;  %v11148_v2 = vadd.f32 %v11075_v43, %v11074_v5 }
 0x57d   : > { %v10286_v46 = vadd.f32 %v16345_v28, %v9819_v15  ;;  %v5154_v52 = vadd.f32 %v16347_v29, %v4688_v20  ;;  %v9821_v11 = vpop.f32.mrb[9].mxu1  ;;  %10717 = vadd.xlane.f32.xlu0 %v10716_v56  ;;  %v4690_v12 = vpop.f32.mrb[10].mxu0  ;;  %v10719_v22 = vadd.f32 %v10645_v53, %v10644_v44 }
 0x57e   : > { %v16434_v30 = vmax.f32 %v5153_v62, 0.0  ;;  %v10287_v31 = vadd.f32 %v16349_v34, %v9821_v11  ;;  %11149 = vadd.xlane.f32.xlu1 %v11148_v2  ;;  %v9823_v41 = vpop.f32.mrb[10].mxu1  ;;  %v5155_v42 = vadd.f32 %v16343_v25, %v4690_v12  ;;  %v4692_v49 = vpop.f32.mrb[11].mxu0  ;;  %v11151_v50 = vadd.f32 %v11077_v14, %v11076_v48 }
 0x57f   : > { %v16438_v59 = vmax.f32 %v10286_v46, 0.0  ;;  %v16440_v60 = vmax.f32 %v5154_v52, 0.0  ;;  %v10288_v9 = vadd.f32 %v16345_v28, %v9823_v41  ;;  %v5156_v7 = vadd.f32 %v16347_v29, %v4692_v49  ;;  %v9825_v13 = vpop.f32.mrb[11].mxu1 }
 0x580   : > { %v10646_v21 = vmul.f32 %v16434_v30, %v16434_v30  ;;  %v16446_v27 = vmax.f32 %v10287_v31, 0.0  ;;  %v16448_v32 = vmax.f32 %v5155_v42, 0.0  ;;  %v10289_v39 = vadd.f32 %v16349_v34, %v9825_v13 }
 0x581   : > { %v11078_v45 = vmul.f32 %v16438_v59, %v16438_v59  ;;  %v10647_v51 = vmul.f32 %v16440_v60, %v16440_v60  ;;  %v16455_v57 = vmax.f32 %v10288_v9, 0.0  ;;  %v16457_v58 = vmax.f32 %v5156_v7, 0.0  ;;  %10720 = vadd.xlane.f32.xlu0 %v10719_v22 }
 0x582   : > { %v11079_v61 = vmul.f32 %v16446_v27, %v16446_v27  ;;  %v10648_v8 = vmul.f32 %v16448_v32, %v16448_v32  ;;  %v16463_v10 = vmax.f32 %v10289_v39, 0.0  ;;  %11152 = vadd.xlane.f32.xlu1 %v11151_v50 }
 0x583   : > { %v11080_v36 = vmul.f32 %v16455_v57, %v16455_v57  ;;  %v10649_v16 = vmul.f32 %v16457_v58, %v16457_v58  ;;  %v4696_v24 = vpop.f32.mrb[12].mxu0  ;;  %v10722_v5 = vadd.f32 %v10647_v51, %v10646_v21 }
 0x584   : > { %v11081_v35 = vmul.f32 %v16463_v10, %v16463_v10  ;;  %v5157_v43 = vadd.f32 %v16343_v25, %v4696_v24  ;;  %v9829_v44 = vpop.f32.mrb[12].mxu1  ;;  %v4698_v48 = vpop.f32.mrb[13].mxu0  ;;  %v11154_v53 = vadd.f32 %v11079_v61, %v11078_v45 }
 0x585   : > { %v10290_v55 = vadd.f32 %v16345_v28, %v9829_v44  ;;  %v5158_v56 = vadd.f32 %v16347_v29, %v4698_v48  ;;  %v9831_v14 = vpop.f32.mrb[13].mxu1  ;;  %10723 = vadd.xlane.f32.xlu0 %v10722_v5  ;;  %v4700_v62 = vpop.f32.mrb[14].mxu0  ;;  %v10725_v15 = vadd.f32 %v10649_v16, %v10648_v8 }
 0x586   : > { %v16474_v20 = vmax.f32 %v5157_v43, 0.0  ;;  %v10291_v2 = vadd.f32 %v16349_v34, %v9831_v14  ;;  %11155 = vadd.xlane.f32.xlu1 %v11154_v53  ;;  %v9833_v46 = vpop.f32.mrb[14].mxu1  ;;  %v5159_v52 = vadd.f32 %v16343_v25, %v4700_v62  ;;  %v4702_v11 = vpop.f32.mrb[15].mxu0  ;;  %v11157_v12 = vadd.f32 %v11081_v35, %v11080_v36 }
 0x587   : > { %v16478_v22 = vmax.f32 %v10290_v55, 0.0  ;;  %v16480_v31 = vmax.f32 %v5158_v56, 0.0  ;;  %v10292_v41 = vadd.f32 %v16345_v28, %v9833_v46  ;;  %v5160_v42 = vadd.f32 %v16347_v29, %v4702_v11  ;;  %v9835_v49 = vpop.f32.mrb[15].mxu1 }
 0x588   : > { %v10650_v50 = vmul.f32 %v16474_v20, %v16474_v20  ;;  %v16486_v9 = vmax.f32 %v10291_v2, 0.0  ;;  %v16488_v7 = vmax.f32 %v5159_v52, 0.0  ;;  %v10293_v13 = vadd.f32 %v16349_v34, %v9835_v49 }
 0x589   : > { %v11082_v21 = vmul.f32 %v16478_v22, %v16478_v22  ;;  %v10651_v39 = vmul.f32 %v16480_v31, %v16480_v31  ;;  %v16495_v45 = vmax.f32 %v10292_v41, 0.0  ;;  %v16497_v51 = vmax.f32 %v5160_v42, 0.0  ;;  %10726 = vadd.xlane.f32.xlu0 %v10725_v15 }
 0x58a   : > { %19245 = vst [vmem:[#allocation5_spill] sm:$0xff] %v16488_v7  ;;  %v11083_v61 = vmul.f32 %v16486_v9, %v16486_v9  ;;  %v10652_v8 = vmul.f32 %v16488_v7, %v16488_v7  ;;  %v16503_v36 = vmax.f32 %v10293_v13, 0.0  ;;  %11158 = vadd.xlane.f32.xlu1 %v11157_v12 }
 0x58b   : > { %19246 = vst [vmem:[#allocation6_spill] sm:$0xff] %v16495_v45  ;;  %19247 = vst [vmem:[#allocation7_spill] sm:$0xff] %v16497_v51  ;;  %v11084_v16 = vmul.f32 %v16495_v45, %v16495_v45  ;;  %v10653_v24 = vmul.f32 %v16497_v51, %v16497_v51  ;;  %v4706_v5 = vpop.f32.mrb[16].mxu0  ;;  %v10728_v35 = vadd.f32 %v10651_v39, %v10650_v50 }
 0x58c   : > { %19248 = vst [vmem:[#allocation8_spill] sm:$0xff] %v16503_v36  ;;  %v11085_v43 = vmul.f32 %v16503_v36, %v16503_v36  ;;  %v5161_v44 = vadd.f32 %v16343_v25, %v4706_v5  ;;  %v9839_v48 = vpop.f32.mrb[16].mxu1  ;;  %v4708_v53 = vpop.f32.mrb[17].mxu0  ;;  %v11160_v55 = vadd.f32 %v11083_v61, %v11082_v21 }
 0x58d   : > { %v10294_v56 = vadd.f32 %v16345_v28, %v9839_v48  ;;  %v5162_v14 = vadd.f32 %v16347_v29, %v4708_v53  ;;  %v9841_v62 = vpop.f32.mrb[17].mxu1  ;;  %10729 = vadd.xlane.f32.xlu0 %v10728_v35  ;;  %v4710_v15 = vpop.f32.mrb[18].mxu0  ;;  %v10731_v2 = vadd.f32 %v10653_v24, %v10652_v8 }
 0x58e   : > { %v16514_v46 = vmax.f32 %v5161_v44, 0.0  ;;  %v10295_v52 = vadd.f32 %v16349_v34, %v9841_v62  ;;  %11161 = vadd.xlane.f32.xlu1 %v11160_v55  ;;  %v9843_v11 = vpop.f32.mrb[18].mxu1  ;;  %v5163_v12 = vadd.f32 %v16343_v25, %v4710_v15  ;;  %v4712_v41 = vpop.f32.mrb[19].mxu0  ;;  %v11163_v42 = vadd.f32 %v11085_v43, %v11084_v16 }
 0x58f   : > { %v16518_v49 = vmax.f32 %v10294_v56, 0.0  ;;  %v16520_v50 = vmax.f32 %v5162_v14, 0.0  ;;  %v10296_v13 = vadd.f32 %v16345_v28, %v9843_v11  ;;  %v5164_v21 = vadd.f32 %v16347_v29, %v4712_v41  ;;  %v9845_v39 = vpop.f32.mrb[19].mxu1 }
 0x590   : > { %19249 = vst [vmem:[#allocation9_spill] sm:$0xff] %v16514_v46  ;;  %v10654_v61 = vmul.f32 %v16514_v46, %v16514_v46  ;;  %v16526_v8 = vmax.f32 %v10295_v52, 0.0  ;;  %v16528_v24 = vmax.f32 %v5163_v12, 0.0  ;;  %v10297_v5 = vadd.f32 %v16349_v34, %v9845_v39 }
 0x591   : > { %19250 = vst [vmem:[#allocation10_spill] sm:$0xff] %v16518_v49  ;;  %19251 = vst [vmem:[#allocation11_spill] sm:$0xff] %v16520_v50  ;;  %v11086_v16 = vmul.f32 %v16518_v49, %v16518_v49  ;;  %v10655_v35 = vmul.f32 %v16520_v50, %v16520_v50  ;;  %v16535_v43 = vmax.f32 %v10296_v13, 0.0  ;;  %v16537_v44 = vmax.f32 %v5164_v21, 0.0  ;;  %10732 = vadd.xlane.f32.xlu0 %v10731_v2 }
 0x592   : > { %19252 = vst [vmem:[#allocation12_spill] sm:$0xff] %v16526_v8  ;;  %19253 = vst [vmem:[#allocation13_spill] sm:$0xff] %v16528_v24  ;;  %v11087_v48 = vmul.f32 %v16526_v8, %v16526_v8  ;;  %v10656_v53 = vmul.f32 %v16528_v24, %v16528_v24  ;;  %v16543_v55 = vmax.f32 %v10297_v5, 0.0  ;;  %11164 = vadd.xlane.f32.xlu1 %v11163_v42 }
 0x593   : > { %19254 = vst [vmem:[#allocation14_spill] sm:$0xff] %v16535_v43  ;;  %19255 = vst [vmem:[#allocation15_spill] sm:$0xff] %v16537_v44  ;;  %v11088_v56 = vmul.f32 %v16535_v43, %v16535_v43  ;;  %v10657_v14 = vmul.f32 %v16537_v44, %v16537_v44  ;;  %v4716_v62 = vpop.f32.mrb[20].mxu0  ;;  %v10734_v15 = vadd.f32 %v10655_v35, %v10654_v61 }
 0x594   : > { %19256 = vst [vmem:[#allocation16_spill] sm:$0xff] %v16543_v55  ;;  %v11089_v2 = vmul.f32 %v16543_v55, %v16543_v55  ;;  %v5165_v52 = vadd.f32 %v16343_v25, %v4716_v62  ;;  %v9849_v11 = vpop.f32.mrb[20].mxu1  ;;  %v4718_v12 = vpop.f32.mrb[21].mxu0  ;;  %v11166_v41 = vadd.f32 %v11087_v48, %v11086_v16 }
 0x595   : > { %v10298_v13 = vadd.f32 %v16345_v28, %v9849_v11  ;;  %v5166_v42 = vadd.f32 %v16347_v29, %v4718_v12  ;;  %v9851_v21 = vpop.f32.mrb[21].mxu1  ;;  %10735 = vadd.xlane.f32.xlu0 %v10734_v15  ;;  %v4720_v39 = vpop.f32.mrb[22].mxu0  ;;  %v10737_v5 = vadd.f32 %v10657_v14, %v10656_v53 }
 0x596   : > { %v16554_v17 = vmax.f32 %v5165_v52, 0.0  ;;  %v10299_v61 = vadd.f32 %v16349_v34, %v9851_v21  ;;  %11167 = vadd.xlane.f32.xlu1 %v11166_v41  ;;  %v9853_v35 = vpop.f32.mrb[22].mxu1  ;;  %v5167_v55 = vadd.f32 %v16343_v25, %v4720_v39  ;;  %v4722_v62 = vpop.f32.mrb[23].mxu0  ;;  %v11169_v43 = vadd.f32 %v11089_v2, %v11088_v56 }
 0x597   : > { %v16558_v44 = vmax.f32 %v10298_v13, 0.0  ;;  %v16560_v16 = vmax.f32 %v5166_v42, 0.0  ;;  %v10300_v48 = vadd.f32 %v16345_v28, %v9853_v35  ;;  %v5168_v15 = vadd.f32 %v16347_v29, %v4722_v62  ;;  %v9855_v11 = vpop.f32.mrb[23].mxu1 }
 0x598   : > { %19257 = vst [vmem:[#allocation17_spill] sm:$0xff] %v16554_v17  ;;  %v10658_v53 = vmul.f32 %v16554_v17, %v16554_v17  ;;  %v16566_v14 = vmax.f32 %v10299_v61, 0.0  ;;  %v16568_v52 = vmax.f32 %v5167_v55, 0.0  ;;  %v10301_v12 = vadd.f32 %v16349_v34, %v9855_v11 }
 0x599   : > { %19258 = vst [vmem:[#allocation18_spill] sm:$0xff] %v16558_v44  ;;  %19259 = vst [vmem:[#allocation19_spill] sm:$0xff] %v16560_v16  ;;  %v11090_v56 = vmul.f32 %v16558_v44, %v16558_v44  ;;  %v10659_v2 = vmul.f32 %v16560_v16, %v16560_v16  ;;  %v16575_v41 = vmax.f32 %v10300_v48, 0.0  ;;  %v16577_v13 = vmax.f32 %v5168_v15, 0.0  ;;  %10738 = vadd.xlane.f32.xlu0 %v10737_v5 }
 0x59a   : > { %19260 = vst [vmem:[#allocation20_spill] sm:$0xff] %v16566_v14  ;;  %19261 = vst [vmem:[#allocation21_spill] sm:$0xff] %v16568_v52  ;;  %v11091_v42 = vmul.f32 %v16566_v14, %v16566_v14  ;;  %v10660_v55 = vmul.f32 %v16568_v52, %v16568_v52  ;;  %v16583_v21 = vmax.f32 %v10301_v12, 0.0  ;;  %11170 = vadd.xlane.f32.xlu1 %v11169_v43 }
 0x59b   : > { %19262 = vst [vmem:[#allocation22_spill] sm:$0xff] %v16575_v41  ;;  %19263 = vst [vmem:[#allocation23_spill] sm:$0xff] %v16577_v13  ;;  %v11092_v39 = vmul.f32 %v16575_v41, %v16575_v41  ;;  %v10661_v61 = vmul.f32 %v16577_v13, %v16577_v13  ;;  %v4726_v35 = vpop.f32.mrb[24].mxu0  ;;  %v10740_v62 = vadd.f32 %v10659_v2, %v10658_v53 }
 0x59c   : > { %19264 = vst [vmem:[#allocation24_spill] sm:$0xff] %v16583_v21  ;;  %v11093_v5 = vmul.f32 %v16583_v21, %v16583_v21  ;;  %v5169_v48 = vadd.f32 %v16343_v25, %v4726_v35  ;;  %v9859_v15 = vpop.f32.mrb[24].mxu1  ;;  %v4728_v11 = vpop.f32.mrb[25].mxu0  ;;  %v11172_v14 = vadd.f32 %v11091_v42, %v11090_v56 }
 0x59d   : > { %v10302_v12 = vadd.f32 %v16345_v28, %v9859_v15  ;;  %v5170_v43 = vadd.f32 %v16347_v29, %v4728_v11  ;;  %v9861_v52 = vpop.f32.mrb[25].mxu1  ;;  %10741 = vadd.xlane.f32.xlu0 %v10740_v62  ;;  %v4730_v41 = vpop.f32.mrb[26].mxu0  ;;  %v10743_v44 = vadd.f32 %v10661_v61, %v10660_v55 }
 0x59e   : > { %v16594_v16 = vmax.f32 %v5169_v48, 0.0  ;;  %v10303_v53 = vadd.f32 %v16349_v34, %v9861_v52  ;;  %11173 = vadd.xlane.f32.xlu1 %v11172_v14  ;;  %v9863_v2 = vpop.f32.mrb[26].mxu1  ;;  %v5171_v21 = vadd.f32 %v16343_v25, %v4730_v41  ;;  %v4732_v35 = vpop.f32.mrb[27].mxu0  ;;  %v11175_v13 = vadd.f32 %v11093_v5, %v11092_v39 }
 0x59f   : > { %v16598_v17 = vmax.f32 %v10302_v12, 0.0  ;;  %v16600_v56 = vmax.f32 %v5170_v43, 0.0  ;;  %v10304_v42 = vadd.f32 %v16345_v28, %v9863_v2  ;;  %v5172_v62 = vadd.f32 %v16347_v29, %v4732_v35  ;;  %v9865_v15 = vpop.f32.mrb[27].mxu1 }
 0x5a0   : > { %19265 = vst [vmem:[#allocation25_spill] sm:$0xff] %v16594_v16  ;;  %v10662_v55 = vmul.f32 %v16594_v16, %v16594_v16  ;;  %v16606_v61 = vmax.f32 %v10303_v53, 0.0  ;;  %v16608_v14 = vmax.f32 %v5171_v21, 0.0  ;;  %v10305_v52 = vadd.f32 %v16349_v34, %v9865_v15 }
 0x5a1   : > { %19266 = vst [vmem:[#allocation26_spill] sm:$0xff] %v16598_v17  ;;  %19267 = vst [vmem:[#allocation27_spill] sm:$0xff] %v16600_v56  ;;  %v11094_v41 = vmul.f32 %v16598_v17, %v16598_v17  ;;  %v10663_v39 = vmul.f32 %v16600_v56, %v16600_v56  ;;  %v16615_v5 = vmax.f32 %v10304_v42, 0.0  ;;  %v16617_v48 = vmax.f32 %v5172_v62, 0.0  ;;  %10744 = vadd.xlane.f32.xlu0 %v10743_v44 }
 0x5a2   : > { %19268 = vst [vmem:[#allocation28_spill] sm:$0xff] %v16606_v61  ;;  %19269 = vst [vmem:[#allocation29_spill] sm:$0xff] %v16608_v14  ;;  %v11095_v11 = vmul.f32 %v16606_v61, %v16606_v61  ;;  %v10664_v21 = vmul.f32 %v16608_v14, %v16608_v14  ;;  %v16623_v12 = vmax.f32 %v10305_v52, 0.0  ;;  %11176 = vadd.xlane.f32.xlu1 %v11175_v13 }
 0x5a3   : > { %19270 = vst [vmem:[#allocation30_spill] sm:$0xff] %v16615_v5  ;;  %19271 = vst [vmem:[#allocation31_spill] sm:$0xff] %v16617_v48  ;;  %v11096_v43 = vmul.f32 %v16615_v5, %v16615_v5  ;;  %v10665_v53 = vmul.f32 %v16617_v48, %v16617_v48  ;;  %v4736_v2 = vpop.f32.mrb[28].mxu0  ;;  %v10746_v35 = vadd.f32 %v10663_v39, %v10662_v55 }
 0x5a4   : > { %19272 = vst [vmem:[#allocation32_spill] sm:$0xff] %v16623_v12  ;;  %v11097_v44 = vmul.f32 %v16623_v12, %v16623_v12  ;;  %v5173_v42 = vadd.f32 %v16343_v25, %v4736_v2  ;;  %v9869_v62 = vpop.f32.mrb[28].mxu1  ;;  %v4738_v15 = vpop.f32.mrb[29].mxu0  ;;  %v11178_v61 = vadd.f32 %v11095_v11, %v11094_v41 }
 0x5a5   : > { %v10306_v52 = vadd.f32 %v16345_v28, %v9869_v62  ;;  %v5174_v13 = vadd.f32 %v16347_v29, %v4738_v15  ;;  %v9871_v14 = vpop.f32.mrb[29].mxu1  ;;  %10747 = vadd.xlane.f32.xlu0 %v10746_v35  ;;  %v4740_v5 = vpop.f32.mrb[30].mxu0  ;;  %v10749_v17 = vadd.f32 %v10665_v53, %v10664_v21 }
 0x5a6   : > { %v16634_v56 = vmax.f32 %v5173_v42, 0.0  ;;  %v10307_v55 = vadd.f32 %v16349_v34, %v9871_v14  ;;  %11179 = vadd.xlane.f32.xlu1 %v11178_v61  ;;  %v9873_v39 = vpop.f32.mrb[30].mxu1  ;;  %v5175_v12 = vadd.f32 %v16343_v25, %v4740_v5  ;;  %v4742_v2 = vpop.f32.mrb[31].mxu0  ;;  %v11181_v48 = vadd.f32 %v11097_v44, %v11096_v43 }
 0x5a7   : > { %v16638_v16 = vmax.f32 %v10306_v52, 0.0  ;;  %v16640_v41 = vmax.f32 %v5174_v13, 0.0  ;;  %v10308_v11 = vadd.f32 %v16345_v28, %v9873_v39  ;;  %v5176_v35 = vadd.f32 %v16347_v29, %v4742_v2  ;;  %v9875_v62 = vpop.f32.mrb[31].mxu1 }
 0x5a8   : > { %19273 = vst [vmem:[#allocation33_spill] sm:$0xff] %v16634_v56  ;;  %v10666_v21 = vmul.f32 %v16634_v56, %v16634_v56  ;;  %v16646_v53 = vmax.f32 %v10307_v55, 0.0  ;;  %v16648_v61 = vmax.f32 %v5175_v12, 0.0  ;;  %v10309_v14 = vadd.f32 %v16349_v34, %v9875_v62 }
 0x5a9   : > { %19274 = vst [vmem:[#allocation34_spill] sm:$0xff] %v16638_v16  ;;  %19275 = vst [vmem:[#allocation35_spill] sm:$0xff] %v16640_v41  ;;  %v11098_v5 = vmul.f32 %v16638_v16, %v16638_v16  ;;  %v10667_v43 = vmul.f32 %v16640_v41, %v16640_v41  ;;  %v16655_v44 = vmax.f32 %v10308_v11, 0.0  ;;  %v16657_v42 = vmax.f32 %v5176_v35, 0.0  ;;  %10750 = vadd.xlane.f32.xlu0 %v10749_v17 }
 0x5aa   : > { %19276 = vst [vmem:[#allocation36_spill] sm:$0xff] %v16646_v53  ;;  %19277 = vst [vmem:[#allocation37_spill] sm:$0xff] %v16648_v61  ;;  %v11099_v15 = vmul.f32 %v16646_v53, %v16646_v53  ;;  %v10668_v12 = vmul.f32 %v16648_v61, %v16648_v61  ;;  %v16663_v52 = vmax.f32 %v10309_v14, 0.0  ;;  %11182 = vadd.xlane.f32.xlu1 %v11181_v48 }
 0x5ab   : > { %19278 = vst [vmem:[#allocation38_spill] sm:$0xff] %v16655_v44  ;;  %19279 = vst [vmem:[#allocation39_spill] sm:$0xff] %v16657_v42  ;;  %v11100_v13 = vmul.f32 %v16655_v44, %v16655_v44  ;;  %v10669_v55 = vmul.f32 %v16657_v42, %v16657_v42  ;;  %v4746_v39 = vpop.f32.mrb[32].mxu0  ;;  %v10752_v2 = vadd.f32 %v10667_v43, %v10666_v21 }
 0x5ac   : > { %19280 = vst [vmem:[#allocation40_spill] sm:$0xff] %v16663_v52  ;;  %v11101_v17 = vmul.f32 %v16663_v52, %v16663_v52  ;;  %v5177_v11 = vadd.f32 %v16343_v25, %v4746_v39  ;;  %v9879_v35 = vpop.f32.mrb[32].mxu1  ;;  %v4748_v62 = vpop.f32.mrb[33].mxu0  ;;  %v11184_v53 = vadd.f32 %v11099_v15, %v11098_v5 }
 0x5ad   : > { %v10310_v14 = vadd.f32 %v16345_v28, %v9879_v35  ;;  %v5178_v48 = vadd.f32 %v16347_v29, %v4748_v62  ;;  %v9881_v61 = vpop.f32.mrb[33].mxu1  ;;  %10753 = vadd.xlane.f32.xlu0 %v10752_v2  ;;  %v4750_v44 = vpop.f32.mrb[34].mxu0  ;;  %v10755_v16 = vadd.f32 %v10669_v55, %v10668_v12 }
 0x5ae   : > { %v16674_v41 = vmax.f32 %v5177_v11, 0.0  ;;  %v10311_v21 = vadd.f32 %v16349_v34, %v9881_v61  ;;  %11185 = vadd.xlane.f32.xlu1 %v11184_v53  ;;  %v9883_v43 = vpop.f32.mrb[34].mxu1  ;;  %v5179_v52 = vadd.f32 %v16343_v25, %v4750_v44  ;;  %v4752_v39 = vpop.f32.mrb[35].mxu0  ;;  %v11187_v42 = vadd.f32 %v11101_v17, %v11100_v13 }
 0x5af   : > { %v16678_v56 = vmax.f32 %v10310_v14, 0.0  ;;  %v16680_v5 = vmax.f32 %v5178_v48, 0.0  ;;  %v10312_v15 = vadd.f32 %v16345_v28, %v9883_v43  ;;  %v5180_v2 = vadd.f32 %v16347_v29, %v4752_v39  ;;  %v9885_v35 = vpop.f32.mrb[35].mxu1 }
 0x5b0   : > { %19281 = vst [vmem:[#allocation41_spill] sm:$0xff] %v16674_v41  ;;  %v10670_v12 = vmul.f32 %v16674_v41, %v16674_v41  ;;  %v16686_v55 = vmax.f32 %v10311_v21, 0.0  ;;  %v16688_v53 = vmax.f32 %v5179_v52, 0.0  ;;  %v10313_v61 = vadd.f32 %v16349_v34, %v9885_v35 }
 0x5b1   : > { %19282 = vst [vmem:[#allocation42_spill] sm:$0xff] %v16678_v56  ;;  %19283 = vst [vmem:[#allocation43_spill] sm:$0xff] %v16680_v5  ;;  %v11102_v44 = vmul.f32 %v16678_v56, %v16678_v56  ;;  %v10671_v13 = vmul.f32 %v16680_v5, %v16680_v5  ;;  %v16695_v17 = vmax.f32 %v10312_v15, 0.0  ;;  %v16697_v11 = vmax.f32 %v5180_v2, 0.0  ;;  %10756 = vadd.xlane.f32.xlu0 %v10755_v16 }
 0x5b2   : > { %19284 = vst [vmem:[#allocation44_spill] sm:$0xff] %v16686_v55  ;;  %19285 = vst [vmem:[#allocation45_spill] sm:$0xff] %v16688_v53  ;;  %v11103_v62 = vmul.f32 %v16686_v55, %v16686_v55  ;;  %v10672_v52 = vmul.f32 %v16688_v53, %v16688_v53  ;;  %v16703_v14 = vmax.f32 %v10313_v61, 0.0  ;;  %11188 = vadd.xlane.f32.xlu1 %v11187_v42 }
 0x5b3   : > { %19286 = vst [vmem:[#allocation46_spill] sm:$0xff] %v16695_v17  ;;  %19287 = vst [vmem:[#allocation47_spill] sm:$0xff] %v16697_v11  ;;  %v11104_v48 = vmul.f32 %v16695_v17, %v16695_v17  ;;  %v10673_v21 = vmul.f32 %v16697_v11, %v16697_v11  ;;  %v4756_v43 = vpop.f32.mrb[36].mxu0  ;;  %v10758_v39 = vadd.f32 %v10671_v13, %v10670_v12 }
 0x5b4   : > { %19288 = vst [vmem:[#allocation48_spill] sm:$0xff] %v16703_v14  ;;  %v11105_v16 = vmul.f32 %v16703_v14, %v16703_v14  ;;  %v5181_v15 = vadd.f32 %v16343_v25, %v4756_v43  ;;  %v9889_v2 = vpop.f32.mrb[36].mxu1  ;;  %v4758_v35 = vpop.f32.mrb[37].mxu0  ;;  %v11190_v55 = vadd.f32 %v11103_v62, %v11102_v44 }
 0x5b5   : > { %v10314_v61 = vadd.f32 %v16345_v28, %v9889_v2  ;;  %v5182_v42 = vadd.f32 %v16347_v29, %v4758_v35  ;;  %v9891_v53 = vpop.f32.mrb[37].mxu1  ;;  %10759 = vadd.xlane.f32.xlu0 %v10758_v39  ;;  %v4760_v17 = vpop.f32.mrb[38].mxu0  ;;  %v10761_v56 = vadd.f32 %v10673_v21, %v10672_v52 }
 0x5b6   : > { %v16714_v5 = vmax.f32 %v5181_v15, 0.0  ;;  %v10315_v12 = vadd.f32 %v16349_v34, %v9891_v53  ;;  %11191 = vadd.xlane.f32.xlu1 %v11190_v55  ;;  %v9893_v13 = vpop.f32.mrb[38].mxu1  ;;  %v5183_v14 = vadd.f32 %v16343_v25, %v4760_v17  ;;  %v4762_v43 = vpop.f32.mrb[39].mxu0  ;;  %v11193_v11 = vadd.f32 %v11105_v16, %v11104_v48 }
 0x5b7   : > { %v16718_v41 = vmax.f32 %v10314_v61, 0.0  ;;  %v16720_v44 = vmax.f32 %v5182_v42, 0.0  ;;  %v10316_v62 = vadd.f32 %v16345_v28, %v9893_v13  ;;  %v5184_v39 = vadd.f32 %v16347_v29, %v4762_v43  ;;  %v9895_v2 = vpop.f32.mrb[39].mxu1 }
 0x5b8   : > { %19289 = vst [vmem:[#allocation49_spill] sm:$0xff] %v16714_v5  ;;  %v10674_v52 = vmul.f32 %v16714_v5, %v16714_v5  ;;  %v16726_v21 = vmax.f32 %v10315_v12, 0.0  ;;  %v16728_v55 = vmax.f32 %v5183_v14, 0.0  ;;  %v10317_v53 = vadd.f32 %v16349_v34, %v9895_v2 }
 0x5b9   : > { %19290 = vst [vmem:[#allocation50_spill] sm:$0xff] %v16718_v41  ;;  %19291 = vst [vmem:[#allocation51_spill] sm:$0xff] %v16720_v44  ;;  %v11106_v17 = vmul.f32 %v16718_v41, %v16718_v41  ;;  %v10675_v48 = vmul.f32 %v16720_v44, %v16720_v44  ;;  %v16735_v16 = vmax.f32 %v10316_v62, 0.0  ;;  %v16737_v15 = vmax.f32 %v5184_v39, 0.0  ;;  %10762 = vadd.xlane.f32.xlu0 %v10761_v56 }
 0x5ba   : > { %19292 = vst [vmem:[#allocation52_spill] sm:$0xff] %v16726_v21  ;;  %19293 = vst [vmem:[#allocation53_spill] sm:$0xff] %v16728_v55  ;;  %v11107_v35 = vmul.f32 %v16726_v21, %v16726_v21  ;;  %v10676_v14 = vmul.f32 %v16728_v55, %v16728_v55  ;;  %v16743_v61 = vmax.f32 %v10317_v53, 0.0  ;;  %11194 = vadd.xlane.f32.xlu1 %v11193_v11 }
 0x5bb   : > { %19294 = vst [vmem:[#allocation54_spill] sm:$0xff] %v16735_v16  ;;  %19295 = vst [vmem:[#allocation55_spill] sm:$0xff] %v16737_v15  ;;  %v11108_v42 = vmul.f32 %v16735_v16, %v16735_v16  ;;  %v10677_v12 = vmul.f32 %v16737_v15, %v16737_v15  ;;  %v4766_v13 = vpop.f32.mrb[40].mxu0  ;;  %v10764_v43 = vadd.f32 %v10675_v48, %v10674_v52 }
 0x5bc   : > { %19296 = vst [vmem:[#allocation56_spill] sm:$0xff] %v16743_v61  ;;  %v11109_v56 = vmul.f32 %v16743_v61, %v16743_v61  ;;  %v5185_v62 = vadd.f32 %v16343_v25, %v4766_v13  ;;  %v9899_v39 = vpop.f32.mrb[40].mxu1  ;;  %v4768_v2 = vpop.f32.mrb[41].mxu0  ;;  %v11196_v21 = vadd.f32 %v11107_v35, %v11106_v17 }
 0x5bd   : > { %v10318_v53 = vadd.f32 %v16345_v28, %v9899_v39  ;;  %v5186_v11 = vadd.f32 %v16347_v29, %v4768_v2  ;;  %v9901_v55 = vpop.f32.mrb[41].mxu1  ;;  %10765 = vadd.xlane.f32.xlu0 %v10764_v43  ;;  %v4770_v16 = vpop.f32.mrb[42].mxu0  ;;  %v10767_v41 = vadd.f32 %v10677_v12, %v10676_v14 }
 0x5be   : > { %v16754_v44 = vmax.f32 %v5185_v62, 0.0  ;;  %v10319_v52 = vadd.f32 %v16349_v34, %v9901_v55  ;;  %11197 = vadd.xlane.f32.xlu1 %v11196_v21  ;;  %v9903_v48 = vpop.f32.mrb[42].mxu1  ;;  %v5187_v61 = vadd.f32 %v16343_v25, %v4770_v16  ;;  %v4772_v13 = vpop.f32.mrb[43].mxu0  ;;  %v11199_v15 = vadd.f32 %v11109_v56, %v11108_v42 }
 0x5bf   : > { %v16758_v5 = vmax.f32 %v10318_v53, 0.0  ;;  %v16760_v17 = vmax.f32 %v5186_v11, 0.0  ;;  %v10320_v35 = vadd.f32 %v16345_v28, %v9903_v48  ;;  %v5188_v43 = vadd.f32 %v16347_v29, %v4772_v13  ;;  %v9905_v39 = vpop.f32.mrb[43].mxu1 }
 0x5c0   : > { %19297 = vst [vmem:[#allocation57_spill] sm:$0xff] %v16754_v44  ;;  %v10678_v14 = vmul.f32 %v16754_v44, %v16754_v44  ;;  %v16766_v12 = vmax.f32 %v10319_v52, 0.0  ;;  %v16768_v21 = vmax.f32 %v5187_v61, 0.0  ;;  %v10321_v55 = vadd.f32 %v16349_v34, %v9905_v39 }
 0x5c1   : > { %19298 = vst [vmem:[#allocation58_spill] sm:$0xff] %v16758_v5  ;;  %19299 = vst [vmem:[#allocation59_spill] sm:$0xff] %v16760_v17  ;;  %v11110_v16 = vmul.f32 %v16758_v5, %v16758_v5  ;;  %v10679_v42 = vmul.f32 %v16760_v17, %v16760_v17  ;;  %v16775_v56 = vmax.f32 %v10320_v35, 0.0  ;;  %v16777_v62 = vmax.f32 %v5188_v43, 0.0  ;;  %10768 = vadd.xlane.f32.xlu0 %v10767_v41 }
 0x5c2   : > { %19300 = vst [vmem:[#allocation60_spill] sm:$0xff] %v16766_v12  ;;  %19301 = vst [vmem:[#allocation61_spill] sm:$0xff] %v16768_v21  ;;  %v11111_v2 = vmul.f32 %v16766_v12, %v16766_v12  ;;  %v10680_v61 = vmul.f32 %v16768_v21, %v16768_v21  ;;  %v16783_v53 = vmax.f32 %v10321_v55, 0.0  ;;  %11200 = vadd.xlane.f32.xlu1 %v11199_v15 }
 0x5c3   : > { %19302 = vst [vmem:[#allocation62_spill] sm:$0xff] %v16775_v56  ;;  %19303 = vst [vmem:[#allocation63_spill] sm:$0xff] %v16777_v62  ;;  %v11112_v11 = vmul.f32 %v16775_v56, %v16775_v56  ;;  %v10681_v52 = vmul.f32 %v16777_v62, %v16777_v62  ;;  %v4776_v48 = vpop.f32.mrb[44].mxu0  ;;  %v10770_v13 = vadd.f32 %v10679_v42, %v10678_v14 }
 0x5c4   : > { %19304 = vst [vmem:[#allocation64_spill] sm:$0xff] %v16783_v53  ;;  %v11113_v41 = vmul.f32 %v16783_v53, %v16783_v53  ;;  %v5189_v35 = vadd.f32 %v16343_v25, %v4776_v48  ;;  %v9909_v43 = vpop.f32.mrb[44].mxu1  ;;  %v4778_v39 = vpop.f32.mrb[45].mxu0  ;;  %v11202_v12 = vadd.f32 %v11111_v2, %v11110_v16 }
 0x5c5   : > { %v10322_v55 = vadd.f32 %v16345_v28, %v9909_v43  ;;  %v5190_v15 = vadd.f32 %v16347_v29, %v4778_v39  ;;  %v9911_v21 = vpop.f32.mrb[45].mxu1  ;;  %10771 = vadd.xlane.f32.xlu0 %v10770_v13  ;;  %v4780_v56 = vpop.f32.mrb[46].mxu0  ;;  %v10773_v5 = vadd.f32 %v10681_v52, %v10680_v61 }
 0x5c6   : > { %v16794_v17 = vmax.f32 %v5189_v35, 0.0  ;;  %v10323_v14 = vadd.f32 %v16349_v34, %v9911_v21  ;;  %11203 = vadd.xlane.f32.xlu1 %v11202_v12  ;;  %v9913_v42 = vpop.f32.mrb[46].mxu1  ;;  %v5191_v53 = vadd.f32 %v16343_v25, %v4780_v56  ;;  %v4782_v48 = vpop.f32.mrb[47].mxu0  ;;  %v11205_v62 = vadd.f32 %v11113_v41, %v11112_v11 }
 0x5c7   : > { %v16798_v44 = vmax.f32 %v10322_v55, 0.0  ;;  %v16800_v16 = vmax.f32 %v5190_v15, 0.0  ;;  %v10324_v2 = vadd.f32 %v16345_v28, %v9913_v42  ;;  %v5192_v13 = vadd.f32 %v16347_v29, %v4782_v48  ;;  %v9915_v43 = vpop.f32.mrb[47].mxu1 }
 0x5c8   : > { %19305 = vst [vmem:[#allocation65_spill] sm:$0xff] %v16794_v17  ;;  %v10682_v61 = vmul.f32 %v16794_v17, %v16794_v17  ;;  %v16806_v52 = vmax.f32 %v10323_v14, 0.0  ;;  %v16808_v12 = vmax.f32 %v5191_v53, 0.0  ;;  %v10325_v21 = vadd.f32 %v16349_v34, %v9915_v43 }
 0x5c9   : > { %19306 = vst [vmem:[#allocation66_spill] sm:$0xff] %v16798_v44  ;;  %19307 = vst [vmem:[#allocation67_spill] sm:$0xff] %v16800_v16  ;;  %v11114_v56 = vmul.f32 %v16798_v44, %v16798_v44  ;;  %v10683_v11 = vmul.f32 %v16800_v16, %v16800_v16  ;;  %v16815_v41 = vmax.f32 %v10324_v2, 0.0  ;;  %v16817_v35 = vmax.f32 %v5192_v13, 0.0  ;;  %10774 = vadd.xlane.f32.xlu0 %v10773_v5 }
 0x5ca   : > { %19308 = vst [vmem:[#allocation68_spill] sm:$0xff] %v16806_v52  ;;  %19309 = vst [vmem:[#allocation69_spill] sm:$0xff] %v16808_v12  ;;  %v11115_v39 = vmul.f32 %v16806_v52, %v16806_v52  ;;  %v10684_v53 = vmul.f32 %v16808_v12, %v16808_v12  ;;  %v16823_v55 = vmax.f32 %v10325_v21, 0.0  ;;  %11206 = vadd.xlane.f32.xlu1 %v11205_v62 }
 0x5cb   : > { %19310 = vst [vmem:[#allocation70_spill] sm:$0xff] %v16815_v41  ;;  %19311 = vst [vmem:[#allocation71_spill] sm:$0xff] %v16817_v35  ;;  %v11116_v15 = vmul.f32 %v16815_v41, %v16815_v41  ;;  %v10685_v14 = vmul.f32 %v16817_v35, %v16817_v35  ;;  %v4786_v42 = vpop.f32.mrb[48].mxu0  ;;  %v10776_v48 = vadd.f32 %v10683_v11, %v10682_v61 }
 0x5cc   : > { %19312 = vst [vmem:[#allocation72_spill] sm:$0xff] %v16823_v55  ;;  %v11117_v5 = vmul.f32 %v16823_v55, %v16823_v55  ;;  %v5193_v2 = vadd.f32 %v16343_v25, %v4786_v42  ;;  %v9919_v13 = vpop.f32.mrb[48].mxu1  ;;  %v4788_v43 = vpop.f32.mrb[49].mxu0  ;;  %v11208_v52 = vadd.f32 %v11115_v39, %v11114_v56 }
 0x5cd   : > { %v10326_v21 = vadd.f32 %v16345_v28, %v9919_v13  ;;  %v5194_v62 = vadd.f32 %v16347_v29, %v4788_v43  ;;  %v9921_v12 = vpop.f32.mrb[49].mxu1  ;;  %10777 = vadd.xlane.f32.xlu0 %v10776_v48  ;;  %v4790_v41 = vpop.f32.mrb[50].mxu0  ;;  %v10779_v44 = vadd.f32 %v10685_v14, %v10684_v53 }
 0x5ce   : > { %v16834_v16 = vmax.f32 %v5193_v2, 0.0  ;;  %v10327_v61 = vadd.f32 %v16349_v34, %v9921_v12  ;;  %11209 = vadd.xlane.f32.xlu1 %v11208_v52  ;;  %v9923_v11 = vpop.f32.mrb[50].mxu1  ;;  %v5195_v55 = vadd.f32 %v16343_v25, %v4790_v41  ;;  %v4792_v42 = vpop.f32.mrb[51].mxu0  ;;  %v11211_v35 = vadd.f32 %v11117_v5, %v11116_v15 }
 0x5cf   : > { %v16838_v17 = vmax.f32 %v10326_v21, 0.0  ;;  %v16840_v56 = vmax.f32 %v5194_v62, 0.0  ;;  %v10328_v39 = vadd.f32 %v16345_v28, %v9923_v11  ;;  %v5196_v48 = vadd.f32 %v16347_v29, %v4792_v42  ;;  %v9925_v13 = vpop.f32.mrb[51].mxu1 }
 0x5d0   : > { %19313 = vst [vmem:[#allocation73_spill] sm:$0xff] %v16834_v16  ;;  %v10686_v53 = vmul.f32 %v16834_v16, %v16834_v16  ;;  %v16846_v14 = vmax.f32 %v10327_v61, 0.0  ;;  %v16848_v52 = vmax.f32 %v5195_v55, 0.0  ;;  %v10329_v12 = vadd.f32 %v16349_v34, %v9925_v13 }
 0x5d1   : > { %19314 = vst [vmem:[#allocation74_spill] sm:$0xff] %v16838_v17  ;;  %19315 = vst [vmem:[#allocation75_spill] sm:$0xff] %v16840_v56  ;;  %v11118_v41 = vmul.f32 %v16838_v17, %v16838_v17  ;;  %v10687_v15 = vmul.f32 %v16840_v56, %v16840_v56  ;;  %v16855_v5 = vmax.f32 %v10328_v39, 0.0  ;;  %v16857_v2 = vmax.f32 %v5196_v48, 0.0  ;;  %10780 = vadd.xlane.f32.xlu0 %v10779_v44 }
 0x5d2   : > { %19316 = vst [vmem:[#allocation76_spill] sm:$0xff] %v16846_v14  ;;  %19317 = vst [vmem:[#allocation77_spill] sm:$0xff] %v16848_v52  ;;  %v11119_v43 = vmul.f32 %v16846_v14, %v16846_v14  ;;  %v10688_v55 = vmul.f32 %v16848_v52, %v16848_v52  ;;  %v16863_v21 = vmax.f32 %v10329_v12, 0.0  ;;  %11212 = vadd.xlane.f32.xlu1 %v11211_v35 }
 0x5d3   : > { %19318 = vst [vmem:[#allocation78_spill] sm:$0xff] %v16855_v5  ;;  %19319 = vst [vmem:[#allocation79_spill] sm:$0xff] %v16857_v2  ;;  %v11120_v62 = vmul.f32 %v16855_v5, %v16855_v5  ;;  %v10689_v61 = vmul.f32 %v16857_v2, %v16857_v2  ;;  %v4796_v11 = vpop.f32.mrb[52].mxu0  ;;  %v10782_v42 = vadd.f32 %v10687_v15, %v10686_v53 }
 0x5d4   : > { %19320 = vst [vmem:[#allocation80_spill] sm:$0xff] %v16863_v21  ;;  %v11121_v44 = vmul.f32 %v16863_v21, %v16863_v21  ;;  %v5197_v39 = vadd.f32 %v16343_v25, %v4796_v11  ;;  %v9929_v48 = vpop.f32.mrb[52].mxu1  ;;  %v4798_v13 = vpop.f32.mrb[53].mxu0  ;;  %v11214_v14 = vadd.f32 %v11119_v43, %v11118_v41 }
 0x5d5   : > { %v10330_v12 = vadd.f32 %v16345_v28, %v9929_v48  ;;  %v5198_v35 = vadd.f32 %v16347_v29, %v4798_v13  ;;  %v9931_v52 = vpop.f32.mrb[53].mxu1  ;;  %10783 = vadd.xlane.f32.xlu0 %v10782_v42  ;;  %v4800_v5 = vpop.f32.mrb[54].mxu0  ;;  %v10785_v17 = vadd.f32 %v10689_v61, %v10688_v55 }
 0x5d6   : > { %v16874_v56 = vmax.f32 %v5197_v39, 0.0  ;;  %v10331_v53 = vadd.f32 %v16349_v34, %v9931_v52  ;;  %11215 = vadd.xlane.f32.xlu1 %v11214_v14  ;;  %v9933_v15 = vpop.f32.mrb[54].mxu1  ;;  %v5199_v21 = vadd.f32 %v16343_v25, %v4800_v5  ;;  %v4802_v11 = vpop.f32.mrb[55].mxu0  ;;  %v11217_v2 = vadd.f32 %v11121_v44, %v11120_v62 }
 0x5d7   : > { %v16878_v16 = vmax.f32 %v10330_v12, 0.0  ;;  %v16880_v41 = vmax.f32 %v5198_v35, 0.0  ;;  %v10332_v43 = vadd.f32 %v16345_v28, %v9933_v15  ;;  %v5200_v42 = vadd.f32 %v16347_v29, %v4802_v11  ;;  %v9935_v48 = vpop.f32.mrb[55].mxu1 }
 0x5d8   : > { %19321 = vst [vmem:[#allocation81_spill] sm:$0xff] %v16874_v56  ;;  %v10690_v55 = vmul.f32 %v16874_v56, %v16874_v56  ;;  %v16886_v61 = vmax.f32 %v10331_v53, 0.0  ;;  %v16888_v14 = vmax.f32 %v5199_v21, 0.0  ;;  %v10333_v52 = vadd.f32 %v16349_v34, %v9935_v48 }
 0x5d9   : > { %19322 = vst [vmem:[#allocation82_spill] sm:$0xff] %v16878_v16  ;;  %19323 = vst [vmem:[#allocation83_spill] sm:$0xff] %v16880_v41  ;;  %v11122_v5 = vmul.f32 %v16878_v16, %v16878_v16  ;;  %v10691_v62 = vmul.f32 %v16880_v41, %v16880_v41  ;;  %v16895_v44 = vmax.f32 %v10332_v43, 0.0  ;;  %v16897_v39 = vmax.f32 %v5200_v42, 0.0  ;;  %10786 = vadd.xlane.f32.xlu0 %v10785_v17 }
 0x5da   : > { %19324 = vst [vmem:[#allocation84_spill] sm:$0xff] %v16886_v61  ;;  %19325 = vst [vmem:[#allocation85_spill] sm:$0xff] %v16888_v14  ;;  %v11123_v13 = vmul.f32 %v16886_v61, %v16886_v61  ;;  %v10692_v21 = vmul.f32 %v16888_v14, %v16888_v14  ;;  %v16903_v12 = vmax.f32 %v10333_v52, 0.0  ;;  %11218 = vadd.xlane.f32.xlu1 %v11217_v2 }
 0x5db   : > { %19326 = vst [vmem:[#allocation86_spill] sm:$0xff] %v16895_v44  ;;  %19327 = vst [vmem:[#allocation87_spill] sm:$0xff] %v16897_v39  ;;  %v11124_v35 = vmul.f32 %v16895_v44, %v16895_v44  ;;  %v10693_v53 = vmul.f32 %v16897_v39, %v16897_v39  ;;  %v4806_v15 = vpop.f32.mrb[56].mxu0  ;;  %v10788_v11 = vadd.f32 %v10691_v62, %v10690_v55 }
 0x5dc   : > { %19328 = vst [vmem:[#allocation88_spill] sm:$0xff] %v16903_v12  ;;  %v11125_v17 = vmul.f32 %v16903_v12, %v16903_v12  ;;  %v5201_v43 = vadd.f32 %v16343_v25, %v4806_v15  ;;  %v9939_v42 = vpop.f32.mrb[56].mxu1  ;;  %v4808_v48 = vpop.f32.mrb[57].mxu0  ;;  %v11220_v61 = vadd.f32 %v11123_v13, %v11122_v5 }
 0x5dd   : > { %v10334_v52 = vadd.f32 %v16345_v28, %v9939_v42  ;;  %v5202_v2 = vadd.f32 %v16347_v29, %v4808_v48  ;;  %v9941_v14 = vpop.f32.mrb[57].mxu1  ;;  %10789 = vadd.xlane.f32.xlu0 %v10788_v11  ;;  %v4810_v44 = vpop.f32.mrb[58].mxu0  ;;  %v10791_v16 = vadd.f32 %v10693_v53, %v10692_v21 }
 0x5de   : > { %v16914_v41 = vmax.f32 %v5201_v43, 0.0  ;;  %v10335_v55 = vadd.f32 %v16349_v34, %v9941_v14  ;;  %11221 = vadd.xlane.f32.xlu1 %v11220_v61  ;;  %v9943_v62 = vpop.f32.mrb[58].mxu1  ;;  %v5203_v12 = vadd.f32 %v16343_v25, %v4810_v44  ;;  %v4812_v15 = vpop.f32.mrb[59].mxu0  ;;  %v11223_v39 = vadd.f32 %v11125_v17, %v11124_v35 }
 0x5df   : > { %v16918_v56 = vmax.f32 %v10334_v52, 0.0  ;;  %v16920_v5 = vmax.f32 %v5202_v2, 0.0  ;;  %v10336_v13 = vadd.f32 %v16345_v28, %v9943_v62  ;;  %v5204_v11 = vadd.f32 %v16347_v29, %v4812_v15  ;;  %v9945_v42 = vpop.f32.mrb[59].mxu1 }
 0x5e0   : > { %19329 = vst [vmem:[#allocation89_spill] sm:$0xff] %v16914_v41  ;;  %v10694_v21 = vmul.f32 %v16914_v41, %v16914_v41  ;;  %v16926_v53 = vmax.f32 %v10335_v55, 0.0  ;;  %v16928_v61 = vmax.f32 %v5203_v12, 0.0  ;;  %v10337_v14 = vadd.f32 %v16349_v34, %v9945_v42 }
 0x5e1   : > { %19330 = vst [vmem:[#allocation90_spill] sm:$0xff] %v16918_v56  ;;  %19331 = vst [vmem:[#allocation91_spill] sm:$0xff] %v16920_v5  ;;  %v11126_v44 = vmul.f32 %v16918_v56, %v16918_v56  ;;  %v10695_v35 = vmul.f32 %v16920_v5, %v16920_v5  ;;  %v16935_v17 = vmax.f32 %v10336_v13, 0.0  ;;  %v16937_v43 = vmax.f32 %v5204_v11, 0.0  ;;  %10792 = vadd.xlane.f32.xlu0 %v10791_v16 }
 0x5e2   : > { %19332 = vst [vmem:[#allocation92_spill] sm:$0xff] %v16926_v53  ;;  %19333 = vst [vmem:[#allocation93_spill] sm:$0xff] %v16928_v61  ;;  %v11127_v48 = vmul.f32 %v16926_v53, %v16926_v53  ;;  %v10696_v12 = vmul.f32 %v16928_v61, %v16928_v61  ;;  %v16943_v52 = vmax.f32 %v10337_v14, 0.0  ;;  %11224 = vadd.xlane.f32.xlu1 %v11223_v39 }
 0x5e3   : > { %19334 = vst [vmem:[#allocation94_spill] sm:$0xff] %v16935_v17  ;;  %19335 = vst [vmem:[#allocation95_spill] sm:$0xff] %v16937_v43  ;;  %v11128_v2 = vmul.f32 %v16935_v17, %v16935_v17  ;;  %v10697_v55 = vmul.f32 %v16937_v43, %v16937_v43  ;;  %v4816_v62 = vpop.f32.mrb[60].mxu0  ;;  %v10794_v15 = vadd.f32 %v10695_v35, %v10694_v21 }
 0x5e4   : > { %19336 = vst [vmem:[#allocation96_spill] sm:$0xff] %v16943_v52  ;;  %v11129_v16 = vmul.f32 %v16943_v52, %v16943_v52  ;;  %v5205_v13 = vadd.f32 %v16343_v25, %v4816_v62  ;;  %v9949_v11 = vpop.f32.mrb[60].mxu1  ;;  %v4818_v42 = vpop.f32.mrb[61].mxu0  ;;  %v11226_v53 = vadd.f32 %v11127_v48, %v11126_v44 }
 0x5e5   : > { %v10338_v14 = vadd.f32 %v16345_v28, %v9949_v11  ;;  %v5206_v39 = vadd.f32 %v16347_v29, %v4818_v42  ;;  %v9951_v61 = vpop.f32.mrb[61].mxu1  ;;  %10795 = vadd.xlane.f32.xlu0 %v10794_v15  ;;  %v4820_v17 = vpop.f32.mrb[62].mxu0  ;;  %v10797_v56 = vadd.f32 %v10697_v55, %v10696_v12 }
 0x5e6   : > { %v16954_v5 = vmax.f32 %v5205_v13, 0.0  ;;  %v10339_v21 = vadd.f32 %v16349_v34, %v9951_v61  ;;  %11227 = vadd.xlane.f32.xlu1 %v11226_v53  ;;  %v9953_v35 = vpop.f32.mrb[62].mxu1  ;;  %v5207_v52 = vadd.f32 %v16343_v25, %v4820_v17  ;;  %v4822_v62 = vpop.f32.mrb[63].mxu0  ;;  %v11229_v43 = vadd.f32 %v11129_v16, %v11128_v2 }
 0x5e7   : > { %v16958_v41 = vmax.f32 %v10338_v14, 0.0  ;;  %v16960_v44 = vmax.f32 %v5206_v39, 0.0  ;;  %v10340_v48 = vadd.f32 %v16345_v28, %v9953_v35  ;;  %v5208_v15 = vadd.f32 %v16347_v29, %v4822_v62  ;;  %v9955_v11 = vpop.f32.mrb[63].mxu1 }
 0x5e8   : > { %19337 = vst [vmem:[#allocation97_spill] sm:$0xff] %v16954_v5  ;;  %v10698_v12 = vmul.f32 %v16954_v5, %v16954_v5  ;;  %v16966_v55 = vmax.f32 %v10339_v21, 0.0  ;;  %v16968_v53 = vmax.f32 %v5207_v52, 0.0  ;;  %v10341_v61 = vadd.f32 %v16349_v34, %v9955_v11 }
 0x5e9   : > { %19338 = vst [vmem:[#allocation98_spill] sm:$0xff] %v16958_v41  ;;  %19339 = vst [vmem:[#allocation99_spill] sm:$0xff] %v16960_v44  ;;  %v11130_v17 = vmul.f32 %v16958_v41, %v16958_v41  ;;  %v10699_v2 = vmul.f32 %v16960_v44, %v16960_v44  ;;  %v16975_v16 = vmax.f32 %v10340_v48, 0.0  ;;  %v16977_v13 = vmax.f32 %v5208_v15, 0.0  ;;  %10798 = vadd.xlane.f32.xlu0 %v10797_v56 }
 0x5ea   : > { %19340 = vst [vmem:[#allocation100_spill] sm:$0xff] %v16966_v55  ;;  %19341 = vst [vmem:[#allocation101_spill] sm:$0xff] %v16968_v53  ;;  %v11131_v42 = vmul.f32 %v16966_v55, %v16966_v55  ;;  %v10700_v52 = vmul.f32 %v16968_v53, %v16968_v53  ;;  %v16983_v14 = vmax.f32 %v10341_v61, 0.0  ;;  %11230 = vadd.xlane.f32.xlu1 %v11229_v43 }
 0x5eb   : > { %19342 = vst [vmem:[#allocation102_spill] sm:$0xff] %v16975_v16  ;;  %19343 = vst [vmem:[#allocation103_spill] sm:$0xff] %v16977_v13  ;;  %v11132_v39 = vmul.f32 %v16975_v16, %v16975_v16  ;;  %v10701_v21 = vmul.f32 %v16977_v13, %v16977_v13  ;;  %v4826_v35 = vpop.f32.mrb[64].mxu0  ;;  %v10800_v62 = vadd.f32 %v10699_v2, %v10698_v12 }
 0x5ec   : > { %19344 = vst [vmem:[#allocation104_spill] sm:$0xff] %v16983_v14  ;;  %v11133_v56 = vmul.f32 %v16983_v14, %v16983_v14  ;;  %v5209_v48 = vadd.f32 %v16343_v25, %v4826_v35  ;;  %v9959_v15 = vpop.f32.mrb[64].mxu1  ;;  %v4828_v11 = vpop.f32.mrb[65].mxu0  ;;  %v11232_v55 = vadd.f32 %v11131_v42, %v11130_v17 }
 0x5ed   : > { %v10342_v61 = vadd.f32 %v16345_v28, %v9959_v15  ;;  %v5210_v43 = vadd.f32 %v16347_v29, %v4828_v11  ;;  %v9961_v53 = vpop.f32.mrb[65].mxu1  ;;  %10801 = vadd.xlane.f32.xlu0 %v10800_v62  ;;  %v4830_v16 = vpop.f32.mrb[66].mxu0  ;;  %v10803_v41 = vadd.f32 %v10701_v21, %v10700_v52 }
 0x5ee   : > { %v16994_v44 = vmax.f32 %v5209_v48, 0.0  ;;  %v10343_v12 = vadd.f32 %v16349_v34, %v9961_v53  ;;  %11233 = vadd.xlane.f32.xlu1 %v11232_v55  ;;  %v9963_v2 = vpop.f32.mrb[66].mxu1  ;;  %v5211_v14 = vadd.f32 %v16343_v25, %v4830_v16  ;;  %v4832_v35 = vpop.f32.mrb[67].mxu0  ;;  %v11235_v13 = vadd.f32 %v11133_v56, %v11132_v39 }
 0x5ef   : > { %v16998_v5 = vmax.f32 %v10342_v61, 0.0  ;;  %v17000_v17 = vmax.f32 %v5210_v43, 0.0  ;;  %v10344_v42 = vadd.f32 %v16345_v28, %v9963_v2  ;;  %v5212_v62 = vadd.f32 %v16347_v29, %v4832_v35  ;;  %v9965_v15 = vpop.f32.mrb[67].mxu1 }
 0x5f0   : > { %19345 = vst [vmem:[#allocation105_spill] sm:$0xff] %v16994_v44  ;;  %v10702_v52 = vmul.f32 %v16994_v44, %v16994_v44  ;;  %v17006_v21 = vmax.f32 %v10343_v12, 0.0  ;;  %v17008_v55 = vmax.f32 %v5211_v14, 0.0  ;;  %v10345_v53 = vadd.f32 %v16349_v34, %v9965_v15 }
 0x5f1   : > { %19346 = vst [vmem:[#allocation106_spill] sm:$0xff] %v16998_v5  ;;  %19347 = vst [vmem:[#allocation107_spill] sm:$0xff] %v17000_v17  ;;  %v11134_v16 = vmul.f32 %v16998_v5, %v16998_v5  ;;  %v10703_v39 = vmul.f32 %v17000_v17, %v17000_v17  ;;  %v17015_v56 = vmax.f32 %v10344_v42, 0.0  ;;  %v17017_v48 = vmax.f32 %v5212_v62, 0.0  ;;  %10804 = vadd.xlane.f32.xlu0 %v10803_v41 }
 0x5f2   : > { %19348 = vst [vmem:[#allocation108_spill] sm:$0xff] %v17006_v21  ;;  %19349 = vst [vmem:[#allocation109_spill] sm:$0xff] %v17008_v55  ;;  %v11135_v11 = vmul.f32 %v17006_v21, %v17006_v21  ;;  %v10704_v14 = vmul.f32 %v17008_v55, %v17008_v55  ;;  %v17023_v61 = vmax.f32 %v10345_v53, 0.0  ;;  %11236 = vadd.xlane.f32.xlu1 %v11235_v13 }
 0x5f3   : > { %19350 = vst [vmem:[#allocation110_spill] sm:$0xff] %v17015_v56  ;;  %19351 = vst [vmem:[#allocation111_spill] sm:$0xff] %v17017_v48  ;;  %v11136_v43 = vmul.f32 %v17015_v56, %v17015_v56  ;;  %v10705_v12 = vmul.f32 %v17017_v48, %v17017_v48  ;;  %v4836_v2 = vpop.f32.mrb[68].mxu0  ;;  %v10806_v35 = vadd.f32 %v10703_v39, %v10702_v52 }
 0x5f4   : > { %19352 = vst [vmem:[#allocation112_spill] sm:$0xff] %v17023_v61  ;;  %v11137_v41 = vmul.f32 %v17023_v61, %v17023_v61  ;;  %v5213_v42 = vadd.f32 %v16343_v25, %v4836_v2  ;;  %v9969_v62 = vpop.f32.mrb[68].mxu1  ;;  %v4838_v15 = vpop.f32.mrb[69].mxu0  ;;  %v11238_v21 = vadd.f32 %v11135_v11, %v11134_v16 }
 0x5f5   : > { %v10346_v53 = vadd.f32 %v16345_v28, %v9969_v62  ;;  %v5214_v13 = vadd.f32 %v16347_v29, %v4838_v15  ;;  %v9971_v55 = vpop.f32.mrb[69].mxu1  ;;  %10807 = vadd.xlane.f32.xlu0 %v10806_v35  ;;  %v4840_v56 = vpop.f32.mrb[70].mxu0  ;;  %v10809_v5 = vadd.f32 %v10705_v12, %v10704_v14 }
 0x5f6   : > { %v17034_v17 = vmax.f32 %v5213_v42, 0.0  ;;  %v10347_v52 = vadd.f32 %v16349_v34, %v9971_v55  ;;  %11239 = vadd.xlane.f32.xlu1 %v11238_v21  ;;  %v9973_v39 = vpop.f32.mrb[70].mxu1  ;;  %v5215_v61 = vadd.f32 %v16343_v25, %v4840_v56  ;;  %v4842_v2 = vpop.f32.mrb[71].mxu0  ;;  %v11241_v48 = vadd.f32 %v11137_v41, %v11136_v43 }
 0x5f7   : > { %v17038_v44 = vmax.f32 %v10346_v53, 0.0  ;;  %v17040_v16 = vmax.f32 %v5214_v13, 0.0  ;;  %v10348_v11 = vadd.f32 %v16345_v28, %v9973_v39  ;;  %v5216_v35 = vadd.f32 %v16347_v29, %v4842_v2  ;;  %v9975_v62 = vpop.f32.mrb[71].mxu1 }
 0x5f8   : > { %19353 = vst [vmem:[#allocation113_spill] sm:$0xff] %v17034_v17  ;;  %v10706_v14 = vmul.f32 %v17034_v17, %v17034_v17  ;;  %v17046_v12 = vmax.f32 %v10347_v52, 0.0  ;;  %v17048_v21 = vmax.f32 %v5215_v61, 0.0  ;;  %v10349_v25 = vadd.f32 %v16349_v34, %v9975_v62 }
 0x5f9   : > { %19354 = vst [vmem:[#allocation114_spill] sm:$0xff] %v17038_v44  ;;  %19355 = vst [vmem:[#allocation115_spill] sm:$0xff] %v17040_v16  ;;  %v11138_v55 = vmul.f32 %v17038_v44, %v17038_v44  ;;  %v10707_v56 = vmul.f32 %v17040_v16, %v17040_v16  ;;  %v17055_v43 = vmax.f32 %v10348_v11, 0.0  ;;  %v17057_v28 = vmax.f32 %v5216_v35, 0.0  ;;  %10810 = vadd.xlane.f32.xlu0 %v10809_v5 }
 0x5fa   : > { %19356 = vst [vmem:[#allocation116_spill] sm:$0xff] %v17046_v12  ;;  %19357 = vst [vmem:[#allocation117_spill] sm:$0xff] %v17048_v21  ;;  %v11139_v29 = vmul.f32 %v17046_v12, %v17046_v12  ;;  %v17061_v41 = vmax.f32 %v10349_v25, 0.0  ;;  %11242 = vadd.xlane.f32.xlu1 %v11241_v48  ;;  %v10708_v34 = vmul.f32 %v17048_v21, %v17048_v21 }
 0x5fb   : > { %19358 = vst [vmem:[#allocation118_spill] sm:$0xff] %v17055_v43  ;;  %19359 = vst [vmem:[#allocation119_spill] sm:$0xff] %v17057_v28  ;;  %v10709_v61 = vmul.f32 %v17057_v28, %v17057_v28  ;;  %v10812_v42 = vadd.f32 %v10707_v56, %v10706_v14  ;;  %v11140_v15 = vmul.f32 %v17055_v43, %v17055_v43 }
 0x5fc   : > { %19360 = vst [vmem:[#allocation120_spill] sm:$0xff] %v17061_v41  ;;  %v11141_v53 = vmul.f32 %v17061_v41, %v17061_v41  ;;  %v11244_v5 = vadd.f32 %v11139_v29, %v11138_v55 }
 0x5fd   : > { %10813 = vadd.xlane.f32.xlu0 %v10812_v42  ;;  %v10815_v13 = vadd.f32 %v10709_v61, %v10708_v34 }
 0x5fe   : > { %11245 = vadd.xlane.f32.xlu1 %v11244_v5  ;;  %v11247_v52 = vadd.f32 %v11141_v53, %v11140_v15 }
 0x601   : > { %10816 = vadd.xlane.f32.xlu0 %v10815_v13 }
 0x602   : > { %11248 = vadd.xlane.f32.xlu1 %v11247_v52  ;;  %v10712_v48 = vpop.xlane.xlu0 %10711 }
 0x603   : > { %v11144_v39 = vpop.xlane.xlu1 %11143  ;;  %14475 = vrsqrt.f32 %v10712_v48  ;;  %vm10820_vm3 = vcmp.eq.f32.partialorder %v10712_v48, inf  ;;  %v10823_v34 = vand.u32 2147483648, %v10712_v48  ;;  %vm10822_vm5 = vcmp.eq.f32.partialorder %v10712_v48, 0.0 }
 0x604   : > { %14477 = vrsqrt.f32 %v11144_v39  ;;  %vm11252_vm4 = vcmp.eq.f32.partialorder %v11144_v39, inf  ;;  %v11255_v5 = vand.u32 2147483648, %v11144_v39  ;;  %vm11254_vm6 = vcmp.eq.f32.partialorder %v11144_v39, 0.0 }
 0x606   : > { %v17071_v2 = vpop.xlane.xlu0 %10714 }
 0x607   : > { %v17073_v11 = vpop.xlane.xlu1 %11146  ;;  %14479 = vrsqrt.f32 %v17071_v2  ;;  %vm10827_vm7 = vcmp.eq.f32.partialorder %v17071_v2, inf  ;;  %vm10829_vm10 = vcmp.eq.f32.partialorder %v17071_v2, 0.0 }
 0x608   : > { %14481 = vrsqrt.f32 %v17073_v11  ;;  %vm11259_vm8 = vcmp.eq.f32.partialorder %v17073_v11, inf  ;;  %vm11261_vm9 = vcmp.eq.f32.partialorder %v17073_v11, 0.0 }
 0x60a   : > { %v17077_v35 = vpop.xlane.xlu0 %10717 }
 0x60b   : > { %v17079_v62 = vpop.xlane.xlu1 %11149  ;;  %14483 = vrsqrt.f32 %v17077_v35  ;;  %vm10834_vm11 = vcmp.eq.f32.partialorder %v17077_v35, inf  ;;  %vm10836_vm12 = vcmp.eq.f32.partialorder %v17077_v35, 0.0 }
 0x60c   : > { %14485 = vrsqrt.f32 %v17079_v62  ;;  %vm11266_vm13 = vcmp.eq.f32.partialorder %v17079_v62, inf  ;;  %vm11268_vm14 = vcmp.eq.f32.partialorder %v17079_v62, 0.0 }
 0x60d   : > { %v14476_v14 = vpop.eup %14475 }
 0x60e   : > { %v14478_v25 = vpop.eup %14477  ;;  %v10819_v55 = vmul.f32 %v14476_v14, %v10712_v48  ;;  %v17083_v56 = vpop.xlane.xlu0 %10720 }
 0x60f   : > { %v11251_v29 = vmul.f32 %v14478_v25, %v11144_v39  ;;  %v17085_v61 = vpop.xlane.xlu1 %11152  ;;  %14487 = vrsqrt.f32 %v17083_v56  ;;  %vm10841_vm0 = vcmp.eq.f32.partialorder %v17083_v56, inf }
 0x610   : > { %v10821_v42 = vsel %vm10820_vm3, %v10712_v48, %v10819_v55  ;;  %14489 = vrsqrt.f32 %v17085_v61  ;;  %vm11273_vm15 = vcmp.eq.f32.partialorder %v17085_v61, inf }
 0x611   : > { %v14480_v15 = vpop.eup %14479  ;;  %v11253_v53 = vsel %vm11252_vm4, %v11144_v39, %v11251_v29  ;;  %v10824_v13 = vsel %vm10822_vm5, %v10823_v34, %v10821_v42  ;;  %v10830_v39 = vand.u32 2147483648, %v17071_v2  ;;  %v11262_v29 = vand.u32 2147483648, %v17073_v11 }
 0x612   : > { %v14482_v52 = vpop.eup %14481  ;;  %v17089_v14 = vpop.xlane.xlu0 %10723  ;;  %v11502_v25 = vadd.f32 1e-10, %v10824_v13  ;;  %v10826_v28 = vmul.f32 %v14480_v15, %v17071_v2  ;;  %v11256_v41 = vsel %vm11254_vm6, %v11255_v5, %v11253_v53  ;;  %v10837_v5 = vand.u32 2147483648, %v17077_v35 }
 0x613   : > { %v17092_v21 = vpop.xlane.xlu1 %11155  ;;  %14491 = vrsqrt.f32 %v17089_v14  ;;  %v11258_v48 = vmul.f32 %v14482_v52, %v17073_v11  ;;  %v11646_v42 = vadd.f32 1e-10, %v11256_v41  ;;  %vm10848_vm2 = vcmp.eq.f32.partialorder %v17089_v14, inf }
 0x614   : > { %14493 = vrsqrt.f32 %v17092_v21  ;;  %v10828_v53 = vsel %vm10827_vm7, %v17071_v2, %v10826_v28  ;;  %v11269_v28 = vand.u32 2147483648, %v17079_v62  ;;  %vm11280_vm1 = vcmp.eq.f32.partialorder %v17092_v21, inf }
 0x615   : > { %v14484_v55 = vpop.eup %14483  ;;  %14495 = vrcp.f32 %v11502_v25  ;;  %v11260_v52 = vsel %vm11259_vm8, %v17073_v11, %v11258_v48 }
 0x616   : > { %v17104_v34 = vpop.xlane.xlu0 %10726  ;;  %v14486_v15 = vpop.eup %14485  ;;  %v10833_v43 = vmul.f32 %v14484_v55, %v17077_v35  ;;  %v10831_v55 = vsel %vm10829_vm10, %v10830_v39, %v10828_v53  ;;  %v11263_v25 = vsel %vm11261_vm9, %v11262_v29, %v11260_v52 }
 0x617   : > { %v17109_v13 = vpop.xlane.xlu1 %11158  ;;  %14497 = vrsqrt.f32 %v17104_v34  ;;  %v11265_v48 = vmul.f32 %v14486_v15, %v17079_v62  ;;  %v11503_v24 = vadd.f32 1e-10, %v10831_v55  ;;  %v11647_v2 = vadd.f32 1e-10, %v11263_v25 }
 0x618   : > { %14499 = vrsqrt.f32 %v17109_v13  ;;  %v10835_v15 = vsel %vm10834_vm11, %v17077_v35, %v10833_v43  ;;  %vm11287_vm3 = vcmp.eq.f32.partialorder %v17109_v13, inf  ;;  %vm11289_vm4 = vcmp.eq.f32.partialorder %v17109_v13, 0.0 }
 0x619   : > { %v14488_v41 = vpop.eup %14487  ;;  %14501 = vrcp.f32 %v11646_v42  ;;  %v11267_v29 = vsel %vm11266_vm13, %v17079_v62, %v11265_v48  ;;  %v11290_v43 = vand.u32 2147483648, %v17109_v13  ;;  %v10838_v48 = vsel %vm10836_vm12, %v10837_v5, %v10835_v15 }
 0x61a   : > { %v14490_v12 = vpop.eup %14489  ;;  %v17123_v16 = vpop.xlane.xlu0 %10729  ;;  %v10840_v42 = vmul.f32 %v14488_v41, %v17083_v56  ;;  %v11504_v49 = vadd.f32 1e-10, %v10838_v48 }
 0x61b   : > { %v17129_v17 = vpop.xlane.xlu1 %11161  ;;  %14503 = vrsqrt.f32 %v17123_v16  ;;  %v11272_v53 = vmul.f32 %v14490_v12, %v17085_v61  ;;  %vm10862_vm5 = vcmp.eq.f32.partialorder %v17123_v16, inf  ;;  %vm10864_vm7 = vcmp.eq.f32.partialorder %v17123_v16, 0.0 }
 0x61c   : > { %14505 = vrsqrt.f32 %v17129_v17  ;;  %v17161_v8 = vsel %vm10841_vm0, %v17083_v56, %v10840_v42  ;;  %vm11294_vm6 = vcmp.eq.f32.partialorder %v17129_v17, inf  ;;  %vm11296_vm8 = vcmp.eq.f32.partialorder %v17129_v17, 0.0 }
 0x61d   : > { %v14492_v39 = vpop.eup %14491  ;;  %v17170_v35 = vsel %vm11273_vm15, %v17085_v61, %v11272_v53  ;;  %v11297_v5 = vand.u32 2147483648, %v17129_v17  ;;  %v10865_v42 = vand.u32 2147483648, %v17123_v16 }
 0x61e   : > { %v14494_v11 = vpop.eup %14493  ;;  %v17149_v41 = vpop.xlane.xlu0 %10732  ;;  %v10847_v12 = vmul.f32 %v14492_v39, %v17089_v14 }
 0x61f   : > { %v17153_v44 = vpop.xlane.xlu1 %11164  ;;  %14507 = vrsqrt.f32 %v17149_v41  ;;  %v14496_v55 = vpop.eup %14495  ;;  %v11279_v52 = vmul.f32 %v14494_v11, %v17092_v21  ;;  %v11270_v11 = vsel %vm11268_vm14, %v11269_v28, %v11267_v29  ;;  %vm10869_vm9 = vcmp.eq.f32.partialorder %v17149_v41, inf }
 0x620   : > { %14509 = vrsqrt.f32 %v17153_v44  ;;  %v17182_v53 = vsel %vm10848_vm2, %v17089_v14, %v10847_v12  ;;  %vm11301_vm10 = vcmp.eq.f32.partialorder %v17153_v44, inf  ;;  %vm10871_vm11 = vcmp.eq.f32.partialorder %v17149_v41, 0.0 }
 0x621   : > { %v14498_v25 = vpop.eup %14497  ;;  %14511 = vrcp.f32 %v11503_v24  ;;  %v17192_v62 = vsel %vm11280_vm1, %v17092_v21, %v11279_v52  ;;  %v10872_v48 = vand.u32 2147483648, %v17149_v41  ;;  %v11574_v52 = vmul.f32 %v14496_v55, %v16354_v54 }
 0x622   : > { %v14500_v15 = vpop.eup %14499  ;;  %v17175_v39 = vpop.xlane.xlu0 %10735  ;;  %14513 = vrcp.f32 %v11647_v2  ;;  %v17202_v12 = vmul.f32 %v14498_v25, %v17104_v34  ;;  %v11575_v45 = vmul.f32 %v14496_v55, %v16360_v6  ;;  %v11648_v51 = vadd.f32 1e-10, %v11270_v11 }
 0x623   : > { %v11286_v50 = vmul.f32 %v14500_v15, %v17109_v13  ;;  %v17186_v24 = vpop.xlane.xlu1 %11167  ;;  %14515 = vrsqrt.f32 %v17175_v39  ;;  %v14502_v46 = vpop.eup %14501  ;;  %vm11303_vm12 = vcmp.eq.f32.partialorder %v17153_v44, 0.0  ;;  %vm10876_vm13 = vcmp.eq.f32.partialorder %v17175_v39, inf }
 0x624   : > { %14517 = vrsqrt.f32 %v17186_v24  ;;  %v11718_v54 = vmul.f32 %v14502_v46, %v16358_v1  ;;  %vm10878_vm14 = vcmp.eq.f32.partialorder %v17175_v39, 0.0  ;;  %vm11308_vm15 = vcmp.eq.f32.partialorder %v17186_v24, inf }
 0x625   : > { %v14504_v2 = vpop.eup %14503  ;;  %v11288_v29 = vsel %vm11287_vm3, %v17109_v13, %v11286_v50  ;;  %14519 = vrcp.f32 %v11504_v49  ;;  %v11719_v49 = vmul.f32 %v14502_v46, %v16364_v26  ;;  %vm11310_vm0 = vcmp.eq.f32.partialorder %v17186_v24, 0.0 }
 0x626   : > { %v14506_v15 = vpop.eup %14505  ;;  %v10861_v36 = vmul.f32 %v14504_v2, %v17123_v16  ;;  %v17207_v28 = vpop.xlane.xlu0 %10738  ;;  %v11291_v7 = vsel %vm11289_vm4, %v11290_v43, %v11288_v29  ;;  %v11311_v26 = vand.u32 2147483648, %v17186_v24  ;;  %vm10855_vm2 = vcmp.eq.f32.partialorder %v17104_v34, inf }
 0x627   : > { %v11293_v50 = vmul.f32 %v14506_v15, %v17129_v17  ;;  %v17215_v25 = vpop.xlane.xlu1 %11170  ;;  %14521 = vrsqrt.f32 %v17207_v28  ;;  %v10879_v15 = vand.u32 2147483648, %v17175_v39  ;;  %vm10883_vm1 = vcmp.eq.f32.partialorder %v17207_v28, inf }
 0x628   : > { %v10863_v6 = vsel %vm10862_vm5, %v17123_v16, %v10861_v36  ;;  %14523 = vrsqrt.f32 %v17215_v25  ;;  %v11651_v36 = vadd.f32 1e-10, %v11291_v7  ;;  %v11790_v16 = vsub.f32 %v11574_v52, %v11718_v54 }
 0x629   : > { %v14508_v13 = vpop.eup %14507  ;;  %v11295_v43 = vsel %vm11294_vm6, %v17129_v17, %v11293_v50  ;;  %v10866_v55 = vsel %vm10864_vm7, %v10865_v42, %v10863_v6  ;;  %14525 = vrcp.f32 %v11648_v51  ;;  %v11791_v17 = vsub.f32 %v11575_v45, %v11719_v49 }
 0x62a   : > { %v14510_v1 = vpop.eup %14509  ;;  %v11298_v11 = vsel %vm11296_vm8, %v11297_v5, %v11295_v43  ;;  %v10868_v2 = vmul.f32 %v14508_v13, %v17149_v41  ;;  %v11508_v50 = vadd.f32 1e-10, %v10866_v55  ;;  %v11862_v54 = vmul.f32 %v11790_v16, %v11790_v16 }
 0x62b   : > { %v14512_v46 = vpop.eup %14511  ;;  %v11300_v29 = vmul.f32 %v14510_v1, %v17153_v44  ;;  %v17242_v5 = vpop.xlane.xlu1 %11173  ;;  %v11652_v13 = vadd.f32 1e-10, %v11298_v11  ;;  %14527 = vrcp.f32 %v11651_v36  ;;  %vm11315_vm3 = vcmp.eq.f32.partialorder %v17215_v25, inf }
 0x62c   : > { %v14514_v42 = vpop.eup %14513  ;;  %v10870_v7 = vsel %vm10869_vm9, %v17149_v41, %v10868_v2  ;;  %v11863_v45 = vmul.f32 %v11791_v17, %v11791_v17  ;;  %vm11317_vm4 = vcmp.eq.f32.partialorder %v17215_v25, 0.0  ;;  %14529 = vrsqrt.f32 %v17242_v5  ;;  %v17255_v11 = vpop.xlane.xlu0 %10741 }
 0x62d   : > { %v14516_v6 = vpop.eup %14515  ;;  %v11302_v52 = vsel %vm11301_vm10, %v17153_v44, %v11300_v29  ;;  %v10873_v51 = vsel %vm10871_vm11, %v10872_v48, %v10870_v7  ;;  %14531 = vrcp.f32 %v11508_v50  ;;  %v19361_v41 = vand.u32 2147483648, %v17153_v44 }
 0x62e   : > { %v14518_v43 = vpop.eup %14517  ;;  %v10875_v55 = vmul.f32 %v14516_v6, %v17175_v39  ;;  %v11509_v49 = vadd.f32 1e-10, %v10873_v51  ;;  %v11934_v29 = vadd.f32 %v11863_v45, %v11862_v54  ;;  %14533 = vrcp.f32 %v11652_v13 }
 0x62f   : > { %v11307_v1 = vmul.f32 %v14518_v43, %v17186_v24  ;;  %v14520_v2 = vpop.eup %14519  ;;  %v11305_v48 = vsel %vm11303_vm12, %v19361_v41, %v11302_v52  ;;  %v11318_v50 = vand.u32 2147483648, %v17215_v25  ;;  %vm10885_vm5 = vcmp.eq.f32.partialorder %v17207_v28, 0.0  ;;  %v17275_v13 = vpop.xlane.xlu1 %11176 }
 0x630   : > { %v10877_v36 = vsel %vm10876_vm13, %v17175_v39, %v10875_v55  ;;  %11935 = vadd.xlane.f32.xlu0 %v11934_v29  ;;  %14535 = vrsqrt.f32 %v17255_v11  ;;  %v11653_v51 = vadd.f32 1e-10, %v11305_v48  ;;  %v11577_v43 = vmul.f32 %v14512_v46, %v16373_v3  ;;  %v17288_v48 = vpop.xlane.xlu0 %10744 }
 0x631   : > { %v14522_v16 = vpop.eup %14521  ;;  %v11309_v7 = vsel %vm11308_vm15, %v17186_v24, %v11307_v1  ;;  %v10880_v17 = vsel %vm10878_vm14, %v10879_v15, %v10877_v36  ;;  %14537 = vrcp.f32 %v11509_v49  ;;  %v10886_v15 = vand.u32 2147483648, %v17207_v28 }
 0x632   : > { %v14524_v6 = vpop.eup %14523  ;;  %v11312_v44 = vsel %vm11310_vm0, %v11311_v26, %v11309_v7  ;;  %v10882_v52 = vmul.f32 %v14522_v16, %v17207_v28  ;;  %v11510_v54 = vadd.f32 1e-10, %v10880_v17  ;;  %v11576_v26 = vmul.f32 %v14512_v46, %v16366_v33 }
 0x633   : > { %v11314_v39 = vmul.f32 %v14524_v6, %v17215_v25  ;;  %v14526_v55 = vpop.eup %14525  ;;  %v11654_v45 = vadd.f32 1e-10, %v11312_v44  ;;  %v11720_v41 = vmul.f32 %v14514_v42, %v16371_v0  ;;  %v11721_v3 = vmul.f32 %v14514_v42, %v16381_v23  ;;  %v17307_v23 = vpop.xlane.xlu1 %11179 }
 0x634   : > { %v10884_v24 = vsel %vm10883_vm1, %v17207_v28, %v10882_v52  ;;  %v17294_v28 = vsel %vm10855_vm2, %v17104_v34, %v17202_v12  ;;  %14539 = vrsqrt.f32 %v17275_v13  ;;  %vm10843_vm6 = vcmp.eq.f32.partialorder %v17083_v56, 0.0 }
 0x635   : > { %v11316_v1 = vsel %vm11315_vm3, %v17215_v25, %v11314_v39  ;;  %v10887_v49 = vsel %vm10885_vm5, %v10886_v15, %v10884_v24  ;;  %14541 = vrcp.f32 %v11653_v51  ;;  %vm11322_vm7 = vcmp.eq.f32.partialorder %v17242_v5, inf  ;;  %v17303_v46 = vpop.eup %14527  ;;  %v17321_v15 = vpop.xlane.xlu0 %10747 }
 0x636   : > { %v11319_v33 = vsel %vm11317_vm4, %v11318_v50, %v11316_v1  ;;  %vm11324_vm8 = vcmp.eq.f32.partialorder %v17242_v5, 0.0  ;;  %v11792_v0 = vsub.f32 %v11576_v26, %v11720_v41  ;;  %vm11275_vm9 = vcmp.eq.f32.partialorder %v17085_v61, 0.0  ;;  %v14530_v42 = vpop.eup %14529 }
 0x637   : > { %14543 = vrcp.f32 %v11510_v54  ;;  %v11511_v12 = vadd.f32 1e-10, %v10887_v49  ;;  %v11325_v25 = vand.u32 2147483648, %v17242_v5  ;;  %v11793_v36 = vsub.f32 %v11577_v43, %v11721_v3  ;;  %v17310_v7 = vpop.eup %14531  ;;  %v17340_v49 = vpop.xlane.xlu1 %11182 }
 0x638   : > { %14545 = vrcp.f32 %v11654_v45  ;;  %v11655_v29 = vadd.f32 1e-10, %v11319_v33  ;;  %vm10890_vm10 = vcmp.eq.f32.partialorder %v17255_v11, inf  ;;  %v11864_v16 = vmul.f32 %v11792_v0, %v11792_v0  ;;  %v17315_v44 = vpop.eup %14533 }
 0x639   : > { %v11321_v17 = vmul.f32 %v14530_v42, %v17242_v5  ;;  %v11865_v50 = vmul.f32 %v11793_v36, %v11793_v36  ;;  %14547 = vrsqrt.f32 %v17288_v48  ;;  %v11578_v6 = vmul.f32 %v14520_v2, %v16394_v40 }
 0x63a   : > { %v11579_v52 = vmul.f32 %v14520_v2, %v16400_v4  ;;  %v11722_v51 = vmul.f32 %v14526_v55, %v16398_v63  ;;  %v11723_v39 = vmul.f32 %v14526_v55, %v16406_v18  ;;  %14549 = vrsqrt.f32 %v17307_v23  ;;  %v14536_v54 = vpop.eup %14535 }
 0x63b   : > { %14551 = vrcp.f32 %v11511_v12  ;;  %v11323_v24 = vsel %vm11322_vm7, %v17242_v5, %v11321_v17  ;;  %vm10892_vm11 = vcmp.eq.f32.partialorder %v17255_v11, 0.0  ;;  %v11937_v40 = vadd.f32 %v11865_v50, %v11864_v16  ;;  %v17327_v26 = vpop.eup %14537 }
 0x63c   : > { %vm11282_vm12 = vcmp.eq.f32.partialorder %v17092_v21, 0.0  ;;  %vm10850_vm13 = vcmp.eq.f32.partialorder %v17089_v14, 0.0  ;;  %v11326_v63 = vsel %vm11324_vm8, %v11325_v25, %v11323_v24  ;;  %v10889_v4 = vmul.f32 %v14536_v54, %v17255_v11 }
 0x63d   : > { %v11794_v18 = vsub.f32 %v11578_v6, %v11722_v51  ;;  %v11795_v2 = vsub.f32 %v11579_v52, %v11723_v39  ;;  %v11656_v43 = vadd.f32 1e-10, %v11326_v63  ;;  %v10893_v55 = vand.u32 2147483648, %v17255_v11  ;;  %11938 = vadd.xlane.f32.xlu1 %v11937_v40  ;;  %v17379_v40 = vpop.xlane.xlu1 %11185 }
 0x63e   : > { %vm11329_vm14 = vcmp.eq.f32.partialorder %v17275_v13, inf  ;;  %14553 = vrsqrt.f32 %v17321_v15  ;;  %v10891_v45 = vsel %vm10890_vm10, %v17255_v11, %v10889_v4  ;;  %v14540_v41 = vpop.eup %14539  ;;  %vm11331_vm15 = vcmp.eq.f32.partialorder %v17275_v13, 0.0 }
 0x63f   : > { %14555 = vrcp.f32 %v11655_v29  ;;  %v11866_v1 = vmul.f32 %v11794_v18, %v11794_v18  ;;  %v11867_v5 = vmul.f32 %v11795_v2, %v11795_v2  ;;  %v10894_v33 = vsel %vm10892_vm11, %v10893_v55, %v10891_v45  ;;  %v17350_v12 = vpop.eup %14541 }
 0x640   : > { %14557 = vrcp.f32 %v11656_v43  ;;  %v19362_v3 = vand.u32 2147483648, %v17083_v56  ;;  %v11512_v25 = vadd.f32 1e-10, %v10894_v33  ;;  %v11328_v36 = vmul.f32 %v14540_v41, %v17275_v13 }
 0x641   : > { %v11940_v42 = vadd.f32 %v11867_v5, %v11866_v1  ;;  %v19363_v29 = vand.u32 2147483648, %v17085_v61  ;;  %v17358_v16 = vpop.eup %14543  ;;  %v11332_v17 = vand.u32 2147483648, %v17275_v13  ;;  %14559 = vrsqrt.f32 %v17340_v49  ;;  %v17370_v61 = vpop.xlane.xlu0 %10750 }
 0x642   : > { %v10845_v0 = vsel %vm10843_vm6, %v19362_v3, %v17161_v8  ;;  %v17362_v8 = vpop.eup %14545  ;;  %vm10857_vm0 = vcmp.eq.f32.partialorder %v17104_v34, 0.0  ;;  %14561 = vrcp.f32 %v11512_v25  ;;  %v11330_v56 = vsel %vm11329_vm14, %v17275_v13, %v11328_v36 }
 0x643   : > { %v11277_v11 = vsel %vm11275_vm9, %v19363_v29, %v17170_v35  ;;  %v11505_v50 = vadd.f32 1e-10, %v10845_v0  ;;  %vm10897_vm1 = vcmp.eq.f32.partialorder %v17288_v48, inf  ;;  %vm10899_vm2 = vcmp.eq.f32.partialorder %v17288_v48, 0.0  ;;  %11941 = vadd.xlane.f32.xlu0 %v11940_v42  ;;  %v14548_v35 = vpop.eup %14547  ;;  %v17420_v29 = vpop.xlane.xlu1 %11188 }
 0x644   : > { %v11649_v6 = vadd.f32 1e-10, %v11277_v11  ;;  %v11333_v52 = vsel %vm11331_vm15, %v11332_v17, %v11330_v56  ;;  %v10900_v51 = vand.u32 2147483648, %v17288_v48  ;;  %vm11336_vm3 = vcmp.eq.f32.partialorder %v17307_v23, inf  ;;  %v14550_v39 = vpop.eup %14549 }
 0x645   : > { %14563 = vrcp.f32 %v11505_v50  ;;  %v10896_v54 = vmul.f32 %v14548_v35, %v17288_v48  ;;  %vm11338_vm4 = vcmp.eq.f32.partialorder %v17307_v23, 0.0  ;;  %v11339_v24 = vand.u32 2147483648, %v17307_v23  ;;  %v17381_v63 = vpop.eup %14551  ;;  %v17409_v3 = vpop.xlane.xlu0 %10753 }
 0x646   : > { %14565 = vrcp.f32 %v11649_v6  ;;  %v11335_v13 = vmul.f32 %v14550_v39, %v17307_v23  ;;  %v19364_v4 = vand.u32 2147483648, %v17089_v14  ;;  %v19365_v2 = vand.u32 2147483648, %v17092_v21 }
 0x647   : > { %14567 = vrsqrt.f32 %v17370_v61  ;;  %v11657_v55 = vadd.f32 1e-10, %v11333_v52  ;;  %v10898_v45 = vsel %vm10897_vm1, %v17288_v48, %v10896_v54  ;;  %vm10904_vm5 = vcmp.eq.f32.partialorder %v17321_v15, inf }
 0x648   : > { %v10852_v18 = vsel %vm10850_vm13, %v19364_v4, %v17182_v53  ;;  %v11284_v43 = vsel %vm11282_vm12, %v19365_v2, %v17192_v62  ;;  %v14554_v41 = vpop.eup %14553  ;;  %v10901_v33 = vsel %vm10899_vm2, %v10900_v51, %v10898_v45  ;;  %v11337_v14 = vsel %vm11336_vm3, %v17307_v23, %v11335_v13 }
 0x649   : > { %v11506_v1 = vadd.f32 1e-10, %v10852_v18  ;;  %v11650_v5 = vadd.f32 1e-10, %v11284_v43  ;;  %14569 = vrsqrt.f32 %v17379_v40  ;;  %v17405_v21 = vpop.eup %14555  ;;  %v11513_v53 = vadd.f32 1e-10, %v10901_v33  ;;  %v17443_v4 = vpop.xlane.xlu0 %10756 }
 0x64a   : > { %v10903_v62 = vmul.f32 %v14554_v41, %v17321_v15  ;;  %vm10906_vm6 = vcmp.eq.f32.partialorder %v17321_v15, 0.0  ;;  %v17411_v48 = vpop.eup %14557  ;;  %v11340_v0 = vsel %vm11338_vm4, %v11339_v24, %v11337_v14  ;;  %v10907_v25 = vand.u32 2147483648, %v17321_v15 }
 0x64b   : > { %14571 = vrcp.f32 %v11506_v1  ;;  %vm11343_vm7 = vcmp.eq.f32.partialorder %v17340_v49, inf  ;;  %vm11345_vm8 = vcmp.eq.f32.partialorder %v17340_v49, 0.0  ;;  %v11346_v42 = vand.u32 2147483648, %v17340_v49  ;;  %v14560_v11 = vpop.eup %14559 }
 0x64c   : > { %14573 = vrcp.f32 %v11650_v5  ;;  %v10905_v36 = vsel %vm10904_vm5, %v17321_v15, %v10903_v62  ;;  %vm10911_vm9 = vcmp.eq.f32.partialorder %v17370_v61, inf  ;;  %v19366_v23 = vand.u32 2147483648, %v17104_v34  ;;  %v17428_v6 = vpop.eup %14561 }
 0x64d   : > { %14575 = vrcp.f32 %v11657_v55  ;;  %v10908_v17 = vsel %vm10906_vm6, %v10907_v25, %v10905_v36  ;;  %v11658_v15 = vadd.f32 1e-10, %v11340_v0  ;;  %v11342_v56 = vmul.f32 %v14560_v11, %v17340_v49 }
 0x64e   : > { %14577 = vrcp.f32 %v11513_v53  ;;  %v10859_v50 = vsel %vm10857_vm0, %v19366_v23, %v17294_v28  ;;  %vm10913_vm10 = vcmp.eq.f32.partialorder %v17370_v61, 0.0  ;;  %v10914_v51 = vand.u32 2147483648, %v17370_v61 }
 0x64f   : > { %14579 = vrsqrt.f32 %v17409_v3  ;;  %v11507_v35 = vadd.f32 1e-10, %v10859_v50  ;;  %v14564_v52 = vpop.eup %14563  ;;  %vm11350_vm11 = vcmp.eq.f32.partialorder %v17379_v40, inf  ;;  %v11353_v39 = vand.u32 2147483648, %v17379_v40 }
 0x650   : > { %14581 = vrsqrt.f32 %v17420_v29  ;;  %v14566_v34 = vpop.eup %14565  ;;  %v11514_v28 = vadd.f32 1e-10, %v10908_v17  ;;  %v11580_v54 = vmul.f32 %v14564_v52, %v16408_v19  ;;  %v11581_v24 = vmul.f32 %v14564_v52, %v16417_v38 }
 0x651   : > { %v11344_v13 = vsel %vm11343_vm7, %v17340_v49, %v11342_v56  ;;  %vm11352_vm12 = vcmp.eq.f32.partialorder %v17379_v40, 0.0  ;;  %v14568_v18 = vpop.eup %14567  ;;  %v11724_v2 = vmul.f32 %v14566_v34, %v16415_v37  ;;  %v11725_v43 = vmul.f32 %v14566_v34, %v16423_v47 }
 0x652   : > { %v11347_v55 = vsel %vm11345_vm8, %v11346_v42, %v11344_v13  ;;  %14583 = vrcp.f32 %v11507_v35  ;;  %v10910_v19 = vmul.f32 %v14568_v18, %v17370_v61  ;;  %vm10918_vm13 = vcmp.eq.f32.partialorder %v17409_v3, inf }
 0x653   : > { %14585 = vrcp.f32 %v11658_v15  ;;  %v10921_v38 = vand.u32 2147483648, %v17409_v3  ;;  %v11728_v45 = vmul.f32 %v17303_v46, %v16455_v57  ;;  %v14570_v1 = vpop.eup %14569  ;;  %v11796_v5 = vsub.f32 %v11580_v54, %v11724_v2  ;;  %v17481_v15 = vpop.xlane.xlu1 %11191 }
 0x654   : > { %v11797_v41 = vsub.f32 %v11581_v24, %v11725_v43  ;;  %vm10920_vm14 = vcmp.eq.f32.partialorder %v17409_v3, 0.0  ;;  %v11729_v37 = vmul.f32 %v17303_v46, %v16463_v10  ;;  %14587 = vrsqrt.f32 %v17443_v4 }
 0x655   : > { %v14572_v47 = vpop.eup %14571  ;;  %14589 = vrcp.f32 %v11514_v28  ;;  %v11659_v49 = vadd.f32 1e-10, %v11347_v55  ;;  %v11349_v33 = vmul.f32 %v14570_v1, %v17379_v40  ;;  %vm11357_vm15 = vcmp.eq.f32.partialorder %v17420_v29, inf }
 0x656   : > { %v14574_v14 = vpop.eup %14573  ;;  %v11868_v53 = vmul.f32 %v11796_v5, %v11796_v5  ;;  %v11869_v57 = vmul.f32 %v11797_v41, %v11797_v41  ;;  %v10912_v62 = vsel %vm10911_vm9, %v17370_v61, %v10910_v19  ;;  %v11582_v0 = vmul.f32 %v14572_v47, %v16434_v30 }
 0x657   : > { %vm11359_vm0 = vcmp.eq.f32.partialorder %v17420_v29, 0.0  ;;  %v17465_v10 = vpop.eup %14575  ;;  %v11583_v46 = vmul.f32 %v14572_v47, %v16440_v60  ;;  %v11726_v25 = vmul.f32 %v14574_v14, %v16438_v59  ;;  %v11727_v36 = vmul.f32 %v14574_v14, %v16446_v27 }
 0x658   : > { %v11360_v42 = vand.u32 2147483648, %v17420_v29  ;;  %v17471_v11 = vpop.eup %14577  ;;  %v11943_v17 = vadd.f32 %v11869_v57, %v11868_v53  ;;  %v11351_v23 = vsel %vm11350_vm11, %v17379_v40, %v11349_v33  ;;  %vm10925_vm1 = vcmp.eq.f32.partialorder %v17443_v4, inf }
 0x659   : > { %v11586_v30 = vmul.f32 %v17310_v7, %v16474_v20  ;;  %v14580_v50 = vpop.eup %14579  ;;  %14591 = vrcp.f32 %v11659_v49  ;;  %v10915_v59 = vsel %vm10913_vm10, %v10914_v51, %v10912_v62  ;;  %v11798_v60 = vsub.f32 %v11582_v0, %v11726_v25  ;;  %v19367_v25 = vld [vmem:[#allocation5_spill] sm:$0xff] }
 0x65a   : > { %v11799_v27 = vsub.f32 %v11583_v46, %v11727_v36  ;;  %v14582_v56 = vpop.eup %14581  ;;  %11944 = vadd.xlane.f32.xlu1 %v11943_v17  ;;  %v11354_v35 = vsel %vm11352_vm12, %v11353_v39, %v11351_v23  ;;  %v10917_v52 = vmul.f32 %v14580_v50, %v17409_v3  ;;  %v11587_v34 = vmul.f32 %v17310_v7, %v16480_v31  ;;  %v17497_v31 = vpop.xlane.xlu0 %10759 }
 0x65b   : > { %v11730_v20 = vmul.f32 %v17315_v44, %v16478_v22  ;;  %v11870_v28 = vmul.f32 %v11798_v60, %v11798_v60  ;;  %v11356_v51 = vmul.f32 %v14582_v56, %v17420_v29  ;;  %v11731_v54 = vmul.f32 %v17315_v44, %v16486_v9 }
 0x65c   : > { %v11871_v61 = vmul.f32 %v11799_v27, %v11799_v27  ;;  %v14584_v24 = vpop.eup %14583  ;;  %v11515_v13 = vadd.f32 1e-10, %v10915_v59  ;;  %v10919_v40 = vsel %vm10918_vm13, %v17409_v3, %v10917_v52  ;;  %v10928_v39 = vand.u32 2147483648, %v17443_v4  ;;  %v19372_v52 = vld [vmem:[#allocation11_spill] sm:$0xff] }
 0x65d   : > { %v11802_v18 = vsub.f32 %v11586_v30, %v11730_v20  ;;  %v17499_v7 = vpop.eup %14585  ;;  %v10922_v2 = vsel %vm10920_vm14, %v10921_v38, %v10919_v40  ;;  %v11584_v43 = vmul.f32 %v14584_v24, %v16448_v32  ;;  %v11585_v9 = vmul.f32 %v14584_v24, %v16457_v58  ;;  %v17513_v38 = vpop.xlane.xlu1 %11194  ;;  %v19370_v30 = vld [vmem:[#allocation8_spill] sm:$0xff]  ;;  %v19373_v20 = vld [vmem:[#allocation10_spill] sm:$0xff] }
 0x65e   : > { %v11946_v22 = vadd.f32 %v11871_v61, %v11870_v28  ;;  %v14588_v44 = vpop.eup %14587  ;;  %v11660_v55 = vadd.f32 1e-10, %v11354_v35  ;;  %v11358_v19 = vsel %vm11357_vm15, %v17420_v29, %v11356_v51  ;;  %v11803_v1 = vsub.f32 %v11587_v34, %v11731_v54  ;;  %v19371_v35 = vld [vmem:[#allocation9_spill] sm:$0xff]  ;;  %v19374_v24 = vld [vmem:[#allocation12_spill] sm:$0xff] }
 0x65f   : > { %v11874_v5 = vmul.f32 %v11802_v18, %v11802_v18  ;;  %v17508_v41 = vpop.eup %14589  ;;  %v11800_v47 = vsub.f32 %v11584_v43, %v11728_v45  ;;  %v11801_v49 = vsub.f32 %v11585_v9, %v11729_v37  ;;  %v11361_v3 = vsel %vm11359_vm0, %v11360_v42, %v11358_v19  ;;  %v17520_v45 = vpop.xlane.xlu0 %10762  ;;  %v19368_v42 = vld [vmem:[#allocation7_spill] sm:$0xff] }
 0x660   : > { %11947 = vadd.xlane.f32.xlu0 %v11946_v22  ;;  %v10924_v32 = vmul.f32 %v14588_v44, %v17443_v4  ;;  %14593 = vrcp.f32 %v11515_v13  ;;  %v11516_v58 = vadd.f32 1e-10, %v10922_v2  ;;  %v11661_v33 = vadd.f32 1e-10, %v11361_v3 }
 0x661   : > { %v11875_v14 = vmul.f32 %v11803_v1, %v11803_v1  ;;  %v11872_v53 = vmul.f32 %v11800_v47, %v11800_v47  ;;  %v11873_v57 = vmul.f32 %v11801_v49, %v11801_v49  ;;  %14595 = vrsqrt.f32 %v17481_v15  ;;  %v17533_v59 = vpop.xlane.xlu1 %11197  ;;  %v19376_v49 = vld [vmem:[#allocation15_spill] sm:$0xff] }
 0x662   : > { %v10926_v62 = vsel %vm10925_vm1, %v17443_v4, %v10924_v32  ;;  %14597 = vrcp.f32 %v11660_v55  ;;  %vm10927_vm2 = vcmp.eq.f32.partialorder %v17443_v4, 0.0  ;;  %v11588_v36 = vmul.f32 %v17327_v26, %v19367_v25  ;;  %v19369_v4 = vld [vmem:[#allocation6_spill] sm:$0xff] }
 0x663   : > { %v11952_v29 = vadd.f32 %v11875_v14, %v11874_v5  ;;  %v17522_v37 = vpop.eup %14591  ;;  %v11949_v0 = vadd.f32 %v11873_v57, %v11872_v53  ;;  %v10929_v46 = vsel %vm10927_vm2, %v10928_v39, %v10926_v62  ;;  %14599 = vrsqrt.f32 %v17497_v31  ;;  %v17547_v61 = vpop.xlane.xlu0 %10765  ;;  %v19375_v5 = vld [vmem:[#allocation13_spill] sm:$0xff]  ;;  %v19377_v32 = vld [vmem:[#allocation14_spill] sm:$0xff]  ;;  %v19378_v57 = vld [vmem:[#allocation16_spill] sm:$0xff] }
 0x664   : > { %14601 = vrcp.f32 %v11516_v58  ;;  %v11589_v17 = vmul.f32 %v17327_v26, %v19368_v42  ;;  %v11732_v23 = vmul.f32 %v17350_v12, %v19369_v4  ;;  %v11733_v50 = vmul.f32 %v17350_v12, %v19370_v30 }
 0x665   : > { %11953 = vadd.xlane.f32.xlu0 %v11952_v29  ;;  %11950 = vadd.xlane.f32.xlu1 %v11949_v0  ;;  %14603 = vrcp.f32 %v11661_v33  ;;  %v11517_v60 = vadd.f32 1e-10, %v10929_v46  ;;  %vm11364_vm3 = vcmp.eq.f32.partialorder %v17481_v15, inf  ;;  %vm11366_vm4 = vcmp.eq.f32.partialorder %v17481_v15, 0.0  ;;  %v17558_v43 = vpop.xlane.xlu1 %11200 }
 0x666   : > { %14605 = vrsqrt.f32 %v17513_v38  ;;  %v11367_v27 = vand.u32 2147483648, %v17481_v15  ;;  %v11804_v26 = vsub.f32 %v11588_v36, %v11732_v23  ;;  %v11805_v56 = vsub.f32 %v11589_v17, %v11733_v50 }
 0x667   : > { %14607 = vrsqrt.f32 %v17520_v45  ;;  %vm10932_vm5 = vcmp.eq.f32.partialorder %v17497_v31, inf  ;;  %v11590_v12 = vmul.f32 %v17358_v16, %v19371_v35  ;;  %v11591_v34 = vmul.f32 %v17358_v16, %v19372_v52  ;;  %v17590_v17 = vpop.xlane.xlu0 %10768 }
 0x668   : > { %v11734_v28 = vmul.f32 %v17362_v8, %v19373_v20  ;;  %v11876_v51 = vmul.f32 %v11804_v26, %v11804_v26  ;;  %v11877_v54 = vmul.f32 %v11805_v56, %v11805_v56  ;;  %v11735_v13 = vmul.f32 %v17362_v8, %v19374_v24 }
 0x669   : > { %14609 = vrsqrt.f32 %v17533_v59  ;;  %vm10934_vm6 = vcmp.eq.f32.partialorder %v17497_v31, 0.0  ;;  %v10935_v39 = vand.u32 2147483648, %v17497_v31  ;;  %vm11371_vm7 = vcmp.eq.f32.partialorder %v17513_v38, inf }
 0x66a   : > { %v17552_v40 = vpop.eup %14593  ;;  %14611 = vrcp.f32 %v11517_v60  ;;  %v11806_v16 = vsub.f32 %v11590_v12, %v11734_v28  ;;  %v11955_v22 = vadd.f32 %v11877_v54, %v11876_v51  ;;  %v11807_v2 = vsub.f32 %v11591_v34, %v11735_v13 }
 0x66b   : > { %v14596_v18 = vpop.eup %14595  ;;  %14613 = vrsqrt.f32 %v17547_v61  ;;  %vm11373_vm8 = vcmp.eq.f32.partialorder %v17513_v38, 0.0  ;;  %v11374_v44 = vand.u32 2147483648, %v17513_v38  ;;  %v11592_v47 = vmul.f32 %v17381_v63, %v19375_v5 }
 0x66c   : > { %v17560_v8 = vpop.eup %14597  ;;  %v11363_v9 = vmul.f32 %v14596_v18, %v17481_v15  ;;  %v11878_v55 = vmul.f32 %v11806_v16, %v11806_v16  ;;  %11956 = vadd.xlane.f32.xlu1 %v11955_v22  ;;  %v11879_v1 = vmul.f32 %v11807_v2, %v11807_v2  ;;  %v11593_v3 = vmul.f32 %v17381_v63, %v19376_v49  ;;  %v17623_v18 = vpop.xlane.xlu1 %11203  ;;  %v19380_v22 = vld [vmem:[#allocation19_spill] sm:$0xff] }
 0x66d   : > { %v14600_v19 = vpop.eup %14599  ;;  %v11736_v58 = vmul.f32 %v17405_v21, %v19377_v32  ;;  %v11737_v62 = vmul.f32 %v17405_v21, %v19378_v57  ;;  %14615 = vrsqrt.f32 %v17558_v43  ;;  %vm10939_vm9 = vcmp.eq.f32.partialorder %v17520_v45, inf }
 0x66e   : > { %v17571_v33 = vpop.eup %14601  ;;  %v11365_v14 = vsel %vm11364_vm3, %v17481_v15, %v11363_v9  ;;  %v10931_v53 = vmul.f32 %v14600_v19, %v17497_v31  ;;  %vm10941_vm10 = vcmp.eq.f32.partialorder %v17520_v45, 0.0  ;;  %v11958_v63 = vadd.f32 %v11879_v1, %v11878_v55  ;;  %v19381_v9 = vld [vmem:[#allocation18_spill] sm:$0xff] }
 0x66f   : > { %v17580_v29 = vpop.eup %14603  ;;  %v11808_v0 = vsub.f32 %v11592_v47, %v11736_v58  ;;  %v11368_v25 = vsel %vm11366_vm4, %v11367_v27, %v11365_v14  ;;  %v10942_v21 = vand.u32 2147483648, %v17520_v45  ;;  %v11809_v42 = vsub.f32 %v11593_v3, %v11737_v62  ;;  %v19382_v47 = vld [vmem:[#allocation20_spill] sm:$0xff]  ;;  %v17636_v3 = vpop.xlane.xlu0 %10771 }
 0x670   : > { %v14606_v46 = vpop.eup %14605  ;;  %v10933_v36 = vsel %vm10932_vm5, %v17497_v31, %v10931_v53  ;;  %11959 = vadd.xlane.f32.xlu0 %v11958_v63  ;;  %vm11378_vm11 = vcmp.eq.f32.partialorder %v17533_v59, inf  ;;  %vm11380_vm12 = vcmp.eq.f32.partialorder %v17533_v59, 0.0  ;;  %v11381_v50 = vand.u32 2147483648, %v17533_v59  ;;  %v17649_v63 = vpop.xlane.xlu1 %11206 }
 0x671   : > { %v14608_v4 = vpop.eup %14607  ;;  %v11370_v23 = vmul.f32 %v14606_v46, %v17513_v38  ;;  %v11880_v30 = vmul.f32 %v11808_v0, %v11808_v0  ;;  %vm10946_vm13 = vcmp.eq.f32.partialorder %v17547_v61, inf  ;;  %v11881_v60 = vmul.f32 %v11809_v42, %v11809_v42  ;;  %v19383_v42 = vld [vmem:[#allocation21_spill] sm:$0xff] }
 0x672   : > { %v10938_v15 = vmul.f32 %v14608_v4, %v17520_v45  ;;  %v11662_v26 = vadd.f32 1e-10, %v11368_v25  ;;  %v10936_v56 = vsel %vm10934_vm6, %v10935_v39, %v10933_v36  ;;  %14617 = vrsqrt.f32 %v17590_v17  ;;  %v19379_v39 = vld [vmem:[#allocation17_spill] sm:$0xff] }
 0x673   : > { %v14610_v27 = vpop.eup %14609  ;;  %v11372_v35 = vsel %vm11371_vm7, %v17513_v38, %v11370_v23  ;;  %vm10948_vm14 = vcmp.eq.f32.partialorder %v17547_v61, 0.0  ;;  %v10949_v51 = vand.u32 2147483648, %v17547_v61  ;;  %v11961_v54 = vadd.f32 %v11881_v60, %v11880_v30  ;;  %v19384_v23 = vld [vmem:[#allocation23_spill] sm:$0xff]  ;;  %v19386_v60 = vld [vmem:[#allocation24_spill] sm:$0xff] }
 0x674   : > { %v17604_v12 = vpop.eup %14611  ;;  %v11375_v52 = vsel %vm11373_vm8, %v11374_v44, %v11372_v35  ;;  %v10940_v34 = vsel %vm10939_vm9, %v17520_v45, %v10938_v15  ;;  %v11377_v20 = vmul.f32 %v14610_v27, %v17533_v59  ;;  %vm11385_vm15 = vcmp.eq.f32.partialorder %v17558_v43, inf  ;;  %v17660_v15 = vpop.xlane.xlu0 %10774 }
 0x675   : > { %v14614_v31 = vpop.eup %14613  ;;  %v10943_v28 = vsel %vm10941_vm10, %v10942_v21, %v10940_v34  ;;  %v11518_v24 = vadd.f32 1e-10, %v10936_v56  ;;  %v11594_v16 = vmul.f32 %v17428_v6, %v19379_v39  ;;  %14619 = vrcp.f32 %v11662_v26  ;;  %11962 = vadd.xlane.f32.xlu1 %v11961_v54 }
 0x676   : > { %v11379_v38 = vsel %vm11378_vm11, %v17533_v59, %v11377_v20  ;;  %v10945_v13 = vmul.f32 %v14614_v31, %v17547_v61  ;;  %v11663_v45 = vadd.f32 1e-10, %v11375_v52  ;;  %v11595_v2 = vmul.f32 %v17428_v6, %v19380_v22  ;;  %v17680_v31 = vpop.xlane.xlu1 %11209 }
 0x677   : > { %v11738_v44 = vmul.f32 %v17411_v48, %v19381_v9  ;;  %v14616_v55 = vpop.eup %14615  ;;  %v11519_v19 = vadd.f32 1e-10, %v10943_v28  ;;  %v11382_v1 = vsel %vm11380_vm12, %v11381_v50, %v11379_v38  ;;  %v11739_v49 = vmul.f32 %v17411_v48, %v19382_v47 }
 0x678   : > { %v10947_v5 = vsel %vm10946_vm13, %v17547_v61, %v10945_v13  ;;  %v11384_v32 = vmul.f32 %v14616_v55, %v17558_v43  ;;  %vm11387_vm0 = vcmp.eq.f32.partialorder %v17558_v43, 0.0  ;;  %14621 = vrsqrt.f32 %v17623_v18  ;;  %v19388_v13 = vld [vmem:[#allocation27_spill] sm:$0xff] }
 0x679   : > { %v11810_v6 = vsub.f32 %v11594_v16, %v11738_v44  ;;  %14623 = vrcp.f32 %v11518_v24  ;;  %v10950_v59 = vsel %vm10948_vm14, %v10949_v51, %v10947_v5  ;;  %v11388_v58 = vand.u32 2147483648, %v17558_v43  ;;  %v19387_v24 = vld [vmem:[#allocation25_spill] sm:$0xff]  ;;  %v17694_v44 = vpop.xlane.xlu0 %10777 }
 0x67a   : > { %v11811_v14 = vsub.f32 %v11595_v2, %v11739_v49  ;;  %14625 = vrcp.f32 %v11663_v45  ;;  %v11664_v53 = vadd.f32 1e-10, %v11382_v1  ;;  %v11386_v48 = vsel %vm11385_vm15, %v17558_v43, %v11384_v32  ;;  %v19385_v43 = vld [vmem:[#allocation22_spill] sm:$0xff]  ;;  %v19390_v2 = vld [vmem:[#allocation28_spill] sm:$0xff] }
 0x67b   : > { %v11882_v57 = vmul.f32 %v11810_v6, %v11810_v6  ;;  %14627 = vrcp.f32 %v11519_v19  ;;  %vm10953_vm1 = vcmp.eq.f32.partialorder %v17590_v17, inf  ;;  %vm10955_vm2 = vcmp.eq.f32.partialorder %v17590_v17, 0.0  ;;  %v19389_v45 = vld [vmem:[#allocation26_spill] sm:$0xff] }
 0x67c   : > { %v11883_v62 = vmul.f32 %v11811_v14, %v11811_v14  ;;  %v14618_v61 = vpop.eup %14617  ;;  %v11520_v0 = vadd.f32 1e-10, %v10950_v59  ;;  %v11389_v46 = vsel %vm11387_vm0, %v11388_v58, %v11386_v48  ;;  %v10956_v25 = vand.u32 2147483648, %v17590_v17 }
 0x67d   : > { %14629 = vrsqrt.f32 %v17636_v3  ;;  %v10952_v36 = vmul.f32 %v14618_v61, %v17590_v17  ;;  %v11596_v4 = vmul.f32 %v17471_v11, %v19383_v42  ;;  %v11597_v30 = vmul.f32 %v17471_v11, %v19384_v23 }
 0x67e   : > { %v11964_v21 = vadd.f32 %v11883_v62, %v11882_v57  ;;  %14631 = vrcp.f32 %v11664_v53  ;;  %vm11392_vm3 = vcmp.eq.f32.partialorder %v17623_v18, inf  ;;  %v11740_v50 = vmul.f32 %v17465_v10, %v19385_v43  ;;  %v17713_v53 = vpop.xlane.xlu1 %11212  ;;  %v19392_v62 = vld [vmem:[#allocation31_spill] sm:$0xff] }
 0x67f   : > { %v11741_v27 = vmul.f32 %v17465_v10, %v19386_v60  ;;  %v11665_v26 = vadd.f32 1e-10, %v11389_v46  ;;  %v10954_v56 = vsel %vm10953_vm1, %v17590_v17, %v10952_v36  ;;  %vm11394_vm4 = vcmp.eq.f32.partialorder %v17623_v18, 0.0  ;;  %v17672_v11 = vpop.eup %14619 }
 0x680   : > { %11965 = vadd.xlane.f32.xlu0 %v11964_v21  ;;  %14633 = vrsqrt.f32 %v17649_v63  ;;  %v11395_v35 = vand.u32 2147483648, %v17623_v18  ;;  %v11812_v52 = vsub.f32 %v11596_v4, %v11740_v50  ;;  %v10957_v10 = vsel %vm10955_vm2, %v10956_v25, %v10954_v56  ;;  %v19394_v4 = vld [vmem:[#allocation32_spill] sm:$0xff]  ;;  %v17736_v56 = vpop.xlane.xlu0 %10780 }
 0x681   : > { %v11813_v34 = vsub.f32 %v11597_v30, %v11741_v27  ;;  %14635 = vrsqrt.f32 %v17660_v15  ;;  %vm10960_vm5 = vcmp.eq.f32.partialorder %v17636_v3, inf  ;;  %v10963_v20 = vand.u32 2147483648, %v17636_v3 }
 0x682   : > { %14637 = vrcp.f32 %v11520_v0  ;;  %v14622_v28 = vpop.eup %14621  ;;  %v11884_v51 = vmul.f32 %v11812_v52, %v11812_v52  ;;  %v11598_v38 = vmul.f32 %v17508_v41, %v19387_v24  ;;  %v11599_v39 = vmul.f32 %v17508_v41, %v19388_v13  ;;  %v19393_v0 = vld [vmem:[#allocation30_spill] sm:$0xff] }
 0x683   : > { %v11885_v54 = vmul.f32 %v11813_v34, %v11813_v34  ;;  %v17686_v16 = vpop.eup %14623  ;;  %14639 = vrcp.f32 %v11665_v26  ;;  %v11391_v17 = vmul.f32 %v14622_v28, %v17623_v18  ;;  %vm10962_vm6 = vcmp.eq.f32.partialorder %v17636_v3, 0.0 }
 0x684   : > { %v11742_v22 = vmul.f32 %v17499_v7, %v19389_v45  ;;  %v11743_v9 = vmul.f32 %v17499_v7, %v19390_v2  ;;  %v17696_v55 = vpop.eup %14625  ;;  %v11521_v19 = vadd.f32 1e-10, %v10957_v10  ;;  %vm11399_vm7 = vcmp.eq.f32.partialorder %v17649_v63, inf }
 0x685   : > { %v11967_v1 = vadd.f32 %v11885_v54, %v11884_v51  ;;  %14641 = vrsqrt.f32 %v17680_v31  ;;  %v17700_v41 = vpop.eup %14627  ;;  %v11393_v5 = vsel %vm11392_vm3, %v17623_v18, %v11391_v17  ;;  %vm11401_vm8 = vcmp.eq.f32.partialorder %v17649_v63, 0.0  ;;  %v19391_v18 = vld [vmem:[#allocation29_spill] sm:$0xff]  ;;  %v17758_v17 = vpop.xlane.xlu1 %11215 }
 0x686   : > { %v11814_v47 = vsub.f32 %v11598_v38, %v11742_v22  ;;  %v11815_v7 = vsub.f32 %v11599_v39, %v11743_v9  ;;  %v11396_v32 = vsel %vm11394_vm4, %v11395_v35, %v11393_v5  ;;  %v11402_v6 = vand.u32 2147483648, %v17649_v63  ;;  %v19395_v22 = vld [vmem:[#allocation33_spill] sm:$0xff]  ;;  %v19396_v9 = vld [vmem:[#allocation35_spill] sm:$0xff] }
 0x687   : > { %v14630_v49 = vpop.eup %14629  ;;  %11968 = vadd.xlane.f32.xlu1 %v11967_v1  ;;  %vm10967_vm9 = vcmp.eq.f32.partialorder %v17660_v15, inf  ;;  %14643 = vrsqrt.f32 %v17694_v44  ;;  %vm10969_vm10 = vcmp.eq.f32.partialorder %v17660_v15, 0.0  ;;  %v11600_v57 = vmul.f32 %v17552_v40, %v19391_v18 }
 0x688   : > { %v10959_v59 = vmul.f32 %v14630_v49, %v17636_v3  ;;  %v11886_v58 = vmul.f32 %v11814_v47, %v11814_v47  ;;  %v11887_v14 = vmul.f32 %v11815_v7, %v11815_v7  ;;  %v17715_v48 = vpop.eup %14631  ;;  %14645 = vrcp.f32 %v11521_v19  ;;  %v19397_v47 = vld [vmem:[#allocation34_spill] sm:$0xff]  ;;  %v17773_v49 = vpop.xlane.xlu0 %10783 }
 0x689   : > { %v11601_v61 = vmul.f32 %v17552_v40, %v19392_v62  ;;  %v11744_v46 = vmul.f32 %v17522_v37, %v19393_v0  ;;  %v11666_v36 = vadd.f32 1e-10, %v11396_v32  ;;  %v11745_v23 = vmul.f32 %v17522_v37, %v19394_v4  ;;  %v19399_v4 = vld [vmem:[#allocation37_spill] sm:$0xff] }
 0x68a   : > { %v14634_v25 = vpop.eup %14633  ;;  %v10961_v21 = vsel %vm10960_vm5, %v17636_v3, %v10959_v59  ;;  %v11970_v42 = vadd.f32 %v11887_v14, %v11886_v58  ;;  %v10970_v50 = vand.u32 2147483648, %v17660_v15  ;;  %14647 = vrsqrt.f32 %v17713_v53  ;;  %v19398_v59 = vld [vmem:[#allocation36_spill] sm:$0xff] }
 0x68b   : > { %v14636_v30 = vpop.eup %14635  ;;  %v11398_v43 = vmul.f32 %v14634_v25, %v17649_v63  ;;  %v11816_v60 = vsub.f32 %v11600_v57, %v11744_v46  ;;  %vm11406_vm11 = vcmp.eq.f32.partialorder %v17680_v31, inf  ;;  %vm11408_vm12 = vcmp.eq.f32.partialorder %v17680_v31, 0.0 }
 0x68c   : > { %v17731_v40 = vpop.eup %14637  ;;  %v10966_v27 = vmul.f32 %v14636_v30, %v17660_v15  ;;  %11971 = vadd.xlane.f32.xlu0 %v11970_v42  ;;  %v11817_v26 = vsub.f32 %v11601_v61, %v11745_v23  ;;  %v10964_v37 = vsel %vm10962_vm6, %v10963_v20, %v10961_v21  ;;  %v11409_v52 = vand.u32 2147483648, %v17680_v31  ;;  %v19400_v30 = vld [vmem:[#allocation39_spill] sm:$0xff] }
 0x68d   : > { %v11400_v35 = vsel %vm11399_vm7, %v17649_v63, %v11398_v43  ;;  %v11888_v34 = vmul.f32 %v11816_v60, %v11816_v60  ;;  %v17744_v10 = vpop.eup %14639  ;;  %14649 = vrcp.f32 %v11666_v36  ;;  %vm10974_vm13 = vcmp.eq.f32.partialorder %v17694_v44, inf  ;;  %v17793_v36 = vpop.xlane.xlu1 %11218 }
 0x68e   : > { %v10968_v28 = vsel %vm10967_vm9, %v17660_v15, %v10966_v27  ;;  %v11889_v51 = vmul.f32 %v11817_v26, %v11817_v26  ;;  %v11403_v3 = vsel %vm11401_vm8, %v11402_v6, %v11400_v35  ;;  %vm10976_vm14 = vcmp.eq.f32.partialorder %v17694_v44, 0.0  ;;  %v19401_v27 = vld [vmem:[#allocation38_spill] sm:$0xff] }
 0x68f   : > { %v14642_v54 = vpop.eup %14641  ;;  %v10977_v20 = vand.u32 2147483648, %v17694_v44  ;;  %14651 = vrsqrt.f32 %v17736_v56  ;;  %v11522_v24 = vadd.f32 1e-10, %v10964_v37  ;;  %v10971_v38 = vsel %vm10969_vm10, %v10970_v50, %v10968_v28  ;;  %v19402_v37 = vld [vmem:[#allocation40_spill] sm:$0xff]  ;;  %v17812_v28 = vpop.xlane.xlu0 %10786 }
 0x690   : > { %v11405_v13 = vmul.f32 %v14642_v54, %v17680_v31  ;;  %v11973_v39 = vadd.f32 %v11889_v51, %v11888_v34  ;;  %vm11413_vm15 = vcmp.eq.f32.partialorder %v17713_v53, inf  ;;  %v11416_v63 = vand.u32 2147483648, %v17713_v53 }
 0x691   : > { %v14644_v45 = vpop.eup %14643  ;;  %v11602_v2 = vmul.f32 %v17571_v33, %v19395_v22  ;;  %v11603_v19 = vmul.f32 %v17571_v33, %v19396_v9  ;;  %v11667_v1 = vadd.f32 1e-10, %v11403_v3  ;;  %vm11415_vm0 = vcmp.eq.f32.partialorder %v17713_v53, 0.0 }
 0x692   : > { %v11407_v15 = vsel %vm11406_vm11, %v17680_v31, %v11405_v13  ;;  %v10973_v5 = vmul.f32 %v14644_v45, %v17694_v44  ;;  %11974 = vadd.xlane.f32.xlu1 %v11973_v39  ;;  %v11746_v7 = vmul.f32 %v17560_v8, %v19397_v47  ;;  %v17775_v32 = vpop.eup %14645  ;;  %v11523_v6 = vadd.f32 1e-10, %v10971_v38  ;;  %v19406_v47 = vld [vmem:[#allocation44_spill] sm:$0xff] }
 0x693   : > { %v11410_v33 = vsel %vm11408_vm12, %v11409_v52, %v11407_v15  ;;  %v11747_v58 = vmul.f32 %v17560_v8, %v19398_v59  ;;  %14653 = vrsqrt.f32 %v17758_v17  ;;  %vm10981_vm1 = vcmp.eq.f32.partialorder %v17736_v56, inf  ;;  %v19405_v15 = vld [vmem:[#allocation42_spill] sm:$0xff] }
 0x694   : > { %14655 = vrcp.f32 %v11522_v24  ;;  %v10975_v14 = vsel %vm10974_vm13, %v17694_v44, %v10973_v5  ;;  %v11818_v18 = vsub.f32 %v11602_v2, %v11746_v7  ;;  %v14648_v57 = vpop.eup %14647  ;;  %v11668_v62 = vadd.f32 1e-10, %v11410_v33  ;;  %v17831_v2 = vpop.xlane.xlu1 %11221 }
 0x695   : > { %v10978_v61 = vsel %vm10976_vm14, %v10977_v20, %v10975_v14  ;;  %v11819_v31 = vsub.f32 %v11603_v19, %v11747_v58  ;;  %14657 = vrsqrt.f32 %v17773_v49  ;;  %v11412_v8 = vmul.f32 %v14648_v57, %v17713_v53  ;;  %v17846_v14 = vpop.xlane.xlu0 %10789 }
 0x696   : > { %14659 = vrcp.f32 %v11667_v1  ;;  %vm10983_vm2 = vcmp.eq.f32.partialorder %v17736_v56, 0.0  ;;  %v11890_v0 = vmul.f32 %v11818_v18, %v11818_v18  ;;  %v10984_v46 = vand.u32 2147483648, %v17736_v56 }
 0x697   : > { %14661 = vrcp.f32 %v11523_v6  ;;  %v11891_v25 = vmul.f32 %v11819_v31, %v11819_v31  ;;  %vm11420_vm3 = vcmp.eq.f32.partialorder %v17758_v17, inf  ;;  %v17795_v21 = vpop.eup %14649  ;;  %v11524_v44 = vadd.f32 1e-10, %v10978_v61 }
 0x698   : > { %v11414_v42 = vsel %vm11413_vm15, %v17713_v53, %v11412_v8  ;;  %v11604_v23 = vmul.f32 %v17604_v12, %v19399_v4  ;;  %v11605_v43 = vmul.f32 %v17604_v12, %v19400_v30  ;;  %14663 = vrcp.f32 %v11668_v62  ;;  %v19407_v30 = vld [vmem:[#allocation45_spill] sm:$0xff] }
 0x699   : > { %v14652_v50 = vpop.eup %14651  ;;  %v11976_v60 = vadd.f32 %v11891_v25, %v11890_v0  ;;  %v11748_v26 = vmul.f32 %v17580_v29, %v19401_v27  ;;  %v11749_v35 = vmul.f32 %v17580_v29, %v19402_v37  ;;  %vm11422_vm4 = vcmp.eq.f32.partialorder %v17758_v17, 0.0  ;;  %v19409_v27 = vld [vmem:[#allocation46_spill] sm:$0xff]  ;;  %v19410_v37 = vld [vmem:[#allocation48_spill] sm:$0xff] }
 0x69a   : > { %v10980_v52 = vmul.f32 %v14652_v50, %v17736_v56  ;;  %v11423_v34 = vand.u32 2147483648, %v17758_v17  ;;  %14665 = vrsqrt.f32 %v17793_v36  ;;  %v11417_v12 = vsel %vm11415_vm0, %v11416_v63, %v11414_v42  ;;  %v19403_v63 = vld [vmem:[#allocation41_spill] sm:$0xff]  ;;  %v17865_v42 = vpop.xlane.xlu1 %11224 }
 0x69b   : > { %11977 = vadd.xlane.f32.xlu0 %v11976_v60  ;;  %vm10988_vm5 = vcmp.eq.f32.partialorder %v17773_v49, inf  ;;  %v11820_v51 = vsub.f32 %v11604_v23, %v11748_v26  ;;  %v11821_v54 = vsub.f32 %v11605_v43, %v11749_v35  ;;  %14667 = vrcp.f32 %v11524_v44  ;;  %v19408_v60 = vld [vmem:[#allocation47_spill] sm:$0xff] }
 0x69c   : > { %v10982_v29 = vsel %vm10981_vm1, %v17736_v56, %v10980_v52  ;;  %vm10990_vm6 = vcmp.eq.f32.partialorder %v17773_v49, 0.0  ;;  %v10991_v3 = vand.u32 2147483648, %v17773_v49  ;;  %14669 = vrsqrt.f32 %v17812_v28  ;;  %v19404_v56 = vld [vmem:[#allocation43_spill] sm:$0xff]  ;;  %v17879_v52 = vpop.xlane.xlu0 %10792 }
 0x69d   : > { %v14654_v20 = vpop.eup %14653  ;;  %v10985_v24 = vsel %vm10983_vm2, %v10984_v46, %v10982_v29  ;;  %v11892_v53 = vmul.f32 %v11820_v51, %v11820_v51  ;;  %v11893_v38 = vmul.f32 %v11821_v54, %v11821_v54  ;;  %v11669_v39 = vadd.f32 1e-10, %v11417_v12 }
 0x69e   : > { %v17825_v13 = vpop.eup %14655  ;;  %v11419_v45 = vmul.f32 %v14654_v20, %v17758_v17  ;;  %vm11427_vm7 = vcmp.eq.f32.partialorder %v17793_v36, inf  ;;  %v11606_v22 = vmul.f32 %v17686_v16, %v19403_v63  ;;  %v11607_v1 = vmul.f32 %v17686_v16, %v19404_v56 }
 0x69f   : > { %v14658_v9 = vpop.eup %14657  ;;  %v11979_v19 = vadd.f32 %v11893_v38, %v11892_v53  ;;  %v11750_v5 = vmul.f32 %v17672_v11, %v19405_v15  ;;  %v11751_v7 = vmul.f32 %v17672_v11, %v19406_v47  ;;  %v11525_v33 = vadd.f32 1e-10, %v10985_v24  ;;  %v17897_v38 = vpop.xlane.xlu1 %11227  ;;  %v19412_v15 = vld [vmem:[#allocation51_spill] sm:$0xff] }
 0x6a0   : > { %v17839_v6 = vpop.eup %14659  ;;  %v11421_v59 = vsel %vm11420_vm3, %v17758_v17, %v11419_v45  ;;  %v10987_v58 = vmul.f32 %v14658_v9, %v17773_v49  ;;  %vm11429_vm8 = vcmp.eq.f32.partialorder %v17793_v36, 0.0  ;;  %14671 = vrsqrt.f32 %v17831_v2 }
 0x6a1   : > { %v17848_v16 = vpop.eup %14661  ;;  %v11424_v18 = vsel %vm11422_vm4, %v11423_v34, %v11421_v59  ;;  %11980 = vadd.xlane.f32.xlu1 %v11979_v19  ;;  %v11822_v11 = vsub.f32 %v11606_v22, %v11750_v5  ;;  %v11823_v57 = vsub.f32 %v11607_v1, %v11751_v7  ;;  %14673 = vrcp.f32 %v11669_v39  ;;  %v19411_v22 = vld [vmem:[#allocation49_spill] sm:$0xff]  ;;  %v19413_v7 = vld [vmem:[#allocation50_spill] sm:$0xff] }
 0x6a2   : > { %v11670_v62 = vadd.f32 1e-10, %v11424_v18  ;;  %v10989_v61 = vsel %vm10988_vm5, %v17773_v49, %v10987_v58  ;;  %v11430_v31 = vand.u32 2147483648, %v17793_v36  ;;  %v17857_v8 = vpop.eup %14663  ;;  %vm10995_vm9 = vcmp.eq.f32.partialorder %v17812_v28, inf  ;;  %v17915_v58 = vpop.xlane.xlu0 %10795 }
 0x6a3   : > { %v11894_v0 = vmul.f32 %v11822_v11, %v11822_v11  ;;  %v11895_v17 = vmul.f32 %v11823_v57, %v11823_v57  ;;  %14675 = vrsqrt.f32 %v17846_v14  ;;  %v10992_v25 = vsel %vm10990_vm6, %v10991_v3, %v10989_v61 }
 0x6a4   : > { %v14666_v46 = vpop.eup %14665  ;;  %14677 = vrcp.f32 %v11525_v33  ;;  %vm10997_vm10 = vcmp.eq.f32.partialorder %v17812_v28, 0.0  ;;  %v10998_v44 = vand.u32 2147483648, %v17812_v28  ;;  %vm11434_vm11 = vcmp.eq.f32.partialorder %v17831_v2, inf  ;;  %v19414_v33 = vld [vmem:[#allocation52_spill] sm:$0xff] }
 0x6a5   : > { %v11426_v4 = vmul.f32 %v14666_v46, %v17793_v36  ;;  %v11982_v23 = vadd.f32 %v11895_v17, %v11894_v0  ;;  %v11608_v43 = vmul.f32 %v17700_v41, %v19407_v30  ;;  %v17871_v50 = vpop.eup %14667  ;;  %14679 = vrcp.f32 %v11670_v62 }
 0x6a6   : > { %v11609_v49 = vmul.f32 %v17700_v41, %v19408_v60  ;;  %v11752_v26 = vmul.f32 %v17696_v55, %v19409_v27  ;;  %v11753_v35 = vmul.f32 %v17696_v55, %v19410_v37  ;;  %v14670_v34 = vpop.eup %14669  ;;  %v11526_v12 = vadd.f32 1e-10, %v10992_v25  ;;  %v19415_v27 = vld [vmem:[#allocation53_spill] sm:$0xff]  ;;  %v19416_v37 = vld [vmem:[#allocation55_spill] sm:$0xff] }
 0x6a7   : > { %v11428_v51 = vsel %vm11427_vm7, %v17793_v36, %v11426_v4  ;;  %11983 = vadd.xlane.f32.xlu0 %v11982_v23  ;;  %vm11436_vm12 = vcmp.eq.f32.partialorder %v17831_v2, 0.0  ;;  %14681 = vrsqrt.f32 %v17865_v42  ;;  %v10994_v54 = vmul.f32 %v14670_v34, %v17812_v28 }
 0x6a8   : > { %v11431_v41 = vsel %vm11429_vm8, %v11430_v31, %v11428_v51  ;;  %v11824_v29 = vsub.f32 %v11608_v43, %v11752_v26  ;;  %v11825_v55 = vsub.f32 %v11609_v49, %v11753_v35  ;;  %v11437_v3 = vand.u32 2147483648, %v17831_v2  ;;  %v17939_v43 = vpop.xlane.xlu1 %11230  ;;  %v19417_v35 = vld [vmem:[#allocation54_spill] sm:$0xff] }
 0x6a9   : > { %vm11002_vm13 = vcmp.eq.f32.partialorder %v17846_v14, inf  ;;  %vm11004_vm14 = vcmp.eq.f32.partialorder %v17846_v14, 0.0  ;;  %14683 = vrsqrt.f32 %v17879_v52  ;;  %v10996_v20 = vsel %vm10995_vm9, %v17812_v28, %v10994_v54  ;;  %v19418_v54 = vld [vmem:[#allocation56_spill] sm:$0xff] }
 0x6aa   : > { %v11005_v24 = vand.u32 2147483648, %v17846_v14  ;;  %v11896_v36 = vmul.f32 %v11824_v29, %v11824_v29  ;;  %v11897_v53 = vmul.f32 %v11825_v55, %v11825_v55  ;;  %v14672_v39 = vpop.eup %14671  ;;  %14685 = vrcp.f32 %v11526_v12  ;;  %v17953_v55 = vpop.xlane.xlu0 %10798 }
 0x6ab   : > { %v11671_v45 = vadd.f32 1e-10, %v11431_v41  ;;  %v10999_v63 = vsel %vm10997_vm10, %v10998_v44, %v10996_v20  ;;  %v11610_v9 = vmul.f32 %v17731_v40, %v19411_v22  ;;  %v17903_v19 = vpop.eup %14673  ;;  %v11433_v56 = vmul.f32 %v14672_v39, %v17831_v2 }
 0x6ac   : > { %v11985_v1 = vadd.f32 %v11897_v53, %v11896_v36  ;;  %vm11441_vm15 = vcmp.eq.f32.partialorder %v17865_v42, inf  ;;  %v11611_v5 = vmul.f32 %v17731_v40, %v19412_v15  ;;  %vm11443_vm0 = vcmp.eq.f32.partialorder %v17865_v42, 0.0  ;;  %v17976_v15 = vpop.xlane.xlu1 %11233 }
 0x6ad   : > { %v14676_v47 = vpop.eup %14675  ;;  %v11754_v28 = vmul.f32 %v17715_v48, %v19413_v7  ;;  %v11755_v59 = vmul.f32 %v17715_v48, %v19414_v33  ;;  %14687 = vrsqrt.f32 %v17897_v38  ;;  %v11527_v11 = vadd.f32 1e-10, %v10999_v63  ;;  %v19420_v33 = vld [vmem:[#allocation59_spill] sm:$0xff] }
 0x6ae   : > { %v17917_v18 = vpop.eup %14677  ;;  %v11435_v40 = vsel %vm11434_vm11, %v17831_v2, %v11433_v56  ;;  %v11001_v57 = vmul.f32 %v14676_v47, %v17846_v14  ;;  %11986 = vadd.xlane.f32.xlu1 %v11985_v1  ;;  %v11444_v62 = vand.u32 2147483648, %v17865_v42  ;;  %14689 = vrcp.f32 %v11671_v45 }
 0x6af   : > { %v11438_v48 = vsel %vm11436_vm12, %v11437_v3, %v11435_v40  ;;  %v11826_v61 = vsub.f32 %v11610_v9, %v11754_v28  ;;  %v11827_v31 = vsub.f32 %v11611_v5, %v11755_v59  ;;  %v17926_v0 = vpop.eup %14679  ;;  %vm11009_vm1 = vcmp.eq.f32.partialorder %v17879_v52, inf }
 0x6b0   : > { %v11003_v17 = vsel %vm11002_vm13, %v17846_v14, %v11001_v57  ;;  %vm11011_vm2 = vcmp.eq.f32.partialorder %v17879_v52, 0.0  ;;  %14691 = vrsqrt.f32 %v17915_v58  ;;  %v11012_v2 = vand.u32 2147483648, %v17879_v52  ;;  %v19421_v57 = vld [vmem:[#allocation58_spill] sm:$0xff] }
 0x6b1   : > { %v14682_v46 = vpop.eup %14681  ;;  %v11006_v25 = vsel %vm11004_vm14, %v11005_v24, %v11003_v17  ;;  %v11898_v44 = vmul.f32 %v11826_v61, %v11826_v61  ;;  %v11899_v4 = vmul.f32 %v11827_v31, %v11827_v31  ;;  %14693 = vrcp.f32 %v11527_v11  ;;  %v17990_v31 = vpop.xlane.xlu0 %10801 }
 0x6b2   : > { %v11672_v23 = vadd.f32 1e-10, %v11438_v48  ;;  %v11440_v30 = vmul.f32 %v14682_v46, %v17865_v42  ;;  %vm11448_vm3 = vcmp.eq.f32.partialorder %v17897_v38, inf  ;;  %v11612_v26 = vmul.f32 %v17775_v32, %v19415_v27  ;;  %v19422_v48 = vld [vmem:[#allocation60_spill] sm:$0xff] }
 0x6b3   : > { %v14684_v60 = vpop.eup %14683  ;;  %v11988_v49 = vadd.f32 %v11899_v4, %v11898_v44  ;;  %v11613_v14 = vmul.f32 %v17775_v32, %v19416_v37  ;;  %v11756_v34 = vmul.f32 %v17744_v10, %v19417_v35  ;;  %v11528_v12 = vadd.f32 1e-10, %v11006_v25 }
 0x6b4   : > { %v11442_v51 = vsel %vm11441_vm15, %v17865_v42, %v11440_v30  ;;  %v11008_v41 = vmul.f32 %v14684_v60, %v17879_v52  ;;  %v11757_v29 = vmul.f32 %v17744_v10, %v19418_v54  ;;  %v17955_v3 = vpop.eup %14685  ;;  %vm11450_vm4 = vcmp.eq.f32.partialorder %v17897_v38, 0.0  ;;  %v18007_v60 = vpop.xlane.xlu1 %11236 }
 0x6b5   : > { %v11445_v32 = vsel %vm11443_vm0, %v11444_v62, %v11442_v51  ;;  %11989 = vadd.xlane.f32.xlu0 %v11988_v49  ;;  %v11828_v20 = vsub.f32 %v11612_v26, %v11756_v34  ;;  %14695 = vrsqrt.f32 %v17939_v43  ;;  %v11451_v42 = vand.u32 2147483648, %v17897_v38  ;;  %v19423_v26 = vld [vmem:[#allocation61_spill] sm:$0xff] }
 0x6b6   : > { %14697 = vrcp.f32 %v11672_v23  ;;  %v11673_v24 = vadd.f32 1e-10, %v11445_v32  ;;  %v11010_v36 = vsel %vm11009_vm1, %v17879_v52, %v11008_v41  ;;  %v11829_v10 = vsub.f32 %v11613_v14, %v11757_v29  ;;  %v19419_v52 = vld [vmem:[#allocation57_spill] sm:$0xff]  ;;  %v19424_v14 = vld [vmem:[#allocation63_spill] sm:$0xff]  ;;  %v19426_v41 = vld [vmem:[#allocation64_spill] sm:$0xff]  ;;  %v18022_v29 = vpop.xlane.xlu0 %10804 }
 0x6b7   : > { %v14688_v53 = vpop.eup %14687  ;;  %v11013_v39 = vsel %vm11011_vm2, %v11012_v2, %v11010_v36  ;;  %v11900_v45 = vmul.f32 %v11828_v20, %v11828_v20  ;;  %14699 = vrsqrt.f32 %v17953_v55  ;;  %vm11016_vm5 = vcmp.eq.f32.partialorder %v17915_v58, inf }
 0x6b8   : > { %14701 = vrcp.f32 %v11528_v12  ;;  %v11447_v63 = vmul.f32 %v14688_v53, %v17897_v38  ;;  %v11901_v22 = vmul.f32 %v11829_v10, %v11829_v10  ;;  %v17970_v9 = vpop.eup %14689  ;;  %vm11018_vm6 = vcmp.eq.f32.partialorder %v17915_v58, 0.0  ;;  %v19425_v12 = vld [vmem:[#allocation62_spill] sm:$0xff] }
 0x6b9   : > { %14703 = vrcp.f32 %v11673_v24  ;;  %v11019_v56 = vand.u32 2147483648, %v17915_v58  ;;  %v11614_v1 = vmul.f32 %v17825_v13, %v19419_v52  ;;  %v11529_v47 = vadd.f32 1e-10, %v11013_v39 }
 0x6ba   : > { %v14692_v5 = vpop.eup %14691  ;;  %v11449_v7 = vsel %vm11448_vm3, %v17897_v38, %v11447_v63  ;;  %v11991_v28 = vadd.f32 %v11901_v22, %v11900_v45  ;;  %v11615_v59 = vmul.f32 %v17825_v13, %v19420_v33  ;;  %v11758_v62 = vmul.f32 %v17795_v21, %v19421_v57 }
 0x6bb   : > { %v11452_v11 = vsel %vm11450_vm4, %v11451_v42, %v11449_v7  ;;  %v11015_v40 = vmul.f32 %v14692_v5, %v17915_v58  ;;  %v11759_v61 = vmul.f32 %v17795_v21, %v19422_v48  ;;  %v17992_v17 = vpop.eup %14693  ;;  %vm11455_vm7 = vcmp.eq.f32.partialorder %v17939_v43, inf  ;;  %v19427_v7 = vld [vmem:[#allocation65_spill] sm:$0xff] }
 0x6bc   : > { %11992 = vadd.xlane.f32.xlu1 %v11991_v28  ;;  %vm11457_vm8 = vcmp.eq.f32.partialorder %v17939_v43, 0.0  ;;  %v11458_v13 = vand.u32 2147483648, %v17939_v43  ;;  %14705 = vrsqrt.f32 %v17976_v15  ;;  %vm11023_vm9 = vcmp.eq.f32.partialorder %v17953_v55, inf  ;;  %v19428_v28 = vld [vmem:[#allocation67_spill] sm:$0xff] }
 0x6bd   : > { %v11017_v38 = vsel %vm11016_vm5, %v17915_v58, %v11015_v40  ;;  %v11830_v21 = vsub.f32 %v11614_v1, %v11758_v62  ;;  %v11831_v46 = vsub.f32 %v11615_v59, %v11759_v61  ;;  %14707 = vrcp.f32 %v11529_v47  ;;  %v18046_v1 = vpop.xlane.xlu1 %11239  ;;  %v19429_v40 = vld [vmem:[#allocation66_spill] sm:$0xff]  ;;  %v19430_v62 = vld [vmem:[#allocation68_spill] sm:$0xff]  ;;  %v18059_v61 = vpop.xlane.xlu0 %10807 }
 0x6be   : > { %v11674_v25 = vadd.f32 1e-10, %v11452_v11  ;;  %vm11025_vm10 = vcmp.eq.f32.partialorder %v17953_v55, 0.0  ;;  %v11026_v2 = vand.u32 2147483648, %v17953_v55  ;;  %v11020_v4 = vsel %vm11018_vm6, %v11019_v56, %v11017_v38 }
 0x6bf   : > { %v14696_v44 = vpop.eup %14695  ;;  %v11902_v23 = vmul.f32 %v11830_v21, %v11830_v21  ;;  %v11903_v30 = vmul.f32 %v11831_v46, %v11831_v46  ;;  %14709 = vrsqrt.f32 %v17990_v31  ;;  %vm11462_vm11 = vcmp.eq.f32.partialorder %v17976_v15, inf }
 0x6c0   : > { %v18009_v49 = vpop.eup %14697  ;;  %v11454_v27 = vmul.f32 %v14696_v44, %v17939_v43  ;;  %v11616_v37 = vmul.f32 %v17848_v16, %v19423_v26  ;;  %v11617_v35 = vmul.f32 %v17848_v16, %v19424_v14  ;;  %vm11464_vm12 = vcmp.eq.f32.partialorder %v17976_v15, 0.0 }
 0x6c1   : > { %v14700_v58 = vpop.eup %14699  ;;  %v11994_v34 = vadd.f32 %v11903_v30, %v11902_v23  ;;  %v11760_v51 = vmul.f32 %v17839_v6, %v19425_v12  ;;  %v11761_v54 = vmul.f32 %v17839_v6, %v19426_v41  ;;  %v11530_v20 = vadd.f32 1e-10, %v11020_v4  ;;  %v18077_v30 = vpop.xlane.xlu1 %11242  ;;  %v19432_v41 = vld [vmem:[#allocation71_spill] sm:$0xff] }
 0x6c2   : > { %v18024_v32 = vpop.eup %14701  ;;  %v11456_v24 = vsel %vm11455_vm7, %v17939_v43, %v11454_v27  ;;  %v11022_v16 = vmul.f32 %v14700_v58, %v17953_v55  ;;  %14711 = vrsqrt.f32 %v18007_v60  ;;  %v11465_v45 = vand.u32 2147483648, %v17976_v15 }
 0x6c3   : > { %v18031_v36 = vpop.eup %14703  ;;  %14713 = vrcp.f32 %v11674_v25  ;;  %v11459_v10 = vsel %vm11457_vm8, %v11458_v13, %v11456_v24  ;;  %11995 = vadd.xlane.f32.xlu0 %v11994_v34  ;;  %v11832_v6 = vsub.f32 %v11616_v37, %v11760_v51  ;;  %v11833_v53 = vsub.f32 %v11617_v35, %v11761_v54  ;;  %v19431_v35 = vld [vmem:[#allocation69_spill] sm:$0xff] }
 0x6c4   : > { %v11675_v39 = vadd.f32 1e-10, %v11459_v10  ;;  %v11024_v42 = vsel %vm11023_vm9, %v17953_v55, %v11022_v16  ;;  %14715 = vrsqrt.f32 %v18022_v29  ;;  %vm11030_vm13 = vcmp.eq.f32.partialorder %v17990_v31, inf  ;;  %v19434_v10 = vld [vmem:[#allocation72_spill] sm:$0xff] }
 0x6c5   : > { %v11027_v63 = vsel %vm11025_vm10, %v11026_v2, %v11024_v42  ;;  %v11904_v22 = vmul.f32 %v11832_v6, %v11832_v6  ;;  %v11905_v43 = vmul.f32 %v11833_v53, %v11833_v53  ;;  %14717 = vrcp.f32 %v11530_v20  ;;  %v19433_v20 = vld [vmem:[#allocation70_spill] sm:$0xff]  ;;  %v18099_v53 = vpop.xlane.xlu0 %10810 }
 0x6c6   : > { %v14706_v56 = vpop.eup %14705  ;;  %vm11032_vm14 = vcmp.eq.f32.partialorder %v17990_v31, 0.0  ;;  %v11033_v52 = vand.u32 2147483648, %v17990_v31  ;;  %vm11469_vm15 = vcmp.eq.f32.partialorder %v18007_v60, inf  ;;  %v11618_v55 = vmul.f32 %v17871_v50, %v19427_v7  ;;  %v18118_v7 = vpop.xlane.xlu1 %11245 }
 0x6c7   : > { %v11461_v5 = vmul.f32 %v14706_v56, %v17976_v15  ;;  %v11997_v47 = vadd.f32 %v11905_v43, %v11904_v22  ;;  %v11619_v33 = vmul.f32 %v17871_v50, %v19428_v28  ;;  %v18053_v59 = vpop.eup %14707  ;;  %14719 = vrcp.f32 %v11675_v39 }
 0x6c8   : > { %v11531_v11 = vadd.f32 1e-10, %v11027_v63  ;;  %v11762_v57 = vmul.f32 %v17857_v8, %v19429_v40  ;;  %v11763_v48 = vmul.f32 %v17857_v8, %v19430_v62  ;;  %vm11471_vm0 = vcmp.eq.f32.partialorder %v18007_v60, 0.0  ;;  %v19436_v62 = vld [vmem:[#allocation75_spill] sm:$0xff] }
 0x6c9   : > { %v14710_v13 = vpop.eup %14709  ;;  %v11463_v38 = vsel %vm11462_vm11, %v17976_v15, %v11461_v5  ;;  %11998 = vadd.xlane.f32.xlu1 %v11997_v47  ;;  %v11472_v50 = vand.u32 2147483648, %v18007_v60  ;;  %14721 = vrsqrt.f32 %v18046_v1  ;;  %vm11037_vm1 = vcmp.eq.f32.partialorder %v18022_v29, inf }
 0x6ca   : > { %v11466_v21 = vsel %vm11464_vm12, %v11465_v45, %v11463_v38  ;;  %v11029_v46 = vmul.f32 %v14710_v13, %v17990_v31  ;;  %v11834_v8 = vsub.f32 %v11618_v55, %v11762_v57  ;;  %v11835_v25 = vsub.f32 %v11619_v33, %v11763_v48  ;;  %v19437_v13 = vld [vmem:[#allocation74_spill] sm:$0xff] }
 0x6cb   : > { %vm11039_vm2 = vcmp.eq.f32.partialorder %v18022_v29, 0.0  ;;  %v11040_v2 = vand.u32 2147483648, %v18022_v29  ;;  %14723 = vrsqrt.f32 %v18059_v61  ;;  %v11676_v26 = vadd.f32 1e-10, %v11466_v21 }
 0x6cc   : > { %v14712_v44 = vpop.eup %14711  ;;  %14725 = vrcp.f32 %v11531_v11  ;;  %v11031_v4 = vsel %vm11030_vm13, %v17990_v31, %v11029_v46  ;;  %v11906_v15 = vmul.f32 %v11834_v8, %v11834_v8  ;;  %v11907_v23 = vmul.f32 %v11835_v25, %v11835_v25  ;;  %v19438_v8 = vld [vmem:[#allocation76_spill] sm:$0xff] }
 0x6cd   : > { %v18079_v27 = vpop.eup %14713  ;;  %v11034_v37 = vsel %vm11032_vm14, %v11033_v52, %v11031_v4  ;;  %v11468_v14 = vmul.f32 %v14712_v44, %v18007_v60  ;;  %vm11476_vm3 = vcmp.eq.f32.partialorder %v18046_v1, inf  ;;  %v11620_v58 = vmul.f32 %v17917_v18, %v19431_v35 }
 0x6ce   : > { %v14716_v34 = vpop.eup %14715  ;;  %v11532_v12 = vadd.f32 1e-10, %v11034_v37  ;;  %v12000_v51 = vadd.f32 %v11907_v23, %v11906_v15  ;;  %vm11478_vm4 = vcmp.eq.f32.partialorder %v18046_v1, 0.0  ;;  %v11621_v54 = vmul.f32 %v17917_v18, %v19432_v41  ;;  %v19440_v41 = vld [vmem:[#allocation79_spill] sm:$0xff] }
 0x6cf   : > { %v11764_v24 = vmul.f32 %v17903_v19, %v19433_v20  ;;  %v11470_v31 = vsel %vm11469_vm15, %v18007_v60, %v11468_v14  ;;  %v11036_v16 = vmul.f32 %v14716_v34, %v18022_v29  ;;  %v11765_v6 = vmul.f32 %v17903_v19, %v19434_v10  ;;  %v18101_v39 = vpop.eup %14717  ;;  %v19441_v10 = vld [vmem:[#allocation78_spill] sm:$0xff] }
 0x6d0   : > { %14727 = vrsqrt.f32 %v18077_v30  ;;  %v11473_v18 = vsel %vm11471_vm0, %v11472_v50, %v11470_v31  ;;  %12001 = vadd.xlane.f32.xlu0 %v12000_v51  ;;  %v11479_v42 = vand.u32 2147483648, %v18046_v1  ;;  %vm11044_vm5 = vcmp.eq.f32.partialorder %v18059_v61, inf }
 0x6d1   : > { %v11836_v45 = vsub.f32 %v11620_v58, %v11764_v24  ;;  %14729 = vrcp.f32 %v11676_v26  ;;  %v11038_v19 = vsel %vm11037_vm1, %v18022_v29, %v11036_v16  ;;  %vm11046_vm6 = vcmp.eq.f32.partialorder %v18059_v61, 0.0  ;;  %v18111_v22 = vpop.eup %14719  ;;  %v19435_v29 = vld [vmem:[#allocation73_spill] sm:$0xff]  ;;  %v18153_v58 = vpop.xlane.xlu1 %11248 }
 0x6d2   : > { %v11837_v63 = vsub.f32 %v11621_v54, %v11765_v6  ;;  %v11041_v60 = vsel %vm11039_vm2, %v11040_v2, %v11038_v19  ;;  %v11047_v43 = vand.u32 2147483648, %v18059_v61  ;;  %14731 = vrsqrt.f32 %v18099_v53  ;;  %v18138_v2 = vpop.xlane.xlu0 %10813 }
 0x6d3   : > { %v11908_v56 = vmul.f32 %v11836_v45, %v11836_v45  ;;  %v14722_v52 = vpop.eup %14721  ;;  %14733 = vrcp.f32 %v11532_v12  ;;  %v11677_v5 = vadd.f32 1e-10, %v11473_v18  ;;  %vm11483_vm7 = vcmp.eq.f32.partialorder %v18077_v30, inf  ;;  %v19439_v12 = vld [vmem:[#allocation77_spill] sm:$0xff] }
 0x6d4   : > { %v11909_v47 = vmul.f32 %v11837_v63, %v11837_v63  ;;  %v11533_v55 = vadd.f32 1e-10, %v11041_v60  ;;  %v11475_v28 = vmul.f32 %v14722_v52, %v18046_v1  ;;  %vm11485_vm8 = vcmp.eq.f32.partialorder %v18077_v30, 0.0 }
 0x6d5   : > { %v11622_v33 = vmul.f32 %v17955_v3, %v19435_v29  ;;  %v14724_v11 = vpop.eup %14723  ;;  %v11486_v57 = vand.u32 2147483648, %v18077_v30  ;;  %v11623_v48 = vmul.f32 %v17955_v3, %v19436_v62  ;;  %v11766_v38 = vmul.f32 %v17926_v0, %v19437_v13 }
 0x6d6   : > { %v12003_v40 = vadd.f32 %v11909_v47, %v11908_v56  ;;  %v18129_v50 = vpop.eup %14725  ;;  %v11477_v21 = vsel %vm11476_vm3, %v18046_v1, %v11475_v28  ;;  %v11043_v46 = vmul.f32 %v14724_v11, %v18059_v61  ;;  %v11767_v25 = vmul.f32 %v17926_v0, %v19438_v8  ;;  %v18168_v18 = vpop.xlane.xlu0 %10816 }
 0x6d7   : > { %14735 = vrsqrt.f32 %v18118_v7  ;;  %v11480_v3 = vsel %vm11478_vm4, %v11479_v42, %v11477_v21  ;;  %vm11051_vm9 = vcmp.eq.f32.partialorder %v18099_v53, inf  ;;  %v11838_v44 = vsub.f32 %v11622_v33, %v11766_v38  ;;  %v19445_v38 = vld [vmem:[#allocation82_spill] sm:$0xff] }
 0x6d8   : > { %14737 = vrcp.f32 %v11677_v5  ;;  %12004 = vadd.xlane.f32.xlu1 %v12003_v40  ;;  %v11045_v4 = vsel %vm11044_vm5, %v18059_v61, %v11043_v46  ;;  %vm11053_vm10 = vcmp.eq.f32.partialorder %v18099_v53, 0.0  ;;  %v11839_v0 = vsub.f32 %v11623_v48, %v11767_v25  ;;  %v19444_v48 = vld [vmem:[#allocation83_spill] sm:$0xff] }
 0x6d9   : > { %14739 = vrcp.f32 %v11533_v55  ;;  %v11048_v23 = vsel %vm11046_vm6, %v11047_v43, %v11045_v4  ;;  %v11054_v26 = vand.u32 2147483648, %v18099_v53  ;;  %v11910_v1 = vmul.f32 %v11838_v44, %v11838_v44 }
 0x6da   : > { %v14728_v15 = vpop.eup %14727  ;;  %14741 = vrsqrt.f32 %v18138_v2  ;;  %v11678_v37 = vadd.f32 1e-10, %v11480_v3  ;;  %v11911_v35 = vmul.f32 %v11839_v0, %v11839_v0  ;;  %vm11490_vm11 = vcmp.eq.f32.partialorder %v18118_v7, inf  ;;  %v19446_v3 = vld [vmem:[#allocation84_spill] sm:$0xff] }
 0x6db   : > { %v11482_v14 = vmul.f32 %v14728_v15, %v18077_v30  ;;  %v18155_v34 = vpop.eup %14729  ;;  %vm11492_vm12 = vcmp.eq.f32.partialorder %v18118_v7, 0.0  ;;  %v11493_v61 = vand.u32 2147483648, %v18118_v7  ;;  %v11624_v51 = vmul.f32 %v17992_v17, %v19439_v12  ;;  %v19447_v15 = vld [vmem:[#allocation85_spill] sm:$0xff]  ;;  %v19450_v12 = vld [vmem:[#allocation88_spill] sm:$0xff] }
 0x6dc   : > { %v11625_v54 = vmul.f32 %v17992_v17, %v19440_v41  ;;  %v14732_v20 = vpop.eup %14731  ;;  %v11534_v24 = vadd.f32 1e-10, %v11048_v23  ;;  %v12006_v16 = vadd.f32 %v11911_v35, %v11910_v1  ;;  %v11768_v6 = vmul.f32 %v17970_v9, %v19441_v10  ;;  %v19442_v17 = vld [vmem:[#allocation80_spill] sm:$0xff]  ;;  %v19449_v35 = vld [vmem:[#allocation86_spill] sm:$0xff]  ;;  %v19451_v41 = vld [vmem:[#allocation89_spill] sm:$0xff] }
 0x6dd   : > { %v11484_v31 = vsel %vm11483_vm7, %v18077_v30, %v11482_v14  ;;  %v18170_v42 = vpop.eup %14733  ;;  %v11050_v19 = vmul.f32 %v14732_v20, %v18099_v53  ;;  %vm11058_vm13 = vcmp.eq.f32.partialorder %v18138_v2, inf  ;;  %v11769_v63 = vmul.f32 %v17970_v9, %v19442_v17 }
 0x6de   : > { %v11487_v45 = vsel %vm11485_vm8, %v11486_v57, %v11484_v31  ;;  %14743 = vrsqrt.f32 %v18153_v58  ;;  %12007 = vadd.xlane.f32.xlu0 %v12006_v16  ;;  %vm11060_vm14 = vcmp.eq.f32.partialorder %v18138_v2, 0.0  ;;  %v11840_v43 = vsub.f32 %v11624_v51, %v11768_v6 }
 0x6df   : > { %14745 = vrcp.f32 %v11678_v37  ;;  %v11679_v60 = vadd.f32 1e-10, %v11487_v45  ;;  %v11052_v30 = vsel %vm11051_vm9, %v18099_v53, %v11050_v19  ;;  %v11061_v56 = vand.u32 2147483648, %v18138_v2  ;;  %v19443_v53 = vld [vmem:[#allocation81_spill] sm:$0xff]  ;;  %v19448_v37 = vld [vmem:[#allocation87_spill] sm:$0xff] }
 0x6e0   : > { %v11841_v52 = vsub.f32 %v11625_v54, %v11769_v63  ;;  %14747 = vrsqrt.f32 %v18168_v18  ;;  %v11055_v9 = vsel %vm11053_vm10, %v11054_v26, %v11052_v30  ;;  %v11912_v47 = vmul.f32 %v11840_v43, %v11840_v43  ;;  %v19452_v19 = vld [vmem:[#allocation91_spill] sm:$0xff]  ;;  %v19453_v43 = vld [vmem:[#allocation90_spill] sm:$0xff] }
 0x6e1   : > { %v14736_v5 = vpop.eup %14735  ;;  %14749 = vrcp.f32 %v11534_v24  ;;  %v11500_v55 = vand.u32 2147483648, %v18153_v58  ;;  %v11535_v29 = vadd.f32 1e-10, %v11055_v9  ;;  %vm11497_vm15 = vcmp.eq.f32.partialorder %v18153_v58, inf }
 0x6e2   : > { %v18188_v28 = vpop.eup %14737  ;;  %14751 = vrcp.f32 %v11679_v60  ;;  %v11489_v33 = vmul.f32 %v14736_v5, %v18118_v7  ;;  %v11913_v11 = vmul.f32 %v11841_v52, %v11841_v52  ;;  %vm11499_vm0 = vcmp.eq.f32.partialorder %v18153_v58, 0.0  ;;  %v19454_v52 = vld [vmem:[#allocation92_spill] sm:$0xff] }
 0x6e3   : > { %v18192_v40 = vpop.eup %14739  ;;  %v11068_v57 = vand.u32 2147483648, %v18168_v18  ;;  %v11626_v62 = vmul.f32 %v18024_v32, %v19443_v53  ;;  %v11627_v13 = vmul.f32 %v18024_v32, %v19444_v48  ;;  %v11770_v21 = vmul.f32 %v18009_v49, %v19445_v38  ;;  %v19455_v53 = vld [vmem:[#allocation93_spill] sm:$0xff]  ;;  %v19456_v38 = vld [vmem:[#allocation95_spill] sm:$0xff] }
 0x6e4   : > { %v14742_v46 = vpop.eup %14741  ;;  %14753 = vrcp.f32 %v11535_v29  ;;  %v11491_v8 = vsel %vm11490_vm11, %v18118_v7, %v11489_v33  ;;  %v12009_v25 = vadd.f32 %v11913_v11, %v11912_v47  ;;  %vm11065_vm1 = vcmp.eq.f32.partialorder %v18168_v18, inf }
 0x6e5   : > { %v11771_v44 = vmul.f32 %v18009_v49, %v19446_v3  ;;  %v11494_v4 = vsel %vm11492_vm12, %v11493_v61, %v11491_v8  ;;  %v11057_v32 = vmul.f32 %v14742_v46, %v18138_v2  ;;  %vm11067_vm2 = vcmp.eq.f32.partialorder %v18168_v18, 0.0 }
 0x6e6   : > { %v11842_v0 = vsub.f32 %v11626_v62, %v11770_v21  ;;  %v11628_v23 = vmul.f32 %v18053_v59, %v19447_v15  ;;  %v11680_v26 = vadd.f32 1e-10, %v11494_v4  ;;  %12010 = vadd.xlane.f32.xlu1 %v12009_v25  ;;  %v11629_v14 = vmul.f32 %v18053_v59, %v19448_v37  ;;  %v19457_v25 = vld [vmem:[#allocation94_spill] sm:$0xff]  ;;  %v19458_v4 = vld [vmem:[#allocation96_spill] sm:$0xff] }
 0x6e7   : > { %v11843_v1 = vsub.f32 %v11627_v13, %v11771_v44  ;;  %v11772_v49 = vmul.f32 %v18031_v36, %v19449_v35  ;;  %v11059_v7 = vsel %vm11058_vm13, %v18138_v2, %v11057_v32  ;;  %v11773_v51 = vmul.f32 %v18031_v36, %v19450_v12 }
 0x6e8   : > { %v11914_v61 = vmul.f32 %v11842_v0, %v11842_v0  ;;  %v11630_v54 = vmul.f32 %v18101_v39, %v19451_v41  ;;  %v14744_v20 = vpop.eup %14743  ;;  %14755 = vrcp.f32 %v11680_v26  ;;  %v11062_v24 = vsel %vm11060_vm14, %v11061_v56, %v11059_v7  ;;  %v19459_v0 = vld [vmem:[#allocation97_spill] sm:$0xff]  ;;  %v19460_v26 = vld [vmem:[#allocation99_spill] sm:$0xff] }
 0x6e9   : > { %v11915_v59 = vmul.f32 %v11843_v1, %v11843_v1  ;;  %v11844_v31 = vsub.f32 %v11628_v23, %v11772_v49  ;;  %v14746_v16 = vpop.eup %14745  ;;  %v11536_v10 = vadd.f32 1e-10, %v11062_v24  ;;  %v11496_v6 = vmul.f32 %v14744_v20, %v18153_v58  ;;  %v19463_v49 = vld [vmem:[#allocation101_spill] sm:$0xff] }
 0x6ea   : > { %v11845_v45 = vsub.f32 %v11629_v14, %v11773_v51  ;;  %v11631_v17 = vmul.f32 %v18101_v39, %v19452_v19  ;;  %v14748_v63 = vpop.eup %14747  ;;  %v11774_v30 = vmul.f32 %v18079_v27, %v19453_v43  ;;  %v11775_v2 = vmul.f32 %v18079_v27, %v19454_v52  ;;  %v19462_v14 = vld [vmem:[#allocation100_spill] sm:$0xff]  ;;  %v19464_v51 = vld [vmem:[#allocation103_spill] sm:$0xff] }
 0x6eb   : > { %v12012_v36 = vadd.f32 %v11915_v59, %v11914_v61  ;;  %v11916_v60 = vmul.f32 %v11844_v31, %v11844_v31  ;;  %v14750_v56 = vpop.eup %14749  ;;  %14757 = vrcp.f32 %v11536_v10  ;;  %v11498_v5 = vsel %vm11497_vm15, %v18153_v58, %v11496_v6  ;;  %v19466_v59 = vld [vmem:[#allocation104_spill] sm:$0xff]  ;;  %v19467_v10 = vld [vmem:[#allocation105_spill] sm:$0xff]  ;;  %v19468_v19 = vld [vmem:[#allocation107_spill] sm:$0xff] }
 0x6ec   : > { %v11064_v9 = vmul.f32 %v14748_v63, %v18168_v18  ;;  %v11917_v47 = vmul.f32 %v11845_v45, %v11845_v45  ;;  %v14752_v29 = vpop.eup %14751  ;;  %v11501_v39 = vsel %vm11499_vm0, %v11500_v55, %v11498_v5  ;;  %v11846_v33 = vsub.f32 %v11630_v54, %v11774_v30  ;;  %v19465_v54 = vld [vmem:[#allocation102_spill] sm:$0xff]  ;;  %v19470_v52 = vld [vmem:[#allocation108_spill] sm:$0xff] }
 0x6ed   : > { %12013 = vadd.xlane.f32.xlu0 %v12012_v36  ;;  %v11847_v11 = vsub.f32 %v11631_v17, %v11775_v2  ;;  %v11632_v62 = vmul.f32 %v18129_v50, %v19455_v53  ;;  %v11681_v27 = vadd.f32 1e-10, %v11501_v39  ;;  %v11633_v21 = vmul.f32 %v18129_v50, %v19456_v38  ;;  %v19469_v63 = vld [vmem:[#allocation106_spill] sm:$0xff] }
 0x6ee   : > { %v11066_v48 = vsel %vm11065_vm1, %v18168_v18, %v11064_v9  ;;  %v12015_v13 = vadd.f32 %v11917_v47, %v11916_v60  ;;  %v14754_v46 = vpop.eup %14753  ;;  %v11918_v55 = vmul.f32 %v11846_v33, %v11846_v33  ;;  %v11776_v3 = vmul.f32 %v18111_v22, %v19457_v25  ;;  %v19471_v47 = vld [vmem:[#allocation109_spill] sm:$0xff]  ;;  %v19472_v33 = vld [vmem:[#allocation111_spill] sm:$0xff] }
 0x6ef   : > { %v11069_v58 = vsel %vm11067_vm2, %v11068_v57, %v11066_v48  ;;  %v11919_v8 = vmul.f32 %v11847_v11, %v11847_v11  ;;  %14759 = vrcp.f32 %v11681_v27  ;;  %v11777_v32 = vmul.f32 %v18111_v22, %v19458_v4  ;;  %v19461_v57 = vld [vmem:[#allocation98_spill] sm:$0xff] }
 0x6f0   : > { %v11537_v44 = vadd.f32 1e-10, %v11069_v58  ;;  %12016 = vadd.xlane.f32.xlu1 %v12015_v13  ;;  %v11634_v15 = vmul.f32 %v18170_v42, %v19459_v0  ;;  %v11848_v50 = vsub.f32 %v11632_v62, %v11776_v3  ;;  %v11635_v18 = vmul.f32 %v18170_v42, %v19460_v26  ;;  %v19473_v27 = vld [vmem:[#allocation110_spill] sm:$0xff]  ;;  %v19474_v13 = vld [vmem:[#allocation112_spill] sm:$0xff] }
 0x6f1   : > { %v12018_v23 = vadd.f32 %v11919_v8, %v11918_v55  ;;  %v11778_v1 = vmul.f32 %v18155_v34, %v19461_v57  ;;  %v11849_v37 = vsub.f32 %v11633_v21, %v11777_v32  ;;  %v11779_v35 = vmul.f32 %v18155_v34, %v19462_v14  ;;  %v19475_v21 = vld [vmem:[#allocation113_spill] sm:$0xff]  ;;  %v19476_v55 = vld [vmem:[#allocation115_spill] sm:$0xff]  ;;  %v19477_v4 = vld [vmem:[#allocation114_spill] sm:$0xff] }
 0x6f2   : > { %14761 = vrcp.f32 %v11537_v44  ;;  %v11636_v7 = vmul.f32 %v18192_v40, %v19463_v49  ;;  %v14756_v22 = vpop.eup %14755  ;;  %v11920_v61 = vmul.f32 %v11848_v50, %v11848_v50  ;;  %v11637_v41 = vmul.f32 %v18192_v40, %v19464_v51  ;;  %v19478_v0 = vld [vmem:[#allocation116_spill] sm:$0xff]  ;;  %v19481_v49 = vld [vmem:[#allocation117_spill] sm:$0xff] }
 0x6f3   : > { %12019 = vadd.xlane.f32.xlu0 %v12018_v23  ;;  %v11850_v12 = vsub.f32 %v11634_v15, %v11778_v1  ;;  %v11780_v42 = vmul.f32 %v18188_v28, %v19465_v54  ;;  %v11921_v20 = vmul.f32 %v11849_v37, %v11849_v37  ;;  %v11851_v24 = vsub.f32 %v11635_v18, %v11779_v35  ;;  %v19479_v23 = vld [vmem:[#allocation118_spill] sm:$0xff]  ;;  %v19480_v26 = vld [vmem:[#allocation120_spill] sm:$0xff] }
 0x6f4   : > { %v11781_v31 = vmul.f32 %v18188_v28, %v19466_v59  ;;  %v11638_v34 = vmul.f32 %v14750_v56, %v19467_v10  ;;  %v11639_v17 = vmul.f32 %v14750_v56, %v19468_v19  ;;  %v11782_v36 = vmul.f32 %v14746_v16, %v19469_v63 }
 0x6f5   : > { %v11922_v6 = vmul.f32 %v11850_v12, %v11850_v12  ;;  %v11852_v45 = vsub.f32 %v11636_v7, %v11780_v42  ;;  %v14758_v60 = vpop.eup %14757  ;;  %v12021_v43 = vadd.f32 %v11921_v20, %v11920_v61  ;;  %v11923_v30 = vmul.f32 %v11851_v24, %v11851_v24  ;;  %v19482_v61 = vld [vmem:[#allocation119_spill] sm:$0xff] }
 0x6f6   : > { %v11853_v40 = vsub.f32 %v11637_v41, %v11781_v31  ;;  %v11783_v2 = vmul.f32 %v14746_v16, %v19470_v52  ;;  %v11854_v9 = vsub.f32 %v11638_v34, %v11782_v36  ;;  %v11640_v39 = vmul.f32 %v14754_v46, %v19471_v47  ;;  %v19483_v41 = vld [vmem:[#allocation4_spill] sm:$0xff] }
 0x6f7   : > { %v11924_v5 = vmul.f32 %v11852_v45, %v11852_v45  ;;  %v11641_v28 = vmul.f32 %v14754_v46, %v19472_v33  ;;  %12022 = vadd.xlane.f32.xlu1 %v12021_v43  ;;  %v12024_v11 = vadd.f32 %v11923_v30, %v11922_v6  ;;  %v11784_v56 = vmul.f32 %v14752_v29, %v19473_v27 }
 0x6f8   : > { %v11925_v53 = vmul.f32 %v11853_v40, %v11853_v40  ;;  %v11855_v62 = vsub.f32 %v11639_v17, %v11783_v2  ;;  %v11926_v48 = vmul.f32 %v11854_v9, %v11854_v9  ;;  %v11785_v38 = vmul.f32 %v14752_v29, %v19474_v13 }
 0x6f9   : > { %v11642_v58 = vmul.f32 %v14758_v60, %v19475_v21  ;;  %v11643_v8 = vmul.f32 %v14758_v60, %v19476_v55  ;;  %v14760_v16 = vpop.eup %14759  ;;  %12025 = vadd.xlane.f32.xlu0 %v12024_v11  ;;  %v11856_v44 = vsub.f32 %v11640_v39, %v11784_v56  ;;  %v11786_v46 = vmul.f32 %v14756_v22, %v19477_v4 }
 0x6fa   : > { %v12027_v25 = vadd.f32 %v11925_v53, %v11924_v5  ;;  %v11927_v3 = vmul.f32 %v11855_v62, %v11855_v62  ;;  %v11857_v32 = vsub.f32 %v11641_v28, %v11785_v38  ;;  %v11787_v15 = vmul.f32 %v14756_v22, %v19478_v0 }
 0x6fb   : > { %v11788_v50 = vmul.f32 %v14760_v16, %v19479_v23  ;;  %v11789_v18 = vmul.f32 %v14760_v16, %v19480_v26  ;;  %v11928_v1 = vmul.f32 %v11856_v44, %v11856_v44  ;;  %v11858_v37 = vsub.f32 %v11642_v58, %v11786_v46  ;;  %v11939_v26 = vpop.xlane.xlu1 %11938 }
 0x6fc   : > { %v14762_v57 = vpop.eup %14761  ;;  %12028 = vadd.xlane.f32.xlu1 %v12027_v25  ;;  %v12030_v29 = vadd.f32 %v11927_v3, %v11926_v48  ;;  %v11929_v14 = vmul.f32 %v11857_v32, %v11857_v32  ;;  %v11859_v35 = vsub.f32 %v11643_v8, %v11787_v15  ;;  %v12044_v42 = vadd.s32 8, %v19483_v41 }
 0x6fd   : > { %v11644_v7 = vmul.f32 %v14762_v57, %v19481_v49  ;;  %v11645_v12 = vmul.f32 %v14762_v57, %v19482_v61  ;;  %v11930_v51 = vmul.f32 %v11858_v37, %v11858_v37  ;;  %v12045_v6 = vadd.s32 16, %v19483_v41 }
 0x6fe   : > { %12031 = vadd.xlane.f32.xlu0 %v12030_v29  ;;  %v18286_v54 = vmul.u32.u64.low 3817748708, %v19483_v41  ;;  %v18287_v22 = vmul.u32.u64.high 3817748708, %v19483_v41, %v18286_v54  ;;  %v12033_v20 = vadd.f32 %v11929_v14, %v11928_v1  ;;  %v11931_v24 = vmul.f32 %v11859_v35, %v11859_v35 }
 0x6ff   : > { %v11860_v59 = vsub.f32 %v11644_v7, %v11788_v50  ;;  %v11861_v31 = vsub.f32 %v11645_v12, %v11789_v18  ;;  %v18290_v10 = vmul.u32.u64.low 3817748708, %v12044_v42  ;;  %v18291_v34 = vmul.u32.u64.high 3817748708, %v12044_v42, %v18290_v10 }
 0x700   : > { %v12046_v45 = vadd.s32 24, %v19483_v41  ;;  %12034 = vadd.xlane.f32.xlu1 %v12033_v20  ;;  %v12036_v19 = vadd.f32 %v11931_v24, %v11930_v51  ;;  %v12047_v36 = vadd.s32 32, %v19483_v41  ;;  %v12085_v60 = vshrl.u32 %v18287_v22, 4  ;;  %v11936_v24 = vpop.xlane.xlu0 %11935 }
 0x701   : > { %v11932_v17 = vmul.f32 %v11860_v59, %v11860_v59  ;;  %v11933_v63 = vmul.f32 %v11861_v31, %v11861_v31  ;;  %v18297_v43 = vmul.u32.u64.low 3817748708, %v12045_v6  ;;  %v18298_v30 = vmul.u32.u64.high 3817748708, %v12045_v6, %v18297_v43 }
 0x702   : > { %12037 = vadd.xlane.f32.xlu0 %v12036_v19  ;;  %v18300_v52 = vmul.u32.u64.low 3817748708, %v12046_v45  ;;  %v18301_v2 = vmul.u32.u64.high 3817748708, %v12046_v45, %v18300_v52  ;;  %v12096_v5 = vshrl.u32 %v18291_v34, 4  ;;  %v12048_v9 = vadd.s32 40, %v19483_v41 }
 0x703   : > { %v12039_v40 = vadd.f32 %v11933_v63, %v11932_v17  ;;  %v12086_v47 = vmul.u32 18, %v12085_v60  ;;  %v18305_v39 = vmul.u32.u64.low 3817748708, %v12047_v36  ;;  %v18306_v33 = vmul.u32.u64.high 3817748708, %v12047_v36, %v18305_v39 }
 0x704   : > { %v12097_v28 = vmul.u32 18, %v12096_v5  ;;  %v12107_v11 = vshrl.u32 %v18298_v30, 4  ;;  %v18309_v62 = vmul.u32.u64.low 3817748708, %v12048_v9  ;;  %v18310_v27 = vmul.u32.u64.high 3817748708, %v12048_v9, %v18309_v62 }
 0x705   : > { %12040 = vadd.xlane.f32.xlu1 %v12039_v40  ;;  %v12087_v56 = vsub.s32 %v19483_v41, %v12086_v47  ;;  %v18314_v48 = vadd.s32 48, %v19483_v41  ;;  %v12118_v38 = vshrl.u32 %v18301_v2, 4  ;;  %v12129_v58 = vshrl.u32 %v18306_v33, 4  ;;  %v11942_v40 = vpop.xlane.xlu0 %11941 }
 0x706   : > { %v12098_v53 = vsub.s32 %v12044_v42, %v12097_v28  ;;  %v12108_v13 = vmul.u32 18, %v12107_v11  ;;  %v12140_v4 = vshrl.u32 %v18310_v27, 4  ;;  %v18328_v0 = vadd.s32 56, %v19483_v41 }
 0x707   : > { %vm12475_vm5 = vcmp.ne.s32.totalorder %v12087_v56, 0  ;;  %vm12511_vm6 = vcmp.lt.s32.totalorder %v12087_v56, 0  ;;  %v18319_v55 = vmul.u32.u64.low 3817748708, %v18314_v48  ;;  %v18320_v8 = vmul.u32.u64.high 3817748708, %v18314_v48, %v18319_v55 }
 0x708   : > { %vm12476_vm3 = vcmp.ne.s32.totalorder %v12098_v53, 0  ;;  %vm12512_vm4 = vcmp.lt.s32.totalorder %v12098_v53, 0  ;;  %v12584_v21 = vadd.s32 18, %v12098_v53  ;;  %v12583_v16 = vadd.s32 18, %v12087_v56  ;;  %vm18322_vm8 = vmand %vm12511_vm6, %vm12475_vm5 }
 0x709   : > { %vm12548_vm7 = vmand %vm12512_vm4, %vm12476_vm3  ;;  %v12109_v25 = vsub.s32 %v12045_v6, %v12108_v13  ;;  %v12119_v3 = vmul.u32 18, %v12118_v38  ;;  %v12130_v32 = vmul.u32 18, %v12129_v58  ;;  %v18337_v57 = vadd.s32 64, %v19483_v41 }
 0x70a   : > { %v12620_v46 = vsel %vm12548_vm7, %v12584_v21, %v12098_v53  ;;  %v12619_v15 = vsel %vm18322_vm8, %v12583_v16, %v12087_v56  ;;  %v12141_v18 = vmul.u32 18, %v12140_v4  ;;  %v18340_v29 = vadd.s32 72, %v19483_v41  ;;  %v11945_v56 = vpop.xlane.xlu1 %11944 }
 0x70b   : > { %vm12477_vm9 = vcmp.ne.s32.totalorder %v12109_v25, 0  ;;  %vm12513_vm10 = vcmp.lt.s32.totalorder %v12109_v25, 0  ;;  %v12120_v23 = vsub.s32 %v12046_v45, %v12119_v3  ;;  %vm18332_vm11 = vcmp.lt.s32.totalorder %v12620_v46, 16  ;;  %v11948_v3 = vpop.xlane.xlu0 %11947 }
 0x70c   : > { %v12585_v1 = vadd.s32 18, %v12109_v25  ;;  %v12131_v37 = vsub.s32 %v12047_v36, %v12130_v32  ;;  %v18343_v14 = vmul.u32.u64.low 3817748708, %v18328_v0  ;;  %v18344_v35 = vmul.u32.u64.high 3817748708, %v18328_v0, %v18343_v14  ;;  %vm18350_vm13 = vmand %vm12513_vm10, %vm12477_vm9 }
 0x70d   : > { %vm18346_vm12 = vcmp.lt.s32.totalorder %v12619_v15, 16  ;;  %v18355_v61 = vadd.s32 80, %v19483_v41  ;;  %v12692_v12 = vsel %vm18332_vm11, %v11939_v26, 0.0  ;;  %vm12478_vm14 = vcmp.ne.s32.totalorder %v12120_v23, 0 }
 0x70e   : > { %vm12514_vm15 = vcmp.lt.s32.totalorder %v12120_v23, 0  ;;  %v12151_v51 = vshrl.u32 %v18320_v8, 4  ;;  %v12586_v54 = vadd.s32 18, %v12120_v23  ;;  %v18360_v22 = vsub.s32 %v12048_v9, %v12141_v18 }
 0x70f   : > { %v18363_v42 = vmul.u32.u64.low 3817748708, %v18337_v57  ;;  %v18364_v20 = vmul.u32.u64.high 3817748708, %v18337_v57, %v18363_v42  ;;  %v12621_v59 = vsel %vm18350_vm13, %v12585_v1, %v12109_v25  ;;  %vm12479_vm0 = vcmp.ne.s32.totalorder %v12131_v37, 0  ;;  %vm18378_vm2 = vmand %vm12514_vm15, %vm12478_vm14 }
 0x710   : > { %v18369_v31 = vmul.u32.u64.low 3817748708, %v18340_v29  ;;  %v18370_v10 = vmul.u32.u64.high 3817748708, %v18340_v29, %v18369_v31  ;;  %vm12515_vm1 = vcmp.lt.s32.totalorder %v12131_v37, 0  ;;  %v12162_v34 = vshrl.u32 %v18344_v35, 4 }
 0x711   : > { %v18374_v6 = vmul.u32.u64.low 3817748708, %v18355_v61  ;;  %v18375_v45 = vmul.u32.u64.high 3817748708, %v18355_v61, %v18374_v6  ;;  %v12152_v17 = vmul.u32 18, %v12151_v51  ;;  %v18383_v63 = vadd.s32 88, %v19483_v41  ;;  %vm18393_vm5 = vmand %vm12515_vm1, %vm12479_vm0 }
 0x712   : > { %vm12727_vm3 = vcmask 7168   ;;  %v12587_v36 = vadd.s32 18, %v12131_v37  ;;  %v12691_v60 = vsel %vm18346_vm12, %v11936_v24, 0.0  ;;  %vm18388_vm4 = vcmp.lt.s32.totalorder %v12621_v59, 16 }
 0x713   : > { %v12729_v43 = vsel %vm12727_vm3, %v12692_v12, 0.0  ;;  %v12622_v2 = vsel %vm18378_vm2, %v12586_v54, %v12120_v23  ;;  %vm12480_vm6 = vcmp.ne.s32.totalorder %v18360_v22, 0  ;;  %v12163_v5 = vmul.u32 18, %v12162_v34  ;;  %v11951_v12 = vpop.xlane.xlu1 %11950 }
 0x714   : > { %v12173_v9 = vshrl.u32 %v18364_v20, 4  ;;  %vm12516_vm7 = vcmp.lt.s32.totalorder %v18360_v22, 0  ;;  %v12153_v47 = vsub.s32 %v18314_v48, %v12152_v17  ;;  %v12728_v28 = vsel %vm12727_vm3, %v12691_v60, 0.0 }
 0x715   : > { %v18404_v39 = vmul.u32.u64.low 3817748708, %v18383_v63  ;;  %v18405_v33 = vmul.u32.u64.high 3817748708, %v18383_v63, %v18404_v39  ;;  %v12693_v11 = vsel %vm18388_vm4, %v11942_v40, 0.0  ;;  %v12623_v53 = vsel %vm18393_vm5, %v12587_v36, %v12131_v37  ;;  %vm18424_vm9 = vmand %vm12516_vm7, %vm12480_vm6 }
 0x716   : > { %v18413_v62 = vadd.s32 96, %v19483_v41  ;;  %vm18415_vm8 = vcmp.lt.s32.totalorder %v12622_v2, 16  ;;  %v12588_v48 = vadd.s32 18, %v18360_v22  ;;  %v12184_v13 = vshrl.u32 %v18370_v10, 4 }
 0x717   : > { %v12195_v38 = vshrl.u32 %v18375_v45, 4  ;;  %v12730_v21 = vadd.f32 %v12729_v43, %v12728_v28  ;;  %v12164_v55 = vsub.s32 %v18328_v0, %v12163_v5  ;;  %v12174_v8 = vmul.u32 18, %v12173_v9 }
 0x718   : > { %v12731_v16 = vsel %vm12727_vm3, %v12693_v11, 0.0  ;;  %vm18430_vm10 = vcmp.lt.s32.totalorder %v12623_v53, 16  ;;  %vm12481_vm11 = vcmp.ne.s32.totalorder %v12153_v47, 0  ;;  %vm12517_vm12 = vcmp.lt.s32.totalorder %v12153_v47, 0 }
 0x719   : > { %v12694_v44 = vsel %vm18415_vm8, %v11945_v56, 0.0  ;;  %v18437_v4 = vmul.u32.u64.low 3817748708, %v18413_v62  ;;  %v18438_v46 = vmul.u32.u64.high 3817748708, %v18413_v62, %v18437_v4  ;;  %v18441_v32 = vadd.s32 104, %v19483_v41  ;;  %vm18448_vm13 = vmand %vm12517_vm12, %vm12481_vm11 }
 0x71a   : > { %v12624_v0 = vsel %vm18424_vm9, %v12588_v48, %v18360_v22  ;;  %v12589_v15 = vadd.s32 18, %v12153_v47  ;;  %v12185_v23 = vmul.u32 18, %v12184_v13  ;;  %v12196_v50 = vmul.u32 18, %v12195_v38 }
 0x71b   : > { %v12695_v26 = vsel %vm18430_vm10, %v11948_v3, 0.0  ;;  %vm12482_vm14 = vcmp.ne.s32.totalorder %v12164_v55, 0  ;;  %vm12518_vm15 = vcmp.lt.s32.totalorder %v12164_v55, 0  ;;  %v12175_v1 = vsub.s32 %v18337_v57, %v12174_v8 }
 0x71c   : > { %v12732_v37 = vadd.f32 %v12731_v16, %v12730_v21  ;;  %v12733_v14 = vsel %vm12727_vm3, %v12694_v44, 0.0  ;;  %v12206_v35 = vshrl.u32 %v18405_v33, 4  ;;  %v18456_v49 = vadd.s32 112, %v19483_v41  ;;  %vm18469_vm1 = vmand %vm12518_vm15, %vm12482_vm14  ;;  %v11957_v33 = vpop.xlane.xlu1 %11956 }
 0x71d   : > { %vm18458_vm0 = vcmp.lt.s32.totalorder %v12624_v0, 16  ;;  %v12590_v51 = vadd.s32 18, %v12164_v55  ;;  %v18463_v54 = vmul.u32.u64.low 3817748708, %v18441_v32  ;;  %v18464_v22 = vmul.u32.u64.high 3817748708, %v18441_v32, %v18463_v54 }
 0x71e   : > { %v12735_v57 = vsel %vm12727_vm3, %v12695_v26, 0.0  ;;  %v12625_v42 = vsel %vm18448_vm13, %v12589_v15, %v12153_v47  ;;  %v18474_v24 = vsub.s32 %v18340_v29, %v12185_v23  ;;  %v18477_v59 = vsub.s32 %v18355_v61, %v12196_v50  ;;  %v11954_v61 = vpop.xlane.xlu0 %11953 }
 0x71f   : > { %v12734_v31 = vadd.f32 %v12733_v14, %v12732_v37  ;;  %vm12483_vm2 = vcmp.ne.s32.totalorder %v12175_v1, 0  ;;  %vm12519_vm4 = vcmp.lt.s32.totalorder %v12175_v1, 0  ;;  %v18480_v10 = vadd.s32 120, %v19483_v41 }
 0x720   : > { %v12696_v34 = vsel %vm18458_vm0, %v11951_v12, 0.0  ;;  %v12207_v6 = vmul.u32 18, %v12206_v35  ;;  %v18485_v45 = vmul.u32.u64.low 3817748708, %v18456_v49  ;;  %v18486_v19 = vmul.u32.u64.high 3817748708, %v18456_v49, %v18485_v45  ;;  %vm18494_vm6 = vmand %vm12519_vm4, %vm12483_vm2 }
 0x721   : > { %v12736_v17 = vadd.f32 %v12735_v57, %v12734_v31  ;;  %vm18488_vm5 = vcmp.lt.s32.totalorder %v12625_v42, 16  ;;  %v12626_v36 = vsel %vm18469_vm1, %v12590_v51, %v12164_v55  ;;  %v12591_v60 = vadd.s32 18, %v12175_v1 }
 0x722   : > { %vm12484_vm7 = vcmp.ne.s32.totalorder %v18474_v24, 0  ;;  %vm12520_vm8 = vcmp.lt.s32.totalorder %v18474_v24, 0  ;;  %vm12485_vm9 = vcmp.ne.s32.totalorder %v18477_v59, 0  ;;  %v12217_v30 = vshrl.u32 %v18438_v46, 4  ;;  %v11960_v15 = vpop.xlane.xlu0 %11959 }
 0x723   : > { %vm12521_vm10 = vcmp.lt.s32.totalorder %v18477_v59, 0  ;;  %v18504_v40 = vmul.u32.u64.low 3817748708, %v18480_v10  ;;  %v18505_v52 = vmul.u32.u64.high 3817748708, %v18480_v10, %v18504_v40  ;;  %v18508_v2 = vadd.s32 128, %v19483_v41  ;;  %vm18520_vm12 = vmand %vm12520_vm8, %vm12484_vm7 }
 0x724   : > { %v12737_v5 = vsel %vm12727_vm3, %v12696_v34, 0.0  ;;  %v12697_v9 = vsel %vm18488_vm5, %v11954_v61, 0.0  ;;  %vm18513_vm11 = vcmp.lt.s32.totalorder %v12626_v36, 16  ;;  %v12208_v39 = vsub.s32 %v18383_v63, %v12207_v6  ;;  %vm18529_vm13 = vmand %vm12521_vm10, %vm12485_vm9 }
 0x725   : > { %v12627_v28 = vsel %vm18494_vm6, %v12591_v60, %v12175_v1  ;;  %v12592_v53 = vadd.s32 18, %v18474_v24  ;;  %v12593_v27 = vadd.s32 18, %v18477_v59  ;;  %v12228_v56 = vshrl.u32 %v18464_v22, 4  ;;  %v11963_v22 = vpop.xlane.xlu1 %11962 }
 0x726   : > { %v12218_v63 = vmul.u32 18, %v12217_v30  ;;  %v18534_v13 = vmul.u32.u64.low 3817748708, %v18508_v2  ;;  %v18535_v38 = vmul.u32.u64.high 3817748708, %v18508_v2, %v18534_v13  ;;  %v18538_v21 = vadd.s32 136, %v19483_v41  ;;  %v11966_v20 = vpop.xlane.xlu0 %11965 }
 0x727   : > { %v12738_v58 = vadd.f32 %v12737_v5, %v12736_v17  ;;  %v12739_v55 = vsel %vm12727_vm3, %v12697_v9, 0.0  ;;  %v12239_v8 = vshrl.u32 %v18486_v19, 4  ;;  %v18543_v16 = vadd.s32 144, %v19483_v41 }
 0x728   : > { %v12698_v25 = vsel %vm18513_vm11, %v11957_v33, 0.0  ;;  %vm18547_vm14 = vcmp.lt.s32.totalorder %v12627_v28, 16  ;;  %vm12486_vm15 = vcmp.ne.s32.totalorder %v12208_v39, 0  ;;  %vm12522_vm0 = vcmp.lt.s32.totalorder %v12208_v39, 0 }
 0x729   : > { %v12628_v44 = vsel %vm18520_vm12, %v12592_v53, %v18474_v24  ;;  %v12629_v4 = vsel %vm18529_vm13, %v12593_v27, %v18477_v59  ;;  %v12594_v46 = vadd.s32 18, %v12208_v39  ;;  %v12229_v0 = vmul.u32 18, %v12228_v56  ;;  %vm18563_vm1 = vmand %vm12522_vm0, %vm12486_vm15 }
 0x72a   : > { %v12219_v23 = vsub.s32 %v18413_v62, %v12218_v63  ;;  %v12250_v50 = vshrl.u32 %v18505_v52, 4  ;;  %v18560_v26 = vmul.u32.u64.low 3817748708, %v18538_v21  ;;  %v18561_v18 = vmul.u32.u64.high 3817748708, %v18538_v21, %v18560_v26 }
 0x72b   : > { %v12240_v37 = vmul.u32 18, %v12239_v8  ;;  %v18568_v14 = vmul.u32.u64.low 3817748708, %v18543_v16  ;;  %v18569_v35 = vmul.u32.u64.high 3817748708, %v18543_v16, %v18568_v14  ;;  %v18572_v7 = vadd.s32 152, %v19483_v41 }
 0x72c   : > { %v12740_v12 = vadd.f32 %v12739_v55, %v12738_v58  ;;  %v12741_v62 = vsel %vm12727_vm3, %v12698_v25, 0.0  ;;  %v12699_v51 = vsel %vm18547_vm14, %v11960_v15, 0.0  ;;  %vm18577_vm2 = vcmp.lt.s32.totalorder %v12628_v44, 16  ;;  %v11972_v25 = vpop.xlane.xlu0 %11971 }
 0x72d   : > { %vm18581_vm4 = vcmp.lt.s32.totalorder %v12629_v4, 16  ;;  %v12230_v42 = vsub.s32 %v18441_v32, %v12229_v0  ;;  %v12630_v24 = vsel %vm18563_vm1, %v12594_v46, %v12208_v39  ;;  %vm12487_vm5 = vcmp.ne.s32.totalorder %v12219_v23, 0 }
 0x72e   : > { %v12251_v59 = vmul.u32 18, %v12250_v50  ;;  %v12261_v31 = vshrl.u32 %v18535_v38, 4  ;;  %vm12523_vm6 = vcmp.lt.s32.totalorder %v12219_v23, 0  ;;  %v12241_v34 = vsub.s32 %v18456_v49, %v12240_v37  ;;  %v11969_v49 = vpop.xlane.xlu1 %11968 }
 0x72f   : > { %v18591_v6 = vmul.u32.u64.low 3817748708, %v18572_v7  ;;  %v18592_v45 = vmul.u32.u64.high 3817748708, %v18572_v7, %v18591_v6  ;;  %v12742_v19 = vadd.f32 %v12741_v62, %v12740_v12  ;;  %v12743_v17 = vsel %vm12727_vm3, %v12699_v51, 0.0  ;;  %vm18604_vm9 = vmand %vm12523_vm6, %vm12487_vm5 }
 0x730   : > { %v12700_v32 = vsel %vm18577_vm2, %v11963_v22, 0.0  ;;  %v12701_v29 = vsel %vm18581_vm4, %v11966_v20, 0.0  ;;  %vm18599_vm7 = vcmp.lt.s32.totalorder %v12630_v24, 16  ;;  %v12595_v36 = vadd.s32 18, %v12219_v23  ;;  %v11978_v62 = vpop.xlane.xlu0 %11977 }
 0x731   : > { %vm12488_vm8 = vcmp.ne.s32.totalorder %v12230_v42, 0  ;;  %vm12524_vm10 = vcmp.lt.s32.totalorder %v12230_v42, 0  ;;  %v12252_v43 = vsub.s32 %v18480_v10, %v12251_v59  ;;  %v12262_v30 = vmul.u32 18, %v12261_v31 }
 0x732   : > { %v12272_v40 = vshrl.u32 %v18561_v18, 4  ;;  %vm12489_vm11 = vcmp.ne.s32.totalorder %v12241_v34, 0  ;;  %vm12525_vm12 = vcmp.lt.s32.totalorder %v12241_v34, 0  ;;  %v12283_v52 = vshrl.u32 %v18569_v35, 4  ;;  %vm18622_vm13 = vmand %vm12524_vm10, %vm12488_vm8  ;;  %v11975_v18 = vpop.xlane.xlu1 %11974 }
 0x733   : > { %v18612_v5 = vadd.s32 160, %v19483_v41  ;;  %v12744_v9 = vadd.f32 %v12743_v17, %v12742_v19  ;;  %v12745_v47 = vsel %vm12727_vm3, %v12700_v32, 0.0  ;;  %v12596_v39 = vadd.s32 18, %v12230_v42  ;;  %vm18626_vm14 = vmand %vm12525_vm12, %vm12489_vm11 }
 0x734   : > { %v12747_v33 = vsel %vm12727_vm3, %v12701_v29, 0.0  ;;  %v12702_v28 = vsel %vm18599_vm7, %v11969_v49, 0.0  ;;  %v12631_v10 = vsel %vm18604_vm9, %v12595_v36, %v12219_v23  ;;  %v12597_v53 = vadd.s32 18, %v12241_v34 }
 0x735   : > { %vm12490_vm15 = vcmp.ne.s32.totalorder %v12252_v43, 0  ;;  %vm12526_vm0 = vcmp.lt.s32.totalorder %v12252_v43, 0  ;;  %v12263_v56 = vsub.s32 %v18508_v2, %v12262_v30  ;;  %v12273_v48 = vmul.u32 18, %v12272_v40 }
 0x736   : > { %v12284_v63 = vmul.u32 18, %v12283_v52  ;;  %v12294_v13 = vshrl.u32 %v18592_v45, 4  ;;  %v18633_v38 = vmul.u32.u64.low 3817748708, %v18612_v5  ;;  %v18634_v58 = vmul.u32.u64.high 3817748708, %v18612_v5, %v18633_v38  ;;  %vm18650_vm2 = vmand %vm12526_vm0, %vm12490_vm15  ;;  %v11981_v45 = vpop.xlane.xlu1 %11980 }
 0x737   : > { %v12746_v55 = vadd.f32 %v12745_v47, %v12744_v9  ;;  %vm18636_vm1 = vcmp.lt.s32.totalorder %v12631_v10, 16  ;;  %v12632_v3 = vsel %vm18622_vm13, %v12596_v39, %v12230_v42  ;;  %v12749_v44 = vsel %vm12727_vm3, %v12702_v28, 0.0  ;;  %v11984_v9 = vpop.xlane.xlu0 %11983 }
 0x738   : > { %v12633_v2 = vsel %vm18626_vm14, %v12597_v53, %v12241_v34  ;;  %v12598_v4 = vadd.s32 18, %v12252_v43  ;;  %v18646_v46 = vadd.s32 168, %v19483_v41  ;;  %vm12491_vm4 = vcmp.ne.s32.totalorder %v12263_v56, 0 }
 0x739   : > { %v12748_v0 = vadd.f32 %v12747_v33, %v12746_v55  ;;  %vm12527_vm5 = vcmp.lt.s32.totalorder %v12263_v56, 0  ;;  %v12274_v23 = vsub.s32 %v18538_v21, %v12273_v48  ;;  %v12703_v50 = vsel %vm18636_vm1, %v11972_v25, 0.0 }
 0x73a   : > { %vm18657_vm6 = vcmp.lt.s32.totalorder %v12632_v3, 16  ;;  %v12285_v1 = vsub.s32 %v18543_v16, %v12284_v63  ;;  %v12295_v37 = vmul.u32 18, %v12294_v13  ;;  %vm18662_vm7 = vcmp.lt.s32.totalorder %v12633_v2, 16  ;;  %vm18668_vm8 = vmand %vm12527_vm5, %vm12491_vm4 }
 0x73b   : > { %v12750_v14 = vadd.f32 %v12749_v44, %v12748_v0  ;;  %v12599_v12 = vadd.s32 18, %v12263_v56  ;;  %v12634_v21 = vsel %vm18650_vm2, %v12598_v4, %v12252_v43  ;;  %v18677_v16 = vadd.s32 176, %v19483_v41  ;;  %v11987_v8 = vpop.xlane.xlu1 %11986 }
 0x73c   : > { %v18673_v54 = vmul.u32.u64.low 3817748708, %v18646_v46  ;;  %v18674_v22 = vmul.u32.u64.high 3817748708, %v18646_v46, %v18673_v54  ;;  %v12751_v57 = vsel %vm12727_vm3, %v12703_v50, 0.0  ;;  %v12704_v42 = vsel %vm18657_vm6, %v11975_v18, 0.0 }
 0x73d   : > { %vm12492_vm9 = vcmp.ne.s32.totalorder %v12274_v23, 0  ;;  %vm12528_vm10 = vcmp.lt.s32.totalorder %v12274_v23, 0  ;;  %vm12493_vm11 = vcmp.ne.s32.totalorder %v12285_v1, 0  ;;  %vm12529_vm12 = vcmp.lt.s32.totalorder %v12285_v1, 0 }
 0x73e   : > { %v12296_v20 = vsub.s32 %v18572_v7, %v12295_v37  ;;  %v12305_v24 = vshrl.u32 %v18634_v58, 4  ;;  %v12705_v59 = vsel %vm18662_vm7, %v11978_v62, 0.0  ;;  %vm18686_vm13 = vcmp.lt.s32.totalorder %v12634_v21, 16  ;;  %vm18695_vm14 = vmand %vm12528_vm10, %vm12492_vm9 }
 0x73f   : > { %v12635_v34 = vsel %vm18668_vm8, %v12599_v12, %v12263_v56  ;;  %v18693_v6 = vadd.s32 184, %v19483_v41  ;;  %v12600_v7 = vadd.s32 18, %v12274_v23  ;;  %v12601_v17 = vadd.s32 18, %v12285_v1  ;;  %vm18706_vm15 = vmand %vm12529_vm12, %vm12493_vm11 }
 0x740   : > { %v18700_v32 = vmul.u32.u64.low 3817748708, %v18677_v16  ;;  %v18701_v29 = vmul.u32.u64.high 3817748708, %v18677_v16, %v18700_v32  ;;  %v12752_v61 = vadd.f32 %v12751_v57, %v12750_v14  ;;  %v12753_v36 = vsel %vm12727_vm3, %v12704_v42, 0.0 }
 0x741   : > { %v18711_v60 = vadd.s32 192, %v19483_v41  ;;  %v12755_v43 = vsel %vm12727_vm3, %v12705_v59, 0.0  ;;  %vm12494_vm0 = vcmp.ne.s32.totalorder %v12296_v20, 0  ;;  %vm12530_vm1 = vcmp.lt.s32.totalorder %v12296_v20, 0 }
 0x742   : > { %v12306_v30 = vmul.u32 18, %v12305_v24  ;;  %v12706_v40 = vsel %vm18686_vm13, %v11981_v45, 0.0  ;;  %vm18716_vm2 = vcmp.lt.s32.totalorder %v12635_v34, 16  ;;  %v12636_v33 = vsel %vm18695_vm14, %v12600_v7, %v12274_v23  ;;  %vm18729_vm4 = vmand %vm12530_vm1, %vm12494_vm0  ;;  %v11990_v3 = vpop.xlane.xlu0 %11989 }
 0x743   : > { %v18721_v47 = vmul.u32.u64.low 3817748708, %v18693_v6  ;;  %v18722_v39 = vmul.u32.u64.high 3817748708, %v18693_v6, %v18721_v47  ;;  %v12637_v28 = vsel %vm18706_vm15, %v12601_v17, %v12285_v1  ;;  %v12602_v10 = vadd.s32 18, %v12296_v20 }
 0x744   : > { %v12316_v11 = vshrl.u32 %v18674_v22, 4  ;;  %v12754_v53 = vadd.f32 %v12753_v36, %v12752_v61  ;;  %v18734_v56 = vmul.u32.u64.low 3817748708, %v18711_v60  ;;  %v18735_v48 = vmul.u32.u64.high 3817748708, %v18711_v60, %v18734_v56 }
 0x745   : > { %v12757_v63 = vsel %vm12727_vm3, %v12706_v40, 0.0  ;;  %v12707_v13 = vsel %vm18716_vm2, %v11984_v9, 0.0  ;;  %v12307_v38 = vsub.s32 %v18612_v5, %v12306_v30  ;;  %vm18741_vm5 = vcmp.lt.s32.totalorder %v12636_v33, 16 }
 0x746   : > { %v12756_v58 = vadd.f32 %v12755_v43, %v12754_v53  ;;  %vm18745_vm6 = vcmp.lt.s32.totalorder %v12637_v28, 16  ;;  %v12638_v44 = vsel %vm18729_vm4, %v12602_v10, %v12296_v20  ;;  %v12317_v2 = vmul.u32 18, %v12316_v11 }
 0x747   : > { %v12327_v4 = vshrl.u32 %v18701_v29, 4  ;;  %v18753_v0 = vadd.s32 200, %v19483_v41  ;;  %v12759_v15 = vsel %vm12727_vm3, %v12707_v13, 0.0  ;;  %v18757_v23 = vadd.s32 208, %v19483_v41 }
 0x748   : > { %v12758_v5 = vadd.f32 %v12757_v63, %v12756_v58  ;;  %v12708_v50 = vsel %vm18741_vm5, %v11987_v8, 0.0  ;;  %vm12495_vm7 = vcmp.ne.s32.totalorder %v12307_v38, 0  ;;  %vm12531_vm8 = vcmp.lt.s32.totalorder %v12307_v38, 0 }
 0x749   : > { %v18762_v26 = vadd.s32 216, %v19483_v41  ;;  %v12709_v18 = vsel %vm18745_vm6, %v11990_v3, 0.0  ;;  %vm18766_vm9 = vcmp.lt.s32.totalorder %v12638_v44, 16  ;;  %v12603_v37 = vadd.s32 18, %v12307_v38  ;;  %v11993_v51 = vpop.xlane.xlu1 %11992  ;;  %vm18778_vm10 = vmand %vm12531_vm8, %vm12495_vm7 }
 0x74a   : > { %v12338_v14 = vshrl.u32 %v18722_v39, 4  ;;  %v18772_v35 = vsub.s32 %v18646_v46, %v12317_v2  ;;  %v12328_v12 = vmul.u32 18, %v12327_v4  ;;  %v12349_v22 = vshrl.u32 %v18735_v48, 4 }
 0x74b   : > { %v18775_v62 = vmul.u32.u64.low 3817748708, %v18753_v0  ;;  %v18776_v21 = vmul.u32.u64.high 3817748708, %v18753_v0, %v18775_v62  ;;  %v18784_v57 = vmul.u32.u64.low 3817748708, %v18757_v23  ;;  %v18785_v42 = vmul.u32.u64.high 3817748708, %v18757_v23, %v18784_v57 }
 0x74c   : > { %v18788_v20 = vadd.s32 224, %v19483_v41  ;;  %v18791_v46 = vmul.u32.u64.low 3817748708, %v18762_v26  ;;  %v18792_v24 = vmul.u32.u64.high 3817748708, %v18762_v26, %v18791_v46  ;;  %v12760_v59 = vadd.f32 %v12759_v15, %v12758_v5 }
 0x74d   : > { %v12761_v31 = vsel %vm12727_vm3, %v12708_v50, 0.0  ;;  %v12763_v34 = vsel %vm12727_vm3, %v12709_v18, 0.0  ;;  %v12339_v45 = vmul.u32 18, %v12338_v14  ;;  %v12710_v19 = vsel %vm18766_vm9, %v11993_v51, 0.0 }
 0x74e   : > { %v12639_v7 = vsel %vm18778_vm10, %v12603_v37, %v12307_v38  ;;  %vm12496_vm11 = vcmp.ne.s32.totalorder %v18772_v35, 0  ;;  %vm12532_vm12 = vcmp.lt.s32.totalorder %v18772_v35, 0  ;;  %v12329_v17 = vsub.s32 %v18677_v16, %v12328_v12 }
 0x74f   : > { %v12350_v32 = vmul.u32 18, %v12349_v22  ;;  %v18804_v29 = vmul.u32.u64.low 3817748708, %v18788_v20  ;;  %v18805_v61 = vmul.u32.u64.high 3817748708, %v18788_v20, %v18804_v29  ;;  %v12762_v36 = vadd.f32 %v12761_v31, %v12760_v59  ;;  %vm18808_vm13 = vmand %vm12532_vm12, %vm12496_vm11 }
 0x750   : > { %v12604_v49 = vadd.s32 18, %v18772_v35  ;;  %v12340_v30 = vsub.s32 %v18693_v6, %v12339_v45  ;;  %v18814_v40 = vadd.s32 232, %v19483_v41  ;;  %v12765_v16 = vsel %vm12727_vm3, %v12710_v19, 0.0  ;;  %v11996_v39 = vpop.xlane.xlu0 %11995 }
 0x751   : > { %v12764_v52 = vadd.f32 %v12763_v34, %v12762_v36  ;;  %vm18817_vm14 = vcmp.lt.s32.totalorder %v12639_v7, 16  ;;  %v12360_v47 = vshrl.u32 %v18776_v21, 4  ;;  %vm12497_vm15 = vcmp.ne.s32.totalorder %v12329_v17, 0 }
 0x752   : > { %vm12533_vm0 = vcmp.lt.s32.totalorder %v12329_v17, 0  ;;  %v18823_v33 = vsub.s32 %v18711_v60, %v12350_v32  ;;  %v12371_v6 = vshrl.u32 %v18785_v42, 4  ;;  %v12640_v28 = vsel %vm18808_vm13, %v12604_v49, %v18772_v35 }
 0x753   : > { %v12605_v10 = vadd.s32 18, %v12329_v17  ;;  %v12382_v11 = vshrl.u32 %v18792_v24, 4  ;;  %v18831_v53 = vadd.s32 240, %v19483_v41  ;;  %vm12498_vm1 = vcmp.ne.s32.totalorder %v12340_v30, 0  ;;  %vm18839_vm4 = vmand %vm12533_vm0, %vm12497_vm15 }
 0x754   : > { %vm12534_vm2 = vcmp.lt.s32.totalorder %v12340_v30, 0  ;;  %v18834_v27 = vmul.u32.u64.low 3817748708, %v18814_v40  ;;  %v18835_v56 = vmul.u32.u64.high 3817748708, %v18814_v40, %v18834_v27  ;;  %v12711_v60 = vsel %vm18817_vm14, %v11996_v39, 0.0 }
 0x755   : > { %v12606_v63 = vadd.s32 18, %v12340_v30  ;;  %v12361_v13 = vmul.u32 18, %v12360_v47  ;;  %v18844_v38 = vadd.s32 248, %v19483_v41  ;;  %vm12499_vm5 = vcmp.ne.s32.totalorder %v18823_v33, 0  ;;  %vm18849_vm7 = vmand %vm12534_vm2, %vm12498_vm1 }
 0x756   : > { %vm12535_vm6 = vcmp.lt.s32.totalorder %v18823_v33, 0  ;;  %v12372_v58 = vmul.u32 18, %v12371_v6  ;;  %v12393_v55 = vshrl.u32 %v18805_v61, 4  ;;  %v12383_v25 = vmul.u32 18, %v12382_v11  ;;  %v11999_v35 = vpop.xlane.xlu1 %11998 }
 0x757   : > { %v18854_v3 = vmul.u32.u64.low 3817748708, %v18831_v53  ;;  %v18855_v44 = vmul.u32.u64.high 3817748708, %v18831_v53, %v18854_v3  ;;  %v18858_v2 = vadd.s32 256, %v19483_v41  ;;  %v12766_v4 = vadd.f32 %v12765_v16, %v12764_v52  ;;  %vm18881_vm9 = vmand %vm12535_vm6, %vm12499_vm5 }
 0x758   : > { %v12767_v5 = vsel %vm12727_vm3, %v12711_v60, 0.0  ;;  %v12641_v15 = vsel %vm18839_vm4, %v12605_v10, %v12329_v17  ;;  %v12607_v50 = vadd.s32 18, %v18823_v33  ;;  %v18865_v18 = vsub.s32 %v18753_v0, %v12361_v13 }
 0x759   : > { %v18868_v1 = vmul.u32.u64.low 3817748708, %v18844_v38  ;;  %v18869_v37 = vmul.u32.u64.high 3817748708, %v18844_v38, %v18868_v1  ;;  %vm18871_vm8 = vcmp.lt.s32.totalorder %v12640_v28, 16  ;;  %v12642_v12 = vsel %vm18849_vm7, %v12606_v63, %v12340_v30 }
 0x75a   : > { %v18886_v0 = vsub.s32 %v18757_v23, %v12372_v58  ;;  %v12394_v21 = vmul.u32 18, %v12393_v55  ;;  %v18889_v51 = vsub.s32 %v18762_v26, %v12383_v25  ;;  %v12768_v57 = vadd.f32 %v12767_v5, %v12766_v4 }
 0x75b   : > { %v18892_v54 = vmul.u32.u64.low 3817748708, %v18858_v2  ;;  %v18893_v22 = vmul.u32.u64.high 3817748708, %v18858_v2, %v18892_v54  ;;  %vm18895_vm10 = vcmp.lt.s32.totalorder %v12641_v15, 16  ;;  %v12404_v46 = vshrl.u32 %v18835_v56, 4 }
 0x75c   : > { %v18901_v24 = vadd.s32 264, %v19483_v41  ;;  %v12712_v23 = vsel %vm18871_vm8, %v11999_v35, 0.0  ;;  %vm18905_vm11 = vcmp.lt.s32.totalorder %v12642_v12, 16  ;;  %v12643_v59 = vsel %vm18881_vm9, %v12607_v50, %v18823_v33 }
 0x75d   : > { %vm12500_vm12 = vcmp.ne.s32.totalorder %v18865_v18, 0  ;;  %vm12536_vm13 = vcmp.lt.s32.totalorder %v18865_v18, 0  ;;  %vm12501_vm14 = vcmp.ne.s32.totalorder %v18886_v0, 0  ;;  %v12395_v31 = vsub.s32 %v18788_v20, %v12394_v21  ;;  %v12002_v19 = vpop.xlane.xlu0 %12001 }
 0x75e   : > { %v18917_v34 = vadd.s32 272, %v19483_v41  ;;  %vm12537_vm15 = vcmp.lt.s32.totalorder %v18886_v0, 0  ;;  %vm12502_vm0 = vcmp.ne.s32.totalorder %v18889_v51, 0  ;;  %vm12538_vm1 = vcmp.lt.s32.totalorder %v18889_v51, 0  ;;  %vm18932_vm2 = vmand %vm12536_vm13, %vm12500_vm12 }
 0x75f   : > { %v12415_v45 = vshrl.u32 %v18855_v44, 4  ;;  %v12405_v7 = vmul.u32 18, %v12404_v46  ;;  %v18924_v17 = vmul.u32.u64.low 3817748708, %v18901_v24  ;;  %v18925_v32 = vmul.u32.u64.high 3817748708, %v18901_v24, %v18924_v17  ;;  %vm18942_vm4 = vmand %vm12537_vm15, %vm12501_vm14 }
 0x760   : > { %v18928_v29 = vadd.s32 280, %v19483_v41  ;;  %v12608_v61 = vadd.s32 18, %v18865_v18  ;;  %v12609_v36 = vadd.s32 18, %v18886_v0  ;;  %v12610_v49 = vadd.s32 18, %v18889_v51  ;;  %vm18957_vm7 = vmand %vm12538_vm1, %vm12502_vm0 }
 0x761   : > { %v12426_v43 = vshrl.u32 %v18869_v37, 4  ;;  %vm12503_vm5 = vcmp.ne.s32.totalorder %v12395_v31, 0  ;;  %vm12539_vm6 = vcmp.lt.s32.totalorder %v12395_v31, 0  ;;  %v12769_v16 = vsel %vm12727_vm3, %v12712_v23, 0.0 }
 0x762   : > { %v18947_v41 = vmul.u32.u64.low 3817748708, %v18917_v34  ;;  %v18948_v52 = vmul.u32.u64.high 3817748708, %v18917_v34, %v18947_v41  ;;  %v12713_v9 = vsel %vm18895_vm10, %v12002_v19, 0.0  ;;  %v12416_v39 = vmul.u32 18, %v12415_v45  ;;  %vm18973_vm9 = vmand %vm12539_vm6, %vm12503_vm5 }
 0x763   : > { %v12437_v33 = vshrl.u32 %v18893_v22, 4  ;;  %v12611_v28 = vadd.s32 18, %v12395_v31  ;;  %v18963_v10 = vsub.s32 %v18814_v40, %v12405_v7  ;;  %vm18969_vm8 = vcmp.lt.s32.totalorder %v12643_v59, 16 }
 0x764   : > { %v18966_v11 = vmul.u32.u64.low 3817748708, %v18928_v29  ;;  %v18967_v27 = vmul.u32.u64.high 3817748708, %v18928_v29, %v18966_v11  ;;  %v12427_v48 = vmul.u32 18, %v12426_v43  ;;  %v12770_v63 = vadd.f32 %v12769_v16, %v12768_v57 }
 0x765   : > { %v12005_v6 = vpop.xlane.xlu1 %12004  ;;  %v12644_v13 = vsel %vm18932_vm2, %v12608_v61, %v18865_v18  ;;  %v12645_v40 = vsel %vm18942_vm4, %v12609_v36, %v18886_v0  ;;  %v12646_v58 = vsel %vm18957_vm7, %v12610_v49, %v18889_v51  ;;  %v12771_v55 = vsel %vm12727_vm3, %v12713_v9, 0.0 }
 0x766   : > { %v12714_v8 = vsel %vm18905_vm11, %v12005_v6, 0.0  ;;  %v12417_v3 = vsub.s32 %v18831_v53, %v12416_v39  ;;  %v12438_v44 = vmul.u32 18, %v12437_v33  ;;  %v12647_v4 = vsel %vm18973_vm9, %v12611_v28, %v12395_v31 }
 0x767   : > { %vm12504_vm10 = vcmp.ne.s32.totalorder %v18963_v10, 0  ;;  %vm12540_vm12 = vcmp.lt.s32.totalorder %v18963_v10, 0  ;;  %v12448_v5 = vshrl.u32 %v18925_v32, 4  ;;  %vm18995_vm13 = vcmp.lt.s32.totalorder %v12644_v13, 16 }
 0x768   : > { %vm18999_vm14 = vcmp.lt.s32.totalorder %v12645_v40, 16  ;;  %vm19003_vm11 = vcmp.lt.s32.totalorder %v12646_v58, 16  ;;  %v12428_v1 = vsub.s32 %v18844_v38, %v12427_v48  ;;  %v12773_v37 = vsel %vm12727_vm3, %v12714_v8, 0.0  ;;  %vm19021_vm0 = vmand %vm12540_vm12, %vm12504_vm10 }
 0x769   : > { %v12612_v35 = vadd.s32 18, %v18963_v10  ;;  %v12459_v12 = vshrl.u32 %v18948_v52, 4  ;;  %v12772_v62 = vadd.f32 %v12771_v55, %v12770_v63  ;;  %vm19013_vm15 = vcmp.lt.s32.totalorder %v12647_v4, 16 }
 0x76a   : > { %vm12505_vm1 = vcmp.ne.s32.totalorder %v12417_v3, 0  ;;  %v12439_v51 = vsub.s32 %v18858_v2, %v12438_v44  ;;  %vm12541_vm2 = vcmp.lt.s32.totalorder %v12417_v3, 0  ;;  %v12449_v22 = vmul.u32 18, %v12448_v5 }
 0x76b   : > { %v12008_v25 = vpop.xlane.xlu0 %12007  ;;  %v12470_v57 = vshrl.u32 %v18967_v27, 4  ;;  %v12774_v42 = vadd.f32 %v12773_v37, %v12772_v62  ;;  %vm12506_vm4 = vcmp.ne.s32.totalorder %v12428_v1, 0  ;;  %vm12542_vm5 = vcmp.lt.s32.totalorder %v12428_v1, 0  ;;  %vm19037_vm6 = vmand %vm12541_vm2, %vm12505_vm1 }
 0x76c   : > { %v12715_v14 = vsel %vm18969_vm8, %v12008_v25, 0.0  ;;  %v12648_v2 = vsel %vm19021_vm0, %v12612_v35, %v18963_v10  ;;  %v12613_v59 = vadd.s32 18, %v12417_v3  ;;  %v12460_v31 = vmul.u32 18, %v12459_v12  ;;  %vm19043_vm9 = vmand %vm12542_vm5, %vm12506_vm4 }
 0x76d   : > { %v12775_v46 = vsel %vm12727_vm3, %v12715_v14, 0.0  ;;  %v12614_v7 = vadd.s32 18, %v12428_v1  ;;  %vm12507_vm7 = vcmp.ne.s32.totalorder %v12439_v51, 0  ;;  %vm12543_vm8 = vcmp.lt.s32.totalorder %v12439_v51, 0 }
 0x76e   : > { %v12776_v17 = vadd.f32 %v12775_v46, %v12774_v42  ;;  %v12450_v61 = vsub.s32 %v18901_v24, %v12449_v22  ;;  %v12471_v36 = vmul.u32 18, %v12470_v57  ;;  %v12615_v30 = vadd.s32 18, %v12439_v51  ;;  %vm19053_vm10 = vmand %vm12543_vm8, %vm12507_vm7 }
 0x76f   : > { %v12649_v16 = vsel %vm19037_vm6, %v12613_v59, %v12417_v3  ;;  %v12461_v47 = vsub.s32 %v18917_v34, %v12460_v31  ;;  %vm19059_vm12 = vcmp.lt.s32.totalorder %v12648_v2, 16  ;;  %v12650_v33 = vsel %vm19043_vm9, %v12614_v7, %v12428_v1 }
 0x770   : > { %v12472_v28 = vsub.s32 %v18928_v29, %v12471_v36  ;;  %v12651_v34 = vsel %vm19053_vm10, %v12615_v30, %v12439_v51  ;;  %v12616_v60 = vadd.s32 18, %v12450_v61  ;;  %vm19075_vm1 = vcmp.lt.s32.totalorder %v12650_v33, 16 }
 0x771   : > { %vm12545_vm0 = vcmp.lt.s32.totalorder %v12461_v47, 0  ;;  %v12617_v13 = vadd.s32 18, %v12461_v47  ;;  %vm19086_vm6 = vcmp.lt.s32.totalorder %v12651_v34, 16 }
 0x772   : > { %vm12510_vm4 = vcmp.ne.s32.totalorder %v12472_v28, 0  ;;  %vm12546_vm5 = vcmp.lt.s32.totalorder %v12472_v28, 0 }
 0x773   : > { %v12011_v50 = vpop.xlane.xlu1 %12010  ;;  %vm19099_vm8 = vmand %vm12546_vm5, %vm12510_vm4 }
 0x774   : > { %v12716_v54 = vsel %vm18995_vm13, %v12011_v50, 0.0  ;;  %vm12508_vm13 = vcmp.ne.s32.totalorder %v12450_v61, 0  ;;  %v12618_v50 = vadd.s32 18, %v12472_v28 }
 0x775   : > { %v12777_v45 = vsel %vm12727_vm3, %v12716_v54, 0.0 }
 0x776   : > { %v12778_v41 = vadd.f32 %v12777_v45, %v12776_v17  ;;  %v12654_v21 = vsel %vm19099_vm8, %v12618_v50, %v12472_v28 }
 0x77a   : > { %v12014_v0 = vpop.xlane.xlu0 %12013 }
 0x77b   : > { %v12717_v23 = vsel %vm18999_vm14, %v12014_v0, 0.0  ;;  %vm12544_vm14 = vcmp.lt.s32.totalorder %v12450_v61, 0 }
 0x77c   : > { %v12779_v49 = vsel %vm12727_vm3, %v12717_v23, 0.0  ;;  %vm19079_vm2 = vmand %vm12544_vm14, %vm12508_vm13 }
 0x77d   : > { %v12017_v26 = vpop.xlane.xlu1 %12016  ;;  %v12780_v6 = vadd.f32 %v12779_v49, %v12778_v41  ;;  %v12652_v15 = vsel %vm19079_vm2, %v12616_v60, %v12450_v61 }
 0x77e   : > { %v12718_v32 = vsel %vm19003_vm11, %v12017_v26, 0.0  ;;  %vm19067_vm11 = vcmp.lt.s32.totalorder %v12649_v16, 16  ;;  %vm12688_vm9 = vcmp.lt.s32.totalorder %v12652_v15, 16 }
 0x77f   : > { %v12781_v24 = vsel %vm12727_vm3, %v12718_v32, 0.0 }
 0x780   : > { %v12020_v43 = vpop.xlane.xlu0 %12019  ;;  %v12782_v27 = vadd.f32 %v12781_v24, %v12780_v6 }
 0x781   : > { %v12719_v52 = vsel %vm19013_vm15, %v12020_v43, 0.0  ;;  %vm12509_vm15 = vcmp.ne.s32.totalorder %v12461_v47, 0 }
 0x782   : > { %v12783_v10 = vsel %vm12727_vm3, %v12719_v52, 0.0  ;;  %vm19090_vm7 = vmand %vm12545_vm0, %vm12509_vm15 }
 0x783   : > { %v12784_v40 = vadd.f32 %v12783_v10, %v12782_v27  ;;  %v12653_v35 = vsel %vm19090_vm7, %v12617_v13, %v12461_v47 }
 0x784   : > { %v12023_v56 = vpop.xlane.xlu1 %12022  ;;  %vm12689_vm10 = vcmp.lt.s32.totalorder %v12653_v35, 16 }
 0x785   : > { %v12720_v48 = vsel %vm19059_vm12, %v12023_v56, 0.0  ;;  %vm12690_vm12 = vcmp.lt.s32.totalorder %v12654_v21, 16 }
 0x786   : > { %v12785_v58 = vsel %vm12727_vm3, %v12720_v48, 0.0  ;;  %v12026_v55 = vpop.xlane.xlu0 %12025 }
 0x787   : > { %v12721_v8 = vsel %vm19067_vm11, %v12026_v55, 0.0  ;;  %v12786_v44 = vadd.f32 %v12785_v58, %v12784_v40 }
 0x788   : > { %v12787_v4 = vsel %vm12727_vm3, %v12721_v8, 0.0 }
 0x789   : > { %v12029_v5 = vpop.xlane.xlu1 %12028  ;;  %v12788_v1 = vadd.f32 %v12787_v4, %v12786_v44 }
 0x78a   : > { %v12722_v18 = vsel %vm19075_vm1, %v12029_v5, 0.0 }
 0x78b   : > { %v12789_v37 = vsel %vm12727_vm3, %v12722_v18, 0.0  ;;  %v12032_v14 = vpop.xlane.xlu0 %12031 }
 0x78c   : > { %v12723_v12 = vsel %vm19086_vm6, %v12032_v14, 0.0  ;;  %v12790_v62 = vadd.f32 %v12789_v37, %v12788_v1 }
 0x78d   : > { %v12791_v0 = vsel %vm12727_vm3, %v12723_v12, 0.0  ;;  %v12035_v38 = vpop.xlane.xlu1 %12034 }
 0x78e   : > { %v12792_v51 = vadd.f32 %v12791_v0, %v12790_v62  ;;  %v12724_v54 = vsel %vm12688_vm9, %v12035_v38, 0.0 }
 0x78f   : > { %v12793_v22 = vsel %vm12727_vm3, %v12724_v54, 0.0  ;;  %v12038_v57 = vpop.xlane.xlu0 %12037 }
 0x790   : > { %v12794_v42 = vadd.f32 %v12793_v22, %v12792_v51  ;;  %v12725_v46 = vsel %vm12689_vm10, %v12038_v57, 0.0 }
 0x791   : > { %v12795_v23 = vsel %vm12727_vm3, %v12725_v46, 0.0 }
 0x792   : > { %v12041_v26 = vpop.xlane.xlu1 %12040  ;;  %v12796_v2 = vadd.f32 %v12795_v23, %v12794_v42 }
 0x793   : > { %v12726_v59 = vsel %vm12690_vm12, %v12041_v26, 0.0 }
 0x794   : > { %v12797_v31 = vsel %vm12727_vm3, %v12726_v59, 0.0 }
 0x795   : > { %v12798_v45 = vadd.f32 %v12797_v31, %v12796_v2 }
 0x797   : > { %12799 = vadd.xlane.f32.xlu0 %v12798_v45 }
 0x824   : > { %v12800_v19 = vpop.xlane.xlu0 %12799 }
 0x825   : > { %v12801_v7 = vrot.slane %v12800_v19, 4 }
 0x827   : > { %v12802_v17 = vadd.f32 %v12801_v7, %v12800_v19 }
 0x829   : > { %v12803_v32 = vrot.slane %v12802_v17, 2 }
 0x82b   : > { %v12804_v20 = vadd.f32 %v12803_v32, %v12802_v17 }
 0x82d   : > { %v12805_v61 = vrot.slane %v12804_v20, 1 }
 0x82f   : > { %v12806_v36 = vadd.f32 %v12805_v61, %v12804_v20 }
 0x831   : > { %14463 = vpush %v12806_v36 }
 0x862   : > { %s14464_s22 = spop %14463 }
 0x863   : > { %s12808_s26 = smul.f32 0.00390625, %s14464_s22 }
 0x865   : > { %v12809_v49 = vstv %s12808_s26 }
 0x866   : > { %12811 = vst [vmem:[%s213_s25] sm:$0x1] %v12809_v49 }
 0x867 PF: > { %s14_s15 = sadd.s32 1, %s14769_s15  }
 0x868   : > { %p11_p4 = scmp.ge.s32.totalorder %s14_s15, 4  }
 0x86a   :  { %13 = sbr.rel (!%p11_p4) target bundleno = 1 (0x1), region = 77 }

</bundles_post_ra>
